<compile_context>
chip_gen: v6e
topology: v6e:2x2x1
jax: 0.10.0
libtpu: 0.0.40
codegen_flags: <defaults>
</compile_context>

<pallas_src>
import functools

import jax
import jax.numpy as jnp
from jax.experimental import pallas as pl
from jax.experimental.pallas import tpu as pltpu


# ----------------------------------------------------------------------------
# The single fused kernel (one image per grid step).
# ----------------------------------------------------------------------------
def fused_contrast_kernel(
        x_ref, b1_ref, s1_ref, t1_ref, b2_ref, s2_ref, t2_ref,
        bl_ref, bc_ref, cs_ref, ct_ref,
        g_ref, gt_ref, mm_ref, e_ref, vb_ref, bb_ref,
        w1_ref, b1m_ref, w2_ref, b2m_ref, spsh_ref,
        o_ref,
        pad_s, cpad_s, cat_s,
        *, H, W, C, Co, dilations):
    f32 = jnp.float32
    WC = W * C
    WCo = W * Co
    P = max(dilations)

    def band_conv(pad, w_ref, row0, step, b=None):
        # sum_ky pad[row0 + ky*step : +H, :] @ w[ky]   (bf16 x bf16 -> f32 acc)
        def wk(k):
            return w_ref[k] if b is None else w_ref[b, k]
        acc = jnp.dot(pad[row0:row0 + H, :], wk(0), preferred_element_type=f32)
        for k in (1, 2):
            acc = acc + jnp.dot(pad[row0 + k * step:row0 + k * step + H, :],
                                wk(k), preferred_element_type=f32)
        return acc

    # ---- conv1: pad 1 row top/bottom (halo-only zeroing), bf16 scratch ------
    pad_s[0:1, :] = jnp.zeros((1, WC), jnp.bfloat16)
    pad_s[H + 1:H + 2, :] = jnp.zeros((1, WC), jnp.bfloat16)
    pad_s[1:1 + H, :] = x_ref[0].astype(jnp.bfloat16)
    h1 = band_conv(pad_s, b1_ref, 0, 1)                       # (H, W*C)
    h1 = jnp.maximum(h1 * s1_ref[...] + t1_ref[...], 0.0)

    # ---- conv2: reuse pad_s (halo rows already zero) ------------------------
    pad_s[1:1 + H, :] = h1.astype(jnp.bfloat16)
    h2 = band_conv(pad_s, b2_ref, 0, 1)
    h2 = jnp.maximum(h2 * s2_ref[...] + t2_ref[...], 0.0)

    # ---- contrast block: pad to max dilation, halo-only zeroing -------------
    cpad_s[0:P, :] = jnp.zeros((P, WC), jnp.bfloat16)
    cpad_s[P + H:H + 2 * P, :] = jnp.zeros((P, WC), jnp.bfloat16)
    cpad_s[P:P + H, :] = h2.astype(jnp.bfloat16)

    # local path: one fused banded matmul for all 4 branches (branch-major cols)
    loc = band_conv(cpad_s, bl_ref, P - 1, 1)                 # (H, W*4*Co)
    # context path: each branch lands in a 128-lane-aligned slab (unmasked vst)
    for b, d in enumerate(dilations):
        cat_s[:, b * WCo:(b + 1) * WCo] = band_conv(cpad_s, bc_ref, P - d, d, b=b)
    # full-width subtract + shared BN (+ folded biases) + ReLU
    cat = jnp.maximum((loc - cat_s[...]) * cs_ref[...] + ct_ref[...], 0.0)

    # ---- CBAM ChannelGate (avg pool -> MLP -> sigmoid) ----------------------
    rowsum = jnp.sum(cat, axis=0, keepdims=True)              # (1, W*C)
    avg = jnp.dot(rowsum, g_ref[...],
                  preferred_element_type=f32) * (1.0 / float(H * W))   # (1, C)
    hm = jnp.maximum(jnp.dot(avg, w1_ref[...],
                             preferred_element_type=f32) + b1m_ref[...], 0.0)
    att = jnp.dot(hm, w2_ref[...], preferred_element_type=f32) + b2m_ref[...]
    cgate = jnp.dot(jax.nn.sigmoid(att), gt_ref[...],
                    preferred_element_type=f32)               # (1, W*C)
    xg = cat * cgate

    # ---- CBAM SpatialGate (channel mean -> 7x7 conv -> BN -> sigmoid) -------
    m = jnp.dot(xg, mm_ref[...], preferred_element_type=f32)  # (H, W)
    conv = jnp.zeros((H, W), f32)
    for ky in range(7):                                       # 7x7 conv as 14 tiny matmuls
        mv = jnp.dot(vb_ref[ky], m, preferred_element_type=f32)
        conv = conv + jnp.dot(mv, bb_ref[ky], preferred_element_type=f32)
    sgate = jnp.dot(jax.nn.sigmoid(conv + spsh_ref[...]), e_ref[...],
                    preferred_element_type=f32)               # (H, W*C)

    # lane-dense 512-wide output store
    o_ref[0] = xg * sgate


def _const_spec(shape):
    rank = len(shape)
    return pl.BlockSpec(shape, lambda n, _r=rank: (0,) * _r)


def _fused_call(x, prep, *, H, W, C):
    N = x.shape[0]
    Co = C // 4
    Cr = prep['w1'].shape[1]
    WC = W * C
    WCo = W * Co
    dil = (2, 4, 8, 16)
    P = max(dil)
    kern = functools.partial(fused_contrast_kernel, H=H, W=W, C=C, Co=Co,
                             dilations=dil)
    in_specs = [
        pl.BlockSpec((1, H, WC), lambda n: (n, 0, 0)),    # x
        _const_spec((3, WC, WC)),                         # conv1 band weights
        _const_spec((1, WC)), _const_spec((1, WC)),       # bn1 scale / shift
        _const_spec((3, WC, WC)),                         # conv2 band weights
        _const_spec((1, WC)), _const_spec((1, WC)),       # bn2 scale / shift
        _const_spec((3, WC, WC)),                         # local (4 branches fused)
        _const_spec((4, 3, WC, WCo)),                     # context per branch
        _const_spec((1, WC)), _const_spec((1, WC)),       # contrast BN scale / shift
        _const_spec((WC, C)), _const_spec((C, WC)),       # channel sum / broadcast
        _const_spec((WC, W)), _const_spec((W, WC)),       # channel mean / pixel bcast
        _const_spec((7, H, H)), _const_spec((7, W, W)),   # 7x7 spatial conv bands
        _const_spec((C, Cr)), _const_spec((1, Cr)),       # MLP layer 1
        _const_spec((Cr, C)), _const_spec((1, C)),        # MLP layer 2
        _const_spec((1, W)),                              # spatial BN shift
    ]
    return pl.pallas_call(
        kern,
        out_shape=jax.ShapeDtypeStruct((N, H, WC), jnp.float32),
        grid=(N,),
        in_specs=in_specs,
        out_specs=pl.BlockSpec((1, H, WC), lambda n: (n, 0, 0)),
        scratch_shapes=[
            pltpu.VMEM((H + 2, WC), jnp.bfloat16),        # conv1/conv2 row-padded input
            pltpu.VMEM((H + 2 * P, WC), jnp.bfloat16),    # contrast row-padded input
            pltpu.VMEM((H, WC), jnp.float32),             # context accumulator (aligned slabs)
        ],
        compiler_params=pltpu.CompilerParams(
            dimension_semantics=("parallel",),
            vmem_limit_bytes=32 * 1024 * 1024),
    )(x, prep['b1'], prep['s1'], prep['t1'], prep['b2'], prep['s2'], prep['t2'],
      prep['bl'], prep['bc'], prep['cs'], prep['ct'],
      prep['g'], prep['gt'], prep['mm'], prep['e'], prep['vb'], prep['bb'],
      prep['w1'], prep['b1m'], prep['w2'], prep['b2m'], prep['spsh'])


# ----------------------------------------------------------------------------
# One-time parameter preparation (banded weight matrices, folded BN, bf16 cast,
# CBAM selection matrices).  Done once, outside the measured forward.
# ----------------------------------------------------------------------------
def prepare_params(p, H, W, planes, dilations=(2, 4, 8, 16)):
    C = planes
    Co = C // 4
    Cr = C // 16
    WC = W * C

    def band(w, d):
        # w: (3,3,Cin,Cout) -> (3, W*Cin, W*Cout) banded matrices (lane-dense conv).
        Cin, Cout = w.shape[2], w.shape[3]
        ar = jnp.arange(W)
        mats = []
        for ky in range(3):
            B = jnp.zeros((W * Cin, W * Cout), jnp.float32)
            for kx in range(3):
                mask = (ar[:, None] == ar[None, :] + (kx - 1) * d).astype(jnp.float32)
                B = B + jnp.kron(mask, w[ky, kx])
            mats.append(B)
        return jnp.stack(mats)

    def lane_tile(v):                      # (C,) -> (1, W*C) in (w, c) lane order
        return jnp.tile(v, W).reshape(1, -1)

    prep = {}
    # conv1 / conv2 : fold conv bias + eval-mode BN into scale/shift
    prep['b1'] = band(p['conv1_w'], 1).astype(jnp.bfloat16)
    prep['s1'] = lane_tile(p['bn1_scale'])
    prep['t1'] = lane_tile(p['bn1_shift'] + p['bn1_scale'] * p['conv1_b'])
    prep['b2'] = band(p['conv2_w'], 1).astype(jnp.bfloat16)
    prep['s2'] = lane_tile(p['bn2_scale'])
    prep['t2'] = lane_tile(p['bn2_shift'] + p['bn2_scale'] * p['conv2_b'])

    # contrast block: local weights for all 4 branches fused, output lanes in
    # BRANCH-MAJOR order (b, w, co) so the 4 context slabs concatenate at
    # 128-lane-aligned offsets (wrapper un-permutes at the end, for free).
    wl_cat = jnp.concatenate(p['local_w'], axis=-1)           # (3,3,C,4*Co)
    bl_pm = band(wl_cat, 1)                                   # pixel-major columns
    bi, wi, ci = jnp.meshgrid(jnp.arange(4), jnp.arange(W), jnp.arange(Co),
                              indexing='ij')
    perm = (wi * (4 * Co) + bi * Co + ci).reshape(-1)
    prep['bl'] = bl_pm[:, :, perm].astype(jnp.bfloat16)       # (3, WC, WC) branch-major
    prep['bc'] = jnp.stack([band(p['ctx_w'][b], d)
                            for b, d in enumerate(dilations)]).astype(jnp.bfloat16)
    # shared BN + folded (local - context) biases, branch-major lane order
    bias_d = jnp.stack(p['local_b']) - jnp.stack(p['ctx_b'])  # (4, Co)
    cs = jnp.broadcast_to(p['cbn_scale'], (4, W, Co))
    ct = jnp.broadcast_to(p['cbn_shift'][None, None, :]
                          + p['cbn_scale'][None, None, :] * bias_d[:, None, :],
                          (4, W, Co))
    prep['cs'] = cs.reshape(1, -1)
    prep['ct'] = ct.reshape(1, -1)

    # CBAM constants (branch-major lane maps)
    lanes = jnp.arange(WC)
    b_of = lanes // (W * Co)
    w_of = (lanes // Co) % W
    ch_of = b_of * Co + lanes % Co
    prep['g'] = jax.nn.one_hot(ch_of, C, dtype=jnp.float32)           # (WC, C)
    prep['gt'] = prep['g'].T                                          # (C, WC)
    prep['mm'] = jax.nn.one_hot(w_of, W, dtype=jnp.float32) / float(C)  # (WC, W)
    prep['e'] = jax.nn.one_hot(w_of, W, dtype=jnp.float32).T          # (W, WC)
    prep['vb'] = jnp.stack([jnp.eye(H, H, k=ky - 3, dtype=jnp.float32)
                            for ky in range(7)])
    prep['bb'] = jnp.stack([
        sum(p['sp_w'][ky, kx] * jnp.eye(W, W, k=3 - kx, dtype=jnp.float32)
            for kx in range(7))
        for ky in range(7)]) * p['sp_bn_scale']               # BN scale folded
    prep['w1'] = p['mlp_w1']
    prep['b1m'] = p['mlp_b1'].reshape(1, Cr)
    prep['w2'] = p['mlp_w2']
    prep['b2m'] = p['mlp_b2'].reshape(1, C)
    prep['spsh'] = jnp.full((1, W), p['sp_bn_shift'], jnp.float32)
    return prep


@jax.jit
def contrast_module_forward(x_nchw, prep):
    N, C, H, W = x_nchw.shape
    Co = C // 4
    # NCHW -> lane-dense (N, H, W*C)
    x = jnp.transpose(x_nchw, (0, 2, 3, 1)).astype(jnp.float32).reshape(N, H, W * C)
    out = _fused_call(x, prep, H=H, W=W, C=C)                 # branch-major lanes
    # (N, H, 4, W, Co) -> NCHW with channel = b*Co + co (matches torch.cat order)
    out = out.reshape(N, H, 4, W, Co).transpose(0, 2, 4, 1, 3).reshape(N, C, H, W)
    return out


# ----------------------------------------------------------------------------
# Parameter init (deterministic, synthetic) and a pure-JAX reference.
# ----------------------------------------------------------------------------
def init_params(key, planes):
    C = planes
    Co = planes // 4
    keys = iter(jax.random.split(key, 64))

    def nrm(shape, scale):
        return (scale * jax.random.normal(next(keys), shape)).astype(jnp.float32)

    def make_bn(ch, eps=1e-5):
        gamma = 1.0 + 0.1 * jax.random.normal(next(keys), (ch,))
        beta = 0.1 * jax.random.normal(next(keys), (ch,))
        mean = 0.1 * jax.random.normal(next(keys), (ch,))
        var = 1.0 + 0.1 * jnp.abs(jax.random.normal(next(keys), (ch,)))
        scale = gamma / jnp.sqrt(var + eps)
        shift = beta - mean * scale
        return scale.astype(jnp.float32), shift.astype(jnp.float32)

    p = {}
    p['conv1_w'] = nrm((3, 3, C, C), 0.05)
    p['conv1_b'] = nrm((C,), 0.05)
    p['bn1_scale'], p['bn1_shift'] = make_bn(C)
    p['conv2_w'] = nrm((3, 3, C, C), 0.05)
    p['conv2_b'] = nrm((C,), 0.05)
    p['bn2_scale'], p['bn2_shift'] = make_bn(C)

    p['local_w'] = [nrm((3, 3, C, Co), 0.05) for _ in range(4)]
    p['local_b'] = [nrm((Co,), 0.05) for _ in range(4)]
    p['ctx_w'] = [nrm((3, 3, C, Co), 0.05) for _ in range(4)]
    p['ctx_b'] = [nrm((Co,), 0.05) for _ in range(4)]
    p['cbn_scale'], p['cbn_shift'] = make_bn(Co)   # shared BN across the 4 branches

    p['mlp_w1'] = nrm((C, C // 16), 0.2)
    p['mlp_b1'] = nrm((C // 16,), 0.1)
    p['mlp_w2'] = nrm((C // 16, C), 0.2)
    p['mlp_b2'] = nrm((C,), 0.1)

    p['sp_w'] = nrm((7, 7), 0.1)
    s_scale, s_shift = make_bn(1)
    p['sp_bn_scale'] = s_scale[0]
    p['sp_bn_shift'] = s_shift[0]
    return p


@jax.jit
def reference_forward(x_nchw, p):
    # Pure-JAX (f32) reference with the same eval-mode BN folding.
    x = jnp.transpose(x_nchw, (0, 2, 3, 1)).astype(jnp.float32)
    dn = ('NHWC', 'HWIO', 'NHWC')

    def conv(h, w, b, d=1):
        out = jax.lax.conv_general_dilated(h, w, (1, 1), [(d, d), (d, d)],
                                           rhs_dilation=(d, d),
                                           dimension_numbers=dn)
        return out + b

    def bnrelu(h, s, t):
        return jnp.maximum(h * s + t, 0.0)

    h = bnrelu(conv(x, p['conv1_w'], p['conv1_b']), p['bn1_scale'], p['bn1_shift'])
    h = bnrelu(conv(h, p['conv2_w'], p['conv2_b']), p['bn2_scale'], p['bn2_shift'])
    branches = []
    for b_i, d in enumerate((2, 4, 8, 16)):
        loc = conv(h, p['local_w'][b_i], p['local_b'][b_i], 1)
        ctx = conv(h, p['ctx_w'][b_i], p['ctx_b'][b_i], d)
        branches.append(bnrelu(loc - ctx, p['cbn_scale'], p['cbn_shift']))
    cat = jnp.concatenate(branches, axis=-1)
    avg = jnp.mean(cat, axis=(1, 2))
    att = jnp.maximum(avg @ p['mlp_w1'] + p['mlp_b1'], 0.0) @ p['mlp_w2'] + p['mlp_b2']
    xg = cat * jax.nn.sigmoid(att)[:, None, None, :]
    m = jnp.mean(xg, axis=-1, keepdims=True)
    sc = jax.lax.conv_general_dilated(m, p['sp_w'].reshape(7, 7, 1, 1), (1, 1),
                                      [(3, 3), (3, 3)], dimension_numbers=dn)
    ss = jax.nn.sigmoid(sc * p['sp_bn_scale'] + p['sp_bn_shift'])
    return jnp.transpose(xg * ss, (0, 3, 1, 2))


if __name__ == "__main__":
    key = jax.random.PRNGKey(0)
    k_param, k_input = jax.random.split(key)

    planes, N, H, W = 32, 2, 16, 16   # planes must be divisible by 16 (ChannelGate)
    params = init_params(k_param, planes)
    x = jax.random.normal(k_input, (N, planes, H, W), jnp.float32)  # NCHW like PyTorch

    prep = prepare_params(params, H, W, planes)
    out = jax.block_until_ready(contrast_module_forward(x, prep))
    assert out.shape == (N, planes, H, W), out.shape
    assert bool(jnp.all(jnp.isfinite(out)))

    ref = jax.block_until_ready(reference_forward(x, params))
    max_err = float(jnp.max(jnp.abs(out - ref)))
    assert max_err < 8e-2, max_err   # bf16 conv operands vs f32 reference

    print("KERNEL_OK")
</pallas_src>

<mosaic_0001>
module attributes {stable_mosaic.version = 11 : i64} {
  func.func @fused_contrast_kernel(%arg0: i32, %arg1: memref<1x16x512xf32, #tpu.memory_space<vmem>>, %arg2: memref<3x512x512xbf16, #tpu.memory_space<vmem>>, %arg3: memref<1x512xf32, #tpu.memory_space<vmem>>, %arg4: memref<1x512xf32, #tpu.memory_space<vmem>>, %arg5: memref<3x512x512xbf16, #tpu.memory_space<vmem>>, %arg6: memref<1x512xf32, #tpu.memory_space<vmem>>, %arg7: memref<1x512xf32, #tpu.memory_space<vmem>>, %arg8: memref<3x512x512xbf16, #tpu.memory_space<vmem>>, %arg9: memref<4x3x512x128xbf16, #tpu.memory_space<vmem>>, %arg10: memref<1x512xf32, #tpu.memory_space<vmem>>, %arg11: memref<1x512xf32, #tpu.memory_space<vmem>>, %arg12: memref<512x32xf32, #tpu.memory_space<vmem>>, %arg13: memref<32x512xf32, #tpu.memory_space<vmem>>, %arg14: memref<512x16xf32, #tpu.memory_space<vmem>>, %arg15: memref<16x512xf32, #tpu.memory_space<vmem>>, %arg16: memref<7x16x16xf32, #tpu.memory_space<vmem>>, %arg17: memref<7x16x16xf32, #tpu.memory_space<vmem>>, %arg18: memref<32x2xf32, #tpu.memory_space<vmem>>, %arg19: memref<1x2xf32, #tpu.memory_space<vmem>>, %arg20: memref<2x32xf32, #tpu.memory_space<vmem>>, %arg21: memref<1x32xf32, #tpu.memory_space<vmem>>, %arg22: memref<1x16xf32, #tpu.memory_space<vmem>>, %arg23: memref<1x16x512xf32, #tpu.memory_space<vmem>>, %arg24: memref<18x512xbf16, #tpu.memory_space<vmem>>, %arg25: memref<48x512xbf16, #tpu.memory_space<vmem>>, %arg26: memref<16x512xf32, #tpu.memory_space<vmem>>) attributes {dimension_semantics = [#tpu.dimension_semantics<parallel>], iteration_bounds = array<i64: 2>, scalar_prefetch = 0 : i64, scratch_operands = 3 : i64, tpu.core_type = #tpu.core_type<tc>, window_params = [{transform_indices = @transform_0, window_bounds = array<i64: 1, 16, 512>}, {pipeline_mode = #tpu.pipeline_mode<synchronous>, transform_indices = @transform_1, window_bounds = array<i64: 3, 512, 512>}, {pipeline_mode = #tpu.pipeline_mode<synchronous>, transform_indices = @transform_2, window_bounds = array<i64: 1, 512>}, {pipeline_mode = #tpu.pipeline_mode<synchronous>, transform_indices = @transform_3, window_bounds = array<i64: 1, 512>}, {pipeline_mode = #tpu.pipeline_mode<synchronous>, transform_indices = @transform_4, window_bounds = array<i64: 3, 512, 512>}, {pipeline_mode = #tpu.pipeline_mode<synchronous>, transform_indices = @transform_5, window_bounds = array<i64: 1, 512>}, {pipeline_mode = #tpu.pipeline_mode<synchronous>, transform_indices = @transform_6, window_bounds = array<i64: 1, 512>}, {pipeline_mode = #tpu.pipeline_mode<synchronous>, transform_indices = @transform_7, window_bounds = array<i64: 3, 512, 512>}, {pipeline_mode = #tpu.pipeline_mode<synchronous>, transform_indices = @transform_8, window_bounds = array<i64: 4, 3, 512, 128>}, {pipeline_mode = #tpu.pipeline_mode<synchronous>, transform_indices = @transform_9, window_bounds = array<i64: 1, 512>}, {pipeline_mode = #tpu.pipeline_mode<synchronous>, transform_indices = @transform_10, window_bounds = array<i64: 1, 512>}, {pipeline_mode = #tpu.pipeline_mode<synchronous>, transform_indices = @transform_11, window_bounds = array<i64: 512, 32>}, {pipeline_mode = #tpu.pipeline_mode<synchronous>, transform_indices = @transform_12, window_bounds = array<i64: 32, 512>}, {pipeline_mode = #tpu.pipeline_mode<synchronous>, transform_indices = @transform_13, window_bounds = array<i64: 512, 16>}, {pipeline_mode = #tpu.pipeline_mode<synchronous>, transform_indices = @transform_14, window_bounds = array<i64: 16, 512>}, {pipeline_mode = #tpu.pipeline_mode<synchronous>, transform_indices = @transform_15, window_bounds = array<i64: 7, 16, 16>}, {pipeline_mode = #tpu.pipeline_mode<synchronous>, transform_indices = @transform_16, window_bounds = array<i64: 7, 16, 16>}, {pipeline_mode = #tpu.pipeline_mode<synchronous>, transform_indices = @transform_17, window_bounds = array<i64: 32, 2>}, {pipeline_mode = #tpu.pipeline_mode<synchronous>, transform_indices = @transform_18, window_bounds = array<i64: 1, 2>}, {pipeline_mode = #tpu.pipeline_mode<synchronous>, transform_indices = @transform_19, window_bounds = array<i64: 2, 32>}, {pipeline_mode = #tpu.pipeline_mode<synchronous>, transform_indices = @transform_20, window_bounds = array<i64: 1, 32>}, {pipeline_mode = #tpu.pipeline_mode<synchronous>, transform_indices = @transform_21, window_bounds = array<i64: 1, 16>}, {transform_indices = @transform_22, window_bounds = array<i64: 1, 16, 512>}]} {
    %cst = arith.constant 0.000000e+00 : bf16
    %0 = vector.broadcast %cst : bf16 to vector<1x512xbf16>
    %c0 = arith.constant 0 : index
    %c0_0 = arith.constant 0 : index
    %1 = vector.load %arg24[%c0, %c0_0] : memref<18x512xbf16, #tpu.memory_space<vmem>>, vector<1x512xbf16>
    tpu.vector_store %arg24[%c0, %c0_0], %0 {strides = array<i32>} : memref<18x512xbf16, #tpu.memory_space<vmem>>, vector<1x512xbf16>,
    %cst_1 = arith.constant 0.000000e+00 : bf16
    %2 = vector.broadcast %cst_1 : bf16 to vector<1x512xbf16>
    %c17 = arith.constant 17 : index
    %c0_2 = arith.constant 0 : index
    %3 = vector.load %arg24[%c17, %c0_2] : memref<18x512xbf16, #tpu.memory_space<vmem>>, vector<1x512xbf16>
    tpu.vector_store %arg24[%c17, %c0_2], %2 {strides = array<i32>} : memref<18x512xbf16, #tpu.memory_space<vmem>>, vector<1x512xbf16>,
    %c0_3 = arith.constant 0 : index
    %c0_4 = arith.constant 0 : index
    %c0_5 = arith.constant 0 : index
    %4 = vector.load %arg1[%c0_3, %c0_4, %c0_5] : memref<1x16x512xf32, #tpu.memory_space<vmem>>, vector<1x16x512xf32>
    %5 = vector.shape_cast %4 : vector<1x16x512xf32> to vector<16x512xf32>
    %6 = arith.truncf %5 : vector<16x512xf32> to vector<16x512xbf16>
    %c1 = arith.constant 1 : index
    %c0_6 = arith.constant 0 : index
    %7 = vector.load %arg24[%c1, %c0_6] : memref<18x512xbf16, #tpu.memory_space<vmem>>, vector<16x512xbf16>
    tpu.vector_store %arg24[%c1, %c0_6], %6 {strides = array<i32>} : memref<18x512xbf16, #tpu.memory_space<vmem>>, vector<16x512xbf16>,
    %c0_7 = arith.constant 0 : index
    %c0_8 = arith.constant 0 : index
    %8 = vector.load %arg24[%c0_7, %c0_8] : memref<18x512xbf16, #tpu.memory_space<vmem>>, vector<16x512xbf16>
    %c0_9 = arith.constant 0 : index
    %c0_10 = arith.constant 0 : index
    %c0_11 = arith.constant 0 : index
    %9 = vector.load %arg2[%c0_9, %c0_10, %c0_11] : memref<3x512x512xbf16, #tpu.memory_space<vmem>>, vector<1x512x512xbf16>
    %10 = vector.shape_cast %9 : vector<1x512x512xbf16> to vector<512x512xbf16>
    %cst_12 = arith.constant dense<0.000000e+00> : vector<16x512xf32>
    %11 = tpu.matmul %8, %10, %cst_12 {dimension_numbers = #tpu.dot_dimension_numbers<[1], [0], [0], [1], [0, 0, 1, 1], [], []>} : vector<16x512xbf16>, vector<512x512xbf16>, vector<16x512xf32> -> vector<16x512xf32>
    %c1_13 = arith.constant 1 : index
    %c0_14 = arith.constant 0 : index
    %12 = vector.load %arg24[%c1_13, %c0_14] : memref<18x512xbf16, #tpu.memory_space<vmem>>, vector<16x512xbf16>
    %c1_15 = arith.constant 1 : index
    %c0_16 = arith.constant 0 : index
    %c0_17 = arith.constant 0 : index
    %13 = vector.load %arg2[%c1_15, %c0_16, %c0_17] : memref<3x512x512xbf16, #tpu.memory_space<vmem>>, vector<1x512x512xbf16>
    %14 = vector.shape_cast %13 : vector<1x512x512xbf16> to vector<512x512xbf16>
    %cst_18 = arith.constant dense<0.000000e+00> : vector<16x512xf32>
    %15 = tpu.matmul %12, %14, %cst_18 {dimension_numbers = #tpu.dot_dimension_numbers<[1], [0], [0], [1], [0, 0, 1, 1], [], []>} : vector<16x512xbf16>, vector<512x512xbf16>, vector<16x512xf32> -> vector<16x512xf32>
    %16 = arith.addf %11, %15 : vector<16x512xf32>
    %c2 = arith.constant 2 : index
    %c0_19 = arith.constant 0 : index
    %17 = vector.load %arg24[%c2, %c0_19] : memref<18x512xbf16, #tpu.memory_space<vmem>>, vector<16x512xbf16>
    %c2_20 = arith.constant 2 : index
    %c0_21 = arith.constant 0 : index
    %c0_22 = arith.constant 0 : index
    %18 = vector.load %arg2[%c2_20, %c0_21, %c0_22] : memref<3x512x512xbf16, #tpu.memory_space<vmem>>, vector<1x512x512xbf16>
    %19 = vector.shape_cast %18 : vector<1x512x512xbf16> to vector<512x512xbf16>
    %cst_23 = arith.constant dense<0.000000e+00> : vector<16x512xf32>
    %20 = tpu.matmul %17, %19, %cst_23 {dimension_numbers = #tpu.dot_dimension_numbers<[1], [0], [0], [1], [0, 0, 1, 1], [], []>} : vector<16x512xbf16>, vector<512x512xbf16>, vector<16x512xf32> -> vector<16x512xf32>
    %21 = arith.addf %16, %20 : vector<16x512xf32>
    %c0_24 = arith.constant 0 : index
    %c0_25 = arith.constant 0 : index
    %22 = vector.load %arg3[%c0_24, %c0_25] : memref<1x512xf32, #tpu.memory_space<vmem>>, vector<1x512xf32>
    %23 = vector.broadcast %22 : vector<1x512xf32> to vector<16x512xf32>
    %24 = arith.mulf %21, %23 : vector<16x512xf32>
    %c0_26 = arith.constant 0 : index
    %c0_27 = arith.constant 0 : index
    %25 = vector.load %arg4[%c0_26, %c0_27] : memref<1x512xf32, #tpu.memory_space<vmem>>, vector<1x512xf32>
    %26 = vector.broadcast %25 : vector<1x512xf32> to vector<16x512xf32>
    %27 = arith.addf %24, %26 : vector<16x512xf32>
    %cst_28 = arith.constant 0.000000e+00 : f32
    %28 = vector.broadcast %cst_28 : f32 to vector<16x512xf32>
    %29 = arith.maximumf %27, %28 : vector<16x512xf32>
    %30 = arith.truncf %29 : vector<16x512xf32> to vector<16x512xbf16>
    %c1_29 = arith.constant 1 : index
    %c0_30 = arith.constant 0 : index
    %31 = vector.load %arg24[%c1_29, %c0_30] : memref<18x512xbf16, #tpu.memory_space<vmem>>, vector<16x512xbf16>
    tpu.vector_store %arg24[%c1_29, %c0_30], %30 {strides = array<i32>} : memref<18x512xbf16, #tpu.memory_space<vmem>>, vector<16x512xbf16>,
    %c0_31 = arith.constant 0 : index
    %c0_32 = arith.constant 0 : index
    %32 = vector.load %arg24[%c0_31, %c0_32] : memref<18x512xbf16, #tpu.memory_space<vmem>>, vector<16x512xbf16>
    %c0_33 = arith.constant 0 : index
    %c0_34 = arith.constant 0 : index
    %c0_35 = arith.constant 0 : index
    %33 = vector.load %arg5[%c0_33, %c0_34, %c0_35] : memref<3x512x512xbf16, #tpu.memory_space<vmem>>, vector<1x512x512xbf16>
    %34 = vector.shape_cast %33 : vector<1x512x512xbf16> to vector<512x512xbf16>
    %cst_36 = arith.constant dense<0.000000e+00> : vector<16x512xf32>
    %35 = tpu.matmul %32, %34, %cst_36 {dimension_numbers = #tpu.dot_dimension_numbers<[1], [0], [0], [1], [0, 0, 1, 1], [], []>} : vector<16x512xbf16>, vector<512x512xbf16>, vector<16x512xf32> -> vector<16x512xf32>
    %c1_37 = arith.constant 1 : index
    %c0_38 = arith.constant 0 : index
    %36 = vector.load %arg24[%c1_37, %c0_38] : memref<18x512xbf16, #tpu.memory_space<vmem>>, vector<16x512xbf16>
    %c1_39 = arith.constant 1 : index
    %c0_40 = arith.constant 0 : index
    %c0_41 = arith.constant 0 : index
    %37 = vector.load %arg5[%c1_39, %c0_40, %c0_41] : memref<3x512x512xbf16, #tpu.memory_space<vmem>>, vector<1x512x512xbf16>
    %38 = vector.shape_cast %37 : vector<1x512x512xbf16> to vector<512x512xbf16>
    %cst_42 = arith.constant dense<0.000000e+00> : vector<16x512xf32>
    %39 = tpu.matmul %36, %38, %cst_42 {dimension_numbers = #tpu.dot_dimension_numbers<[1], [0], [0], [1], [0, 0, 1, 1], [], []>} : vector<16x512xbf16>, vector<512x512xbf16>, vector<16x512xf32> -> vector<16x512xf32>
    %40 = arith.addf %35, %39 : vector<16x512xf32>
    %c2_43 = arith.constant 2 : index
    %c0_44 = arith.constant 0 : index
    %41 = vector.load %arg24[%c2_43, %c0_44] : memref<18x512xbf16, #tpu.memory_space<vmem>>, vector<16x512xbf16>
    %c2_45 = arith.constant 2 : index
    %c0_46 = arith.constant 0 : index
    %c0_47 = arith.constant 0 : index
    %42 = vector.load %arg5[%c2_45, %c0_46, %c0_47] : memref<3x512x512xbf16, #tpu.memory_space<vmem>>, vector<1x512x512xbf16>
    %43 = vector.shape_cast %42 : vector<1x512x512xbf16> to vector<512x512xbf16>
    %cst_48 = arith.constant dense<0.000000e+00> : vector<16x512xf32>
    %44 = tpu.matmul %41, %43, %cst_48 {dimension_numbers = #tpu.dot_dimension_numbers<[1], [0], [0], [1], [0, 0, 1, 1], [], []>} : vector<16x512xbf16>, vector<512x512xbf16>, vector<16x512xf32> -> vector<16x512xf32>
    %45 = arith.addf %40, %44 : vector<16x512xf32>
    %c0_49 = arith.constant 0 : index
    %c0_50 = arith.constant 0 : index
    %46 = vector.load %arg6[%c0_49, %c0_50] : memref<1x512xf32, #tpu.memory_space<vmem>>, vector<1x512xf32>
    %47 = vector.broadcast %46 : vector<1x512xf32> to vector<16x512xf32>
    %48 = arith.mulf %45, %47 : vector<16x512xf32>
    %c0_51 = arith.constant 0 : index
    %c0_52 = arith.constant 0 : index
    %49 = vector.load %arg7[%c0_51, %c0_52] : memref<1x512xf32, #tpu.memory_space<vmem>>, vector<1x512xf32>
    %50 = vector.broadcast %49 : vector<1x512xf32> to vector<16x512xf32>
    %51 = arith.addf %48, %50 : vector<16x512xf32>
    %cst_53 = arith.constant 0.000000e+00 : f32
    %52 = vector.broadcast %cst_53 : f32 to vector<16x512xf32>
    %53 = arith.maximumf %51, %52 : vector<16x512xf32>
    %cst_54 = arith.constant 0.000000e+00 : bf16
    %54 = vector.broadcast %cst_54 : bf16 to vector<16x512xbf16>
    %c0_55 = arith.constant 0 : index
    %c0_56 = arith.constant 0 : index
    %55 = vector.load %arg25[%c0_55, %c0_56] : memref<48x512xbf16, #tpu.memory_space<vmem>>, vector<16x512xbf16>
    tpu.vector_store %arg25[%c0_55, %c0_56], %54 {strides = array<i32>} : memref<48x512xbf16, #tpu.memory_space<vmem>>, vector<16x512xbf16>,
    %cst_57 = arith.constant 0.000000e+00 : bf16
    %56 = vector.broadcast %cst_57 : bf16 to vector<16x512xbf16>
    %c32 = arith.constant 32 : index
    %c0_58 = arith.constant 0 : index
    %57 = vector.load %arg25[%c32, %c0_58] : memref<48x512xbf16, #tpu.memory_space<vmem>>, vector<16x512xbf16>
    tpu.vector_store %arg25[%c32, %c0_58], %56 {strides = array<i32>} : memref<48x512xbf16, #tpu.memory_space<vmem>>, vector<16x512xbf16>,
    %58 = arith.truncf %53 : vector<16x512xf32> to vector<16x512xbf16>
    %c16 = arith.constant 16 : index
    %c0_59 = arith.constant 0 : index
    %59 = vector.load %arg25[%c16, %c0_59] : memref<48x512xbf16, #tpu.memory_space<vmem>>, vector<16x512xbf16>
    tpu.vector_store %arg25[%c16, %c0_59], %58 {strides = array<i32>} : memref<48x512xbf16, #tpu.memory_space<vmem>>, vector<16x512xbf16>,
    %c15 = arith.constant 15 : index
    %c0_60 = arith.constant 0 : index
    %60 = vector.load %arg25[%c15, %c0_60] : memref<48x512xbf16, #tpu.memory_space<vmem>>, vector<16x512xbf16>
    %c0_61 = arith.constant 0 : index
    %c0_62 = arith.constant 0 : index
    %c0_63 = arith.constant 0 : index
    %61 = vector.load %arg8[%c0_61, %c0_62, %c0_63] : memref<3x512x512xbf16, #tpu.memory_space<vmem>>, vector<1x512x512xbf16>
    %62 = vector.shape_cast %61 : vector<1x512x512xbf16> to vector<512x512xbf16>
    %cst_64 = arith.constant dense<0.000000e+00> : vector<16x512xf32>
    %63 = tpu.matmul %60, %62, %cst_64 {dimension_numbers = #tpu.dot_dimension_numbers<[1], [0], [0], [1], [0, 0, 1, 1], [], []>} : vector<16x512xbf16>, vector<512x512xbf16>, vector<16x512xf32> -> vector<16x512xf32>
    %c16_65 = arith.constant 16 : index
    %c0_66 = arith.constant 0 : index
    %64 = vector.load %arg25[%c16_65, %c0_66] : memref<48x512xbf16, #tpu.memory_space<vmem>>, vector<16x512xbf16>
    %c1_67 = arith.constant 1 : index
    %c0_68 = arith.constant 0 : index
    %c0_69 = arith.constant 0 : index
    %65 = vector.load %arg8[%c1_67, %c0_68, %c0_69] : memref<3x512x512xbf16, #tpu.memory_space<vmem>>, vector<1x512x512xbf16>
    %66 = vector.shape_cast %65 : vector<1x512x512xbf16> to vector<512x512xbf16>
    %cst_70 = arith.constant dense<0.000000e+00> : vector<16x512xf32>
    %67 = tpu.matmul %64, %66, %cst_70 {dimension_numbers = #tpu.dot_dimension_numbers<[1], [0], [0], [1], [0, 0, 1, 1], [], []>} : vector<16x512xbf16>, vector<512x512xbf16>, vector<16x512xf32> -> vector<16x512xf32>
    %68 = arith.addf %63, %67 : vector<16x512xf32>
    %c17_71 = arith.constant 17 : index
    %c0_72 = arith.constant 0 : index
    %69 = vector.load %arg25[%c17_71, %c0_72] : memref<48x512xbf16, #tpu.memory_space<vmem>>, vector<16x512xbf16>
    %c2_73 = arith.constant 2 : index
    %c0_74 = arith.constant 0 : index
    %c0_75 = arith.constant 0 : index
    %70 = vector.load %arg8[%c2_73, %c0_74, %c0_75] : memref<3x512x512xbf16, #tpu.memory_space<vmem>>, vector<1x512x512xbf16>
    %71 = vector.shape_cast %70 : vector<1x512x512xbf16> to vector<512x512xbf16>
    %cst_76 = arith.constant dense<0.000000e+00> : vector<16x512xf32>
    %72 = tpu.matmul %69, %71, %cst_76 {dimension_numbers = #tpu.dot_dimension_numbers<[1], [0], [0], [1], [0, 0, 1, 1], [], []>} : vector<16x512xbf16>, vector<512x512xbf16>, vector<16x512xf32> -> vector<16x512xf32>
    %73 = arith.addf %68, %72 : vector<16x512xf32>
    %c14 = arith.constant 14 : index
    %c0_77 = arith.constant 0 : index
    %74 = vector.load %arg25[%c14, %c0_77] : memref<48x512xbf16, #tpu.memory_space<vmem>>, vector<16x512xbf16>
    %c0_78 = arith.constant 0 : index
    %c0_79 = arith.constant 0 : index
    %c0_80 = arith.constant 0 : index
    %c0_81 = arith.constant 0 : index
    %75 = vector.load %arg9[%c0_78, %c0_79, %c0_80, %c0_81] : memref<4x3x512x128xbf16, #tpu.memory_space<vmem>>, vector<1x1x512x128xbf16>
    %76 = vector.shape_cast %75 : vector<1x1x512x128xbf16> to vector<512x128xbf16>
    %cst_82 = arith.constant dense<0.000000e+00> : vector<16x128xf32>
    %77 = tpu.matmul %74, %76, %cst_82 {dimension_numbers = #tpu.dot_dimension_numbers<[1], [0], [0], [1], [0, 0, 1, 1], [], []>} : vector<16x512xbf16>, vector<512x128xbf16>, vector<16x128xf32> -> vector<16x128xf32>
    %c16_83 = arith.constant 16 : index
    %c0_84 = arith.constant 0 : index
    %78 = vector.load %arg25[%c16_83, %c0_84] : memref<48x512xbf16, #tpu.memory_space<vmem>>, vector<16x512xbf16>
    %c0_85 = arith.constant 0 : index
    %c1_86 = arith.constant 1 : index
    %c0_87 = arith.constant 0 : index
    %c0_88 = arith.constant 0 : index
    %79 = vector.load %arg9[%c0_85, %c1_86, %c0_87, %c0_88] : memref<4x3x512x128xbf16, #tpu.memory_space<vmem>>, vector<1x1x512x128xbf16>
    %80 = vector.shape_cast %79 : vector<1x1x512x128xbf16> to vector<512x128xbf16>
    %cst_89 = arith.constant dense<0.000000e+00> : vector<16x128xf32>
    %81 = tpu.matmul %78, %80, %cst_89 {dimension_numbers = #tpu.dot_dimension_numbers<[1], [0], [0], [1], [0, 0, 1, 1], [], []>} : vector<16x512xbf16>, vector<512x128xbf16>, vector<16x128xf32> -> vector<16x128xf32>
    %82 = arith.addf %77, %81 : vector<16x128xf32>
    %c18 = arith.constant 18 : index
    %c0_90 = arith.constant 0 : index
    %83 = vector.load %arg25[%c18, %c0_90] : memref<48x512xbf16, #tpu.memory_space<vmem>>, vector<16x512xbf16>
    %c0_91 = arith.constant 0 : index
    %c2_92 = arith.constant 2 : index
    %c0_93 = arith.constant 0 : index
    %c0_94 = arith.constant 0 : index
    %84 = vector.load %arg9[%c0_91, %c2_92, %c0_93, %c0_94] : memref<4x3x512x128xbf16, #tpu.memory_space<vmem>>, vector<1x1x512x128xbf16>
    %85 = vector.shape_cast %84 : vector<1x1x512x128xbf16> to vector<512x128xbf16>
    %cst_95 = arith.constant dense<0.000000e+00> : vector<16x128xf32>
    %86 = tpu.matmul %83, %85, %cst_95 {dimension_numbers = #tpu.dot_dimension_numbers<[1], [0], [0], [1], [0, 0, 1, 1], [], []>} : vector<16x512xbf16>, vector<512x128xbf16>, vector<16x128xf32> -> vector<16x128xf32>
    %87 = arith.addf %82, %86 : vector<16x128xf32>
    %c0_96 = arith.constant 0 : index
    %c0_97 = arith.constant 0 : index
    %88 = vector.load %arg26[%c0_96, %c0_97] : memref<16x512xf32, #tpu.memory_space<vmem>>, vector<16x128xf32>
    tpu.vector_store %arg26[%c0_96, %c0_97], %87 {strides = array<i32>} : memref<16x512xf32, #tpu.memory_space<vmem>>, vector<16x128xf32>,
    %c12 = arith.constant 12 : index
    %c0_98 = arith.constant 0 : index
    %89 = vector.load %arg25[%c12, %c0_98] : memref<48x512xbf16, #tpu.memory_space<vmem>>, vector<16x512xbf16>
    %c1_99 = arith.constant 1 : index
    %c0_100 = arith.constant 0 : index
    %c0_101 = arith.constant 0 : index
    %c0_102 = arith.constant 0 : index
    %90 = vector.load %arg9[%c1_99, %c0_100, %c0_101, %c0_102] : memref<4x3x512x128xbf16, #tpu.memory_space<vmem>>, vector<1x1x512x128xbf16>
    %91 = vector.shape_cast %90 : vector<1x1x512x128xbf16> to vector<512x128xbf16>
    %cst_103 = arith.constant dense<0.000000e+00> : vector<16x128xf32>
    %92 = tpu.matmul %89, %91, %cst_103 {dimension_numbers = #tpu.dot_dimension_numbers<[1], [0], [0], [1], [0, 0, 1, 1], [], []>} : vector<16x512xbf16>, vector<512x128xbf16>, vector<16x128xf32> -> vector<16x128xf32>
    %c16_104 = arith.constant 16 : index
    %c0_105 = arith.constant 0 : index
    %93 = vector.load %arg25[%c16_104, %c0_105] : memref<48x512xbf16, #tpu.memory_space<vmem>>, vector<16x512xbf16>
    %c1_106 = arith.constant 1 : index
    %c1_107 = arith.constant 1 : index
    %c0_108 = arith.constant 0 : index
    %c0_109 = arith.constant 0 : index
    %94 = vector.load %arg9[%c1_106, %c1_107, %c0_108, %c0_109] : memref<4x3x512x128xbf16, #tpu.memory_space<vmem>>, vector<1x1x512x128xbf16>
    %95 = vector.shape_cast %94 : vector<1x1x512x128xbf16> to vector<512x128xbf16>
    %cst_110 = arith.constant dense<0.000000e+00> : vector<16x128xf32>
    %96 = tpu.matmul %93, %95, %cst_110 {dimension_numbers = #tpu.dot_dimension_numbers<[1], [0], [0], [1], [0, 0, 1, 1], [], []>} : vector<16x512xbf16>, vector<512x128xbf16>, vector<16x128xf32> -> vector<16x128xf32>
    %97 = arith.addf %92, %96 : vector<16x128xf32>
    %c20 = arith.constant 20 : index
    %c0_111 = arith.constant 0 : index
    %98 = vector.load %arg25[%c20, %c0_111] : memref<48x512xbf16, #tpu.memory_space<vmem>>, vector<16x512xbf16>
    %c1_112 = arith.constant 1 : index
    %c2_113 = arith.constant 2 : index
    %c0_114 = arith.constant 0 : index
    %c0_115 = arith.constant 0 : index
    %99 = vector.load %arg9[%c1_112, %c2_113, %c0_114, %c0_115] : memref<4x3x512x128xbf16, #tpu.memory_space<vmem>>, vector<1x1x512x128xbf16>
    %100 = vector.shape_cast %99 : vector<1x1x512x128xbf16> to vector<512x128xbf16>
    %cst_116 = arith.constant dense<0.000000e+00> : vector<16x128xf32>
    %101 = tpu.matmul %98, %100, %cst_116 {dimension_numbers = #tpu.dot_dimension_numbers<[1], [0], [0], [1], [0, 0, 1, 1], [], []>} : vector<16x512xbf16>, vector<512x128xbf16>, vector<16x128xf32> -> vector<16x128xf32>
    %102 = arith.addf %97, %101 : vector<16x128xf32>
    %c0_117 = arith.constant 0 : index
    %c128 = arith.constant 128 : index
    %103 = vector.load %arg26[%c0_117, %c128] : memref<16x512xf32, #tpu.memory_space<vmem>>, vector<16x128xf32>
    tpu.vector_store %arg26[%c0_117, %c128], %102 {strides = array<i32>} : memref<16x512xf32, #tpu.memory_space<vmem>>, vector<16x128xf32>,
    %c8 = arith.constant 8 : index
    %c0_118 = arith.constant 0 : index
    %104 = vector.load %arg25[%c8, %c0_118] : memref<48x512xbf16, #tpu.memory_space<vmem>>, vector<16x512xbf16>
    %c2_119 = arith.constant 2 : index
    %c0_120 = arith.constant 0 : index
    %c0_121 = arith.constant 0 : index
    %c0_122 = arith.constant 0 : index
    %105 = vector.load %arg9[%c2_119, %c0_120, %c0_121, %c0_122] : memref<4x3x512x128xbf16, #tpu.memory_space<vmem>>, vector<1x1x512x128xbf16>
    %106 = vector.shape_cast %105 : vector<1x1x512x128xbf16> to vector<512x128xbf16>
    %cst_123 = arith.constant dense<0.000000e+00> : vector<16x128xf32>
    %107 = tpu.matmul %104, %106, %cst_123 {dimension_numbers = #tpu.dot_dimension_numbers<[1], [0], [0], [1], [0, 0, 1, 1], [], []>} : vector<16x512xbf16>, vector<512x128xbf16>, vector<16x128xf32> -> vector<16x128xf32>
    %c16_124 = arith.constant 16 : index
    %c0_125 = arith.constant 0 : index
    %108 = vector.load %arg25[%c16_124, %c0_125] : memref<48x512xbf16, #tpu.memory_space<vmem>>, vector<16x512xbf16>
    %c2_126 = arith.constant 2 : index
    %c1_127 = arith.constant 1 : index
    %c0_128 = arith.constant 0 : index
    %c0_129 = arith.constant 0 : index
    %109 = vector.load %arg9[%c2_126, %c1_127, %c0_128, %c0_129] : memref<4x3x512x128xbf16, #tpu.memory_space<vmem>>, vector<1x1x512x128xbf16>
    %110 = vector.shape_cast %109 : vector<1x1x512x128xbf16> to vector<512x128xbf16>
    %cst_130 = arith.constant dense<0.000000e+00> : vector<16x128xf32>
    %111 = tpu.matmul %108, %110, %cst_130 {dimension_numbers = #tpu.dot_dimension_numbers<[1], [0], [0], [1], [0, 0, 1, 1], [], []>} : vector<16x512xbf16>, vector<512x128xbf16>, vector<16x128xf32> -> vector<16x128xf32>
    %112 = arith.addf %107, %111 : vector<16x128xf32>
    %c24 = arith.constant 24 : index
    %c0_131 = arith.constant 0 : index
    %113 = vector.load %arg25[%c24, %c0_131] : memref<48x512xbf16, #tpu.memory_space<vmem>>, vector<16x512xbf16>
    %c2_132 = arith.constant 2 : index
    %c2_133 = arith.constant 2 : index
    %c0_134 = arith.constant 0 : index
    %c0_135 = arith.constant 0 : index
    %114 = vector.load %arg9[%c2_132, %c2_133, %c0_134, %c0_135] : memref<4x3x512x128xbf16, #tpu.memory_space<vmem>>, vector<1x1x512x128xbf16>
    %115 = vector.shape_cast %114 : vector<1x1x512x128xbf16> to vector<512x128xbf16>
    %cst_136 = arith.constant dense<0.000000e+00> : vector<16x128xf32>
    %116 = tpu.matmul %113, %115, %cst_136 {dimension_numbers = #tpu.dot_dimension_numbers<[1], [0], [0], [1], [0, 0, 1, 1], [], []>} : vector<16x512xbf16>, vector<512x128xbf16>, vector<16x128xf32> -> vector<16x128xf32>
    %117 = arith.addf %112, %116 : vector<16x128xf32>
    %c0_137 = arith.constant 0 : index
    %c256 = arith.constant 256 : index
    %118 = vector.load %arg26[%c0_137, %c256] : memref<16x512xf32, #tpu.memory_space<vmem>>, vector<16x128xf32>
    tpu.vector_store %arg26[%c0_137, %c256], %117 {strides = array<i32>} : memref<16x512xf32, #tpu.memory_space<vmem>>, vector<16x128xf32>,
    %c0_138 = arith.constant 0 : index
    %c0_139 = arith.constant 0 : index
    %119 = vector.load %arg25[%c0_138, %c0_139] : memref<48x512xbf16, #tpu.memory_space<vmem>>, vector<16x512xbf16>
    %c3 = arith.constant 3 : index
    %c0_140 = arith.constant 0 : index
    %c0_141 = arith.constant 0 : index
    %c0_142 = arith.constant 0 : index
    %120 = vector.load %arg9[%c3, %c0_140, %c0_141, %c0_142] : memref<4x3x512x128xbf16, #tpu.memory_space<vmem>>, vector<1x1x512x128xbf16>
    %121 = vector.shape_cast %120 : vector<1x1x512x128xbf16> to vector<512x128xbf16>
    %cst_143 = arith.constant dense<0.000000e+00> : vector<16x128xf32>
    %122 = tpu.matmul %119, %121, %cst_143 {dimension_numbers = #tpu.dot_dimension_numbers<[1], [0], [0], [1], [0, 0, 1, 1], [], []>} : vector<16x512xbf16>, vector<512x128xbf16>, vector<16x128xf32> -> vector<16x128xf32>
    %c16_144 = arith.constant 16 : index
    %c0_145 = arith.constant 0 : index
    %123 = vector.load %arg25[%c16_144, %c0_145] : memref<48x512xbf16, #tpu.memory_space<vmem>>, vector<16x512xbf16>
    %c3_146 = arith.constant 3 : index
    %c1_147 = arith.constant 1 : index
    %c0_148 = arith.constant 0 : index
    %c0_149 = arith.constant 0 : index
    %124 = vector.load %arg9[%c3_146, %c1_147, %c0_148, %c0_149] : memref<4x3x512x128xbf16, #tpu.memory_space<vmem>>, vector<1x1x512x128xbf16>
    %125 = vector.shape_cast %124 : vector<1x1x512x128xbf16> to vector<512x128xbf16>
    %cst_150 = arith.constant dense<0.000000e+00> : vector<16x128xf32>
    %126 = tpu.matmul %123, %125, %cst_150 {dimension_numbers = #tpu.dot_dimension_numbers<[1], [0], [0], [1], [0, 0, 1, 1], [], []>} : vector<16x512xbf16>, vector<512x128xbf16>, vector<16x128xf32> -> vector<16x128xf32>
    %127 = arith.addf %122, %126 : vector<16x128xf32>
    %c32_151 = arith.constant 32 : index
    %c0_152 = arith.constant 0 : index
    %128 = vector.load %arg25[%c32_151, %c0_152] : memref<48x512xbf16, #tpu.memory_space<vmem>>, vector<16x512xbf16>
    %c3_153 = arith.constant 3 : index
    %c2_154 = arith.constant 2 : index
    %c0_155 = arith.constant 0 : index
    %c0_156 = arith.constant 0 : index
    %129 = vector.load %arg9[%c3_153, %c2_154, %c0_155, %c0_156] : memref<4x3x512x128xbf16, #tpu.memory_space<vmem>>, vector<1x1x512x128xbf16>
    %130 = vector.shape_cast %129 : vector<1x1x512x128xbf16> to vector<512x128xbf16>
    %cst_157 = arith.constant dense<0.000000e+00> : vector<16x128xf32>
    %131 = tpu.matmul %128, %130, %cst_157 {dimension_numbers = #tpu.dot_dimension_numbers<[1], [0], [0], [1], [0, 0, 1, 1], [], []>} : vector<16x512xbf16>, vector<512x128xbf16>, vector<16x128xf32> -> vector<16x128xf32>
    %132 = arith.addf %127, %131 : vector<16x128xf32>
    %c0_158 = arith.constant 0 : index
    %c384 = arith.constant 384 : index
    %133 = vector.load %arg26[%c0_158, %c384] : memref<16x512xf32, #tpu.memory_space<vmem>>, vector<16x128xf32>
    tpu.vector_store %arg26[%c0_158, %c384], %132 {strides = array<i32>} : memref<16x512xf32, #tpu.memory_space<vmem>>, vector<16x128xf32>,
    %c0_159 = arith.constant 0 : index
    %c0_160 = arith.constant 0 : index
    %134 = vector.load %arg26[%c0_159, %c0_160] : memref<16x512xf32, #tpu.memory_space<vmem>>, vector<16x512xf32>
    %135 = arith.subf %73, %134 : vector<16x512xf32>
    %c0_161 = arith.constant 0 : index
    %c0_162 = arith.constant 0 : index
    %136 = vector.load %arg10[%c0_161, %c0_162] : memref<1x512xf32, #tpu.memory_space<vmem>>, vector<1x512xf32>
    %137 = vector.broadcast %136 : vector<1x512xf32> to vector<16x512xf32>
    %138 = arith.mulf %135, %137 : vector<16x512xf32>
    %c0_163 = arith.constant 0 : index
    %c0_164 = arith.constant 0 : index
    %139 = vector.load %arg11[%c0_163, %c0_164] : memref<1x512xf32, #tpu.memory_space<vmem>>, vector<1x512xf32>
    %140 = vector.broadcast %139 : vector<1x512xf32> to vector<16x512xf32>
    %141 = arith.addf %138, %140 : vector<16x512xf32>
    %cst_165 = arith.constant 0.000000e+00 : f32
    %142 = vector.broadcast %cst_165 : f32 to vector<16x512xf32>
    %143 = arith.maximumf %141, %142 : vector<16x512xf32>
    %cst_166 = arith.constant dense<0.000000e+00> : vector<512xf32>
    %144 = vector.multi_reduction <add>, %143, %cst_166 [0] : vector<16x512xf32> to vector<512xf32>
    %145 = vector.shape_cast %144 : vector<512xf32> to vector<1x512xf32>
    %c0_167 = arith.constant 0 : index
    %c0_168 = arith.constant 0 : index
    %146 = vector.load %arg12[%c0_167, %c0_168] : memref<512x32xf32, #tpu.memory_space<vmem>>, vector<512x32xf32>
    %cst_169 = arith.constant dense<0.000000e+00> : vector<1x32xf32>
    %147 = tpu.matmul %145, %146, %cst_169 {dimension_numbers = #tpu.dot_dimension_numbers<[1], [0], [0], [1], [0, 0, 1, 1], [], []>} : vector<1x512xf32>, vector<512x32xf32>, vector<1x32xf32> -> vector<1x32xf32>
    %cst_170 = arith.constant 3.906250e-03 : f32
    %148 = vector.broadcast %cst_170 : f32 to vector<1x32xf32>
    %149 = arith.mulf %147, %148 : vector<1x32xf32>
    %c0_171 = arith.constant 0 : index
    %c0_172 = arith.constant 0 : index
    %150 = vector.load %arg18[%c0_171, %c0_172] : memref<32x2xf32, #tpu.memory_space<vmem>>, vector<32x2xf32>
    %cst_173 = arith.constant dense<0.000000e+00> : vector<1x2xf32>
    %151 = tpu.matmul %149, %150, %cst_173 {dimension_numbers = #tpu.dot_dimension_numbers<[1], [0], [0], [1], [0, 0, 1, 1], [], []>} : vector<1x32xf32>, vector<32x2xf32>, vector<1x2xf32> -> vector<1x2xf32>
    %c0_174 = arith.constant 0 : index
    %c0_175 = arith.constant 0 : index
    %152 = vector.load %arg19[%c0_174, %c0_175] : memref<1x2xf32, #tpu.memory_space<vmem>>, vector<1x2xf32>
    %153 = arith.addf %151, %152 : vector<1x2xf32>
    %cst_176 = arith.constant 0.000000e+00 : f32
    %154 = vector.broadcast %cst_176 : f32 to vector<1x2xf32>
    %155 = arith.maximumf %153, %154 : vector<1x2xf32>
    %c0_177 = arith.constant 0 : index
    %c0_178 = arith.constant 0 : index
    %156 = vector.load %arg20[%c0_177, %c0_178] : memref<2x32xf32, #tpu.memory_space<vmem>>, vector<2x32xf32>
    %cst_179 = arith.constant dense<0.000000e+00> : vector<1x32xf32>
    %157 = tpu.matmul %155, %156, %cst_179 {dimension_numbers = #tpu.dot_dimension_numbers<[1], [0], [0], [1], [0, 0, 1, 1], [], []>} : vector<1x2xf32>, vector<2x32xf32>, vector<1x32xf32> -> vector<1x32xf32>
    %c0_180 = arith.constant 0 : index
    %c0_181 = arith.constant 0 : index
    %158 = vector.load %arg21[%c0_180, %c0_181] : memref<1x32xf32, #tpu.memory_space<vmem>>, vector<1x32xf32>
    %159 = arith.addf %157, %158 : vector<1x32xf32>
    %160 = arith.negf %159 : vector<1x32xf32>
    %161 = math.exp %160 : vector<1x32xf32>
    %cst_182 = arith.constant 1.000000e+00 : f32
    %162 = vector.broadcast %cst_182 : f32 to vector<1x32xf32>
    %163 = arith.addf %162, %161 : vector<1x32xf32>
    %164 = arith.divf %162, %163 : vector<1x32xf32>
    %c0_183 = arith.constant 0 : index
    %c0_184 = arith.constant 0 : index
    %165 = vector.load %arg13[%c0_183, %c0_184] : memref<32x512xf32, #tpu.memory_space<vmem>>, vector<32x512xf32>
    %cst_185 = arith.constant dense<0.000000e+00> : vector<1x512xf32>
    %166 = tpu.matmul %164, %165, %cst_185 {dimension_numbers = #tpu.dot_dimension_numbers<[1], [0], [0], [1], [0, 0, 1, 1], [], []>} : vector<1x32xf32>, vector<32x512xf32>, vector<1x512xf32> -> vector<1x512xf32>
    %167 = vector.broadcast %166 : vector<1x512xf32> to vector<16x512xf32>
    %168 = arith.mulf %143, %167 : vector<16x512xf32>
    %c0_186 = arith.constant 0 : index
    %c0_187 = arith.constant 0 : index
    %169 = vector.load %arg14[%c0_186, %c0_187] : memref<512x16xf32, #tpu.memory_space<vmem>>, vector<512x16xf32>
    %cst_188 = arith.constant dense<0.000000e+00> : vector<16x16xf32>
    %170 = tpu.matmul %168, %169, %cst_188 {dimension_numbers = #tpu.dot_dimension_numbers<[1], [0], [0], [1], [0, 0, 1, 1], [], []>} : vector<16x512xf32>, vector<512x16xf32>, vector<16x16xf32> -> vector<16x16xf32>
    %cst_189 = arith.constant 0.000000e+00 : f32
    %171 = vector.broadcast %cst_189 : f32 to vector<16x16xf32>
    %c0_190 = arith.constant 0 : index
    %c0_191 = arith.constant 0 : index
    %c0_192 = arith.constant 0 : index
    %172 = vector.load %arg16[%c0_190, %c0_191, %c0_192] : memref<7x16x16xf32, #tpu.memory_space<vmem>>, vector<1x16x16xf32>
    %173 = vector.shape_cast %172 : vector<1x16x16xf32> to vector<16x16xf32>
    %cst_193 = arith.constant dense<0.000000e+00> : vector<16x16xf32>
    %174 = tpu.matmul %173, %170, %cst_193 {dimension_numbers = #tpu.dot_dimension_numbers<[1], [0], [0], [1], [0, 0, 1, 1], [], []>} : vector<16x16xf32>, vector<16x16xf32>, vector<16x16xf32> -> vector<16x16xf32>
    %c0_194 = arith.constant 0 : index
    %c0_195 = arith.constant 0 : index
    %c0_196 = arith.constant 0 : index
    %175 = vector.load %arg17[%c0_194, %c0_195, %c0_196] : memref<7x16x16xf32, #tpu.memory_space<vmem>>, vector<1x16x16xf32>
    %176 = vector.shape_cast %175 : vector<1x16x16xf32> to vector<16x16xf32>
    %cst_197 = arith.constant dense<0.000000e+00> : vector<16x16xf32>
    %177 = tpu.matmul %174, %176, %cst_197 {dimension_numbers = #tpu.dot_dimension_numbers<[1], [0], [0], [1], [0, 0, 1, 1], [], []>} : vector<16x16xf32>, vector<16x16xf32>, vector<16x16xf32> -> vector<16x16xf32>
    %178 = arith.addf %171, %177 : vector<16x16xf32>
    %c1_198 = arith.constant 1 : index
    %c0_199 = arith.constant 0 : index
    %c0_200 = arith.constant 0 : index
    %179 = vector.load %arg16[%c1_198, %c0_199, %c0_200] : memref<7x16x16xf32, #tpu.memory_space<vmem>>, vector<1x16x16xf32>
    %180 = vector.shape_cast %179 : vector<1x16x16xf32> to vector<16x16xf32>
    %cst_201 = arith.constant dense<0.000000e+00> : vector<16x16xf32>
    %181 = tpu.matmul %180, %170, %cst_201 {dimension_numbers = #tpu.dot_dimension_numbers<[1], [0], [0], [1], [0, 0, 1, 1], [], []>} : vector<16x16xf32>, vector<16x16xf32>, vector<16x16xf32> -> vector<16x16xf32>
    %c1_202 = arith.constant 1 : index
    %c0_203 = arith.constant 0 : index
    %c0_204 = arith.constant 0 : index
    %182 = vector.load %arg17[%c1_202, %c0_203, %c0_204] : memref<7x16x16xf32, #tpu.memory_space<vmem>>, vector<1x16x16xf32>
    %183 = vector.shape_cast %182 : vector<1x16x16xf32> to vector<16x16xf32>
    %cst_205 = arith.constant dense<0.000000e+00> : vector<16x16xf32>
    %184 = tpu.matmul %181, %183, %cst_205 {dimension_numbers = #tpu.dot_dimension_numbers<[1], [0], [0], [1], [0, 0, 1, 1], [], []>} : vector<16x16xf32>, vector<16x16xf32>, vector<16x16xf32> -> vector<16x16xf32>
    %185 = arith.addf %178, %184 : vector<16x16xf32>
    %c2_206 = arith.constant 2 : index
    %c0_207 = arith.constant 0 : index
    %c0_208 = arith.constant 0 : index
    %186 = vector.load %arg16[%c2_206, %c0_207, %c0_208] : memref<7x16x16xf32, #tpu.memory_space<vmem>>, vector<1x16x16xf32>
    %187 = vector.shape_cast %186 : vector<1x16x16xf32> to vector<16x16xf32>
    %cst_209 = arith.constant dense<0.000000e+00> : vector<16x16xf32>
    %188 = tpu.matmul %187, %170, %cst_209 {dimension_numbers = #tpu.dot_dimension_numbers<[1], [0], [0], [1], [0, 0, 1, 1], [], []>} : vector<16x16xf32>, vector<16x16xf32>, vector<16x16xf32> -> vector<16x16xf32>
    %c2_210 = arith.constant 2 : index
    %c0_211 = arith.constant 0 : index
    %c0_212 = arith.constant 0 : index
    %189 = vector.load %arg17[%c2_210, %c0_211, %c0_212] : memref<7x16x16xf32, #tpu.memory_space<vmem>>, vector<1x16x16xf32>
    %190 = vector.shape_cast %189 : vector<1x16x16xf32> to vector<16x16xf32>
    %cst_213 = arith.constant dense<0.000000e+00> : vector<16x16xf32>
    %191 = tpu.matmul %188, %190, %cst_213 {dimension_numbers = #tpu.dot_dimension_numbers<[1], [0], [0], [1], [0, 0, 1, 1], [], []>} : vector<16x16xf32>, vector<16x16xf32>, vector<16x16xf32> -> vector<16x16xf32>
    %192 = arith.addf %185, %191 : vector<16x16xf32>
    %c3_214 = arith.constant 3 : index
    %c0_215 = arith.constant 0 : index
    %c0_216 = arith.constant 0 : index
    %193 = vector.load %arg16[%c3_214, %c0_215, %c0_216] : memref<7x16x16xf32, #tpu.memory_space<vmem>>, vector<1x16x16xf32>
    %194 = vector.shape_cast %193 : vector<1x16x16xf32> to vector<16x16xf32>
    %cst_217 = arith.constant dense<0.000000e+00> : vector<16x16xf32>
    %195 = tpu.matmul %194, %170, %cst_217 {dimension_numbers = #tpu.dot_dimension_numbers<[1], [0], [0], [1], [0, 0, 1, 1], [], []>} : vector<16x16xf32>, vector<16x16xf32>, vector<16x16xf32> -> vector<16x16xf32>
    %c3_218 = arith.constant 3 : index
    %c0_219 = arith.constant 0 : index
    %c0_220 = arith.constant 0 : index
    %196 = vector.load %arg17[%c3_218, %c0_219, %c0_220] : memref<7x16x16xf32, #tpu.memory_space<vmem>>, vector<1x16x16xf32>
    %197 = vector.shape_cast %196 : vector<1x16x16xf32> to vector<16x16xf32>
    %cst_221 = arith.constant dense<0.000000e+00> : vector<16x16xf32>
    %198 = tpu.matmul %195, %197, %cst_221 {dimension_numbers = #tpu.dot_dimension_numbers<[1], [0], [0], [1], [0, 0, 1, 1], [], []>} : vector<16x16xf32>, vector<16x16xf32>, vector<16x16xf32> -> vector<16x16xf32>
    %199 = arith.addf %192, %198 : vector<16x16xf32>
    %c4 = arith.constant 4 : index
    %c0_222 = arith.constant 0 : index
    %c0_223 = arith.constant 0 : index
    %200 = vector.load %arg16[%c4, %c0_222, %c0_223] : memref<7x16x16xf32, #tpu.memory_space<vmem>>, vector<1x16x16xf32>
    %201 = vector.shape_cast %200 : vector<1x16x16xf32> to vector<16x16xf32>
    %cst_224 = arith.constant dense<0.000000e+00> : vector<16x16xf32>
    %202 = tpu.matmul %201, %170, %cst_224 {dimension_numbers = #tpu.dot_dimension_numbers<[1], [0], [0], [1], [0, 0, 1, 1], [], []>} : vector<16x16xf32>, vector<16x16xf32>, vector<16x16xf32> -> vector<16x16xf32>
    %c4_225 = arith.constant 4 : index
    %c0_226 = arith.constant 0 : index
    %c0_227 = arith.constant 0 : index
    %203 = vector.load %arg17[%c4_225, %c0_226, %c0_227] : memref<7x16x16xf32, #tpu.memory_space<vmem>>, vector<1x16x16xf32>
    %204 = vector.shape_cast %203 : vector<1x16x16xf32> to vector<16x16xf32>
    %cst_228 = arith.constant dense<0.000000e+00> : vector<16x16xf32>
    %205 = tpu.matmul %202, %204, %cst_228 {dimension_numbers = #tpu.dot_dimension_numbers<[1], [0], [0], [1], [0, 0, 1, 1], [], []>} : vector<16x16xf32>, vector<16x16xf32>, vector<16x16xf32> -> vector<16x16xf32>
    %206 = arith.addf %199, %205 : vector<16x16xf32>
    %c5 = arith.constant 5 : index
    %c0_229 = arith.constant 0 : index
    %c0_230 = arith.constant 0 : index
    %207 = vector.load %arg16[%c5, %c0_229, %c0_230] : memref<7x16x16xf32, #tpu.memory_space<vmem>>, vector<1x16x16xf32>
    %208 = vector.shape_cast %207 : vector<1x16x16xf32> to vector<16x16xf32>
    %cst_231 = arith.constant dense<0.000000e+00> : vector<16x16xf32>
    %209 = tpu.matmul %208, %170, %cst_231 {dimension_numbers = #tpu.dot_dimension_numbers<[1], [0], [0], [1], [0, 0, 1, 1], [], []>} : vector<16x16xf32>, vector<16x16xf32>, vector<16x16xf32> -> vector<16x16xf32>
    %c5_232 = arith.constant 5 : index
    %c0_233 = arith.constant 0 : index
    %c0_234 = arith.constant 0 : index
    %210 = vector.load %arg17[%c5_232, %c0_233, %c0_234] : memref<7x16x16xf32, #tpu.memory_space<vmem>>, vector<1x16x16xf32>
    %211 = vector.shape_cast %210 : vector<1x16x16xf32> to vector<16x16xf32>
    %cst_235 = arith.constant dense<0.000000e+00> : vector<16x16xf32>
    %212 = tpu.matmul %209, %211, %cst_235 {dimension_numbers = #tpu.dot_dimension_numbers<[1], [0], [0], [1], [0, 0, 1, 1], [], []>} : vector<16x16xf32>, vector<16x16xf32>, vector<16x16xf32> -> vector<16x16xf32>
    %213 = arith.addf %206, %212 : vector<16x16xf32>
    %c6 = arith.constant 6 : index
    %c0_236 = arith.constant 0 : index
    %c0_237 = arith.constant 0 : index
    %214 = vector.load %arg16[%c6, %c0_236, %c0_237] : memref<7x16x16xf32, #tpu.memory_space<vmem>>, vector<1x16x16xf32>
    %215 = vector.shape_cast %214 : vector<1x16x16xf32> to vector<16x16xf32>
    %cst_238 = arith.constant dense<0.000000e+00> : vector<16x16xf32>
    %216 = tpu.matmul %215, %170, %cst_238 {dimension_numbers = #tpu.dot_dimension_numbers<[1], [0], [0], [1], [0, 0, 1, 1], [], []>} : vector<16x16xf32>, vector<16x16xf32>, vector<16x16xf32> -> vector<16x16xf32>
    %c6_239 = arith.constant 6 : index
    %c0_240 = arith.constant 0 : index
    %c0_241 = arith.constant 0 : index
    %217 = vector.load %arg17[%c6_239, %c0_240, %c0_241] : memref<7x16x16xf32, #tpu.memory_space<vmem>>, vector<1x16x16xf32>
    %218 = vector.shape_cast %217 : vector<1x16x16xf32> to vector<16x16xf32>
    %cst_242 = arith.constant dense<0.000000e+00> : vector<16x16xf32>
    %219 = tpu.matmul %216, %218, %cst_242 {dimension_numbers = #tpu.dot_dimension_numbers<[1], [0], [0], [1], [0, 0, 1, 1], [], []>} : vector<16x16xf32>, vector<16x16xf32>, vector<16x16xf32> -> vector<16x16xf32>
    %220 = arith.addf %213, %219 : vector<16x16xf32>
    %c0_243 = arith.constant 0 : index
    %c0_244 = arith.constant 0 : index
    %221 = vector.load %arg22[%c0_243, %c0_244] : memref<1x16xf32, #tpu.memory_space<vmem>>, vector<1x16xf32>
    %222 = vector.broadcast %221 : vector<1x16xf32> to vector<16x16xf32>
    %223 = arith.addf %220, %222 : vector<16x16xf32>
    %224 = arith.negf %223 : vector<16x16xf32>
    %225 = math.exp %224 : vector<16x16xf32>
    %cst_245 = arith.constant 1.000000e+00 : f32
    %226 = vector.broadcast %cst_245 : f32 to vector<16x16xf32>
    %227 = arith.addf %226, %225 : vector<16x16xf32>
    %228 = arith.divf %226, %227 : vector<16x16xf32>
    %c0_246 = arith.constant 0 : index
    %c0_247 = arith.constant 0 : index
    %229 = vector.load %arg15[%c0_246, %c0_247] : memref<16x512xf32, #tpu.memory_space<vmem>>, vector<16x512xf32>
    %cst_248 = arith.constant dense<0.000000e+00> : vector<16x512xf32>
    %230 = tpu.matmul %228, %229, %cst_248 {dimension_numbers = #tpu.dot_dimension_numbers<[1], [0], [0], [1], [0, 0, 1, 1], [], []>} : vector<16x16xf32>, vector<16x512xf32>, vector<16x512xf32> -> vector<16x512xf32>
    %231 = arith.mulf %168, %230 : vector<16x512xf32>
    %c0_249 = arith.constant 0 : index
    %c0_250 = arith.constant 0 : index
    %c0_251 = arith.constant 0 : index
    %232 = vector.load %arg23[%c0_249, %c0_250, %c0_251] : memref<1x16x512xf32, #tpu.memory_space<vmem>>, vector<1x16x512xf32>
    %233 = vector.shape_cast %232 : vector<1x16x512xf32> to vector<16x512xf32>
    %234 = vector.shape_cast %231 : vector<16x512xf32> to vector<1x16x512xf32>
    tpu.vector_store %arg23[%c0_249, %c0_250, %c0_251], %234 {strides = array<i32>} : memref<1x16x512xf32, #tpu.memory_space<vmem>>, vector<1x16x512xf32>,
    return
  }
  func.func @transform_0(%arg0: i32) -> (i32, i32, i32) {
    %c0_i32 = arith.constant 0 : i32
    %c0_i32_0 = arith.constant 0 : i32
    %c0_i32_1 = arith.constant 0 : i32
    return %arg0, %c0_i32, %c0_i32_0 : i32, i32, i32
  }
  func.func @transform_1(%arg0: i32) -> (i32, i32, i32) {
    %c0_i32 = arith.constant 0 : i32
    %c0_i32_0 = arith.constant 0 : i32
    %c0_i32_1 = arith.constant 0 : i32
    %c0_i32_2 = arith.constant 0 : i32
    return %c0_i32, %c0_i32_0, %c0_i32_1 : i32, i32, i32
  }
  func.func @transform_2(%arg0: i32) -> (i32, i32) {
    %c0_i32 = arith.constant 0 : i32
    %c0_i32_0 = arith.constant 0 : i32
    %c0_i32_1 = arith.constant 0 : i32
    return %c0_i32, %c0_i32_0 : i32, i32
  }
  func.func @transform_3(%arg0: i32) -> (i32, i32) {
    %c0_i32 = arith.constant 0 : i32
    %c0_i32_0 = arith.constant 0 : i32
    %c0_i32_1 = arith.constant 0 : i32
    return %c0_i32, %c0_i32_0 : i32, i32
  }
  func.func @transform_4(%arg0: i32) -> (i32, i32, i32) {
    %c0_i32 = arith.constant 0 : i32
    %c0_i32_0 = arith.constant 0 : i32
    %c0_i32_1 = arith.constant 0 : i32
    %c0_i32_2 = arith.constant 0 : i32
    return %c0_i32, %c0_i32_0, %c0_i32_1 : i32, i32, i32
  }
  func.func @transform_5(%arg0: i32) -> (i32, i32) {
    %c0_i32 = arith.constant 0 : i32
    %c0_i32_0 = arith.constant 0 : i32
    %c0_i32_1 = arith.constant 0 : i32
    return %c0_i32, %c0_i32_0 : i32, i32
  }
  func.func @transform_6(%arg0: i32) -> (i32, i32) {
    %c0_i32 = arith.constant 0 : i32
    %c0_i32_0 = arith.constant 0 : i32
    %c0_i32_1 = arith.constant 0 : i32
    return %c0_i32, %c0_i32_0 : i32, i32
  }
  func.func @transform_7(%arg0: i32) -> (i32, i32, i32) {
    %c0_i32 = arith.constant 0 : i32
    %c0_i32_0 = arith.constant 0 : i32
    %c0_i32_1 = arith.constant 0 : i32
    %c0_i32_2 = arith.constant 0 : i32
    return %c0_i32, %c0_i32_0, %c0_i32_1 : i32, i32, i32
  }
  func.func @transform_8(%arg0: i32) -> (i32, i32, i32, i32) {
    %c0_i32 = arith.constant 0 : i32
    %c0_i32_0 = arith.constant 0 : i32
    %c0_i32_1 = arith.constant 0 : i32
    %c0_i32_2 = arith.constant 0 : i32
    %c0_i32_3 = arith.constant 0 : i32
    return %c0_i32, %c0_i32_0, %c0_i32_1, %c0_i32_2 : i32, i32, i32, i32
  }
  func.func @transform_9(%arg0: i32) -> (i32, i32) {
    %c0_i32 = arith.constant 0 : i32
    %c0_i32_0 = arith.constant 0 : i32
    %c0_i32_1 = arith.constant 0 : i32
    return %c0_i32, %c0_i32_0 : i32, i32
  }
  func.func @transform_10(%arg0: i32) -> (i32, i32) {
    %c0_i32 = arith.constant 0 : i32
    %c0_i32_0 = arith.constant 0 : i32
    %c0_i32_1 = arith.constant 0 : i32
    return %c0_i32, %c0_i32_0 : i32, i32
  }
  func.func @transform_11(%arg0: i32) -> (i32, i32) {
    %c0_i32 = arith.constant 0 : i32
    %c0_i32_0 = arith.constant 0 : i32
    %c0_i32_1 = arith.constant 0 : i32
    return %c0_i32, %c0_i32_0 : i32, i32
  }
  func.func @transform_12(%arg0: i32) -> (i32, i32) {
    %c0_i32 = arith.constant 0 : i32
    %c0_i32_0 = arith.constant 0 : i32
    %c0_i32_1 = arith.constant 0 : i32
    return %c0_i32, %c0_i32_0 : i32, i32
  }
  func.func @transform_13(%arg0: i32) -> (i32, i32) {
    %c0_i32 = arith.constant 0 : i32
    %c0_i32_0 = arith.constant 0 : i32
    %c0_i32_1 = arith.constant 0 : i32
    return %c0_i32, %c0_i32_0 : i32, i32
  }
  func.func @transform_14(%arg0: i32) -> (i32, i32) {
    %c0_i32 = arith.constant 0 : i32
    %c0_i32_0 = arith.constant 0 : i32
    %c0_i32_1 = arith.constant 0 : i32
    return %c0_i32, %c0_i32_0 : i32, i32
  }
  func.func @transform_15(%arg0: i32) -> (i32, i32, i32) {
    %c0_i32 = arith.constant 0 : i32
    %c0_i32_0 = arith.constant 0 : i32
    %c0_i32_1 = arith.constant 0 : i32
    %c0_i32_2 = arith.constant 0 : i32
    return %c0_i32, %c0_i32_0, %c0_i32_1 : i32, i32, i32
  }
  func.func @transform_16(%arg0: i32) -> (i32, i32, i32) {
    %c0_i32 = arith.constant 0 : i32
    %c0_i32_0 = arith.constant 0 : i32
    %c0_i32_1 = arith.constant 0 : i32
    %c0_i32_2 = arith.constant 0 : i32
    return %c0_i32, %c0_i32_0, %c0_i32_1 : i32, i32, i32
  }
  func.func @transform_17(%arg0: i32) -> (i32, i32) {
    %c0_i32 = arith.constant 0 : i32
    %c0_i32_0 = arith.constant 0 : i32
    %c0_i32_1 = arith.constant 0 : i32
    return %c0_i32, %c0_i32_0 : i32, i32
  }
  func.func @transform_18(%arg0: i32) -> (i32, i32) {
    %c0_i32 = arith.constant 0 : i32
    %c0_i32_0 = arith.constant 0 : i32
    %c0_i32_1 = arith.constant 0 : i32
    return %c0_i32, %c0_i32_0 : i32, i32
  }
  func.func @transform_19(%arg0: i32) -> (i32, i32) {
    %c0_i32 = arith.constant 0 : i32
    %c0_i32_0 = arith.constant 0 : i32
    %c0_i32_1 = arith.constant 0 : i32
    return %c0_i32, %c0_i32_0 : i32, i32
  }
  func.func @transform_20(%arg0: i32) -> (i32, i32) {
    %c0_i32 = arith.constant 0 : i32
    %c0_i32_0 = arith.constant 0 : i32
    %c0_i32_1 = arith.constant 0 : i32
    return %c0_i32, %c0_i32_0 : i32, i32
  }
  func.func @transform_21(%arg0: i32) -> (i32, i32) {
    %c0_i32 = arith.constant 0 : i32
    %c0_i32_0 = arith.constant 0 : i32
    %c0_i32_1 = arith.constant 0 : i32
    return %c0_i32, %c0_i32_0 : i32, i32
  }
  func.func @transform_22(%arg0: i32) -> (i32, i32, i32) {
    %c0_i32 = arith.constant 0 : i32
    %c0_i32_0 = arith.constant 0 : i32
    %c0_i32_1 = arith.constant 0 : i32
    return %arg0, %c0_i32, %c0_i32_0 : i32, i32, i32
  }
}

</mosaic_0001>

<bundles_post_ra>
// kernel: contrast_module_forward.1
= control target key start
LH: loop header
LB: loop body
LE: loop exit
PB: predicated region body
PF: predicated region fallthrough
CT: control target
= control target key end

     0   :  { %s24531_s0 = inlined_call_operand.vmem [shape: f32[2,16,512], index: 0, kind: input, shape index: {}]   ;;  %s24532_s1 = inlined_call_operand.hbm [shape: bf16[3,512,512], index: 1, kind: input, shape index: {}]   ;;  %s24533_s2 = inlined_call_operand.hbm [shape: f32[1,512], index: 2, kind: input, shape index: {}]   ;;  %s24534_s3 = inlined_call_operand.hbm [shape: f32[1,512], index: 3, kind: input, shape index: {}]   ;;  %s24535_s4 = inlined_call_operand.hbm [shape: bf16[3,512,512], index: 4, kind: input, shape index: {}]   ;;  %s24536_s5 = inlined_call_operand.hbm [shape: f32[1,512], index: 5, kind: input, shape index: {}]   ;;  %s24537_s6 = inlined_call_operand.hbm [shape: f32[1,512], index: 6, kind: input, shape index: {}]   ;;  %s24538_s7 = inlined_call_operand.hbm [shape: bf16[3,512,512], index: 7, kind: input, shape index: {}]   ;;  %s24539_s8 = inlined_call_operand.hbm [shape: bf16[4,3,512,128], index: 8, kind: input, shape index: {}]   ;;  %s24540_s9 = inlined_call_operand.hbm [shape: f32[1,512], index: 9, kind: input, shape index: {}]   ;;  %s24541_s10 = inlined_call_operand.hbm [shape: f32[1,512], index: 10, kind: input, shape index: {}]   ;;  %s24542_s11 = inlined_call_operand.vmem [shape: f32[512,32], index: 11, kind: input, shape index: {}]   ;;  %s24543_s12 = inlined_call_operand.hbm [shape: f32[32,512], index: 12, kind: input, shape index: {}]   ;;  %s24544_s13 = inlined_call_operand.vmem [shape: f32[512,16], index: 13, kind: input, shape index: {}]   ;;  %s24545_s14 = inlined_call_operand.hbm [shape: f32[16,512], index: 14, kind: input, shape index: {}]   ;;  %s24546_s15 = inlined_call_operand.hbm [shape: f32[7,16,16], index: 15, kind: input, shape index: {}]   ;;  %s24547_s16 = inlined_call_operand.hbm [shape: f32[7,16,16], index: 16, kind: input, shape index: {}]   ;;  %s24548_s17 = inlined_call_operand.vmem [shape: f32[32,2], index: 17, kind: input, shape index: {}]   ;;  %s24549_s18 = inlined_call_operand.hbm [shape: f32[1,2], index: 18, kind: input, shape index: {}]   ;;  %s24550_s19 = inlined_call_operand.hbm [shape: f32[2,32], index: 19, kind: input, shape index: {}]   ;;  %s24551_s20 = inlined_call_operand.hbm [shape: f32[1,32], index: 20, kind: input, shape index: {}]   ;;  %s24552_s21 = inlined_call_operand.hbm [shape: f32[1,16], index: 21, kind: input, shape index: {}]   ;;  %s24553_s22 = inlined_call_operand.vmem [shape: f32[2,16,512], index: 22, kind: output, shape index: {}]  }
   0x1   :  { %24566 = sst [smem:[#allocation44_spill]] %s24531_s0 }
   0x2   :  { %24567 = sst [smem:[#allocation45_spill]] %s24532_s1 }
   0x3   :  { %24568 = sst [smem:[#allocation46_spill]] %s24533_s2 }
   0x4   :  { %24569 = sst [smem:[#allocation47_spill]] %s24534_s3 }
   0x5   :  { %24570 = sst [smem:[#allocation48_spill]] %s24535_s4 }
   0x6   :  { %24571 = sst [smem:[#allocation49_spill]] %s24536_s5 }
   0x7   :  { %24572 = sst [smem:[#allocation50_spill]] %s24537_s6 }
   0x8   :  { %24573 = sst [smem:[#allocation51_spill]] %s24553_s22 }
   0x9   :  { %27 = vsyncpa [#allocation6], 0 }
   0xa   :  { %28 = vsyncpa [#allocation8], 0 }
   0xb   :  { %29 = vsyncpa [#allocation11], 0 }
   0xc   :  { %30 = vsyncpa [#allocation14], 0 }
   0xd   :  { %31 = vsyncpa [#allocation17], 0 }
   0xe   :  { %32 = vsyncpa [#allocation20], 0 }
   0xf   :  { %33 = vsyncpa [#allocation23], 0 }
  0x10   :  { %34 = vsyncpa [#allocation26], 0 }
  0x11   :  { %35 = vsyncpa [#allocation29], 0 }
  0x12   :  { %36 = vsyncpa [#allocation32], 0  ;;  %s22736_s3 = smov 0  }
  0x13 LB: > { %24574 = sst [smem:[#allocation43_spill]] %s22590_s3  ;;  %s22592_s28 = smov [#allocation7]   ;;  %s22590_s3 = sphi %s22736_s3, %s42_s3  }
  0x14   : > { %s566_s29 = sshll.u32 %s22592_s28, 4  ;;  %s22742_s30 = sadd.s32 4294967295, %s22590_s3   ;;  %s567_s29 = int_to_ptr.vmem [resolvable:$true] %s566_s29 }
  0x15   : > { %p17097_p0 = scmp.ge.s32.totalorder %s22590_s3, 1  ;;  %p540_p1 = scmp.lt.s32.totalorder %s22590_s3, 3 }
  0x16   : > { %p24561_p2 = scmp.eq.s32.totalorder %s22742_s30, 0  ;;  %s22593_s0 = smov [#allocation10]  }
  0x17   : > { %p22747_p3 = pnand %p17097_p0, %p540_p1  ;;  %s587_s23 = sshll.u32 %s22593_s0, 4  ;;  %s22753_s23 = int_to_ptr.vmem [resolvable:$true] %s587_s23 }
  0x18   : > { %s22594_s5 = smov [#allocation13]   ;;  %s22595_s6 = smov [#allocation16]  }
  0x19   : > { %s24575_s4 = scalar_select %p22747_p3, 1, 0 }
  0x1a   : > { %p19764_p4 = pneg %p22747_p3  ;;  %s612_s24 = sshll.u32 %s22594_s5, 4  ;;  %s22761_s24 = int_to_ptr.vmem [resolvable:$true] %s612_s24 }
  0x1b   : > { %s22763_s25 = sshll.u32 %s22595_s6, 4  ;;  %s22087_s2 = scalar_lea.vmem %s567_s29, 64  ;;  %s636_s25 = int_to_ptr.vmem [resolvable:$true] %s22763_s25 }
  0x1c   : > { %p22757_p5 = pnand %p24561_p2, %p19764_p4  ;;  %p22088_p7 = scmp.ne.s32.totalorder %s567_s29, %s22087_s2 }
  0x1d   : > { %p22095_p10 = scmp.lt.s32.totalorder %s567_s29, %s567_s29  ;;  %p22096_p11 = scmp.lt.s32.totalorder %s22087_s2, %s22087_s2 }
  0x1e   : > { %p22767_p6 = pneg %p22757_p5 }
  0x1f   : > { %p22097_p12 = por %p22096_p11, %p22095_p10 }
  0x20   : > { %p22090_p8 = pnand %p22088_p7, %p22767_p6 }
  0x22   : > { %p22091_p9 = pneg %p22090_p8 }
  0x24   : > { %p22098_p13 = pnand %p22097_p12, %p22091_p9 }
  0x26   : > { %22101 = shalt.err (!%p22098_p13)
}
  0x27   : > { %s24578_s0 = sld [smem:[#allocation46_spill]]  ;;  %s22113_s5 = scalar_lea.vmem %s22753_s23, 49152 }
  0x28   : > { %p22114_p0 = scmp.ne.s32.totalorder %s22753_s23, %s22113_s5  ;;  %p22121_p7 = scmp.lt.s32.totalorder %s22753_s23, %s22753_s23 }
  0x29   : > { %p22122_p8 = scmp.lt.s32.totalorder %s22113_s5, %s22113_s5 }
  0x2a   : > { %p22116_p1 = pnand %p22114_p0, %p22767_p6 }
  0x2b   : > { %p22123_p9 = por %p22122_p8, %p22121_p7 }
  0x2c   : > { %p22117_p4 = pneg %p22116_p1 }
  0x2d   : > { %19770 = dma.hbm_to_vmem [thread:$0]  (!%p22757_p5), %s24578_s0, 64, %s567_s29, [#allocation8]  }
  0x2e   : > { %p22124_p10 = pnand %p22123_p9, %p22117_p4 }
  0x30   : > { %22127 = shalt.err (!%p22124_p10)
}
  0x31   : > { %s24555_s6 = smov 256   ;;  %s22597_s2 = smov 16  }
  0x32   : > { %s24579_s28 = sld [smem:[#allocation48_spill]]  ;;  %s22139_s0 = scalar_lea.vmem %s22761_s24, 64 }
  0x33   : > { %p22140_p11 = scmp.ne.s32.totalorder %s22761_s24, %s22139_s0  ;;  %p22147_p0 = scmp.lt.s32.totalorder %s22761_s24, %s22761_s24 }
  0x34   : > { %p22148_p1 = scmp.lt.s32.totalorder %s22139_s0, %s22139_s0 }
  0x35   : > { %p22142_p12 = pnand %p22140_p11, %p22767_p6 }
  0x36   : > { %p22149_p4 = por %p22148_p1, %p22147_p0 }
  0x37   : > { %p22143_p13 = pneg %p22142_p12 }
  0x38   : > { %19776 = dma.hbm_to_vmem [thread:$0]  (!%p22757_p5), %s24579_s28, 49152, %s22753_s23, [#allocation11], %s24555_s6, %s24555_s6, %s22597_s2  }
  0x39   : > { %p22150_p7 = pnand %p22149_p4, %p22143_p13 }
  0x3b   : > { %22153 = shalt.err (!%p22150_p7)
}
  0x3c   : > { %s24580_s22 = sld [smem:[#allocation50_spill]]  ;;  %s22165_s23 = scalar_lea.vmem %s636_s25, 49152 }
  0x3d   : > { %p22166_p8 = scmp.ne.s32.totalorder %s636_s25, %s22165_s23  ;;  %p22173_p11 = scmp.lt.s32.totalorder %s636_s25, %s636_s25 }
  0x3e   : > { %p22174_p12 = scmp.lt.s32.totalorder %s22165_s23, %s22165_s23 }
  0x3f   : > { %p22168_p9 = pnand %p22166_p8, %p22767_p6 }
  0x40   : > { %p22175_p0 = por %p22174_p12, %p22173_p11 }
  0x41   : > { %p22169_p10 = pneg %p22168_p9 }
  0x42   : > { %19782 = dma.hbm_to_vmem [thread:$0]  (!%p22757_p5), %s24580_s22, 64, %s22761_s24, [#allocation14]  }
  0x43   : > { %p22176_p13 = pnand %p22175_p0, %p22169_p10 }
  0x45   : > { %22179 = shalt.err (!%p22176_p13)
}
  0x46   : > { %s22598_s29 = smov 64   ;;  %s22599_s27 = smov 4  }
  0x47   : > { %19788 = dma.hbm_to_vmem [thread:$0]  (!%p22757_p5), %s24539_s8, 49152, %s636_s25, [#allocation17], %s22598_s29, %s22598_s29, %s22599_s27  }
  0x48   : > { %s22600_s22 = smov [#allocation19]  }
  0x49   : > { %s660_s24 = sshll.u32 %s22600_s22, 4  ;;  %s661_s24 = int_to_ptr.vmem [resolvable:$true] %s660_s24 }
  0x4a   : > { %s22191_s0 = scalar_lea.vmem %s661_s24, 64  ;;  %p22199_p8 = scmp.lt.s32.totalorder %s661_s24, %s661_s24 }
  0x4b   : > { %p22192_p1 = scmp.ne.s32.totalorder %s661_s24, %s22191_s0  ;;  %p22200_p9 = scmp.lt.s32.totalorder %s22191_s0, %s22191_s0 }
  0x4d   : > { %p22194_p4 = pnand %p22192_p1, %p22767_p6  ;;  %p22201_p10 = por %p22200_p9, %p22199_p8 }
  0x4f   : > { %p22195_p7 = pneg %p22194_p4 }
  0x51   : > { %p22202_p11 = pnand %p22201_p10, %p22195_p7 }
  0x53   : > { %22205 = shalt.err (!%p22202_p11)
}
  0x54   : > { %19794 = dma.hbm_to_vmem [thread:$0]  (!%p22757_p5), %s24541_s10, 64, %s661_s24, [#allocation20]  }
  0x55   : > { %s22601_s25 = smov [#allocation22]  }
  0x56   : > { %s689_s29 = sshll.u32 %s22601_s25, 4  ;;  %s690_s29 = int_to_ptr.vmem [resolvable:$true] %s689_s29 }
  0x57   : > { %s22217_s27 = scalar_lea.vmem %s690_s29, 1024  ;;  %p22225_p1 = scmp.lt.s32.totalorder %s690_s29, %s690_s29 }
  0x58   : > { %p22218_p12 = scmp.ne.s32.totalorder %s690_s29, %s22217_s27  ;;  %p22226_p4 = scmp.lt.s32.totalorder %s22217_s27, %s22217_s27 }
  0x5a   : > { %p22220_p0 = pnand %p22218_p12, %p22767_p6  ;;  %p22227_p8 = por %p22226_p4, %p22225_p1 }
  0x5c   : > { %p22221_p13 = pneg %p22220_p0 }
  0x5e   : > { %p22228_p7 = pnand %p22227_p8, %p22221_p13 }
  0x60   : > { %22231 = shalt.err (!%p22228_p7)
}
  0x61   : > { %s24559_s3 = smov 512   ;;  %s24560_s28 = smov 32  }
  0x62   : > { %19800 = dma.hbm_to_vmem [thread:$0]  (!%p22757_p5), %s24545_s14, 1024, %s690_s29, [#allocation23], %s24559_s3, %s24559_s3, %s24560_s28  }
  0x63   : > { %s22604_s0 = smov [#allocation25]   ;;  %s22605_s23 = smov [#allocation28]  }
  0x64   : > { %s715_s5 = sshll.u32 %s22604_s0, 4  ;;  %s743_s25 = sshll.u32 %s22605_s23, 4  ;;  %s716_s5 = int_to_ptr.vmem [resolvable:$true] %s715_s5  ;;  %s744_s25 = int_to_ptr.vmem [resolvable:$true] %s743_s25 }
  0x65   : > { %s22243_s27 = scalar_lea.vmem %s716_s5, 1792  ;;  %p22251_p12 = scmp.lt.s32.totalorder %s716_s5, %s716_s5 }
  0x66   : > { %p22244_p9 = scmp.ne.s32.totalorder %s716_s5, %s22243_s27  ;;  %p22252_p0 = scmp.lt.s32.totalorder %s22243_s27, %s22243_s27 }
  0x68   : > { %p22246_p10 = pnand %p22244_p9, %p22767_p6  ;;  %p22253_p13 = por %p22252_p0, %p22251_p12 }
  0x6a   : > { %p22247_p11 = pneg %p22246_p10 }
  0x6c   : > { %p22254_p1 = pnand %p22253_p13, %p22247_p11 }
  0x6e   : > { %22257 = shalt.err (!%p22254_p1)
}
  0x6f   : > { %s24557_s6 = smov 128   ;;  %s24558_s22 = smov 8  }
  0x70   : > { %19806 = dma.hbm_to_vmem [thread:$0]  (!%p22757_p5), %s24547_s16, 1792, %s716_s5, [#allocation26], %s24557_s6, %s24557_s6, %s24558_s22  }
  0x71   : > { %s22269_s0 = scalar_lea.vmem %s744_s25, 32  ;;  %p22277_p9 = scmp.lt.s32.totalorder %s744_s25, %s744_s25 }
  0x72   : > { %p22270_p4 = scmp.ne.s32.totalorder %s744_s25, %s22269_s0  ;;  %p22278_p10 = scmp.lt.s32.totalorder %s22269_s0, %s22269_s0 }
  0x74   : > { %p22272_p8 = pnand %p22270_p4, %p22767_p6  ;;  %p22279_p11 = por %p22278_p10, %p22277_p9 }
  0x76   : > { %p22273_p7 = pneg %p22272_p8 }
  0x78   : > { %p22280_p12 = pnand %p22279_p11, %p22273_p7 }
  0x7a   : > { %22283 = shalt.err (!%p22280_p12)
}
  0x7b   : > { %19812 = dma.hbm_to_vmem [thread:$0]  (!%p22757_p5), %s24550_s19, 32, %s744_s25, [#allocation29]  }
  0x7c   : > { %s22608_s29 = smov [#allocation5]   ;;  %s22609_s24 = smov [#allocation9]  }
  0x7d   : > { %s552_s5 = sshll.u32 %s22608_s29, 4  ;;  %s577_s6 = sshll.u32 %s22609_s24, 4  ;;  %s553_s5 = int_to_ptr.vmem [resolvable:$true] %s552_s5  ;;  %s578_s6 = int_to_ptr.vmem [resolvable:$true] %s577_s6 }
  0x7e   : > { %s22295_s22 = scalar_lea.vmem %s553_s5, 49152  ;;  %p22303_p4 = scmp.lt.s32.totalorder %s553_s5, %s553_s5 }
  0x7f   : > { %p22296_p0 = scmp.ne.s32.totalorder %s553_s5, %s22295_s22  ;;  %p22304_p8 = scmp.lt.s32.totalorder %s22295_s22, %s22295_s22 }
  0x81   : > { %p22298_p13 = pnand %p22296_p0, %p22767_p6  ;;  %p22305_p7 = por %p22304_p8, %p22303_p4 }
  0x83   : > { %p22299_p1 = pneg %p22298_p13 }
  0x85   : > { %p22306_p9 = pnand %p22305_p7, %p22299_p1 }
  0x87   : > { %22309 = shalt.err (!%p22306_p9)
}
  0x88   : > { %s24581_s0 = smov 256   ;;  %s24582_s27 = sld [smem:[#allocation45_spill]] }
  0x89   : > { %s22321_s29 = scalar_lea.vmem %s578_s6, 64  ;;  %p22329_p0 = scmp.lt.s32.totalorder %s578_s6, %s578_s6 }
  0x8a   : > { %p22322_p10 = scmp.ne.s32.totalorder %s578_s6, %s22321_s29  ;;  %p22330_p13 = scmp.lt.s32.totalorder %s22321_s29, %s22321_s29 }
  0x8c   : > { %p22324_p11 = pnand %p22322_p10, %p22767_p6  ;;  %p22331_p1 = por %p22330_p13, %p22329_p0 }
  0x8e   : > { %19767 = dma.hbm_to_vmem [thread:$0]  (!%p22757_p5), %s24582_s27, 49152, %s553_s5, [#allocation6], %s24581_s0, %s24581_s0, %s22597_s2  }
  0x8f   : > { %p22325_p12 = pneg %p22324_p11 }
  0x91   : > { %p22332_p4 = pnand %p22331_p1, %p22325_p12 }
  0x93   : > { %22335 = shalt.err (!%p22332_p4)
}
  0x94   : > { %s24583_s3 = sld [smem:[#allocation47_spill]]  ;;  %s22610_s25 = smov [#allocation12]  }
  0x95   : > { %s601_s5 = sshll.u32 %s22610_s25, 4  ;;  %s22611_s23 = smov [#allocation15]   ;;  %s602_s5 = int_to_ptr.vmem [resolvable:$true] %s601_s5 }
  0x96   : > { %s622_s27 = sshll.u32 %s22611_s23, 4  ;;  %s22347_s28 = scalar_lea.vmem %s602_s5, 64  ;;  %s623_s27 = int_to_ptr.vmem [resolvable:$true] %s622_s27 }
  0x97   : > { %p22348_p8 = scmp.ne.s32.totalorder %s602_s5, %s22347_s28  ;;  %p22355_p10 = scmp.lt.s32.totalorder %s602_s5, %s602_s5 }
  0x98   : > { %p22356_p11 = scmp.lt.s32.totalorder %s22347_s28, %s22347_s28 }
  0x99   : > { %p22350_p7 = pnand %p22348_p8, %p22767_p6 }
  0x9a   : > { %19773 = dma.hbm_to_vmem [thread:$0]  (!%p22757_p5), %s24583_s3, 64, %s578_s6, [#allocation8]  }
  0x9b   : > { %p22351_p9 = pneg %p22350_p7  ;;  %p22357_p12 = por %p22356_p11, %p22355_p10 }
  0x9d   : > { %p22358_p0 = pnand %p22357_p12, %p22351_p9 }
  0x9f   : > { %22361 = shalt.err (!%p22358_p0)
}
  0xa0   : > { %s24584_s6 = sld [smem:[#allocation49_spill]]  ;;  %s22373_s3 = scalar_lea.vmem %s623_s27, 49152 }
  0xa1   : > { %p22374_p13 = scmp.ne.s32.totalorder %s623_s27, %s22373_s3  ;;  %p22381_p8 = scmp.lt.s32.totalorder %s623_s27, %s623_s27 }
  0xa2   : > { %p22382_p7 = scmp.lt.s32.totalorder %s22373_s3, %s22373_s3 }
  0xa3   : > { %p22376_p1 = pnand %p22374_p13, %p22767_p6 }
  0xa4   : > { %p22383_p2 = por %p22382_p7, %p22381_p8 }
  0xa5   : > { %p22377_p4 = pneg %p22376_p1 }
  0xa6   : > { %19779 = dma.hbm_to_vmem [thread:$0]  (!%p22757_p5), %s24584_s6, 64, %s602_s5, [#allocation11]  }
  0xa7   : > { %p22384_p3 = pnand %p22383_p2, %p22377_p4 }
  0xa9   : > { %22387 = shalt.err (!%p22384_p3)
}
  0xaa   : > { %19785 = dma.hbm_to_vmem [thread:$0]  (!%p22757_p5), %s24538_s7, 49152, %s623_s27, [#allocation14], %s24581_s0, %s24581_s0, %s22597_s2  }
  0xab   : > { %s22612_s25 = smov [#allocation18]   ;;  %s22613_s23 = smov [#allocation21]  }
  0xac   : > { %s649_s5 = sshll.u32 %s22612_s25, 4  ;;  %s673_s29 = sshll.u32 %s22613_s23, 4  ;;  %s650_s5 = int_to_ptr.vmem [resolvable:$true] %s649_s5  ;;  %s674_s29 = int_to_ptr.vmem [resolvable:$true] %s673_s29 }
  0xad   : > { %s22399_s22 = scalar_lea.vmem %s650_s5, 64  ;;  %p22407_p10 = scmp.lt.s32.totalorder %s650_s5, %s650_s5 }
  0xae   : > { %p22400_p9 = scmp.ne.s32.totalorder %s650_s5, %s22399_s22  ;;  %p22408_p11 = scmp.lt.s32.totalorder %s22399_s22, %s22399_s22 }
  0xb0   : > { %p22402_p2 = pnand %p22400_p9, %p22767_p6  ;;  %p22409_p12 = por %p22408_p11, %p22407_p10 }
  0xb2   : > { %p22403_p3 = pneg %p22402_p2 }
  0xb4   : > { %p22410_p0 = pnand %p22409_p12, %p22403_p3 }
  0xb6   : > { %22413 = shalt.err (!%p22410_p0)
}
  0xb7   : > { %19791 = dma.hbm_to_vmem [thread:$0]  (!%p22757_p5), %s24540_s9, 64, %s650_s5, [#allocation17]  }
  0xb8   : > { %s22425_s2 = scalar_lea.vmem %s674_s29, 2048  ;;  %p22433_p8 = scmp.lt.s32.totalorder %s674_s29, %s674_s29 }
  0xb9   : > { %p22426_p13 = scmp.ne.s32.totalorder %s674_s29, %s22425_s2  ;;  %p22434_p7 = scmp.lt.s32.totalorder %s22425_s2, %s22425_s2 }
  0xbb   : > { %p22428_p1 = pnand %p22426_p13, %p22767_p6  ;;  %p22435_p9 = por %p22434_p7, %p22433_p8 }
  0xbd   : > { %p22429_p4 = pneg %p22428_p1 }
  0xbf   : > { %p22436_p2 = pnand %p22435_p9, %p22429_p4 }
  0xc1   : > { %22439 = shalt.err (!%p22436_p2)
}
  0xc2   : > { %s24585_s0 = smov 32   ;;  %s24586_s27 = smov 512  }
  0xc3   : > { %19797 = dma.hbm_to_vmem [thread:$0]  (!%p22757_p5), %s24543_s12, 2048, %s674_s29, [#allocation20], %s24586_s27, %s24586_s27, %s24585_s0  }
  0xc4   : > { %s22614_s25 = smov [#allocation24]   ;;  %s22615_s23 = smov [#allocation27]  }
  0xc5   : > { %s702_s5 = sshll.u32 %s22614_s25, 4  ;;  %s732_s22 = sshll.u32 %s22615_s23, 4  ;;  %s703_s5 = int_to_ptr.vmem [resolvable:$true] %s702_s5  ;;  %s733_s22 = int_to_ptr.vmem [resolvable:$true] %s732_s22 }
  0xc6   : > { %s22451_s6 = scalar_lea.vmem %s703_s5, 1792  ;;  %p22459_p12 = scmp.lt.s32.totalorder %s703_s5, %s703_s5 }
  0xc7   : > { %p22452_p3 = scmp.ne.s32.totalorder %s703_s5, %s22451_s6  ;;  %p22460_p0 = scmp.lt.s32.totalorder %s22451_s6, %s22451_s6 }
  0xc9   : > { %p22454_p10 = pnand %p22452_p3, %p22767_p6  ;;  %p22461_p13 = por %p22460_p0, %p22459_p12 }
  0xcb   : > { %p22455_p11 = pneg %p22454_p10 }
  0xcd   : > { %p22462_p1 = pnand %p22461_p13, %p22455_p11 }
  0xcf   : > { %22465 = shalt.err (!%p22462_p1)
}
  0xd0   : > { %s24587_s3 = smov 8   ;;  %s24588_s2 = smov 128  }
  0xd1   : > { %19803 = dma.hbm_to_vmem [thread:$0]  (!%p22757_p5), %s24546_s15, 1792, %s703_s5, [#allocation23], %s24588_s2, %s24588_s2, %s24587_s3  }
  0xd2   : > { %s22477_s27 = scalar_lea.vmem %s733_s22, 16  ;;  %s22484_s28 = scalar_lea.vmem %s733_s22, 32 }
  0xd3   : > { %p22478_p4 = scmp.ne.s32.totalorder %s733_s22, %s22477_s27  ;;  %p22485_p9 = scmp.lt.s32.totalorder %s733_s22, %s733_s22 }
  0xd4   : > { %p22486_p2 = scmp.lt.s32.totalorder %s22484_s28, %s22477_s27 }
  0xd5   : > { %p22480_p8 = pnand %p22478_p4, %p22767_p6 }
  0xd6   : > { %p22487_p3 = por %p22486_p2, %p22485_p9 }
  0xd7   : > { %p22481_p7 = pneg %p22480_p8 }
  0xd9   : > { %p22488_p10 = pnand %p22487_p3, %p22481_p7 }
  0xdb   : > { %22491 = shalt.err (!%p22488_p10)
}
  0xdc   : > { %19809 = dma.hbm_to_vmem [thread:$0]  (!%p22757_p5), %s24549_s18, 16, %s733_s22, [#allocation26]  }
  0xdd   : > { %s22616_s5 = smov [#allocation30]   ;;  %s22617_s6 = smov [#allocation31]  }
  0xde   : > { %s754_s23 = sshll.u32 %s22616_s5, 4  ;;  %s765_s3 = sshll.u32 %s22617_s6, 4  ;;  %s755_s23 = int_to_ptr.vmem [resolvable:$true] %s754_s23  ;;  %s766_s3 = int_to_ptr.vmem [resolvable:$true] %s765_s3 }
  0xdf   : > { %s22503_s2 = scalar_lea.vmem %s755_s23, 16  ;;  %s22510_s29 = scalar_lea.vmem %s755_s23, 32 }
  0xe0   : > { %p22504_p11 = scmp.ne.s32.totalorder %s755_s23, %s22503_s2  ;;  %p22511_p13 = scmp.lt.s32.totalorder %s755_s23, %s755_s23 }
  0xe1   : > { %p22512_p1 = scmp.lt.s32.totalorder %s22510_s29, %s22503_s2 }
  0xe2   : > { %p22506_p12 = pnand %p22504_p11, %p22767_p6 }
  0xe3   : > { %p22513_p4 = por %p22512_p1, %p22511_p13 }
  0xe4   : > { %p22507_p0 = pneg %p22506_p12 }
  0xe6   : > { %p22514_p8 = pnand %p22513_p4, %p22507_p0 }
  0xe8   : > { %22517 = shalt.err (!%p22514_p8)
}
  0xe9   : > { %19815 = dma.hbm_to_vmem [thread:$0]  (!%p22757_p5), %s24551_s20, 16, %s755_s23, [#allocation29]  }
  0xea   : > { %s22529_s27 = scalar_lea.vmem %s766_s3, 16  ;;  %s22536_s28 = scalar_lea.vmem %s766_s3, 32 }
  0xeb   : > { %p22530_p7 = scmp.ne.s32.totalorder %s766_s3, %s22529_s27  ;;  %p22537_p3 = scmp.lt.s32.totalorder %s766_s3, %s766_s3 }
  0xec   : > { %p22538_p10 = scmp.lt.s32.totalorder %s22536_s28, %s22529_s27 }
  0xed   : > { %p22532_p9 = pnand %p22530_p7, %p22767_p6 }
  0xee   : > { %p22539_p11 = por %p22538_p10, %p22537_p3 }
  0xef   : > { %p22533_p2 = pneg %p22532_p9 }
  0xf1   : > { %p22540_p12 = pnand %p22539_p11, %p22533_p2 }
  0xf3   : > { %22543 = shalt.err (!%p22540_p12)
}
  0xf4   : > { %19818 = dma.hbm_to_vmem [thread:$0]  (!%p22757_p5), %s24552_s21, 16, %s766_s3, [#allocation32]  }
  0xf5   : > { %p24589_p0 = scmp.ne.s32.totalorder %s24575_s4, 0 }
  0xf6   : > { %p24590_p13 = scmp.eq.s32.totalorder (!%p24589_p0), %s22742_s30, 0 }
  0xf7   : > { %786 = sbr.rel (%p24589_p0) target bundleno = 4245 (0x1095), region = 108 }
  0xfc   : > { %22549 = dma.done.wait (%p24590_p13), [#allocation6], 49152   ;;  %p24591_p6 = pmov %p24590_p13 }
  0xfe   : > { %22551 = vsyncadd (%p24591_p6), [#allocation6], 4294918144  ;;  %p24592_p1 = pmov %p24591_p6 }
 0x100   : > { %22553 = dma.done.wait (%p24592_p1), [#allocation8], 128   ;;  %p24593_p4 = pmov %p24592_p1 }
 0x101   : > { %p24594_p8 = pmov %p24592_p1 }
 0x102   : > { %22555 = vsyncadd (%p24593_p4), [#allocation8], 4294967168 }
 0x103   : > { %22557 = dma.done.wait (%p24594_p8), [#allocation11], 49216   ;;  %p24595_p5 = pmov %p24592_p1 }
 0x104   : > { %p24596_p7 = pmov %p24592_p1 }
 0x105   : > { %22559 = vsyncadd (%p24595_p5), [#allocation11], 4294918080 }
 0x106   : > { %22561 = dma.done.wait (%p24596_p7), [#allocation14], 49216   ;;  %p24597_p9 = pmov %p24592_p1 }
 0x107   : > { %p24598_p2 = pmov %p24592_p1 }
 0x108   : > { %22563 = vsyncadd (%p24597_p9), [#allocation14], 4294918080 }
 0x109   : > { %22565 = dma.done.wait (%p24598_p2), [#allocation17], 49216   ;;  %p24599_p3 = pmov %p24592_p1 }
 0x10a   : > { %p24600_p10 = pmov %p24592_p1 }
 0x10b   : > { %22567 = vsyncadd (%p24599_p3), [#allocation17], 4294918080 }
 0x10c   : > { %22569 = dma.done.wait (%p24600_p10), [#allocation20], 2112   ;;  %p24601_p11 = pmov %p24592_p1 }
 0x10d   : > { %p24602_p12 = pmov %p24592_p1 }
 0x10e   : > { %22571 = vsyncadd (%p24601_p11), [#allocation20], 4294965184 }
 0x10f   : > { %22573 = dma.done.wait (%p24602_p12), [#allocation23], 2816   ;;  %p24603_p0 = pmov %p24592_p1 }
 0x111   : > { %22575 = vsyncadd (%p24603_p0), [#allocation23], 4294964480  ;;  %p24604_p13 = pmov %p24603_p0 }
 0x112   : > { %p24605_p6 = pmov %p24603_p0 }
 0x113   : > { %22577 = dma.done.wait (%p24604_p13), [#allocation26], 1808  }
 0x114   : > { %22579 = vsyncadd (%p24605_p6), [#allocation26], 4294965488  ;;  %p24606_p1 = pmov %p24603_p0 }
 0x115   : > { %p24607_p4 = pmov %p24603_p0 }
 0x116   : > { %22581 = dma.done.wait (%p24606_p1), [#allocation29], 48  }
 0x117   : > { %22583 = vsyncadd (%p24607_p4), [#allocation29], 4294967248  ;;  %p24608_p8 = pmov %p24603_p0 }
 0x118   : > { %p24609_p5 = pmov %p24603_p0 }
 0x119   : > { %22585 = dma.done.wait (%p24608_p8), [#allocation32], 16  }
 0x11a   : > { %22587 = vsyncadd (%p24609_p5), [#allocation32], 4294967280  ;;  %v19892_v0 = vld [vmem:[#allocation5 + $0x4e4] ss:$16 sps:$4 sm:$0xff]   ;;  %v19896_v2 = vld [vmem:[#allocation5 + $0x4e0] ss:$16 sps:$4 sm:$0xff]  }
 0x11b   : > { %v19894_v1 = vld [vmem:[#allocation5 + $0x6e4] ss:$16 sps:$4 sm:$0xff]   ;;  %2022 = vmatprep.subr.bf16.mxu0 %v19892_v0  ;;  %v19897_v3 = vld [vmem:[#allocation5 + $0x6e0] ss:$16 sps:$4 sm:$0xff]   ;;  %vm928_vm0 = vsmask.f32 256 }
 0x11c   : > { %2065 = vmatprep.subr.bf16.mxu1 %v19894_v1  ;;  %v19898_v4 = vld [vmem:[#allocation5 + $0x4c4] ss:$16 sps:$4 sm:$0xff]   ;;  %2023 = vmatpush1.bf16.msra.mxu0 %v19896_v2  ;;  %v19902_v6 = vld [vmem:[#allocation5 + $0x4c0] ss:$16 sps:$4 sm:$0xff]   ;;  %vm927_vm1 = vcmask 1040384   ;;  %vm930_vm5 = vcmask 1044484  }
 0x11d   : > { %2066 = vmatpush1.bf16.msra.mxu1 %v19897_v3  ;;  %v19900_v5 = vld [vmem:[#allocation5 + $0x6c4] ss:$16 sps:$4 sm:$0xff]   ;;  %2024 = vmatprep.subr.bf16.mxu0 %v19898_v4  ;;  %v19903_v7 = vld [vmem:[#allocation5 + $0x6c0] ss:$16 sps:$4 sm:$0xff]   ;;  %vm931_vm2 = vsmask.f32 4352  ;;  %vm22973_vm3 = vmand %vm927_vm1, %vm928_vm0 }
 0x11e   : > { %2067 = vmatprep.subr.bf16.mxu1 %v19900_v5  ;;  %v19904_v8 = vld [vmem:[#allocation5 + $0x4a4] ss:$16 sps:$4 sm:$0xff]   ;;  %v19908_v10 = vld [vmem:[#allocation5 + $0x4a0] ss:$16 sps:$4 sm:$0xff]   ;;  %vm940_vm4 = vsmask.f32 7938  ;;  %vm22979_vm6 = vmand %vm930_vm5, %vm931_vm2 }
 0x11f   : > { %v19906_v9 = vld [vmem:[#allocation5 + $0x6a4] ss:$16 sps:$4 sm:$0xff]   ;;  %v19909_v11 = vld [vmem:[#allocation5 + $0x6a0] ss:$16 sps:$4 sm:$0xff]   ;;  %p916_p7 = scmp.lt.s32.totalorder %s22742_s30, 1  ;;  %vm22985_vm7 = vmand %vm927_vm1, %vm940_vm4  ;;  %s24620_s5 = sld [smem:[#allocation44_spill]] }
 0x120   : > { %2025 = vmatpush1.bf16.msra.mxu0 %v19902_v6  ;;  %v19910_v12 = vld [vmem:[#allocation5 + $0x484] ss:$16 sps:$4 sm:$0xff]   ;;  %v19914_v14 = vld [vmem:[#allocation5 + $0x480] ss:$16 sps:$4 sm:$0xff]   ;;  %vm942_vm8 = vsmask.f32 7954  ;;  %vm23002_vm10 = vmor %vm22979_vm6, %vm22973_vm3 }
 0x121   : > { %2068 = vmatpush1.bf16.msra.mxu1 %v19903_v7  ;;  %2026 = vmatprep.subr.bf16.mxu0 %v19904_v8  ;;  %v19912_v13 = vld [vmem:[#allocation5 + $0x684] ss:$16 sps:$4 sm:$0xff]   ;;  %v19915_v15 = vld [vmem:[#allocation5 + $0x680] ss:$16 sps:$4 sm:$0xff]   ;;  %s24635_s30 = smov (!%p916_p7, %s22742_s30), 1  ;;  %vm22993_vm9 = vmand %vm930_vm5, %vm942_vm8  ;;  %vm1021_vm12 = vcmask 1043456  }
 0x122   : > { %2069 = vmatprep.subr.bf16.mxu1 %v19906_v9  ;;  %v19916_v16 = vld [vmem:[#allocation5 + $0x464] ss:$16 sps:$4 sm:$0xff]   ;;  %v19920_v18 = vld [vmem:[#allocation5 + $0x460] ss:$16 sps:$4 sm:$0xff]   ;;  %s18827_s4 = sshll.u32 %s24635_s30, 6  ;;  %vm944_vm11 = vmor %vm22993_vm9, %vm22985_vm7  ;;  %vm1023_vm13 = vcmask 1047556  }
 0x123   : > { %v19918_v17 = vld [vmem:[#allocation5 + $0x664] ss:$16 sps:$4 sm:$0xff]   ;;  %v19921_v19 = vld [vmem:[#allocation5 + $0x660] ss:$16 sps:$4 sm:$0xff]   ;;  %v934_v53 = vld [vmem:[#allocation2 + $0x18] sm:$0x11] }
 0x124   : > { %2027 = vmatpush1.bf16.msra.mxu0 %v19908_v10  ;;  %v19922_v20 = vld [vmem:[#allocation5 + $0x444] ss:$16 sps:$4 sm:$0xff]   ;;  %v19926_v22 = vld [vmem:[#allocation5 + $0x440] ss:$16 sps:$4 sm:$0xff]   ;;  %v935_v55 = vsel %vm23002_vm10, 0, %v934_v53  ;;  %vm23030_vm15 = vmand %vm1021_vm12, %vm940_vm4  ;;  %vm3151_vm5 = vcmask 1046528  }
 0x125   : > { %2070 = vmatpush1.bf16.msra.mxu1 %v19909_v11  ;;  %2028 = vmatprep.subr.bf16.mxu0 %v19910_v12  ;;  %v19924_v21 = vld [vmem:[#allocation5 + $0x644] ss:$16 sps:$4 sm:$0xff]   ;;  %v19927_v23 = vld [vmem:[#allocation5 + $0x640] ss:$16 sps:$4 sm:$0xff]   ;;  %s23015_s23 = scalar_lea.vmem %s24620_s5, %s18827_s4  ;;  %v945_v56 = vld [vmem:[#allocation2 + $0x8] sm:$0x11] }
 0x126   : > { %2071 = vmatprep.subr.bf16.mxu1 %v19912_v13  ;;  %v19928_v24 = vld [vmem:[#allocation5 + $0x424] ss:$16 sps:$4 sm:$0xff]   ;;  %v19932_v26 = vld [vmem:[#allocation5 + $0x420] ss:$16 sps:$4 sm:$0xff]   ;;  %v952_v58 = vld [vmem:[%s23015_s23 + $0x8] sm:$0xff]  ;;  %v946_v60 = vsel %vm944_vm11, 0, %v945_v56 }
 0x127   : > { %v19930_v25 = vld [vmem:[#allocation5 + $0x624] ss:$16 sps:$4 sm:$0xff]   ;;  %v19933_v27 = vld [vmem:[#allocation5 + $0x620] ss:$16 sps:$4 sm:$0xff]   ;;  %936 = vst [vmem:[#allocation2 + $0x18] sm:$0x11] %v935_v55  ;;  %vm23036_vm1 = vmand %vm1023_vm13, %vm942_vm8 }
 0x128   : > { %2029 = vmatpush1.bf16.msra.mxu0 %v19914_v14  ;;  %v19934_v28 = vld [vmem:[#allocation5 + $0x404] ss:$16 sps:$4 sm:$0xff]   ;;  %v19938_v30 = vld [vmem:[#allocation5 + $0x400] ss:$16 sps:$4 sm:$0xff]   ;;  %v956_v62 = vld [vmem:[%s23015_s23 + $0x28] sm:$0xff]  ;;  %vm10620_vm6 = vcmask 1044480  }
 0x129   : > { %2072 = vmatpush1.bf16.msra.mxu1 %v19915_v15  ;;  %2030 = vmatprep.subr.bf16.mxu0 %v19916_v16  ;;  %v19936_v29 = vld [vmem:[#allocation5 + $0x604] ss:$16 sps:$4 sm:$0xff]   ;;  %v19939_v32 = vld [vmem:[#allocation5 + $0x600] ss:$16 sps:$4 sm:$0xff]   ;;  %947 = vst [vmem:[#allocation2 + $0x8] sm:$0x11] %v946_v60  ;;  %vm23055_vm3 = vmor %vm23036_vm1, %vm23030_vm15 }
 0x12a   : > { %2073 = vmatprep.subr.bf16.mxu1 %v19918_v17  ;;  %v19940_v33 = vld [vmem:[#allocation5 + $0x5e4] ss:$16 sps:$4 sm:$0xff]   ;;  %v19944_v36 = vld [vmem:[#allocation5 + $0x5e0] ss:$16 sps:$4 sm:$0xff]   ;;  %vm979_vm14 = vsmask.f32 4368 }
 0x12b   : > { %v19942_v34 = vld [vmem:[#allocation5 + $0x7e4] ss:$16 sps:$4 sm:$0xff]   ;;  %v19945_v37 = vld [vmem:[#allocation5 + $0x7e0] ss:$16 sps:$4 sm:$0xff]   ;;  %v954_v11 = vld [vmem:[%s23015_s23 + $0x18] sm:$0xff]  ;;  %vm22620_vm7 = vmmov 0  }
 0x12c   : > { %2031 = vmatpush1.bf16.msra.mxu0 %v19920_v18  ;;  %v19946_v39 = vld [vmem:[#allocation5 + $0x5c4] ss:$16 sps:$4 sm:$0xff]   ;;  %v19950_v42 = vld [vmem:[#allocation5 + $0x5c0] ss:$16 sps:$4 sm:$0xff]   ;;  %v958_v16 = vld [vmem:[%s23015_s23 + $0x38] sm:$0xff]  ;;  %vm14916_vm8 = vcmask 261120  }
 0x12d   : > { %2074 = vmatpush1.bf16.msra.mxu1 %v19921_v19  ;;  %2032 = vmatprep.subr.bf16.mxu0 %v19922_v20  ;;  %v19948_v40 = vld [vmem:[#allocation5 + $0x7c4] ss:$16 sps:$4 sm:$0xff]   ;;  %v19951_v43 = vld [vmem:[#allocation5 + $0x7c0] ss:$16 sps:$4 sm:$0xff]   ;;  %vm23061_vm4 = vmor %vm928_vm0, %vm979_vm14  ;;  %vm1329_vm0 = vsmask.f32 7424 }
 0x12e   : > { %2075 = vmatprep.subr.bf16.mxu1 %v19924_v21  ;;  %v19952_v44 = vld [vmem:[#allocation5 + $0x5a4] ss:$16 sps:$4 sm:$0xff]   ;;  %v19956_v47 = vld [vmem:[#allocation5 + $0x5a0] ss:$16 sps:$4 sm:$0xff]   ;;  %v1026_v35 = vld [vmem:[#allocation2 + $0x18] sm:$0xff]  ;;  %vm14997_vm9 = vcmask 1041408  }
 0x12f   : > { %v19954_v45 = vld [vmem:[#allocation5 + $0x7a4] ss:$16 sps:$4 sm:$0xff]   ;;  %v19957_v48 = vld [vmem:[#allocation5 + $0x7a0] ss:$16 sps:$4 sm:$0xff]   ;;  %s24632_s6 = sld [smem:[#allocation51_spill]] }
 0x130   : > { %2033 = vmatpush1.bf16.msra.mxu0 %v19926_v22  ;;  %v19958_v49 = vld [vmem:[#allocation5 + $0x584] ss:$16 sps:$4 sm:$0xff]   ;;  %v19962_v51 = vld [vmem:[#allocation5 + $0x580] ss:$16 sps:$4 sm:$0xff]  }
 0x131   : > { %2076 = vmatpush1.bf16.msra.mxu1 %v19927_v23  ;;  %2034 = vmatprep.subr.bf16.mxu0 %v19928_v24  ;;  %v19960_v50 = vld [vmem:[#allocation5 + $0x784] ss:$16 sps:$4 sm:$0xff]   ;;  %v19963_v52 = vld [vmem:[#allocation5 + $0x780] ss:$16 sps:$4 sm:$0xff]  }
 0x132   : > { %2077 = vmatprep.subr.bf16.mxu1 %v19930_v25  ;;  %v19964_v54 = vld [vmem:[#allocation5 + $0x564] ss:$16 sps:$4 sm:$0xff]   ;;  %v19968_v4 = vld [vmem:[#allocation5 + $0x560] ss:$16 sps:$4 sm:$0xff]  }
 0x133   : > { %v951_v57 = vld [vmem:[%s23015_s23] sm:$0xff]  ;;  %v953_v10 = vld [vmem:[%s23015_s23 + $0x10] sm:$0xff] }
 0x134   : > { %2035 = vmatpush1.bf16.msra.mxu0 %v19932_v26  ;;  %v19966_v59 = vld [vmem:[#allocation5 + $0x764] ss:$16 sps:$4 sm:$0xff]   ;;  %v18829_v63 = vpack.c.bf16 %v952_v58, %v951_v57  ;;  %v19969_v12 = vld [vmem:[#allocation5 + $0x760] ss:$16 sps:$4 sm:$0xff]   ;;  %v18830_v17 = vpack.c.bf16 %v954_v11, %v953_v10  ;;  %v19997_v10 = vld [vmem:[#allocation5 + $0x6ec] ss:$16 sps:$4 sm:$0xff]  }
 0x135   : > { %2078 = vmatpush1.bf16.msra.mxu1 %v19933_v27  ;;  %2036 = vmatprep.subr.bf16.mxu0 %v19934_v28  ;;  %v955_v61 = vld [vmem:[%s23015_s23 + $0x20] sm:$0xff]  ;;  %v957_v15 = vld [vmem:[%s23015_s23 + $0x30] sm:$0xff]  ;;  %s925_s3 = scalar_lea.vmem %s24632_s6, %s18827_s4 }
 0x136   : > { %2079 = vmatprep.subr.bf16.mxu1 %v19936_v29  ;;  %v18831_v0 = vpack.c.bf16 %v956_v62, %v955_v61  ;;  %v937_v2 = vld [vmem:[#allocation2 + $0x20] sm:$0x11]  ;;  %v982_v5 = vshrl.u32 %v18829_v63, 16  ;;  %v985_v6 = vshll.u32 %v18829_v63, 16  ;;  %v18832_v20 = vpack.c.bf16 %v958_v16, %v957_v15 }
 0x137   : > { %v948_v3 = vld [vmem:[#allocation2] sm:$0x11]  ;;  %v938_v8 = vsel %vm23002_vm10, 0, %v937_v2  ;;  %v989_v24 = vshrl.u32 %v18830_v17, 16  ;;  %v992_v25 = vshll.u32 %v18830_v17, 16 }
 0x138   : > { %2037 = vmatpush1.bf16.msra.mxu0 %v19938_v30  ;;  %v949_v9 = vsel %vm944_vm11, 0, %v948_v3  ;;  %v997_v13 = vshrl.u32 %v18831_v0, 16  ;;  %v1000_v14 = vshll.u32 %v18831_v0, 16  ;;  %939 = vst [vmem:[#allocation2 + $0x20] sm:$0x11] %v938_v8  ;;  %v984_v19 = vrot.slane %v982_v5, 7 }
 0x139   : > { %2080 = vmatpush1.bf16.msra.mxu1 %v19939_v32  ;;  %2038 = vmatprep.subr.bf16.mxu0 %v19940_v33  ;;  %950 = vst [vmem:[#allocation2] sm:$0x11] %v949_v9  ;;  %v19970_v18 = vld [vmem:[#allocation5 + $0x544] ss:$16 sps:$4 sm:$0xff]   ;;  %v19974_v26 = vld [vmem:[#allocation5 + $0x540] ss:$16 sps:$4 sm:$0xff]  }
 0x13a   : > { %2081 = vmatprep.subr.bf16.mxu1 %v19942_v34  ;;  %v19972_v21 = vld [vmem:[#allocation5 + $0x744] ss:$16 sps:$4 sm:$0xff]   ;;  %v999_v22 = vrot.slane %v997_v13, 7  ;;  %v987_v28 = vor.u32 %v985_v6, %v984_v19  ;;  %v995_v29 = vrot.slane %v984_v19, 4  ;;  %v1006_v30 = vshrl.u32 %v18832_v20, 16 }
 0x13b   : > { %v1009_v31 = vshll.u32 %v18832_v20, 16  ;;  %v19975_v32 = vld [vmem:[#allocation5 + $0x740] ss:$16 sps:$4 sm:$0xff]   ;;  %v19978_v41 = vld [vmem:[#allocation5 + $0x724] ss:$16 sps:$4 sm:$0xff]   ;;  %vm15478_vm11 = vcmask 130048  }
 0x13c   : > { %2039 = vmatpush2.bf16.msra.mxu0 %v19944_v36  ;;  %v1002_v33 = vor.u32 %v1000_v14, %v999_v22  ;;  %v1013_v34 = vrot.slane %v999_v22, 4  ;;  %v991_v36 = vrot.slane %v989_v24, 7  ;;  %v1027_v38 = vsel %vm23055_vm3, %v987_v28, %v1026_v35  ;;  %v19980_v53 = vld [vmem:[#allocation5 + $0x520] ss:$16 sps:$4 sm:$0xff]   ;;  %v19982_v56 = vld [vmem:[#allocation5 + $0x504] ss:$16 sps:$4 sm:$0xff]  }
 0x13d   : > { %2082 = vmatpush2.bf16.msra.mxu1 %v19945_v37  ;;  %2040 = vmatprep.subr.bf16.mxu0 %v19946_v39  ;;  %v19976_v37 = vld [vmem:[#allocation5 + $0x524] ss:$16 sps:$4 sm:$0xff]   ;;  %v1034_v39 = vld [vmem:[#allocation2 + $0x8] sm:$0x11]  ;;  %1028 = vst [vmem:[#allocation2 + $0x18] sm:$0xff] %v1027_v38 }
 0x13e   : > { %2083 = vmatprep.subr.bf16.mxu1 %v19948_v40  ;;  %v1008_v40 = vrot.slane %v1006_v30, 7  ;;  %v19981_v55 = vld [vmem:[#allocation5 + $0x720] ss:$16 sps:$4 sm:$0xff]   ;;  %v19984_v60 = vld [vmem:[#allocation5 + $0x704] ss:$16 sps:$4 sm:$0xff]  }
 0x13f   : > { %v19986_v0 = vld [vmem:[#allocation5 + $0x500] ss:$16 sps:$4 sm:$0xff]   ;;  %v20000_v35 = vld [vmem:[#allocation5 + $0x4cc] ss:$16 sps:$4 sm:$0xff]   ;;  %v20617_v27 = vld [vmem:[#allocation10 + $0x50c] ss:$16 sps:$4 sm:$0xff]  }
 0x140   : > { %2041 = vmatpush2.bf16.msra.mxu0 %v19950_v42  ;;  %v23069_v42 = vsel %vm23061_vm4, %v995_v29, %v1002_v33  ;;  %v19987_v1 = vld [vmem:[#allocation5 + $0x700] ss:$16 sps:$4 sm:$0xff]  }
 0x141   : > { %2084 = vmatpush2.bf16.msra.mxu1 %v19951_v43  ;;  %2042 = vmatprep.subr.bf16.mxu0 %v19952_v44  ;;  %v1035_v43 = vsel %vm23002_vm10, %v1013_v34, %v1034_v39  ;;  %v994_v44 = vor.u32 %v992_v25, %v991_v36  ;;  %v19998_v39 = vld [vmem:[#allocation5 + $0x4c8] ss:$16 sps:$4 sm:$0xff]   ;;  %v20615_v46 = vld [vmem:[#allocation10 + $0x508] ss:$16 sps:$4 sm:$0xff]  }
 0x142   : > { %2085 = vmatprep.subr.bf16.mxu1 %v19954_v45  ;;  %v1004_v45 = vrot.slane %v991_v36, 4  ;;  %1036 = vst [vmem:[#allocation2 + $0x8] sm:$0x11] %v1035_v43  ;;  %v20003_v43 = vld [vmem:[#allocation5 + $0x6cc] ss:$16 sps:$4 sm:$0xff]  }
 0x144   : > { %2043 = vmatpush2.bf16.msra.mxu0 %v19956_v47  ;;  %v23074_v47 = vcombine.high %v1027_v38, %v23069_v42 }
 0x145   : > { %2086 = vmatpush2.bf16.msra.mxu1 %v19957_v48  ;;  %2044 = vmatprep.subr.bf16.mxu0 %v19958_v49  ;;  %v1011_v48 = vor.u32 %v1009_v31, %v1008_v40  ;;  %v1014_v49 = vrot.slane %v1008_v40, 4 }
 0x146   : > { %2087 = vmatprep.subr.bf16.mxu1 %v19960_v50  ;;  %v1029_v50 = vld [vmem:[#allocation2 + $0x20] sm:$0xff]  ;;  %v1345_v57 = vshll.u32 %v23074_v47, 16  ;;  %v1343_v2 = vshrl.u32 %v23074_v47, 16 }
 0x147   : > { %v23084_v58 = vsel %vm23061_vm4, %v1004_v45, %v1011_v48  ;;  %v20001_v45 = vld [vmem:[#allocation5 + $0x6c8] ss:$16 sps:$4 sm:$0xff]  }
 0x148   : > { %2045 = vmatpush2.bf16.msra.mxu0 %v19962_v51  ;;  %v1037_v51 = vld [vmem:[#allocation2] sm:$0x11]  ;;  %v1347_v5 = vrot.slane %v1345_v57, 1  ;;  %v20004_v48 = vld [vmem:[#allocation5 + $0x4a8] ss:$16 sps:$4 sm:$0xff]  }
 0x149   : > { %2088 = vmatpush2.bf16.msra.mxu1 %v19963_v52  ;;  %2046 = vmatprep.subr.bf16.mxu0 %v19964_v54  ;;  %v23077_v52 = vcombine.low %v1027_v38, %v23069_v42  ;;  %v1030_v54 = vsel %vm23055_vm3, %v994_v44, %v1029_v50  ;;  %v1172_v9 = vld [vmem:[#allocation2 + $0x8] sm:$0x11] }
 0x14a   : > { %2089 = vmatprep.subr.bf16.mxu1 %v19966_v59  ;;  %1031 = vst [vmem:[#allocation2 + $0x20] sm:$0xff] %v1030_v54  ;;  %v1038_v59 = vsel %vm23002_vm10, %v1014_v49, %v1037_v51  ;;  %v23089_v61 = vcombine.high %v1030_v54, %v23084_v58  ;;  %v23093_v63 = vcombine.low %v1030_v54, %v23084_v58  ;;  %v19995_v38 = vld [vmem:[#allocation5 + $0x6e8] ss:$16 sps:$4 sm:$0xff]   ;;  %v20006_v44 = vld [vmem:[#allocation5 + $0x4ac] ss:$16 sps:$4 sm:$0xff]  }
 0x14b   : > { %1039 = vst [vmem:[#allocation2] sm:$0x11] %v1038_v59  ;;  %v1333_v62 = vshll.u32 %v23077_v52, 16  ;;  %v1331_v6 = vshrl.u32 %v23077_v52, 16  ;;  %v23099_v11 = vcombine.high %v1172_v9, %v1172_v9  ;;  %v1348_v17 = vor.u32 %v1347_v5, %v1343_v2  ;;  %v20009_v49 = vld [vmem:[#allocation5 + $0x6ac] ss:$16 sps:$4 sm:$0xff]  }
 0x14c   : > { %2047 = vmatpush2.bf16.msra.mxu0 %v19968_v4  ;;  %v1369_v3 = vshll.u32 %v23089_v61, 16  ;;  %v19994_v4 = vld [vmem:[#allocation5 + $0x4ec] ss:$16 sps:$4 sm:$0xff]   ;;  %v1357_v8 = vshll.u32 %v23093_v63, 16  ;;  %v1367_v13 = vshrl.u32 %v23089_v61, 16  ;;  %v1355_v15 = vshrl.u32 %v23093_v63, 16 }
 0x14d   : > { %2090 = vmatpush2.bf16.msra.mxu1 %v19969_v12  ;;  %2048 = vmatprep.subr.bf16.mxu0 %v19970_v18  ;;  %v1335_v7 = vrot.slane %v1333_v62, 1  ;;  %v23101_v12 = vcombine.low %v1172_v9, %v1172_v9  ;;  %v1350_v18 = vshll.u32 %v23099_v11, 16  ;;  %v20012_v50 = vld [vmem:[#allocation5 + $0x48c] ss:$16 sps:$4 sm:$0xff]   ;;  %v20007_v51 = vld [vmem:[#allocation5 + $0x6a8] ss:$16 sps:$4 sm:$0xff]  }
 0x14e   : > { %2091 = vmatprep.subr.bf16.mxu1 %v19972_v21  ;;  %v1371_v14 = vrot.slane %v1369_v3, 1  ;;  %v1359_v16 = vrot.slane %v1357_v8, 1  ;;  %v20015_v54 = vld [vmem:[#allocation5 + $0x68c] ss:$16 sps:$4 sm:$0xff]   ;;  %v20016_v57 = vld [vmem:[#allocation5 + $0x468] ss:$16 sps:$4 sm:$0xff]  }
 0x14f   : > { %v1336_v20 = vor.u32 %v1335_v7, %v1331_v6  ;;  %v1338_v21 = vshll.u32 %v23101_v12, 16  ;;  %v1352_v25 = vrot.slane %v1350_v18, 1  ;;  %v20021_v59 = vld [vmem:[#allocation5 + $0x66c] ss:$16 sps:$4 sm:$0xff]   ;;  %v20019_v62 = vld [vmem:[#allocation5 + $0x668] ss:$16 sps:$4 sm:$0xff]  }
 0x150   : > { %2049 = vmatpush2.bf16.msra.mxu0 %v19974_v26  ;;  %v1372_v28 = vor.u32 %v1371_v14, %v1367_v13  ;;  %v1360_v30 = vor.u32 %v1359_v16, %v1355_v15  ;;  %v20030_v2 = vld [vmem:[#allocation5 + $0x42c] ss:$16 sps:$4 sm:$0xff]   ;;  %v20025_v3 = vld [vmem:[#allocation5 + $0x648] ss:$16 sps:$4 sm:$0xff]  }
 0x151   : > { %2092 = vmatpush2.bf16.msra.mxu1 %v19975_v32  ;;  %2050 = vmatprep.subr.bf16.mxu0 %v19976_v37  ;;  %v1340_v26 = vrot.slane %v1338_v21, 1  ;;  %v19992_v32 = vld [vmem:[#allocation5 + $0x4e8] ss:$16 sps:$4 sm:$0xff]   ;;  %v1353_v33 = vsel %vm1329_vm0, %v1348_v17, %v1352_v25  ;;  %v20033_v5 = vld [vmem:[#allocation5 + $0x62c] ss:$16 sps:$4 sm:$0xff]  }
 0x152   : > { %2093 = vmatprep.subr.bf16.mxu1 %v19978_v41  ;;  %v1173_v19 = vld [vmem:[#allocation2] sm:$0x11]  ;;  %2054 = vmatprep.mubr.bf16.mxu0 %v1353_v33  ;;  %v20036_v6 = vld [vmem:[#allocation5 + $0x40c] ss:$16 sps:$4 sm:$0xff]   ;;  %v20031_v7 = vld [vmem:[#allocation5 + $0x628] ss:$16 sps:$4 sm:$0xff]  }
 0x153   : > { %v23107_v22 = vcombine.high %v1173_v19, %v1173_v19  ;;  %v23109_v24 = vcombine.low %v1173_v19, %v1173_v19  ;;  %v23115_v34 = vsel %vm1329_vm0, %v1336_v20, %v1340_v26  ;;  %v20034_v8 = vld [vmem:[#allocation5 + $0x408] ss:$16 sps:$4 sm:$0xff]   ;;  %v20039_v9 = vld [vmem:[#allocation5 + $0x60c] ss:$16 sps:$4 sm:$0xff]  }
 0x154   : > { %2051 = vmatpush2.bf16.msra.mxu0 %v19980_v53  ;;  %v20010_v53 = vld [vmem:[#allocation5 + $0x488] ss:$16 sps:$4 sm:$0xff]   ;;  %v20045_v15 = vld [vmem:[#allocation5 + $0x7ec] ss:$16 sps:$4 sm:$0xff]  }
 0x155   : > { %2094 = vmatpush2.bf16.msra.mxu1 %v19981_v55  ;;  %2052 = vmatprep.subr.bf16.mxu0 %v19982_v56  ;;  %v1374_v29 = vshll.u32 %v23107_v22, 16  ;;  %v1362_v31 = vshll.u32 %v23109_v24, 16  ;;  %v20018_v55 = vld [vmem:[#allocation5 + $0x46c] ss:$16 sps:$4 sm:$0xff]   ;;  %v20013_v56 = vld [vmem:[#allocation5 + $0x688] ss:$16 sps:$4 sm:$0xff]  }
 0x156   : > { %2095 = vmatprep.subr.bf16.mxu1 %v19984_v60  ;;  %v20024_v60 = vld [vmem:[#allocation5 + $0x44c] ss:$16 sps:$4 sm:$0xff]   ;;  %v20037_v13 = vld [vmem:[#allocation5 + $0x608] ss:$16 sps:$4 sm:$0xff]  }
 0x157   : > { %v1376_v36 = vrot.slane %v1374_v29, 1  ;;  %v1364_v37 = vrot.slane %v1362_v31, 1  ;;  %v20040_v14 = vld [vmem:[#allocation5 + $0x5e8] ss:$16 sps:$4 sm:$0xff]   ;;  %v20048_v16 = vld [vmem:[#allocation5 + $0x5cc] ss:$16 sps:$4 sm:$0xff]  }
 0x158   : > { %2053 = vmatpush2.bf16.msra.mxu0 %v19986_v0  ;;  %v20022_v0 = vld [vmem:[#allocation5 + $0x448] ss:$16 sps:$4 sm:$0xff]   ;;  %v20051_v19 = vld [vmem:[#allocation5 + $0x7cc] ss:$16 sps:$4 sm:$0xff]  }
 0x159   : > { %2096 = vmatpush2.bf16.msra.mxu1 %v19987_v1  ;;  %2108 = vmatprep.subr.bf16.mxu0 %v19994_v4  ;;  %v1377_v40 = vsel %vm1329_vm0, %v1372_v28, %v1376_v36  ;;  %v23120_v41 = vsel %vm1329_vm0, %v1360_v30, %v1364_v37  ;;  %v20027_v1 = vld [vmem:[#allocation5 + $0x64c] ss:$16 sps:$4 sm:$0xff]   ;;  %v20028_v4 = vld [vmem:[#allocation5 + $0x428] ss:$16 sps:$4 sm:$0xff]  }
 0x15a   : > { %2151 = vmatprep.subr.bf16.mxu1 %v19997_v10  ;;  %2097 = vmatprep.mubr.bf16.mxu1 %v1377_v40  ;;  %v20042_v10 = vld [vmem:[#allocation5 + $0x5ec] ss:$16 sps:$4 sm:$0xff]   ;;  %v20043_v17 = vld [vmem:[#allocation5 + $0x7e8] ss:$16 sps:$4 sm:$0xff]  }
 0x15b   : > { %2055 = vmatmul.mubr.bf16.vlgmr.msra.gmra.mxu0 %v23115_v34  ;;  %v20046_v18 = vld [vmem:[#allocation5 + $0x5c8] ss:$16 sps:$4 sm:$0xff]   ;;  %v20054_v20 = vld [vmem:[#allocation5 + $0x5ac] ss:$16 sps:$4 sm:$0xff]  }
 0x15c   : > { %2109 = vmatpush1.bf16.msra.mxu0 %v19992_v32  ;;  %2140 = vmatprep.mubr.bf16.mxu0 %v1353_v33  ;;  %v20049_v21 = vld [vmem:[#allocation5 + $0x7c8] ss:$16 sps:$4 sm:$0xff]   ;;  %v20057_v26 = vld [vmem:[#allocation5 + $0x7ac] ss:$16 sps:$4 sm:$0xff]  }
 0x15d   : > { %2110 = vmatprep.subr.bf16.mxu0 %v20000_v35  ;;  %2098 = vmatmul.mubr.bf16.vlgmr.msra.gmra.mxu1 %v23120_v41  ;;  %v20052_v25 = vld [vmem:[#allocation5 + $0x5a8] ss:$16 sps:$4 sm:$0xff]   ;;  %v20060_v28 = vld [vmem:[#allocation5 + $0x58c] ss:$16 sps:$4 sm:$0xff]  }
 0x15e   : > { %2152 = vmatpush1.bf16.msra.mxu1 %v19995_v38  ;;  %2183 = vmatprep.mubr.bf16.mxu1 %v1377_v40  ;;  %v20055_v29 = vld [vmem:[#allocation5 + $0x7a8] ss:$16 sps:$4 sm:$0xff]   ;;  %v20063_v31 = vld [vmem:[#allocation5 + $0x78c] ss:$16 sps:$4 sm:$0xff]  }
 0x15f   : > { %2153 = vmatprep.subr.bf16.mxu1 %v20003_v43  ;;  %v20058_v30 = vld [vmem:[#allocation5 + $0x588] ss:$16 sps:$4 sm:$0xff]   ;;  %v20066_v32 = vld [vmem:[#allocation5 + $0x56c] ss:$16 sps:$4 sm:$0xff]  }
 0x160   : > { %2111 = vmatpush1.bf16.msra.mxu0 %v19998_v39  ;;  %v20061_v33 = vld [vmem:[#allocation5 + $0x788] ss:$16 sps:$4 sm:$0xff]   ;;  %v20069_v36 = vld [vmem:[#allocation5 + $0x76c] ss:$16 sps:$4 sm:$0xff]  }
 0x161   : > { %2112 = vmatprep.subr.bf16.mxu0 %v20006_v44  ;;  %v20064_v35 = vld [vmem:[#allocation5 + $0x568] ss:$16 sps:$4 sm:$0xff]   ;;  %v20072_v37 = vld [vmem:[#allocation5 + $0x54c] ss:$16 sps:$4 sm:$0xff]  }
 0x162   : > { %2154 = vmatpush1.bf16.msra.mxu1 %v20001_v45  ;;  %v20067_v38 = vld [vmem:[#allocation5 + $0x768] ss:$16 sps:$4 sm:$0xff]   ;;  %v20075_v40 = vld [vmem:[#allocation5 + $0x74c] ss:$16 sps:$4 sm:$0xff]  }
 0x163   : > { %2155 = vmatprep.subr.bf16.mxu1 %v20009_v49  ;;  %v20070_v39 = vld [vmem:[#allocation5 + $0x548] ss:$16 sps:$4 sm:$0xff]   ;;  %v20078_v43 = vld [vmem:[#allocation5 + $0x52c] ss:$16 sps:$4 sm:$0xff]  }
 0x164   : > { %2113 = vmatpush1.bf16.msra.mxu0 %v20004_v48  ;;  %v20073_v44 = vld [vmem:[#allocation5 + $0x748] ss:$16 sps:$4 sm:$0xff]   ;;  %v20081_v48 = vld [vmem:[#allocation5 + $0x72c] ss:$16 sps:$4 sm:$0xff]  }
 0x165   : > { %2114 = vmatprep.subr.bf16.mxu0 %v20012_v50  ;;  %v20076_v45 = vld [vmem:[#allocation5 + $0x528] ss:$16 sps:$4 sm:$0xff]   ;;  %v20084_v49 = vld [vmem:[#allocation5 + $0x50c] ss:$16 sps:$4 sm:$0xff]  }
 0x166   : > { %2156 = vmatpush1.bf16.msra.mxu1 %v20007_v51  ;;  %v20079_v50 = vld [vmem:[#allocation5 + $0x728] ss:$16 sps:$4 sm:$0xff]  }
 0x167   : > { %2157 = vmatprep.subr.bf16.mxu1 %v20015_v54  ;;  %v20082_v51 = vld [vmem:[#allocation5 + $0x508] ss:$16 sps:$4 sm:$0xff]   ;;  %v20090_v54 = vld [vmem:[#allocation5 + $0xe4] ss:$16 sps:$4 sm:$0xff]  }
 0x168   : > { %2115 = vmatpush1.bf16.msra.mxu0 %v20010_v53  ;;  %v20087_v53 = vld [vmem:[#allocation5 + $0x70c] ss:$16 sps:$4 sm:$0xff]  }
 0x169   : > { %2116 = vmatprep.subr.bf16.mxu0 %v20018_v55  ;;  %v20085_v55 = vld [vmem:[#allocation5 + $0x708] ss:$16 sps:$4 sm:$0xff]  }
 0x16a   : > { %2158 = vmatpush1.bf16.msra.mxu1 %v20013_v56  ;;  %v20088_v56 = vld [vmem:[#allocation5 + $0xe0] ss:$16 sps:$4 sm:$0xff]  }
 0x16b   : > { %2159 = vmatprep.subr.bf16.mxu1 %v20021_v59  ;;  %v20096_v59 = vld [vmem:[#allocation5 + $0xc4] ss:$16 sps:$4 sm:$0xff]  }
 0x16c   : > { %2117 = vmatpush1.bf16.msra.mxu0 %v20016_v57  ;;  %v20093_v57 = vld [vmem:[#allocation5 + $0x2e4] ss:$16 sps:$4 sm:$0xff]  }
 0x16d   : > { %2118 = vmatprep.subr.bf16.mxu0 %v20024_v60  ;;  %v20091_v60 = vld [vmem:[#allocation5 + $0x2e0] ss:$16 sps:$4 sm:$0xff]  }
 0x16e   : > { %2160 = vmatpush1.bf16.msra.mxu1 %v20019_v62  ;;  %v20094_v62 = vld [vmem:[#allocation5 + $0xc0] ss:$16 sps:$4 sm:$0xff]  }
 0x16f   : > { %2161 = vmatprep.subr.bf16.mxu1 %v20027_v1  ;;  %v20102_v1 = vld [vmem:[#allocation5 + $0xa4] ss:$16 sps:$4 sm:$0xff]  }
 0x170   : > { %2119 = vmatpush1.bf16.msra.mxu0 %v20022_v0  ;;  %v20099_v0 = vld [vmem:[#allocation5 + $0x2c4] ss:$16 sps:$4 sm:$0xff]  }
 0x171   : > { %2120 = vmatprep.subr.bf16.mxu0 %v20030_v2  ;;  %v20097_v2 = vld [vmem:[#allocation5 + $0x2c0] ss:$16 sps:$4 sm:$0xff]  }
 0x172   : > { %2162 = vmatpush1.bf16.msra.mxu1 %v20025_v3  ;;  %v20100_v3 = vld [vmem:[#allocation5 + $0xa0] ss:$16 sps:$4 sm:$0xff]  }
 0x173   : > { %2163 = vmatprep.subr.bf16.mxu1 %v20033_v5  ;;  %v20103_v5 = vld [vmem:[#allocation5 + $0x2a0] ss:$16 sps:$4 sm:$0xff]  }
 0x174   : > { %2121 = vmatpush1.bf16.msra.mxu0 %v20028_v4  ;;  %v20105_v4 = vld [vmem:[#allocation5 + $0x2a4] ss:$16 sps:$4 sm:$0xff]  }
 0x175   : > { %2122 = vmatprep.subr.bf16.mxu0 %v20036_v6  ;;  %v20106_v6 = vld [vmem:[#allocation5 + $0x80] ss:$16 sps:$4 sm:$0xff]  }
 0x176   : > { %2164 = vmatpush1.bf16.msra.mxu1 %v20031_v7  ;;  %v20111_v7 = vld [vmem:[#allocation5 + $0x284] ss:$16 sps:$4 sm:$0xff]  }
 0x177   : > { %2165 = vmatprep.subr.bf16.mxu1 %v20039_v9  ;;  %v20109_v9 = vld [vmem:[#allocation5 + $0x280] ss:$16 sps:$4 sm:$0xff]  }
 0x178   : > { %2123 = vmatpush1.bf16.msra.mxu0 %v20034_v8  ;;  %v20114_v8 = vld [vmem:[#allocation5 + $0x64] ss:$16 sps:$4 sm:$0xff]  }
 0x179   : > { %2124 = vmatprep.subr.bf16.mxu0 %v20042_v10  ;;  %v20117_v10 = vld [vmem:[#allocation5 + $0x264] ss:$16 sps:$4 sm:$0xff]  }
 0x17a   : > { %2166 = vmatpush1.bf16.msra.mxu1 %v20037_v13  ;;  %v20120_v13 = vld [vmem:[#allocation5 + $0x44] ss:$16 sps:$4 sm:$0xff]  }
 0x17b   : > { %2167 = vmatprep.subr.bf16.mxu1 %v20045_v15  ;;  %v20118_v15 = vld [vmem:[#allocation5 + $0x40] ss:$16 sps:$4 sm:$0xff]  }
 0x17c   : > { %2125 = vmatpush2.bf16.msra.mxu0 %v20040_v14  ;;  %v20115_v14 = vld [vmem:[#allocation5 + $0x260] ss:$16 sps:$4 sm:$0xff]  }
 0x17d   : > { %2126 = vmatprep.subr.bf16.mxu0 %v20048_v16  ;;  %v20123_v16 = vld [vmem:[#allocation5 + $0x244] ss:$16 sps:$4 sm:$0xff]  }
 0x17e   : > { %2168 = vmatpush2.bf16.msra.mxu1 %v20043_v17  ;;  %v20126_v17 = vld [vmem:[#allocation5 + $0x24] ss:$16 sps:$4 sm:$0xff]  }
 0x17f   : > { %2169 = vmatprep.subr.bf16.mxu1 %v20051_v19  ;;  %v20124_v19 = vld [vmem:[#allocation5 + $0x20] ss:$16 sps:$4 sm:$0xff]  }
 0x180   : > { %2127 = vmatpush2.bf16.msra.mxu0 %v20046_v18  ;;  %v20121_v18 = vld [vmem:[#allocation5 + $0x240] ss:$16 sps:$4 sm:$0xff]  }
 0x181   : > { %2128 = vmatprep.subr.bf16.mxu0 %v20054_v20  ;;  %v20129_v20 = vld [vmem:[#allocation5 + $0x224] ss:$16 sps:$4 sm:$0xff]  }
 0x182   : > { %2170 = vmatpush2.bf16.msra.mxu1 %v20049_v21  ;;  %v20132_v21 = vld [vmem:[#allocation5 + $0x4] ss:$16 sps:$4 sm:$0xff]  }
 0x183   : > { %2171 = vmatprep.subr.bf16.mxu1 %v20057_v26  ;;  %v20130_v26 = vld [vmem:[#allocation5] ss:$16 sps:$4 sm:$0xff]  }
 0x184   : > { %2129 = vmatpush2.bf16.msra.mxu0 %v20052_v25  ;;  %v20127_v25 = vld [vmem:[#allocation5 + $0x220] ss:$16 sps:$4 sm:$0xff]  }
 0x185   : > { %2130 = vmatprep.subr.bf16.mxu0 %v20060_v28  ;;  %v20135_v28 = vld [vmem:[#allocation5 + $0x204] ss:$16 sps:$4 sm:$0xff]  }
 0x186   : > { %2172 = vmatpush2.bf16.msra.mxu1 %v20055_v29  ;;  %v20138_v29 = vld [vmem:[#allocation5 + $0x1e4] ss:$16 sps:$4 sm:$0xff]  }
 0x187   : > { %2173 = vmatprep.subr.bf16.mxu1 %v20063_v31  ;;  %v20136_v31 = vld [vmem:[#allocation5 + $0x1e0] ss:$16 sps:$4 sm:$0xff]  }
 0x188   : > { %2131 = vmatpush2.bf16.msra.mxu0 %v20058_v30  ;;  %v20133_v30 = vld [vmem:[#allocation5 + $0x200] ss:$16 sps:$4 sm:$0xff]  }
 0x189   : > { %2132 = vmatprep.subr.bf16.mxu0 %v20066_v32  ;;  %v20141_v32 = vld [vmem:[#allocation5 + $0x3e4] ss:$16 sps:$4 sm:$0xff]  }
 0x18a   : > { %2174 = vmatpush2.bf16.msra.mxu1 %v20061_v33  ;;  %v20144_v33 = vld [vmem:[#allocation5 + $0x1c4] ss:$16 sps:$4 sm:$0xff]  }
 0x18b   : > { %2175 = vmatprep.subr.bf16.mxu1 %v20069_v36  ;;  %v20142_v36 = vld [vmem:[#allocation5 + $0x1c0] ss:$16 sps:$4 sm:$0xff]  }
 0x18c   : > { %2133 = vmatpush2.bf16.msra.mxu0 %v20064_v35  ;;  %v20139_v35 = vld [vmem:[#allocation5 + $0x3e0] ss:$16 sps:$4 sm:$0xff]  }
 0x18d   : > { %2134 = vmatprep.subr.bf16.mxu0 %v20072_v37  ;;  %v20147_v37 = vld [vmem:[#allocation5 + $0x3c4] ss:$16 sps:$4 sm:$0xff]  }
 0x18e   : > { %2176 = vmatpush2.bf16.msra.mxu1 %v20067_v38  ;;  %v20150_v38 = vld [vmem:[#allocation5 + $0x1a4] ss:$16 sps:$4 sm:$0xff]  }
 0x18f   : > { %2177 = vmatprep.subr.bf16.mxu1 %v20075_v40  ;;  %v20148_v40 = vld [vmem:[#allocation5 + $0x1a0] ss:$16 sps:$4 sm:$0xff]  }
 0x190   : > { %2135 = vmatpush2.bf16.msra.mxu0 %v20070_v39  ;;  %v20145_v39 = vld [vmem:[#allocation5 + $0x3c0] ss:$16 sps:$4 sm:$0xff]  }
 0x191   : > { %2136 = vmatprep.subr.bf16.mxu0 %v20078_v43  ;;  %v20153_v43 = vld [vmem:[#allocation5 + $0x3a4] ss:$16 sps:$4 sm:$0xff]  }
 0x192   : > { %2178 = vmatpush2.bf16.msra.mxu1 %v20073_v44  ;;  %v20156_v44 = vld [vmem:[#allocation5 + $0x184] ss:$16 sps:$4 sm:$0xff]  }
 0x193   : > { %2179 = vmatprep.subr.bf16.mxu1 %v20081_v48  ;;  %v20154_v48 = vld [vmem:[#allocation5 + $0x180] ss:$16 sps:$4 sm:$0xff]  }
 0x194   : > { %2137 = vmatpush2.bf16.msra.mxu0 %v20076_v45  ;;  %v20151_v45 = vld [vmem:[#allocation5 + $0x3a0] ss:$16 sps:$4 sm:$0xff]  }
 0x195   : > { %2138 = vmatprep.subr.bf16.mxu0 %v20084_v49  ;;  %v20159_v49 = vld [vmem:[#allocation5 + $0x384] ss:$16 sps:$4 sm:$0xff]  }
 0x196   : > { %2180 = vmatpush2.bf16.msra.mxu1 %v20079_v50  ;;  %v20162_v50 = vld [vmem:[#allocation5 + $0x164] ss:$16 sps:$4 sm:$0xff]  }
 0x197   : > { %2181 = vmatprep.subr.bf16.mxu1 %v20087_v53  ;;  %v20160_v53 = vld [vmem:[#allocation5 + $0x160] ss:$16 sps:$4 sm:$0xff]  }
 0x198   : > { %2139 = vmatpush2.bf16.msra.mxu0 %v20082_v51  ;;  %v20157_v51 = vld [vmem:[#allocation5 + $0x380] ss:$16 sps:$4 sm:$0xff]  }
 0x199   : > { %2838 = vmatprep.subr.bf16.mxu0 %v20090_v54  ;;  %v20165_v54 = vld [vmem:[#allocation5 + $0x364] ss:$16 sps:$4 sm:$0xff]  }
 0x19a   : > { %2182 = vmatpush2.bf16.msra.mxu1 %v20085_v55  ;;  %v20168_v55 = vld [vmem:[#allocation5 + $0x144] ss:$16 sps:$4 sm:$0xff]  }
 0x19b   : > { %2141 = vmatmul.mubr.bf16.vlgmr.msra.gmra.mxu0 %v23115_v34  ;;  %2881 = vmatprep.subr.bf16.mxu1 %v20093_v57  ;;  %v20108_v34 = vld [vmem:[#allocation5 + $0x84] ss:$16 sps:$4 sm:$0xff]   ;;  %v20166_v57 = vld [vmem:[#allocation5 + $0x140] ss:$16 sps:$4 sm:$0xff]  }
 0x19c   : > { %2839 = vmatpush1.bf16.msra.mxu0 %v20088_v56  ;;  %2870 = vmatprep.mubr.bf16.mxu0 %v23074_v47  ;;  %v20163_v56 = vld [vmem:[#allocation5 + $0x360] ss:$16 sps:$4 sm:$0xff]  }
 0x19d   : > { %2840 = vmatprep.subr.bf16.mxu0 %v20096_v59  ;;  %2184 = vmatmul.mubr.bf16.vlgmr.msra.gmra.mxu1 %v23120_v41  ;;  %v20112_v41 = vld [vmem:[#allocation5 + $0x60] ss:$16 sps:$4 sm:$0xff]   ;;  %v20171_v59 = vld [vmem:[#allocation5 + $0x344] ss:$16 sps:$4 sm:$0xff]  }
 0x19e   : > { %2882 = vmatpush1.bf16.msra.mxu1 %v20091_v60  ;;  %2913 = vmatprep.mubr.bf16.mxu1 %v23089_v61  ;;  %v20174_v60 = vld [vmem:[#allocation5 + $0x124] ss:$16 sps:$4 sm:$0xff]  }
 0x19f   : > { %2883 = vmatprep.subr.bf16.mxu1 %v20099_v0  ;;  %v20172_v0 = vld [vmem:[#allocation5 + $0x120] ss:$16 sps:$4 sm:$0xff]  }
 0x1a0   : > { %2841 = vmatpush1.bf16.msra.mxu0 %v20094_v62  ;;  %v20169_v62 = vld [vmem:[#allocation5 + $0x340] ss:$16 sps:$4 sm:$0xff]  }
 0x1a1   : > { %2842 = vmatprep.subr.bf16.mxu0 %v20102_v1  ;;  %v20177_v1 = vld [vmem:[#allocation5 + $0x324] ss:$16 sps:$4 sm:$0xff]  }
 0x1a2   : > { %2884 = vmatpush1.bf16.msra.mxu1 %v20097_v2  ;;  %v20180_v2 = vld [vmem:[#allocation5 + $0x104] ss:$16 sps:$4 sm:$0xff]  }
 0x1a3   : > { %2885 = vmatprep.subr.bf16.mxu1 %v20105_v4  ;;  %v20178_v4 = vld [vmem:[#allocation5 + $0x100] ss:$16 sps:$4 sm:$0xff]  }
 0x1a4   : > { %2843 = vmatpush1.bf16.msra.mxu0 %v20100_v3  ;;  %v20175_v3 = vld [vmem:[#allocation5 + $0x320] ss:$16 sps:$4 sm:$0xff]  }
 0x1a5   : > { %2844 = vmatprep.subr.bf16.mxu0 %v20108_v34  ;;  %v20183_v34 = vld [vmem:[#allocation5 + $0x304] ss:$16 sps:$4 sm:$0xff]  }
 0x1a6   : > { %2886 = vmatpush1.bf16.msra.mxu1 %v20103_v5  ;;  %v20186_v5 = vld [vmem:[#allocation5 + $0xec] ss:$16 sps:$4 sm:$0xff]  }
 0x1a7   : > { %2887 = vmatprep.subr.bf16.mxu1 %v20111_v7  ;;  %v20184_v7 = vld [vmem:[#allocation5 + $0xe8] ss:$16 sps:$4 sm:$0xff]  }
 0x1a8   : > { %2845 = vmatpush1.bf16.msra.mxu0 %v20106_v6  ;;  %v20181_v6 = vld [vmem:[#allocation5 + $0x300] ss:$16 sps:$4 sm:$0xff]  }
 0x1a9   : > { %2846 = vmatprep.subr.bf16.mxu0 %v20114_v8  ;;  %v20189_v8 = vld [vmem:[#allocation5 + $0x2ec] ss:$16 sps:$4 sm:$0xff]  }
 0x1aa   : > { %2888 = vmatpush1.bf16.msra.mxu1 %v20109_v9  ;;  %v20192_v9 = vld [vmem:[#allocation5 + $0xcc] ss:$16 sps:$4 sm:$0xff]  }
 0x1ab   : > { %2889 = vmatprep.subr.bf16.mxu1 %v20117_v10  ;;  %v20190_v10 = vld [vmem:[#allocation5 + $0xc8] ss:$16 sps:$4 sm:$0xff]  }
 0x1ac   : > { %2847 = vmatpush1.bf16.msra.mxu0 %v20112_v41  ;;  %v20187_v41 = vld [vmem:[#allocation5 + $0x2e8] ss:$16 sps:$4 sm:$0xff]  }
 0x1ad   : > { %2848 = vmatprep.subr.bf16.mxu0 %v20120_v13  ;;  %v20195_v13 = vld [vmem:[#allocation5 + $0x2cc] ss:$16 sps:$4 sm:$0xff]  }
 0x1ae   : > { %2890 = vmatpush1.bf16.msra.mxu1 %v20115_v14  ;;  %v20198_v14 = vld [vmem:[#allocation5 + $0xac] ss:$16 sps:$4 sm:$0xff]  }
 0x1af   : > { %2891 = vmatprep.subr.bf16.mxu1 %v20123_v16  ;;  %v20196_v16 = vld [vmem:[#allocation5 + $0xa8] ss:$16 sps:$4 sm:$0xff]  }
 0x1b0   : > { %2849 = vmatpush1.bf16.msra.mxu0 %v20118_v15  ;;  %v20193_v15 = vld [vmem:[#allocation5 + $0x2c8] ss:$16 sps:$4 sm:$0xff]  }
 0x1b1   : > { %2850 = vmatprep.subr.bf16.mxu0 %v20126_v17  ;;  %v20201_v17 = vld [vmem:[#allocation5 + $0x2ac] ss:$16 sps:$4 sm:$0xff]  }
 0x1b2   : > { %2892 = vmatpush1.bf16.msra.mxu1 %v20121_v18  ;;  %v20204_v18 = vld [vmem:[#allocation5 + $0x8c] ss:$16 sps:$4 sm:$0xff]  }
 0x1b3   : > { %2893 = vmatprep.subr.bf16.mxu1 %v20129_v20  ;;  %v20202_v20 = vld [vmem:[#allocation5 + $0x88] ss:$16 sps:$4 sm:$0xff]  }
 0x1b4   : > { %2851 = vmatpush1.bf16.msra.mxu0 %v20124_v19  ;;  %v20199_v19 = vld [vmem:[#allocation5 + $0x2a8] ss:$16 sps:$4 sm:$0xff]  }
 0x1b5   : > { %2852 = vmatprep.subr.bf16.mxu0 %v20132_v21  ;;  %v20207_v21 = vld [vmem:[#allocation5 + $0x28c] ss:$16 sps:$4 sm:$0xff]  }
 0x1b6   : > { %2894 = vmatpush1.bf16.msra.mxu1 %v20127_v25  ;;  %v20205_v25 = vld [vmem:[#allocation5 + $0x288] ss:$16 sps:$4 sm:$0xff]  }
 0x1b7   : > { %2895 = vmatprep.subr.bf16.mxu1 %v20135_v28  ;;  %v20213_v28 = vld [vmem:[#allocation5 + $0x26c] ss:$16 sps:$4 sm:$0xff]  }
 0x1b8   : > { %2853 = vmatpush1.bf16.msra.mxu0 %v20130_v26  ;;  %v20208_v26 = vld [vmem:[#allocation5 + $0x68] ss:$16 sps:$4 sm:$0xff]  }
 0x1b9   : > { %2854 = vmatprep.subr.bf16.mxu0 %v20138_v29  ;;  %v20211_v29 = vld [vmem:[#allocation5 + $0x268] ss:$16 sps:$4 sm:$0xff]  }
 0x1ba   : > { %2896 = vmatpush1.bf16.msra.mxu1 %v20133_v30  ;;  %v20214_v30 = vld [vmem:[#allocation5 + $0x48] ss:$16 sps:$4 sm:$0xff]  }
 0x1bb   : > { %2897 = vmatprep.subr.bf16.mxu1 %v20141_v32  ;;  %v20222_v32 = vld [vmem:[#allocation5 + $0x2c] ss:$16 sps:$4 sm:$0xff]  }
 0x1bc   : > { %2855 = vmatpush2.bf16.msra.mxu0 %v20136_v31  ;;  %v20219_v31 = vld [vmem:[#allocation5 + $0x24c] ss:$16 sps:$4 sm:$0xff]  }
 0x1bd   : > { %2856 = vmatprep.subr.bf16.mxu0 %v20144_v33  ;;  %v20217_v33 = vld [vmem:[#allocation5 + $0x248] ss:$16 sps:$4 sm:$0xff]  }
 0x1be   : > { %2898 = vmatpush2.bf16.msra.mxu1 %v20139_v35  ;;  %v20220_v35 = vld [vmem:[#allocation5 + $0x28] ss:$16 sps:$4 sm:$0xff]  }
 0x1bf   : > { %2899 = vmatprep.subr.bf16.mxu1 %v20147_v37  ;;  %v20228_v37 = vld [vmem:[#allocation5 + $0xc] ss:$16 sps:$4 sm:$0xff]  }
 0x1c0   : > { %2857 = vmatpush2.bf16.msra.mxu0 %v20142_v36  ;;  %v20225_v36 = vld [vmem:[#allocation5 + $0x22c] ss:$16 sps:$4 sm:$0xff]  }
 0x1c1   : > { %2858 = vmatprep.subr.bf16.mxu0 %v20150_v38  ;;  %v20223_v38 = vld [vmem:[#allocation5 + $0x228] ss:$16 sps:$4 sm:$0xff]  }
 0x1c2   : > { %2900 = vmatpush2.bf16.msra.mxu1 %v20145_v39  ;;  %v20226_v39 = vld [vmem:[#allocation5 + $0x8] ss:$16 sps:$4 sm:$0xff]  }
 0x1c3   : > { %2901 = vmatprep.subr.bf16.mxu1 %v20153_v43  ;;  %v20234_v43 = vld [vmem:[#allocation5 + $0x1ec] ss:$16 sps:$4 sm:$0xff]  }
 0x1c4   : > { %2859 = vmatpush2.bf16.msra.mxu0 %v20148_v40  ;;  %v20231_v40 = vld [vmem:[#allocation5 + $0x20c] ss:$16 sps:$4 sm:$0xff]  }
 0x1c5   : > { %2860 = vmatprep.subr.bf16.mxu0 %v20156_v44  ;;  %v20229_v44 = vld [vmem:[#allocation5 + $0x208] ss:$16 sps:$4 sm:$0xff]  }
 0x1c6   : > { %2902 = vmatpush2.bf16.msra.mxu1 %v20151_v45  ;;  %v20232_v45 = vld [vmem:[#allocation5 + $0x1e8] ss:$16 sps:$4 sm:$0xff]  }
 0x1c7   : > { %2903 = vmatprep.subr.bf16.mxu1 %v20159_v49  ;;  %v20240_v49 = vld [vmem:[#allocation5 + $0x1cc] ss:$16 sps:$4 sm:$0xff]  }
 0x1c8   : > { %2861 = vmatpush2.bf16.msra.mxu0 %v20154_v48  ;;  %v20237_v48 = vld [vmem:[#allocation5 + $0x3ec] ss:$16 sps:$4 sm:$0xff]  }
 0x1c9   : > { %2862 = vmatprep.subr.bf16.mxu0 %v20162_v50  ;;  %v20235_v50 = vld [vmem:[#allocation5 + $0x3e8] ss:$16 sps:$4 sm:$0xff]  }
 0x1ca   : > { %2904 = vmatpush2.bf16.msra.mxu1 %v20157_v51  ;;  %v20238_v51 = vld [vmem:[#allocation5 + $0x1c8] ss:$16 sps:$4 sm:$0xff]  }
 0x1cb   : > { %2905 = vmatprep.subr.bf16.mxu1 %v20165_v54  ;;  %v20246_v54 = vld [vmem:[#allocation5 + $0x1ac] ss:$16 sps:$4 sm:$0xff]  }
 0x1cc   : > { %2863 = vmatpush2.bf16.msra.mxu0 %v20160_v53  ;;  %v20243_v53 = vld [vmem:[#allocation5 + $0x3cc] ss:$16 sps:$4 sm:$0xff]  }
 0x1cd   : > { %2864 = vmatprep.subr.bf16.mxu0 %v20168_v55  ;;  %v20241_v55 = vld [vmem:[#allocation5 + $0x3c8] ss:$16 sps:$4 sm:$0xff]  }
 0x1ce   : > { %2906 = vmatpush2.bf16.msra.mxu1 %v20163_v56  ;;  %v20244_v56 = vld [vmem:[#allocation5 + $0x1a8] ss:$16 sps:$4 sm:$0xff]  }
 0x1cf   : > { %2907 = vmatprep.subr.bf16.mxu1 %v20171_v59  ;;  %v20252_v59 = vld [vmem:[#allocation5 + $0x18c] ss:$16 sps:$4 sm:$0xff]  }
 0x1d0   : > { %2865 = vmatpush2.bf16.msra.mxu0 %v20166_v57  ;;  %v20249_v57 = vld [vmem:[#allocation5 + $0x3ac] ss:$16 sps:$4 sm:$0xff]  }
 0x1d1   : > { %2866 = vmatprep.subr.bf16.mxu0 %v20174_v60  ;;  %v20247_v60 = vld [vmem:[#allocation5 + $0x3a8] ss:$16 sps:$4 sm:$0xff]  }
 0x1d2   : > { %2908 = vmatpush2.bf16.msra.mxu1 %v20169_v62  ;;  %v20250_v62 = vld [vmem:[#allocation5 + $0x188] ss:$16 sps:$4 sm:$0xff]  }
 0x1d3   : > { %2909 = vmatprep.subr.bf16.mxu1 %v20177_v1  ;;  %v20258_v1 = vld [vmem:[#allocation5 + $0x16c] ss:$16 sps:$4 sm:$0xff]  }
 0x1d4   : > { %2867 = vmatpush2.bf16.msra.mxu0 %v20172_v0  ;;  %v20255_v0 = vld [vmem:[#allocation5 + $0x38c] ss:$16 sps:$4 sm:$0xff]  }
 0x1d5   : > { %2868 = vmatprep.subr.bf16.mxu0 %v20180_v2  ;;  %v20253_v2 = vld [vmem:[#allocation5 + $0x388] ss:$16 sps:$4 sm:$0xff]  }
 0x1d6   : > { %2910 = vmatpush2.bf16.msra.mxu1 %v20175_v3  ;;  %v20256_v3 = vld [vmem:[#allocation5 + $0x168] ss:$16 sps:$4 sm:$0xff]  }
 0x1d7   : > { %2911 = vmatprep.subr.bf16.mxu1 %v20183_v34  ;;  %v20264_v34 = vld [vmem:[#allocation5 + $0x14c] ss:$16 sps:$4 sm:$0xff]  }
 0x1d8   : > { %2869 = vmatpush2.bf16.msra.mxu0 %v20178_v4  ;;  %v20261_v4 = vld [vmem:[#allocation5 + $0x36c] ss:$16 sps:$4 sm:$0xff]  }
 0x1d9   : > { %2924 = vmatprep.subr.bf16.mxu0 %v20186_v5  ;;  %v20259_v5 = vld [vmem:[#allocation5 + $0x368] ss:$16 sps:$4 sm:$0xff]  }
 0x1da   : > { %2912 = vmatpush2.bf16.msra.mxu1 %v20181_v6  ;;  %v20262_v6 = vld [vmem:[#allocation5 + $0x148] ss:$16 sps:$4 sm:$0xff]  }
 0x1db   : > { %2871 = vmatmul.mubr.bf16.vlgmr.msra.gmra.mxu0 %v23077_v52  ;;  %2967 = vmatprep.subr.bf16.mxu1 %v20189_v8  ;;  %v20270_v8 = vld [vmem:[#allocation5 + $0x12c] ss:$16 sps:$4 sm:$0xff]  }
 0x1dc   : > { %2925 = vmatpush1.bf16.msra.mxu0 %v20184_v7  ;;  %2956 = vmatprep.mubr.bf16.mxu0 %v23074_v47  ;;  %v20210_v47 = vld [vmem:[#allocation5 + $0x6c] ss:$16 sps:$4 sm:$0xff]  }
 0x1dd   : > { %2926 = vmatprep.subr.bf16.mxu0 %v20192_v9  ;;  %2914 = vmatmul.mubr.bf16.vlgmr.msra.gmra.mxu1 %v23093_v63  ;;  %v20267_v7 = vld [vmem:[#allocation5 + $0x34c] ss:$16 sps:$4 sm:$0xff]   ;;  %v20265_v9 = vld [vmem:[#allocation5 + $0x348] ss:$16 sps:$4 sm:$0xff]  }
 0x1de   : > { %2968 = vmatpush1.bf16.msra.mxu1 %v20187_v41  ;;  %2999 = vmatprep.mubr.bf16.mxu1 %v23089_v61  ;;  %v20216_v61 = vld [vmem:[#allocation5 + $0x4c] ss:$16 sps:$4 sm:$0xff]   ;;  %v20268_v41 = vld [vmem:[#allocation5 + $0x128] ss:$16 sps:$4 sm:$0xff]  }
 0x1df   : > { %2969 = vmatprep.subr.bf16.mxu1 %v20195_v13  ;;  %v20273_v13 = vld [vmem:[#allocation5 + $0x32c] ss:$16 sps:$4 sm:$0xff]  }
 0x1e0   : > { %2927 = vmatpush1.bf16.msra.mxu0 %v20190_v10  ;;  %v23131_v10 = vld [vmem:[#allocation2 + $0x18] sm:$0xee] }
 0x1e1   : > { %2928 = vmatprep.subr.bf16.mxu0 %v20198_v14  ;;  %v20276_v14 = vld [vmem:[#allocation5 + $0x10c] ss:$16 sps:$4 sm:$0xff]  }
 0x1e2   : > { %2970 = vmatpush1.bf16.msra.mxu1 %v20193_v15  ;;  %v23133_v15 = vld [vmem:[#allocation2 + $0x20] sm:$0xee] }
 0x1e3   : > { %2971 = vmatprep.subr.bf16.mxu1 %v20201_v17  ;;  %v17409_v17 = vcombine.high %v23131_v10, %v23069_v42 }
 0x1e4   : > { %2929 = vmatpush1.bf16.msra.mxu0 %v20196_v16  ;;  %v20271_v16 = vld [vmem:[#allocation5 + $0x328] ss:$16 sps:$4 sm:$0xff]  }
 0x1e5   : > { %2930 = vmatprep.subr.bf16.mxu0 %v20204_v18  ;;  %v20274_v18 = vld [vmem:[#allocation5 + $0x108] ss:$16 sps:$4 sm:$0xff]  }
 0x1e6   : > { %2972 = vmatpush1.bf16.msra.mxu1 %v20199_v19  ;;  %v20279_v19 = vld [vmem:[#allocation5 + $0x30c] ss:$16 sps:$4 sm:$0xff]  }
 0x1e7   : > { %2973 = vmatprep.subr.bf16.mxu1 %v20207_v21  ;;  %v20282_v21 = vld [vmem:[#allocation5 + $0x8e4] ss:$16 sps:$4 sm:$0xff]  }
 0x1e8   : > { %2931 = vmatpush1.bf16.msra.mxu0 %v20202_v20  ;;  %v17411_v20 = vcombine.high %v23133_v15, %v23084_v58 }
 0x1e9   : > { %2932 = vmatprep.subr.bf16.mxu0 %v20210_v47  ;;  %v20277_v47 = vld [vmem:[#allocation5 + $0x308] ss:$16 sps:$4 sm:$0xff]  }
 0x1ea   : > { %2974 = vmatpush1.bf16.msra.mxu1 %v20205_v25  ;;  %v3155_v25 = vrot.slane %v17409_v17, 1  ;;  %v20343_v17 = vld [vmem:[#allocation5 + $0xba0] ss:$16 sps:$4 sm:$0xff]  }
 0x1eb   : > { %2975 = vmatprep.subr.bf16.mxu1 %v20213_v28  ;;  %v20280_v28 = vld [vmem:[#allocation5 + $0x8e0] ss:$16 sps:$4 sm:$0xff]  }
 0x1ec   : > { %2933 = vmatpush1.bf16.msra.mxu0 %v20208_v26  ;;  %v3156_v26 = vrot.slane %v23099_v11, 1  ;;  %v20291_v11 = vld [vmem:[#allocation5 + $0xac4] ss:$16 sps:$4 sm:$0xff]  }
 0x1ed   : > { %2934 = vmatprep.subr.bf16.mxu0 %v20216_v61  ;;  %v20285_v61 = vld [vmem:[#allocation5 + $0xae4] ss:$16 sps:$4 sm:$0xff]  }
 0x1ee   : > { %2976 = vmatpush1.bf16.msra.mxu1 %v20211_v29  ;;  %v3161_v29 = vrot.slane %v17411_v20, 1  ;;  %v20354_v20 = vld [vmem:[#allocation5 + $0x964] ss:$16 sps:$4 sm:$0xff]  }
 0x1ef   : > { %2977 = vmatprep.subr.bf16.mxu1 %v20219_v31  ;;  %v20288_v31 = vld [vmem:[#allocation5 + $0x8c4] ss:$16 sps:$4 sm:$0xff]  }
 0x1f0   : > { %2935 = vmatpush1.bf16.msra.mxu0 %v20214_v30  ;;  %v3162_v30 = vrot.slane %v23107_v22, 1  ;;  %v20289_v22 = vld [vmem:[#allocation5 + $0xac0] ss:$16 sps:$4 sm:$0xff]  }
 0x1f1   : > { %2936 = vmatprep.subr.bf16.mxu0 %v20222_v32  ;;  %v20283_v32 = vld [vmem:[#allocation5 + $0xae0] ss:$16 sps:$4 sm:$0xff]  }
 0x1f2   : > { %2978 = vmatpush1.bf16.msra.mxu1 %v20217_v33  ;;  %v23142_v33 = vsel %vm3151_vm5, %v3155_v25, %v3156_v26  ;;  %v20357_v25 = vld [vmem:[#allocation5 + $0xb64] ss:$16 sps:$4 sm:$0xff]  }
 0x1f3   : > { %2979 = vmatprep.subr.bf16.mxu1 %v20225_v36  ;;  %v23146_v36 = vsel %vm3151_vm5, %v3161_v29, %v3162_v30  ;;  %v20360_v26 = vld [vmem:[#allocation5 + $0x944] ss:$16 sps:$4 sm:$0xff]  }
 0x1f4   : > { %2937 = vmatpush1.bf16.msra.mxu0 %v20220_v35  ;;  %v20286_v35 = vld [vmem:[#allocation5 + $0x8c0] ss:$16 sps:$4 sm:$0xff]   ;;  %v20363_v29 = vld [vmem:[#allocation5 + $0xb44] ss:$16 sps:$4 sm:$0xff]  }
 0x1f5   : > { %2938 = vmatprep.subr.bf16.mxu0 %v20228_v37  ;;  %v20294_v37 = vld [vmem:[#allocation5 + $0x8a4] ss:$16 sps:$4 sm:$0xff]  }
 0x1f6   : > { %2980 = vmatpush1.bf16.msra.mxu1 %v20223_v38  ;;  %v20292_v38 = vld [vmem:[#allocation5 + $0x8a0] ss:$16 sps:$4 sm:$0xff]   ;;  %v20366_v30 = vld [vmem:[#allocation5 + $0x924] ss:$16 sps:$4 sm:$0xff]  }
 0x1f7   : > { %2981 = vmatprep.subr.bf16.mxu1 %v20231_v40  ;;  %v20295_v40 = vld [vmem:[#allocation5 + $0xaa0] ss:$16 sps:$4 sm:$0xff]  }
 0x1f8   : > { %2939 = vmatpush1.bf16.msra.mxu0 %v20226_v39  ;;  %v20297_v39 = vld [vmem:[#allocation5 + $0xaa4] ss:$16 sps:$4 sm:$0xff]  }
 0x1f9   : > { %2940 = vmatprep.subr.bf16.mxu0 %v20234_v43  ;;  %v20298_v43 = vld [vmem:[#allocation5 + $0x880] ss:$16 sps:$4 sm:$0xff]  }
 0x1fa   : > { %2982 = vmatpush1.bf16.msra.mxu1 %v20229_v44  ;;  %v20303_v44 = vld [vmem:[#allocation5 + $0xa84] ss:$16 sps:$4 sm:$0xff]  }
 0x1fb   : > { %2983 = vmatprep.subr.bf16.mxu1 %v20237_v48  ;;  %v20301_v48 = vld [vmem:[#allocation5 + $0xa80] ss:$16 sps:$4 sm:$0xff]  }
 0x1fc   : > { %2941 = vmatpush2.bf16.msra.mxu0 %v20232_v45  ;;  %v20306_v45 = vld [vmem:[#allocation5 + $0x864] ss:$16 sps:$4 sm:$0xff]  }
 0x1fd   : > { %2942 = vmatprep.subr.bf16.mxu0 %v20240_v49  ;;  %v20309_v49 = vld [vmem:[#allocation5 + $0xa64] ss:$16 sps:$4 sm:$0xff]  }
 0x1fe   : > { %2984 = vmatpush2.bf16.msra.mxu1 %v20235_v50  ;;  %v20312_v50 = vld [vmem:[#allocation5 + $0x844] ss:$16 sps:$4 sm:$0xff]  }
 0x1ff   : > { %2985 = vmatprep.subr.bf16.mxu1 %v20243_v53  ;;  %v20310_v53 = vld [vmem:[#allocation5 + $0x840] ss:$16 sps:$4 sm:$0xff]  }
 0x200   : > { %2943 = vmatpush2.bf16.msra.mxu0 %v20238_v51  ;;  %v20307_v51 = vld [vmem:[#allocation5 + $0xa60] ss:$16 sps:$4 sm:$0xff]  }
 0x201   : > { %2944 = vmatprep.subr.bf16.mxu0 %v20246_v54  ;;  %v20315_v54 = vld [vmem:[#allocation5 + $0xa44] ss:$16 sps:$4 sm:$0xff]  }
 0x202   : > { %2986 = vmatpush2.bf16.msra.mxu1 %v20241_v55  ;;  %v20318_v55 = vld [vmem:[#allocation5 + $0x824] ss:$16 sps:$4 sm:$0xff]  }
 0x203   : > { %2987 = vmatprep.subr.bf16.mxu1 %v20249_v57  ;;  %v20316_v57 = vld [vmem:[#allocation5 + $0x820] ss:$16 sps:$4 sm:$0xff]  }
 0x204   : > { %2945 = vmatpush2.bf16.msra.mxu0 %v20244_v56  ;;  %v20313_v56 = vld [vmem:[#allocation5 + $0xa40] ss:$16 sps:$4 sm:$0xff]  }
 0x205   : > { %2946 = vmatprep.subr.bf16.mxu0 %v20252_v59  ;;  %v20321_v59 = vld [vmem:[#allocation5 + $0xa24] ss:$16 sps:$4 sm:$0xff]  }
 0x206   : > { %2988 = vmatpush2.bf16.msra.mxu1 %v20247_v60  ;;  %v20324_v60 = vld [vmem:[#allocation5 + $0x804] ss:$16 sps:$4 sm:$0xff]  }
 0x207   : > { %2989 = vmatprep.subr.bf16.mxu1 %v20255_v0  ;;  %v20322_v0 = vld [vmem:[#allocation5 + $0x800] ss:$16 sps:$4 sm:$0xff]  }
 0x208   : > { %2947 = vmatpush2.bf16.msra.mxu0 %v20250_v62  ;;  %v20319_v62 = vld [vmem:[#allocation5 + $0xa20] ss:$16 sps:$4 sm:$0xff]  }
 0x209   : > { %2948 = vmatprep.subr.bf16.mxu0 %v20258_v1  ;;  %v20327_v1 = vld [vmem:[#allocation5 + $0xa04] ss:$16 sps:$4 sm:$0xff]  }
 0x20a   : > { %2990 = vmatpush2.bf16.msra.mxu1 %v20253_v2  ;;  %v20330_v2 = vld [vmem:[#allocation5 + $0x9e4] ss:$16 sps:$4 sm:$0xff]  }
 0x20b   : > { %2991 = vmatprep.subr.bf16.mxu1 %v20261_v4  ;;  %v20328_v4 = vld [vmem:[#allocation5 + $0x9e0] ss:$16 sps:$4 sm:$0xff]  }
 0x20c   : > { %2949 = vmatpush2.bf16.msra.mxu0 %v20256_v3  ;;  %v20325_v3 = vld [vmem:[#allocation5 + $0xa00] ss:$16 sps:$4 sm:$0xff]  }
 0x20d   : > { %2950 = vmatprep.subr.bf16.mxu0 %v20264_v34  ;;  %v20333_v34 = vld [vmem:[#allocation5 + $0xbe4] ss:$16 sps:$4 sm:$0xff]  }
 0x20e   : > { %2992 = vmatpush2.bf16.msra.mxu1 %v20259_v5  ;;  %v20336_v5 = vld [vmem:[#allocation5 + $0x9c4] ss:$16 sps:$4 sm:$0xff]  }
 0x20f   : > { %2993 = vmatprep.subr.bf16.mxu1 %v20267_v7  ;;  %v20334_v7 = vld [vmem:[#allocation5 + $0x9c0] ss:$16 sps:$4 sm:$0xff]  }
 0x210   : > { %2951 = vmatpush2.bf16.msra.mxu0 %v20262_v6  ;;  %v20331_v6 = vld [vmem:[#allocation5 + $0xbe0] ss:$16 sps:$4 sm:$0xff]  }
 0x211   : > { %2952 = vmatprep.subr.bf16.mxu0 %v20270_v8  ;;  %v20339_v8 = vld [vmem:[#allocation5 + $0xbc4] ss:$16 sps:$4 sm:$0xff]  }
 0x212   : > { %2994 = vmatpush2.bf16.msra.mxu1 %v20265_v9  ;;  %v20342_v9 = vld [vmem:[#allocation5 + $0x9a4] ss:$16 sps:$4 sm:$0xff]  }
 0x213   : > { %2995 = vmatprep.subr.bf16.mxu1 %v20273_v13  ;;  %v20340_v13 = vld [vmem:[#allocation5 + $0x9a0] ss:$16 sps:$4 sm:$0xff]  }
 0x214   : > { %2953 = vmatpush2.bf16.msra.mxu0 %v20268_v41  ;;  %v20337_v41 = vld [vmem:[#allocation5 + $0xbc0] ss:$16 sps:$4 sm:$0xff]  }
 0x215   : > { %2954 = vmatprep.subr.bf16.mxu0 %v20276_v14  ;;  %v20345_v14 = vld [vmem:[#allocation5 + $0xba4] ss:$16 sps:$4 sm:$0xff]  }
 0x216   : > { %2996 = vmatpush2.bf16.msra.mxu1 %v20271_v16  ;;  %v20348_v16 = vld [vmem:[#allocation5 + $0x984] ss:$16 sps:$4 sm:$0xff]  }
 0x217   : > { %2997 = vmatprep.subr.bf16.mxu1 %v20279_v19  ;;  %v20351_v19 = vld [vmem:[#allocation5 + $0xb84] ss:$16 sps:$4 sm:$0xff]  }
 0x218   : > { %2955 = vmatpush2.bf16.msra.mxu0 %v20274_v18  ;;  %v20346_v18 = vld [vmem:[#allocation5 + $0x980] ss:$16 sps:$4 sm:$0xff]  }
 0x219   : > { %3808 = vmatprep.subr.bf16.mxu0 %v20282_v21  ;;  %v20349_v21 = vld [vmem:[#allocation5 + $0xb80] ss:$16 sps:$4 sm:$0xff]  }
 0x21a   : > { %2998 = vmatpush2.bf16.msra.mxu1 %v20277_v47  ;;  %v20352_v47 = vld [vmem:[#allocation5 + $0x960] ss:$16 sps:$4 sm:$0xff]  }
 0x21b   : > { %2957 = vmatmul.mubr.bf16.vlgmr.msra.gmra.mxu0 %v23077_v52  ;;  %3851 = vmatprep.subr.bf16.mxu1 %v20285_v61  ;;  %v20300_v52 = vld [vmem:[#allocation5 + $0x884] ss:$16 sps:$4 sm:$0xff]   ;;  %v20358_v61 = vld [vmem:[#allocation5 + $0x940] ss:$16 sps:$4 sm:$0xff]  }
 0x21c   : > { %3809 = vmatpush1.bf16.msra.mxu0 %v20280_v28  ;;  %3840 = vmatprep.mubr.bf16.mxu0 %v23142_v33  ;;  %v20355_v28 = vld [vmem:[#allocation5 + $0xb60] ss:$16 sps:$4 sm:$0xff]  }
 0x21d   : > { %3810 = vmatprep.subr.bf16.mxu0 %v20288_v31  ;;  %3000 = vmatmul.mubr.bf16.vlgmr.msra.gmra.mxu1 %v23093_v63  ;;  %v20304_v63 = vld [vmem:[#allocation5 + $0x860] ss:$16 sps:$4 sm:$0xff]   ;;  %v23151_v31 = vpop.f32.mrf.mxu0 }
 0x21e   : > { %3852 = vmatpush1.bf16.msra.mxu1 %v20283_v32  ;;  %3883 = vmatprep.mubr.bf16.mxu1 %v23146_v36  ;;  %v20361_v32 = vld [vmem:[#allocation5 + $0xb40] ss:$16 sps:$4 sm:$0xff]  }
 0x21f   : > { %3853 = vmatprep.subr.bf16.mxu1 %v20291_v11  ;;  %v20369_v11 = vld [vmem:[#allocation5 + $0xb24] ss:$16 sps:$4 sm:$0xff]  }
 0x220   : > { %3811 = vmatpush1.bf16.msra.mxu0 %v20286_v35  ;;  %v20364_v35 = vld [vmem:[#allocation5 + $0x920] ss:$16 sps:$4 sm:$0xff]  }
 0x221   : > { %3812 = vmatprep.subr.bf16.mxu0 %v20294_v37  ;;  %v20372_v37 = vld [vmem:[#allocation5 + $0x904] ss:$16 sps:$4 sm:$0xff]  }
 0x222   : > { %3854 = vmatpush1.bf16.msra.mxu1 %v20289_v22  ;;  %v23153_v22 = vpop.f32.mrf.mxu1 }
 0x223   : > { %3855 = vmatprep.subr.bf16.mxu1 %v20297_v39  ;;  %v23157_v39 = vpop.f32.mrf.mxu0 }
 0x224   : > { %3813 = vmatpush1.bf16.msra.mxu0 %v20292_v38  ;;  %v17408_v38 = vcombine.low %v23131_v10, %v23069_v42  ;;  %v20373_v42 = vld [vmem:[#allocation5 + $0xb00] ss:$16 sps:$4 sm:$0xff]   ;;  %v20376_v10 = vld [vmem:[#allocation5 + $0x8e8] ss:$16 sps:$4 sm:$0xff]  }
 0x225   : > { %3814 = vmatprep.subr.bf16.mxu0 %v20300_v52  ;;  %v20367_v52 = vld [vmem:[#allocation5 + $0xb20] ss:$16 sps:$4 sm:$0xff]  }
 0x226   : > { %3856 = vmatpush1.bf16.msra.mxu1 %v20295_v40  ;;  %v20370_v40 = vld [vmem:[#allocation5 + $0x900] ss:$16 sps:$4 sm:$0xff]  }
 0x227   : > { %3857 = vmatprep.subr.bf16.mxu1 %v20303_v44  ;;  %v17410_v44 = vcombine.low %v23133_v15, %v23084_v58 }
 0x228   : > { %3815 = vmatpush1.bf16.msra.mxu0 %v20298_v43  ;;  %v20375_v43 = vld [vmem:[#allocation5 + $0xb04] ss:$16 sps:$4 sm:$0xff]  }
 0x229   : > { %3816 = vmatprep.subr.bf16.mxu0 %v20306_v45  ;;  %v20378_v45 = vld [vmem:[#allocation5 + $0x8ec] ss:$16 sps:$4 sm:$0xff]  }
 0x22a   : > { %3858 = vmatpush1.bf16.msra.mxu1 %v20301_v48  ;;  %v23161_v48 = vpop.f32.mrf.mxu1 }
 0x22b   : > { %3859 = vmatprep.subr.bf16.mxu1 %v20309_v49  ;;  %v3153_v49 = vrot.slane %v23101_v12, 1  ;;  %v20379_v12 = vld [vmem:[#allocation5 + $0xae8] ss:$16 sps:$4 sm:$0xff]  }
 0x22c   : > { %3817 = vmatpush1.bf16.msra.mxu0 %v20304_v63  ;;  %v3152_v63 = vrot.slane %v17408_v38, 1  ;;  %v23167_v58 = vpop.f32.mrf.mxu1  ;;  %v20421_v38 = vld [vmem:[#allocation5 + $0xa08] ss:$16 sps:$4 sm:$0xff]  }
 0x22d   : > { %3818 = vmatprep.subr.bf16.mxu0 %v20312_v50  ;;  %v23164_v50 = vpop.f32.mrf.mxu0 }
 0x22e   : > { %3860 = vmatpush1.bf16.msra.mxu1 %v20307_v51  ;;  %v20381_v51 = vld [vmem:[#allocation5 + $0xaec] ss:$16 sps:$4 sm:$0xff]   ;;  %v23170_v15 = vsel %vm3151_vm5, %v3152_v63, %v3153_v49 }
 0x22f   : > { %3861 = vmatprep.subr.bf16.mxu1 %v20315_v54  ;;  %v3159_v54 = vrot.slane %v23109_v24, 1  ;;  %v20435_v63 = vld [vmem:[#allocation5 + $0xbcc] ss:$16 sps:$4 sm:$0xff]  }
 0x230   : > { %3819 = vmatpush1.bf16.msra.mxu0 %v20310_v53  ;;  %v3158_v53 = vrot.slane %v17410_v44, 1  ;;  %v20427_v44 = vld [vmem:[#allocation5 + $0xbe8] ss:$16 sps:$4 sm:$0xff]   ;;  %v20438_v49 = vld [vmem:[#allocation5 + $0x9ac] ss:$16 sps:$4 sm:$0xff]  }
 0x231   : > { %3820 = vmatprep.subr.bf16.mxu0 %v20318_v55  ;;  %v20384_v55 = vld [vmem:[#allocation5 + $0x8cc] ss:$16 sps:$4 sm:$0xff]  }
 0x232   : > { %3862 = vmatpush1.bf16.msra.mxu1 %v20313_v56  ;;  %v23172_v56 = vpop.f32.mrf.mxu0  ;;  %v23176_v24 = vsel %vm3151_vm5, %v3158_v53, %v3159_v54  ;;  %v20444_v53 = vld [vmem:[#allocation5 + $0x98c] ss:$16 sps:$4 sm:$0xff]   ;;  %v20439_v54 = vld [vmem:[#allocation5 + $0xba8] ss:$16 sps:$4 sm:$0xff]  }
 0x233   : > { %3863 = vmatprep.subr.bf16.mxu1 %v20321_v59  ;;  %v20387_v59 = vld [vmem:[#allocation5 + $0xacc] ss:$16 sps:$4 sm:$0xff]  }
 0x234   : > { %3821 = vmatpush1.bf16.msra.mxu0 %v20316_v57  ;;  %v20382_v57 = vld [vmem:[#allocation5 + $0x8c8] ss:$16 sps:$4 sm:$0xff]  }
 0x235   : > { %3822 = vmatprep.subr.bf16.mxu0 %v20324_v60 }
 0x236   : > { %3864 = vmatpush1.bf16.msra.mxu1 %v20319_v62  ;;  %v20390_v62 = vld [vmem:[#allocation5 + $0x8ac] ss:$16 sps:$4 sm:$0xff]  }
 0x237   : > { %3865 = vmatprep.subr.bf16.mxu1 %v20327_v1 }
 0x238   : > { %3823 = vmatpush1.bf16.msra.mxu0 %v20322_v0  ;;  %v23178_v0 = vpop.f32.mrf.mxu1 }
 0x239   : > { %3824 = vmatprep.subr.bf16.mxu0 %v20330_v2  ;;  %v20385_v2 = vld [vmem:[#allocation5 + $0xac8] ss:$16 sps:$4 sm:$0xff]  }
 0x23a   : > { %3866 = vmatpush1.bf16.msra.mxu1 %v20325_v3 }
 0x23b   : > { %3867 = vmatprep.subr.bf16.mxu1 %v20333_v34  ;;  %v20393_v34 = vld [vmem:[#allocation5 + $0xaac] ss:$16 sps:$4 sm:$0xff]  }
 0x23c   : > { %3825 = vmatpush2.bf16.msra.mxu0 %v20328_v4  ;;  %v20388_v4 = vld [vmem:[#allocation5 + $0x8a8] ss:$16 sps:$4 sm:$0xff]  }
 0x23d   : > { %3826 = vmatprep.subr.bf16.mxu0 %v20336_v5 }
 0x23e   : > { %3868 = vmatpush2.bf16.msra.mxu1 %v20331_v6  ;;  %v20396_v6 = vld [vmem:[#allocation5 + $0x88c] ss:$16 sps:$4 sm:$0xff]  }
 0x23f   : > { %3869 = vmatprep.subr.bf16.mxu1 %v20339_v8 }
 0x240   : > { %3827 = vmatpush2.bf16.msra.mxu0 %v20334_v7 }
 0x241   : > { %3828 = vmatprep.subr.bf16.mxu0 %v20342_v9 }
 0x242   : > { %3870 = vmatpush2.bf16.msra.mxu1 %v20337_v41  ;;  %v20391_v41 = vld [vmem:[#allocation5 + $0xaa8] ss:$16 sps:$4 sm:$0xff]  }
 0x243   : > { %3871 = vmatprep.subr.bf16.mxu1 %v20345_v14  ;;  %v20399_v14 = vld [vmem:[#allocation5 + $0xa8c] ss:$16 sps:$4 sm:$0xff]  }
 0x244   : > { %3829 = vmatpush2.bf16.msra.mxu0 %v20340_v13  ;;  %v20394_v13 = vld [vmem:[#allocation5 + $0x888] ss:$16 sps:$4 sm:$0xff]  }
 0x245   : > { %3830 = vmatprep.subr.bf16.mxu0 %v20348_v16 }
 0x246   : > { %3872 = vmatpush2.bf16.msra.mxu1 %v20343_v17  ;;  %v20402_v17 = vld [vmem:[#allocation5 + $0x86c] ss:$16 sps:$4 sm:$0xff]  }
 0x247   : > { %3873 = vmatprep.subr.bf16.mxu1 %v20351_v19  ;;  %v20405_v19 = vld [vmem:[#allocation5 + $0xa6c] ss:$16 sps:$4 sm:$0xff]  }
 0x248   : > { %3831 = vmatpush2.bf16.msra.mxu0 %v20346_v18  ;;  %v20400_v18 = vld [vmem:[#allocation5 + $0x868] ss:$16 sps:$4 sm:$0xff]  }
 0x249   : > { %3832 = vmatprep.subr.bf16.mxu0 %v20354_v20  ;;  %v20408_v20 = vld [vmem:[#allocation5 + $0x84c] ss:$16 sps:$4 sm:$0xff]  }
 0x24a   : > { %3874 = vmatpush2.bf16.msra.mxu1 %v20349_v21  ;;  %v20403_v21 = vld [vmem:[#allocation5 + $0xa68] ss:$16 sps:$4 sm:$0xff]  }
 0x24b   : > { %3875 = vmatprep.subr.bf16.mxu1 %v20357_v25  ;;  %v20411_v25 = vld [vmem:[#allocation5 + $0xa4c] ss:$16 sps:$4 sm:$0xff]  }
 0x24c   : > { %3833 = vmatpush2.bf16.msra.mxu0 %v20352_v47  ;;  %v20406_v47 = vld [vmem:[#allocation5 + $0x848] ss:$16 sps:$4 sm:$0xff]  }
 0x24d   : > { %3834 = vmatprep.subr.bf16.mxu0 %v20360_v26  ;;  %v20414_v26 = vld [vmem:[#allocation5 + $0x82c] ss:$16 sps:$4 sm:$0xff]  }
 0x24e   : > { %3876 = vmatpush2.bf16.msra.mxu1 %v20355_v28  ;;  %v20409_v28 = vld [vmem:[#allocation5 + $0xa48] ss:$16 sps:$4 sm:$0xff]  }
 0x24f   : > { %3877 = vmatprep.subr.bf16.mxu1 %v20363_v29  ;;  %v20417_v29 = vld [vmem:[#allocation5 + $0xa2c] ss:$16 sps:$4 sm:$0xff]  }
 0x250   : > { %3835 = vmatpush2.bf16.msra.mxu0 %v20358_v61  ;;  %v20412_v61 = vld [vmem:[#allocation5 + $0x828] ss:$16 sps:$4 sm:$0xff]  }
 0x251   : > { %3836 = vmatprep.subr.bf16.mxu0 %v20366_v30  ;;  %v20420_v30 = vld [vmem:[#allocation5 + $0x80c] ss:$16 sps:$4 sm:$0xff]  }
 0x252   : > { %3878 = vmatpush2.bf16.msra.mxu1 %v20361_v32  ;;  %v20415_v32 = vld [vmem:[#allocation5 + $0xa28] ss:$16 sps:$4 sm:$0xff]  }
 0x253   : > { %3879 = vmatprep.subr.bf16.mxu1 %v20369_v11  ;;  %v20423_v11 = vld [vmem:[#allocation5 + $0xa0c] ss:$16 sps:$4 sm:$0xff]  }
 0x254   : > { %3837 = vmatpush2.bf16.msra.mxu0 %v20364_v35  ;;  %v20418_v35 = vld [vmem:[#allocation5 + $0x808] ss:$16 sps:$4 sm:$0xff]  }
 0x255   : > { %3838 = vmatprep.subr.bf16.mxu0 %v20372_v37  ;;  %v20426_v37 = vld [vmem:[#allocation5 + $0x9ec] ss:$16 sps:$4 sm:$0xff]  }
 0x256   : > { %3880 = vmatpush2.bf16.msra.mxu1 %v20367_v52  ;;  %v20424_v52 = vld [vmem:[#allocation5 + $0x9e8] ss:$16 sps:$4 sm:$0xff]  }
 0x257   : > { %3881 = vmatprep.subr.bf16.mxu1 %v20375_v43  ;;  %v20432_v43 = vld [vmem:[#allocation5 + $0x9cc] ss:$16 sps:$4 sm:$0xff]  }
 0x258   : > { %3839 = vmatpush2.bf16.msra.mxu0 %v20370_v40  ;;  %v20429_v40 = vld [vmem:[#allocation5 + $0xbec] ss:$16 sps:$4 sm:$0xff]  }
 0x259   : > { %3894 = vmatprep.subr.bf16.mxu0 %v20378_v45  ;;  %v20430_v45 = vld [vmem:[#allocation5 + $0x9c8] ss:$16 sps:$4 sm:$0xff]  }
 0x25a   : > { %3882 = vmatpush2.bf16.msra.mxu1 %v20373_v42  ;;  %v20433_v42 = vld [vmem:[#allocation5 + $0xbc8] ss:$16 sps:$4 sm:$0xff]  }
 0x25b   : > { %v2142_v60 = vpop.f32.mrf.mxu0  ;;  %3841 = vmatmul.mubr.bf16.vlgmr.msra.gmra.mxu0 %v23170_v15  ;;  %3937 = vmatprep.subr.bf16.mxu1 %v20381_v51  ;;  %v20441_v51 = vld [vmem:[#allocation5 + $0xbac] ss:$16 sps:$4 sm:$0xff]  }
 0x25c   : > { %3895 = vmatpush1.bf16.msra.mxu0 %v20376_v10  ;;  %3926 = vmatprep.mubr.bf16.mxu0 %v23142_v33  ;;  %v20436_v10 = vld [vmem:[#allocation5 + $0x9a8] ss:$16 sps:$4 sm:$0xff]  }
 0x25d   : > { %v2144_v1 = vpop.f32.mrf.mxu0  ;;  %3896 = vmatprep.subr.bf16.mxu0 %v20384_v55  ;;  %v2185_v3 = vpop.f32.mrf.mxu1  ;;  %3884 = vmatmul.mubr.bf16.vlgmr.msra.gmra.mxu1 %v23176_v24  ;;  %v20442_v55 = vld [vmem:[#allocation5 + $0x988] ss:$16 sps:$4 sm:$0xff]  }
 0x25e   : > { %v23182_v5 = vadd.f32 %v2185_v3, %v2142_v60  ;;  %3938 = vmatpush1.bf16.msra.mxu1 %v20379_v12  ;;  %3969 = vmatprep.mubr.bf16.mxu1 %v23146_v36  ;;  %v20397_v36 = vld [vmem:[#allocation5 + $0xa88] ss:$16 sps:$4 sm:$0xff]   ;;  %v20447_v12 = vld [vmem:[#allocation5 + $0xb8c] ss:$16 sps:$4 sm:$0xff]  }
 0x25f   : > { %v2187_v7 = vpop.f32.mrf.mxu1  ;;  %v2146_v8 = vpop.f32.mrf.mxu0  ;;  %3939 = vmatprep.subr.bf16.mxu1 %v20387_v59  ;;  %v20445_v59 = vld [vmem:[#allocation5 + $0xb88] ss:$16 sps:$4 sm:$0xff]  }
 0x260   : > { %3897 = vmatpush1.bf16.msra.mxu0 %v20382_v57  ;;  %v23185_v9 = vadd.f32 %v2187_v7, %v2144_v1  ;;  %v20450_v57 = vld [vmem:[#allocation5 + $0x96c] ss:$16 sps:$4 sm:$0xff]   ;;  %v20448_v60 = vld [vmem:[#allocation5 + $0x968] ss:$16 sps:$4 sm:$0xff]  }
 0x261   : > { %3898 = vmatprep.subr.bf16.mxu0 %v20390_v62  ;;  %v2189_v33 = vpop.f32.mrf.mxu1  ;;  %v20453_v62 = vld [vmem:[#allocation5 + $0xb6c] ss:$16 sps:$4 sm:$0xff]   ;;  %v20454_v3 = vld [vmem:[#allocation5 + $0x948] ss:$16 sps:$4 sm:$0xff]  }
 0x262   : > { %v23187_v16 = vadd.f32 %v2189_v33, %v2146_v8  ;;  %3940 = vmatpush1.bf16.msra.mxu1 %v20385_v2  ;;  %v20456_v1 = vld [vmem:[#allocation5 + $0x94c] ss:$16 sps:$4 sm:$0xff]   ;;  %v20451_v2 = vld [vmem:[#allocation5 + $0xb68] ss:$16 sps:$4 sm:$0xff]  }
 0x263   : > { %3941 = vmatprep.subr.bf16.mxu1 %v20393_v34  ;;  %v20462_v34 = vld [vmem:[#allocation5 + $0x92c] ss:$16 sps:$4 sm:$0xff]   ;;  %v20460_v7 = vld [vmem:[#allocation5 + $0x928] ss:$16 sps:$4 sm:$0xff]  }
 0x264   : > { %3899 = vmatpush1.bf16.msra.mxu0 %v20388_v4  ;;  %v20459_v4 = vld [vmem:[#allocation5 + $0xb4c] ss:$16 sps:$4 sm:$0xff]   ;;  %v20463_v33 = vld [vmem:[#allocation5 + $0xb28] ss:$16 sps:$4 sm:$0xff]  }
 0x265   : > { %3900 = vmatprep.subr.bf16.mxu0 %v20396_v6  ;;  %v20457_v6 = vld [vmem:[#allocation5 + $0xb48] ss:$16 sps:$4 sm:$0xff]   ;;  %v20465_v8 = vld [vmem:[#allocation5 + $0xb2c] ss:$16 sps:$4 sm:$0xff]  }
 0x266   : > { %3942 = vmatpush1.bf16.msra.mxu1 %v20391_v41  ;;  %v20468_v41 = vld [vmem:[#allocation5 + $0x90c] ss:$16 sps:$4 sm:$0xff]  }
 0x267   : > { %3943 = vmatprep.subr.bf16.mxu1 %v20399_v14  ;;  %v20471_v14 = vld [vmem:[#allocation5 + $0xb0c] ss:$16 sps:$4 sm:$0xff]  }
 0x268   : > { %3901 = vmatpush1.bf16.msra.mxu0 %v20394_v13  ;;  %v20466_v13 = vld [vmem:[#allocation5 + $0x908] ss:$16 sps:$4 sm:$0xff]  }
 0x269   : > { %3902 = vmatprep.subr.bf16.mxu0 %v20402_v17  ;;  %v20474_v17 = vld [vmem:[#allocation10 + $0x4e4] ss:$16 sps:$4 sm:$0xff]  }
 0x26a   : > { %3944 = vmatpush1.bf16.msra.mxu1 %v20397_v36  ;;  %v20469_v36 = vld [vmem:[#allocation5 + $0xb08] ss:$16 sps:$4 sm:$0xff]  }
 0x26b   : > { %3945 = vmatprep.subr.bf16.mxu1 %v20405_v19  ;;  %v20477_v19 = vld [vmem:[#allocation10 + $0x4c4] ss:$16 sps:$4 sm:$0xff]  }
 0x26c   : > { %3903 = vmatpush1.bf16.msra.mxu0 %v20400_v18  ;;  %v20472_v18 = vld [vmem:[#allocation10 + $0x4e0] ss:$16 sps:$4 sm:$0xff]  }
 0x26d   : > { %3904 = vmatprep.subr.bf16.mxu0 %v20408_v20  ;;  %v20475_v20 = vld [vmem:[#allocation10 + $0x4c0] ss:$16 sps:$4 sm:$0xff]  }
 0x26e   : > { %3946 = vmatpush1.bf16.msra.mxu1 %v20403_v21  ;;  %v20480_v21 = vld [vmem:[#allocation10 + $0x4a4] ss:$16 sps:$4 sm:$0xff]  }
 0x26f   : > { %3947 = vmatprep.subr.bf16.mxu1 %v20411_v25  ;;  %v20483_v25 = vld [vmem:[#allocation10 + $0x484] ss:$16 sps:$4 sm:$0xff]  }
 0x270   : > { %3905 = vmatpush1.bf16.msra.mxu0 %v20406_v47  ;;  %v20478_v47 = vld [vmem:[#allocation10 + $0x4a0] ss:$16 sps:$4 sm:$0xff]  }
 0x271   : > { %3906 = vmatprep.subr.bf16.mxu0 %v20414_v26  ;;  %v20481_v26 = vld [vmem:[#allocation10 + $0x480] ss:$16 sps:$4 sm:$0xff]  }
 0x272   : > { %3948 = vmatpush1.bf16.msra.mxu1 %v20409_v28  ;;  %v20486_v28 = vld [vmem:[#allocation10 + $0x464] ss:$16 sps:$4 sm:$0xff]  }
 0x273   : > { %3949 = vmatprep.subr.bf16.mxu1 %v20417_v29  ;;  %v20489_v29 = vld [vmem:[#allocation10 + $0x444] ss:$16 sps:$4 sm:$0xff]  }
 0x274   : > { %3907 = vmatpush1.bf16.msra.mxu0 %v20412_v61  ;;  %v20484_v61 = vld [vmem:[#allocation10 + $0x460] ss:$16 sps:$4 sm:$0xff]  }
 0x275   : > { %3908 = vmatprep.subr.bf16.mxu0 %v20420_v30  ;;  %v20487_v30 = vld [vmem:[#allocation10 + $0x440] ss:$16 sps:$4 sm:$0xff]  }
 0x276   : > { %3950 = vmatpush1.bf16.msra.mxu1 %v20415_v32  ;;  %v20490_v32 = vld [vmem:[#allocation10 + $0x420] ss:$16 sps:$4 sm:$0xff]  }
 0x277   : > { %3951 = vmatprep.subr.bf16.mxu1 %v20423_v11  ;;  %v20498_v11 = vld [vmem:[#allocation10 + $0x5e4] ss:$16 sps:$4 sm:$0xff]  }
 0x278   : > { %3909 = vmatpush1.bf16.msra.mxu0 %v20418_v35  ;;  %v20493_v35 = vld [vmem:[#allocation10 + $0x400] ss:$16 sps:$4 sm:$0xff]  }
 0x279   : > { %3910 = vmatprep.subr.bf16.mxu0 %v20426_v37  ;;  %v20496_v37 = vld [vmem:[#allocation10 + $0x5e0] ss:$16 sps:$4 sm:$0xff]  }
 0x27a   : > { %3952 = vmatpush1.bf16.msra.mxu1 %v20421_v38  ;;  %v20501_v38 = vld [vmem:[#allocation10 + $0x5c4] ss:$16 sps:$4 sm:$0xff]  }
 0x27b   : > { %3953 = vmatprep.subr.bf16.mxu1 %v20429_v40  ;;  %v20504_v40 = vld [vmem:[#allocation10 + $0x5a4] ss:$16 sps:$4 sm:$0xff]  }
 0x27c   : > { %3911 = vmatpush2.bf16.msra.mxu0 %v20424_v52  ;;  %v20499_v52 = vld [vmem:[#allocation10 + $0x5c0] ss:$16 sps:$4 sm:$0xff]  }
 0x27d   : > { %3912 = vmatprep.subr.bf16.mxu0 %v20432_v43  ;;  %v20502_v43 = vld [vmem:[#allocation10 + $0x5a0] ss:$16 sps:$4 sm:$0xff]  }
 0x27e   : > { %3954 = vmatpush2.bf16.msra.mxu1 %v20427_v44  ;;  %v20507_v44 = vld [vmem:[#allocation10 + $0x584] ss:$16 sps:$4 sm:$0xff]  }
 0x27f   : > { %3955 = vmatprep.subr.bf16.mxu1 %v20435_v63  ;;  %v20510_v63 = vld [vmem:[#allocation10 + $0x564] ss:$16 sps:$4 sm:$0xff]  }
 0x280   : > { %3913 = vmatpush2.bf16.msra.mxu0 %v20430_v45  ;;  %v20505_v45 = vld [vmem:[#allocation10 + $0x580] ss:$16 sps:$4 sm:$0xff]  }
 0x281   : > { %3914 = vmatprep.subr.bf16.mxu0 %v20438_v49  ;;  %v20523_v49 = vld [vmem:[#allocation10 + $0x6e4] ss:$16 sps:$4 sm:$0xff]  }
 0x282   : > { %3956 = vmatpush2.bf16.msra.mxu1 %v20433_v42  ;;  %v20508_v42 = vld [vmem:[#allocation10 + $0x560] ss:$16 sps:$4 sm:$0xff]  }
 0x283   : > { %3957 = vmatprep.subr.bf16.mxu1 %v20441_v51  ;;  %v20513_v51 = vld [vmem:[#allocation10 + $0x544] ss:$16 sps:$4 sm:$0xff]  }
 0x284   : > { %3915 = vmatpush2.bf16.msra.mxu0 %v20436_v10  ;;  %v20521_v10 = vld [vmem:[#allocation10 + $0x6e0] ss:$16 sps:$4 sm:$0xff]  }
 0x285   : > { %3916 = vmatprep.subr.bf16.mxu0 %v20444_v53  ;;  %v20528_v53 = vld [vmem:[#allocation10 + $0x6c0] ss:$16 sps:$4 sm:$0xff]  }
 0x286   : > { %3958 = vmatpush2.bf16.msra.mxu1 %v20439_v54  ;;  %v20530_v54 = vld [vmem:[#allocation10 + $0x6c4] ss:$16 sps:$4 sm:$0xff]  }
 0x287   : > { %3959 = vmatprep.subr.bf16.mxu1 %v20447_v12  ;;  %v23191_v12 = vpop.f32.mrf.mxu0 }
 0x288   : > { %3917 = vmatpush2.bf16.msra.mxu0 %v20442_v55  ;;  %v20511_v55 = vld [vmem:[#allocation10 + $0x540] ss:$16 sps:$4 sm:$0xff]  }
 0x289   : > { %3918 = vmatprep.subr.bf16.mxu0 %v20450_v57 }
 0x28a   : > { %3960 = vmatpush2.bf16.msra.mxu1 %v20445_v59  ;;  %v20516_v59 = vld [vmem:[#allocation10 + $0x524] ss:$16 sps:$4 sm:$0xff]  }
 0x28b   : > { %3961 = vmatprep.subr.bf16.mxu1 %v20453_v62  ;;  %v20536_v62 = vld [vmem:[#allocation10 + $0x6a4] ss:$16 sps:$4 sm:$0xff]  }
 0x28c   : > { %3919 = vmatpush2.bf16.msra.mxu0 %v20448_v60  ;;  %v20534_v60 = vld [vmem:[#allocation10 + $0x6a0] ss:$16 sps:$4 sm:$0xff]  }
 0x28d   : > { %3920 = vmatprep.subr.bf16.mxu0 %v20456_v1  ;;  %v23195_v1 = vpop.f32.mrf.mxu1 }
 0x28e   : > { %3962 = vmatpush2.bf16.msra.mxu1 %v20451_v2  ;;  %v20514_v2 = vld [vmem:[#allocation10 + $0x520] ss:$16 sps:$4 sm:$0xff]  }
 0x28f   : > { %3963 = vmatprep.subr.bf16.mxu1 %v20459_v4 }
 0x290   : > { %3921 = vmatpush2.bf16.msra.mxu0 %v20454_v3 }
 0x291   : > { %3922 = vmatprep.subr.bf16.mxu0 %v20462_v34  ;;  %v20519_v34 = vld [vmem:[#allocation10 + $0x504] ss:$16 sps:$4 sm:$0xff]  }
 0x292   : > { %3964 = vmatpush2.bf16.msra.mxu1 %v20457_v6  ;;  %v20540_v6 = vld [vmem:[#allocation10 + $0x680] ss:$16 sps:$4 sm:$0xff]  }
 0x293   : > { %3965 = vmatprep.subr.bf16.mxu1 %v20465_v8  ;;  %v20517_v8 = vld [vmem:[#allocation10 + $0x500] ss:$16 sps:$4 sm:$0xff]  }
 0x294   : > { %3923 = vmatpush2.bf16.msra.mxu0 %v20460_v7  ;;  %v20542_v7 = vld [vmem:[#allocation10 + $0x684] ss:$16 sps:$4 sm:$0xff]  }
 0x295   : > { %3924 = vmatprep.subr.bf16.mxu0 %v20468_v41 }
 0x296   : > { %3966 = vmatpush2.bf16.msra.mxu1 %v20463_v33 }
 0x297   : > { %3967 = vmatprep.subr.bf16.mxu1 %v20471_v14  ;;  %v20546_v14 = vld [vmem:[#allocation10 + $0x660] ss:$16 sps:$4 sm:$0xff]  }
 0x298   : > { %3925 = vmatpush2.bf16.msra.mxu0 %v20466_v13  ;;  %v20526_v13 = vld [vmem:[#allocation10 + $0x4ec] ss:$16 sps:$4 sm:$0xff]  }
 0x299   : > { %5110 = vmatprep.subr.bf16.mxu0 %v20474_v17  ;;  %v20548_v17 = vld [vmem:[#allocation10 + $0x664] ss:$16 sps:$4 sm:$0xff]  }
 0x29a   : > { %3968 = vmatpush2.bf16.msra.mxu1 %v20469_v36 }
 0x29b   : > { %3927 = vmatmul.mubr.bf16.vlgmr.msra.gmra.mxu0 %v23170_v15  ;;  %v20492_v15 = vld [vmem:[#allocation10 + $0x424] ss:$16 sps:$4 sm:$0xff]   ;;  %5153 = vmatprep.subr.bf16.mxu1 %v20523_v49  ;;  %v23193_v57 = vpop.f32.mrf.mxu0 }
 0x29c   : > { %5111 = vmatpush1.bf16.msra.mxu0 %v20472_v18  ;;  %v20596_v49 = vld [vmem:[#allocation10 + $0x764] ss:$16 sps:$4 sm:$0xff]  }
 0x29d   : > { %5112 = vmatprep.subr.bf16.mxu0 %v20477_v19  ;;  %3970 = vmatmul.mubr.bf16.vlgmr.msra.gmra.mxu1 %v23176_v24  ;;  %v20495_v24 = vld [vmem:[#allocation10 + $0x404] ss:$16 sps:$4 sm:$0xff]   ;;  %v23197_v3 = vpop.f32.mrf.mxu1  ;;  %v23199_v4 = vpop.f32.mrf.mxu0  ;;  %v20552_v19 = vld [vmem:[#allocation10 + $0x640] ss:$16 sps:$4 sm:$0xff]  }
 0x29e   : > { %5154 = vmatpush1.bf16.msra.mxu1 %v20521_v10  ;;  %v20600_v10 = vld [vmem:[#allocation10 + $0x740] ss:$16 sps:$4 sm:$0xff]  }
 0x29f   : > { %5155 = vmatprep.subr.bf16.mxu1 %v20530_v54  ;;  %v23201_v41 = vpop.f32.mrf.mxu1  ;;  %v23203_v33 = vpop.f32.mrf.mxu0  ;;  %v20608_v54 = vld [vmem:[#allocation10 + $0x724] ss:$16 sps:$4 sm:$0xff]  }
 0x2a0   : > { %5113 = vmatpush1.bf16.msra.mxu0 %v20475_v20  ;;  %v20554_v20 = vld [vmem:[#allocation10 + $0x644] ss:$16 sps:$4 sm:$0xff]  }
 0x2a1   : > { %5114 = vmatprep.subr.bf16.mxu0 %v20480_v21  ;;  %v23205_v36 = vpop.f32.mrf.mxu1  ;;  %v23207_v18 = vpop.f32.mrf.mxu0 }
 0x2a2   : > { %5156 = vmatpush1.bf16.msra.mxu1 %v20528_v53  ;;  %v20606_v53 = vld [vmem:[#allocation10 + $0x720] ss:$16 sps:$4 sm:$0xff]  }
 0x2a3   : > { %5157 = vmatprep.subr.bf16.mxu1 %v20536_v62  ;;  %v3990_v62 = vlaneseq }
 0x2a4   : > { %5115 = vmatpush1.bf16.msra.mxu0 %v20478_v47  ;;  %v23209_v47 = vpop.f32.mrf.mxu1 }
 0x2a5   : > { %5116 = vmatprep.subr.bf16.mxu0 %v20483_v25 }
 0x2a6   : > { %5158 = vmatpush1.bf16.msra.mxu1 %v20534_v60  ;;  %v20621_v60 = vld [vmem:[#allocation10 + $0x6ec] ss:$16 sps:$4 sm:$0xff]  }
 0x2a7   : > { %5159 = vmatprep.subr.bf16.mxu1 %v20542_v7  ;;  %v2102_v7 = vadd.f32 %v23161_v48, %v23157_v39  ;;  %v2106_v39 = vadd.f32 %v23178_v0, %v23172_v56 }
 0x2a8   : > { %5117 = vmatpush1.bf16.msra.mxu0 %v20481_v26 }
 0x2a9   : > { %5118 = vmatprep.subr.bf16.mxu0 %v20486_v28 }
 0x2aa   : > { %5160 = vmatpush1.bf16.msra.mxu1 %v20540_v6 }
 0x2ab   : > { %5161 = vmatprep.subr.bf16.mxu1 %v20548_v17 }
 0x2ac   : > { %5119 = vmatpush1.bf16.msra.mxu0 %v20484_v61  ;;  %v20560_v61 = vld [vmem:[#allocation10 + $0x624] ss:$16 sps:$4 sm:$0xff]  }
 0x2ad   : > { %5120 = vmatprep.subr.bf16.mxu0 %v20489_v29 }
 0x2ae   : > { %5162 = vmatpush1.bf16.msra.mxu1 %v20546_v14 }
 0x2af   : > { %5163 = vmatprep.subr.bf16.mxu1 %v20554_v20  ;;  %v2875_v20 = vadd.f32 %v23199_v4, %v2102_v7 }
 0x2b0   : > { %5121 = vmatpush1.bf16.msra.mxu0 %v20487_v30 }
 0x2b1   : > { %5122 = vmatprep.subr.bf16.mxu0 %v20492_v15  ;;  %v20558_v15 = vld [vmem:[#allocation10 + $0x620] ss:$16 sps:$4 sm:$0xff]   ;;  %v2918_v4 = vadd.f32 %v23201_v41, %v2875_v20 }
 0x2b2   : > { %5164 = vmatpush1.bf16.msra.mxu1 %v20552_v19  ;;  %v2104_v19 = vadd.f32 %v23167_v58, %v23164_v50  ;;  %v22064_v20 = vld [vmem:[#allocation2 + $0x18] sm:$0xff] }
 0x2b3   : > { %5165 = vmatprep.subr.bf16.mxu1 %v20560_v61 }
 0x2b4   : > { %5123 = vmatpush1.bf16.msra.mxu0 %v20490_v32  ;;  %v2877_v48 = vadd.f32 %v23203_v33, %v2104_v19  ;;  %v4123_v19 = vld [vmem:[#allocation2 + $0x8] sm:$0x11] }
 0x2b5   : > { %5124 = vmatprep.subr.bf16.mxu0 %v20495_v24 }
 0x2b6   : > { %5166 = vmatpush1.bf16.msra.mxu1 %v20558_v15 }
 0x2b8   : > { %5125 = vmatpush1.bf16.msra.mxu0 %v20493_v35 }
 0x2b9   : > { %5126 = vmatprep.subr.bf16.mxu0 %v20498_v11  ;;  %v20566_v11 = vld [vmem:[#allocation10 + $0x604] ss:$16 sps:$4 sm:$0xff]  }
 0x2ba   : > { %5167 = vmatprep.subr.bf16.mxu1 %v20566_v11 }
 0x2bc   : > { %5127 = vmatpush2.bf16.msra.mxu0 %v20496_v37 }
 0x2bd   : > { %5128 = vmatprep.subr.bf16.mxu0 %v20501_v38  ;;  %v20572_v38 = vld [vmem:[#allocation10 + $0x7e4] ss:$16 sps:$4 sm:$0xff]  }
 0x2c0   : > { %5129 = vmatpush2.bf16.msra.mxu0 %v20499_v52  ;;  %v20570_v52 = vld [vmem:[#allocation10 + $0x7e0] ss:$16 sps:$4 sm:$0xff]  }
 0x2c1   : > { %5130 = vmatprep.subr.bf16.mxu0 %v20504_v40  ;;  %v20578_v40 = vld [vmem:[#allocation10 + $0x7c4] ss:$16 sps:$4 sm:$0xff]  }
 0x2c4   : > { %5131 = vmatpush2.bf16.msra.mxu0 %v20502_v43  ;;  %v20576_v43 = vld [vmem:[#allocation10 + $0x7c0] ss:$16 sps:$4 sm:$0xff]  }
 0x2c5   : > { %5132 = vmatprep.subr.bf16.mxu0 %v20507_v44  ;;  %v20584_v44 = vld [vmem:[#allocation10 + $0x7a4] ss:$16 sps:$4 sm:$0xff]  }
 0x2c8   : > { %5133 = vmatpush2.bf16.msra.mxu0 %v20505_v45  ;;  %v20582_v45 = vld [vmem:[#allocation10 + $0x7a0] ss:$16 sps:$4 sm:$0xff]  }
 0x2c9   : > { %5134 = vmatprep.subr.bf16.mxu0 %v20510_v63  ;;  %v20588_v63 = vld [vmem:[#allocation10 + $0x780] ss:$16 sps:$4 sm:$0xff]  }
 0x2cc   : > { %5135 = vmatpush2.bf16.msra.mxu0 %v20508_v42  ;;  %v20594_v42 = vld [vmem:[#allocation10 + $0x760] ss:$16 sps:$4 sm:$0xff]  }
 0x2cd   : > { %5136 = vmatprep.subr.bf16.mxu0 %v20513_v51  ;;  %v20602_v51 = vld [vmem:[#allocation10 + $0x744] ss:$16 sps:$4 sm:$0xff]  }
 0x2d0   : > { %5137 = vmatpush2.bf16.msra.mxu0 %v20511_v55  ;;  %v20612_v55 = vld [vmem:[#allocation10 + $0x700] ss:$16 sps:$4 sm:$0xff]  }
 0x2d1   : > { %5138 = vmatprep.subr.bf16.mxu0 %v20516_v59  ;;  %v20614_v59 = vld [vmem:[#allocation10 + $0x704] ss:$16 sps:$4 sm:$0xff]  }
 0x2d4   : > { %5139 = vmatpush2.bf16.msra.mxu0 %v20514_v2  ;;  %v23221_v2 = vshrl.u32 %v3990_v62, 7 }
 0x2d5   : > { %5140 = vmatprep.subr.bf16.mxu0 %v20519_v34  ;;  %v2100_v34 = vadd.f32 %v23153_v22, %v23151_v31 }
 0x2d6   : > { %v23233_v17 = vsub.s32 0, %v23221_v2  ;;  %v23241_v22 = vsub.s32 1, %v23221_v2 }
 0x2d8   : > { %5141 = vmatpush2.bf16.msra.mxu0 %v20517_v8  ;;  %v23229_v8 = vld [vmem:[#allocation7] sm:$0xf] }
 0x2d9   : > { %5196 = vmatprep.subr.bf16.mxu0 %v20526_v13  ;;  %v2873_v13 = vadd.f32 %v23193_v57, %v2100_v34  ;;  %v3993_v50 = vrot.slane %v23229_v8, %v23233_v17  ;;  %v3997_v33 = vrot.slane %v23229_v8, %v23241_v22 }
 0x2db   : > { %v2958_v21 = vpop.f32.mrf.mxu0 }
 0x2dc   : > { %v2959_v25 = vadd.f32 %v2958_v21, %v23182_v5  ;;  %v20564_v5 = vld [vmem:[#allocation10 + $0x600] ss:$16 sps:$4 sm:$0xff]  }
 0x2dd   : > { %v23212_v26 = vpop.f32.mrf.mxu0  ;;  %v3001_v28 = vpop.f32.mrf.mxu1  ;;  %5168 = vmatpush1.bf16.msra.mxu1 %v20564_v5 }
 0x2de   : > { %v23214_v29 = vadd.f32 %v3001_v28, %v2959_v25  ;;  %5169 = vmatprep.subr.bf16.mxu1 %v20572_v38  ;;  %v23246_v25 = vld [vmem:[#allocation9] sm:$0xf]  ;;  %v2916_v28 = vadd.f32 %v23197_v3, %v2873_v13  ;;  %v2920_v3 = vadd.f32 %v23205_v36, %v2877_v48 }
 0x2df   : > { %v2962_v30 = vpop.f32.mrf.mxu0  ;;  %v23216_v32 = vpop.f32.mrf.mxu1  ;;  %v4023_v56 = vrot.slane %v23246_v25, %v23233_v17  ;;  %v4027_v41 = vrot.slane %v23246_v25, %v23241_v22 }
 0x2e0   : > { %v2963_v24 = vadd.f32 %v2962_v30, %v23187_v16  ;;  %v20590_v16 = vld [vmem:[#allocation10 + $0x784] ss:$16 sps:$4 sm:$0xff]   ;;  %v2879_v30 = vadd.f32 %v23207_v18, %v2106_v39 }
 0x2e1   : > { %v3005_v35 = vpop.f32.mrf.mxu1  ;;  %5170 = vmatpush2.bf16.msra.mxu1 %v20570_v52  ;;  %v23225_v6 = vpop.f32.mrf.mxu0 }
 0x2e2   : > { %v23219_v37 = vadd.f32 %v3005_v35, %v2963_v24  ;;  %5171 = vmatprep.subr.bf16.mxu1 %v20578_v40  ;;  %v2922_v18 = vadd.f32 %v23209_v47, %v2879_v30 }
 0x2e3   : > { %v23238_v21 = vpop.f32.mrf.mxu1 }
 0x2e5   : > { %5172 = vmatpush2.bf16.msra.mxu1 %v20576_v43 }
 0x2e6   : > { %5173 = vmatprep.subr.bf16.mxu1 %v20584_v44 }
 0x2e9   : > { %5174 = vmatpush2.bf16.msra.mxu1 %v20582_v45 }
 0x2ea   : > { %5175 = vmatprep.subr.bf16.mxu1 %v20590_v16 }
 0x2ed   : > { %5176 = vmatpush2.bf16.msra.mxu1 %v20588_v63 }
 0x2ee   : > { %5177 = vmatprep.subr.bf16.mxu1 %v20596_v49 }
 0x2f1   : > { %5178 = vmatpush2.bf16.msra.mxu1 %v20594_v42 }
 0x2f2   : > { %5179 = vmatprep.subr.bf16.mxu1 %v20602_v51 }
 0x2f5   : > { %5180 = vmatpush2.bf16.msra.mxu1 %v20600_v10 }
 0x2f6   : > { %5181 = vmatprep.subr.bf16.mxu1 %v20608_v54 }
 0x2f9   : > { %5182 = vmatpush2.bf16.msra.mxu1 %v20606_v53 }
 0x2fa   : > { %5183 = vmatprep.subr.bf16.mxu1 %v20614_v59 }
 0x2fd   : > { %5184 = vmatpush2.bf16.msra.mxu1 %v20612_v55 }
 0x2fe   : > { %5239 = vmatprep.subr.bf16.mxu1 %v20621_v60 }
 0x31b   : > { %v3842_v14 = vpop.f32.mrf.mxu0 }
 0x31d   : > { %v3844_v31 = vpop.f32.mrf.mxu0  ;;  %v3885_v57 = vpop.f32.mrf.mxu1 }
 0x31e   : > { %v3886_v61 = vadd.f32 %v3885_v57, %v3842_v14 }
 0x31f   : > { %v3846_v58 = vpop.f32.mrf.mxu0  ;;  %v3887_v15 = vpop.f32.mrf.mxu1 }
 0x320   : > { %v3980_v24 = vadd.f32 %v3886_v61, %v2916_v28  ;;  %v3888_v0 = vadd.f32 %v3887_v15, %v3844_v31 }
 0x321   : > { %v3889_v35 = vpop.f32.mrf.mxu1  ;;  %v3848_v11 = vpop.f32.mrf.mxu0 }
 0x322   : > { %v4010_v5 = vmul.f32 %v3993_v50, %v3980_v24  ;;  %v3981_v38 = vadd.f32 %v3888_v0, %v2918_v4  ;;  %v3890_v52 = vadd.f32 %v3889_v35, %v3846_v58 }
 0x323   : > { %v3891_v40 = vpop.f32.mrf.mxu1 }
 0x324   : > { %v4040_v43 = vadd.f32 %v4023_v56, %v4010_v5  ;;  %v4011_v44 = vmul.f32 %v3997_v33, %v3981_v38  ;;  %v3984_v45 = vadd.f32 %v3890_v52, %v2920_v3  ;;  %v3892_v16 = vadd.f32 %v3891_v40, %v3848_v11 }
 0x326   : > { %v4041_v63 = vadd.f32 %v4027_v41, %v4011_v44  ;;  %v4014_v49 = vmul.f32 %v3993_v50, %v3984_v45  ;;  %v3985_v42 = vadd.f32 %v3892_v16, %v2922_v18  ;;  %v4048_v10 = vmax.f32 %v4040_v43, 0.0  ;;  %v20524_v44 = vld [vmem:[#allocation10 + $0x4e8] ss:$16 sps:$4 sm:$0xff]  }
 0x328   : > { %v4049_v36 = vmax.f32 %v4041_v63, 0.0  ;;  %v4044_v51 = vadd.f32 %v4023_v56, %v4014_v49  ;;  %v4015_v53 = vmul.f32 %v3997_v33, %v3985_v42 }
 0x32a   : > { %v18833_v54 = vpack.c.bf16 %v4049_v36, %v4048_v10  ;;  %v4045_v55 = vadd.f32 %v4027_v41, %v4015_v53  ;;  %v4052_v60 = vmax.f32 %v4044_v51, 0.0  ;;  %v20533_v51 = vld [vmem:[#allocation10 + $0x4cc] ss:$16 sps:$4 sm:$0xff]  }
 0x32c   : > { %v4077_v59 = vshrl.u32 %v18833_v54, 16  ;;  %v4053_v62 = vmax.f32 %v4045_v55, 0.0  ;;  %v4080_v7 = vshll.u32 %v18833_v54, 16 }
 0x32e   : > { %v4079_v34 = vrot.slane %v4077_v59, 7  ;;  %v18835_v47 = vpack.c.bf16 %v4053_v62, %v4052_v60  ;;  %v20531_v60 = vld [vmem:[#allocation10 + $0x4c8] ss:$16 sps:$4 sm:$0xff]   ;;  %v20539_v62 = vld [vmem:[#allocation10 + $0x4ac] ss:$16 sps:$4 sm:$0xff]  }
 0x330   : > { %v4082_v13 = vor.u32 %v4080_v7, %v4079_v34  ;;  %v4092_v14 = vshrl.u32 %v18835_v47, 16  ;;  %v4095_v48 = vshll.u32 %v18835_v47, 16  ;;  %v4090_v57 = vrot.slane %v4079_v34, 4  ;;  %v20537_v34 = vld [vmem:[#allocation10 + $0x4a8] ss:$16 sps:$4 sm:$0xff]  }
 0x331   : > { %v20545_v7 = vld [vmem:[#allocation10 + $0x48c] ss:$16 sps:$4 sm:$0xff]   ;;  %v20543_v47 = vld [vmem:[#allocation10 + $0x488] ss:$16 sps:$4 sm:$0xff]  }
 0x332   : > { %v4116_v31 = vsel %vm23055_vm3, %v4082_v13, %v22064_v20  ;;  %v4094_v39 = vrot.slane %v4092_v14, 7  ;;  %v20551_v13 = vld [vmem:[#allocation10 + $0x46c] ss:$16 sps:$4 sm:$0xff]   ;;  %v20549_v14 = vld [vmem:[#allocation10 + $0x468] ss:$16 sps:$4 sm:$0xff]  }
 0x333   : > { %4117 = vst [vmem:[#allocation2 + $0x18] sm:$0xff] %v4116_v31  ;;  %v20555_v20 = vld [vmem:[#allocation10 + $0x448] ss:$16 sps:$4 sm:$0xff]  }
 0x334   : > { %v4097_v28 = vor.u32 %v4095_v48, %v4094_v39  ;;  %v4108_v61 = vrot.slane %v4094_v39, 4  ;;  %v23287_v48 = vsub.s32 2, %v23221_v2 }
 0x336   : > { %v4098_v50 = vsel %vm23061_vm4, %v4090_v57, %v4097_v28  ;;  %v4124_v58 = vsel %vm23002_vm10, %v4108_v61, %v4123_v19  ;;  %v20557_v19 = vld [vmem:[#allocation10 + $0x44c] ss:$16 sps:$4 sm:$0xff]   ;;  %v20561_v57 = vld [vmem:[#allocation10 + $0x428] ss:$16 sps:$4 sm:$0xff]   ;;  %v2961_v28 = vadd.f32 %v23212_v26, %v23185_v9 }
 0x337   : > { %4125 = vst [vmem:[#allocation2 + $0x8] sm:$0x11] %v4124_v58  ;;  %v23267_v4 = vcombine.high %v4116_v31, %v4098_v50  ;;  %v23269_v30 = vcombine.low %v4116_v31, %v4098_v50  ;;  %v20563_v31 = vld [vmem:[#allocation10 + $0x42c] ss:$16 sps:$4 sm:$0xff]   ;;  %v2192_v58 = vadd.f32 %v23195_v1, %v23191_v12 }
 0x339   : > { %v4433_v24 = vshll.u32 %v23267_v4, 16  ;;  %v4421_v56 = vshll.u32 %v23269_v30, 16  ;;  %v4431_v41 = vshrl.u32 %v23267_v4, 16  ;;  %v4419_v18 = vshrl.u32 %v23269_v30, 16 }
 0x33a   : > { %v6098_v15 = vld [vmem:[#allocation2 + $0x18] sm:$0xee]  ;;  %v2965_v9 = vadd.f32 %v23225_v6, %v2192_v58  ;;  %v4126_v58 = vld [vmem:[#allocation2] sm:$0x11] }
 0x33b   : > { %v17809_v0 = vcombine.high %v6098_v15, %v4098_v50  ;;  %v17808_v3 = vcombine.low %v6098_v15, %v4098_v50  ;;  %v4435_v11 = vrot.slane %v4433_v24, 1  ;;  %v4423_v38 = vrot.slane %v4421_v56, 1  ;;  %v20569_v24 = vld [vmem:[#allocation10 + $0x40c] ss:$16 sps:$4 sm:$0xff]  }
 0x33c   : > { %v23292_v50 = vsub.s32 3, %v23221_v2 }
 0x33d   : > { %v6242_v43 = vrot.slane %v17809_v0, 1  ;;  %v6239_v16 = vrot.slane %v17808_v3, 1  ;;  %v4436_v49 = vor.u32 %v4435_v11, %v4431_v41  ;;  %v4424_v10 = vor.u32 %v4423_v38, %v4419_v18  ;;  %v20567_v3 = vld [vmem:[#allocation10 + $0x408] ss:$16 sps:$4 sm:$0xff]   ;;  %v20575_v41 = vld [vmem:[#allocation10 + $0x5ec] ss:$16 sps:$4 sm:$0xff]  }
 0x33e   : > { %v4261_v33 = vld [vmem:[#allocation2 + $0x8] sm:$0x11]  ;;  %v4001_v0 = vrot.slane %v23229_v8, %v23287_v48  ;;  %v4031_v11 = vrot.slane %v23246_v25, %v23287_v48  ;;  %v4005_v1 = vrot.slane %v23229_v8, %v23292_v50 }
 0x33f   : > { %v17549_v35 = vcombine.high %v4261_v33, %v4261_v33  ;;  %v17548_v5 = vcombine.low %v4261_v33, %v4261_v33 }
 0x341   : > { %v4438_v52 = vshll.u32 %v17549_v35, 16  ;;  %v4426_v40 = vshll.u32 %v17548_v5, 16  ;;  %v6243_v45 = vrot.slane %v17549_v35, 1  ;;  %v6240_v63 = vrot.slane %v17548_v5, 1 }
 0x342   : > { %v3004_v35 = vadd.f32 %v23216_v32, %v2961_v28  ;;  %v4035_v32 = vrot.slane %v23246_v25, %v23292_v50 }
 0x343   : > { %v4440_v42 = vrot.slane %v4438_v52, 1  ;;  %v4428_v36 = vrot.slane %v4426_v40, 1  ;;  %v23276_v53 = vsel %vm3151_vm5, %v6242_v43, %v6243_v45  ;;  %v23279_v54 = vsel %vm3151_vm5, %v6239_v16, %v6240_v63  ;;  %v20573_v40 = vld [vmem:[#allocation10 + $0x5e8] ss:$16 sps:$4 sm:$0xff]   ;;  %v20581_v63 = vld [vmem:[#allocation10 + $0x5cc] ss:$16 sps:$4 sm:$0xff]  }
 0x345   : > { %v4441_v55 = vsel %vm1329_vm0, %v4436_v49, %v4440_v42  ;;  %v23283_v59 = vsel %vm1329_vm0, %v4424_v10, %v4428_v36  ;;  %v20579_v36 = vld [vmem:[#allocation10 + $0x5c8] ss:$16 sps:$4 sm:$0xff]  }
 0x346   : > { %5142 = vmatprep.mubr.bf16.mxu0 %v4441_v55 }
 0x347   : > { %5143 = vmatmul.mubr.bf16.vlgmr.msra.gmra.mxu0 %v23283_v59 }
 0x348   : > { %5197 = vmatpush1.bf16.msra.mxu0 %v20524_v44  ;;  %5228 = vmatprep.mubr.bf16.mxu0 %v4441_v55 }
 0x349   : > { %5198 = vmatprep.subr.bf16.mxu0 %v20533_v51 }
 0x34c   : > { %5199 = vmatpush1.bf16.msra.mxu0 %v20531_v60 }
 0x34d   : > { %5200 = vmatprep.subr.bf16.mxu0 %v20539_v62 }
 0x350   : > { %5201 = vmatpush1.bf16.msra.mxu0 %v20537_v34 }
 0x351   : > { %5202 = vmatprep.subr.bf16.mxu0 %v20545_v7  ;;  %v20585_v7 = vld [vmem:[#allocation10 + $0x5a8] ss:$16 sps:$4 sm:$0xff]  }
 0x354   : > { %5203 = vmatpush1.bf16.msra.mxu0 %v20543_v47 }
 0x355   : > { %5204 = vmatprep.subr.bf16.mxu0 %v20551_v13 }
 0x358   : > { %5205 = vmatpush1.bf16.msra.mxu0 %v20549_v14  ;;  %v20593_v14 = vld [vmem:[#allocation10 + $0x58c] ss:$16 sps:$4 sm:$0xff]  }
 0x359   : > { %5206 = vmatprep.subr.bf16.mxu0 %v20557_v19 }
 0x35b   : > { %v3928_v39 = vpop.f32.mrf.mxu0 }
 0x35c   : > { %5207 = vmatpush1.bf16.msra.mxu0 %v20555_v20 }
 0x35d   : > { %v3930_v61 = vpop.f32.mrf.mxu0  ;;  %v3971_v15 = vpop.f32.mrf.mxu1  ;;  %5208 = vmatprep.subr.bf16.mxu0 %v20563_v31  ;;  %v4118_v31 = vld [vmem:[#allocation2 + $0x20] sm:$0xff] }
 0x35e   : > { %v3972_v56 = vadd.f32 %v3971_v15, %v3928_v39  ;;  %v20599_v15 = vld [vmem:[#allocation10 + $0x56c] ss:$16 sps:$4 sm:$0xff]  }
 0x35f   : > { %v3932_v33 = vpop.f32.mrf.mxu0  ;;  %v3973_v26 = vpop.f32.mrf.mxu1 }
 0x360   : > { %v3982_v2 = vadd.f32 %v3972_v56, %v23214_v29  ;;  %v3974_v12 = vadd.f32 %v3973_v26, %v3930_v61  ;;  %5209 = vmatpush1.bf16.msra.mxu0 %v20561_v57  ;;  %v3008_v29 = vadd.f32 %v23238_v21, %v2965_v9  ;;  %v20587_v21 = vld [vmem:[#allocation10 + $0x5ac] ss:$16 sps:$4 sm:$0xff]   ;;  %v20591_v61 = vld [vmem:[#allocation10 + $0x588] ss:$16 sps:$4 sm:$0xff]  }
 0x361   : > { %v3975_v5 = vpop.f32.mrf.mxu1  ;;  %v3934_v38 = vpop.f32.mrf.mxu0  ;;  %5210 = vmatprep.subr.bf16.mxu0 %v20569_v24  ;;  %v20605_v26 = vld [vmem:[#allocation10 + $0x54c] ss:$16 sps:$4 sm:$0xff]  }
 0x362   : > { %v4012_v52 = vmul.f32 %v4001_v0, %v3982_v2  ;;  %v3983_v18 = vadd.f32 %v3974_v12, %v3004_v35  ;;  %v3976_v6 = vadd.f32 %v3975_v5, %v3932_v33  ;;  %v20603_v12 = vld [vmem:[#allocation10 + $0x548] ss:$16 sps:$4 sm:$0xff]   ;;  %v20611_v5 = vld [vmem:[#allocation10 + $0x52c] ss:$16 sps:$4 sm:$0xff]  }
 0x363   : > { %v3977_v43 = vpop.f32.mrf.mxu1 }
 0x364   : > { %v4042_v44 = vadd.f32 %v4031_v11, %v4012_v52  ;;  %v4013_v45 = vmul.f32 %v4005_v1, %v3983_v18  ;;  %v3986_v16 = vadd.f32 %v3976_v6, %v23219_v37  ;;  %v3978_v8 = vadd.f32 %v3977_v43, %v3934_v38  ;;  %5211 = vmatpush1.bf16.msra.mxu0 %v20567_v3  ;;  %v20597_v3 = vld [vmem:[#allocation10 + $0x568] ss:$16 sps:$4 sm:$0xff]  }
 0x365   : > { %5212 = vmatprep.subr.bf16.mxu0 %v20575_v41  ;;  %v20609_v38 = vld [vmem:[#allocation10 + $0x528] ss:$16 sps:$4 sm:$0xff]  }
 0x366   : > { %v4043_v49 = vadd.f32 %v4035_v32, %v4013_v45  ;;  %v4016_v42 = vmul.f32 %v4001_v0, %v3986_v16  ;;  %v3987_v10 = vadd.f32 %v3978_v8, %v3008_v29  ;;  %v4050_v51 = vmax.f32 %v4042_v44, 0.0 }
 0x368   : > { %v4051_v55 = vmax.f32 %v4043_v49, 0.0  ;;  %v4046_v25 = vadd.f32 %v4031_v11, %v4016_v42  ;;  %v4017_v60 = vmul.f32 %v4005_v1, %v3987_v10  ;;  %5213 = vmatpush2.bf16.msra.mxu0 %v20573_v40  ;;  %v20619_v10 = vld [vmem:[#allocation10 + $0x6e8] ss:$16 sps:$4 sm:$0xff]  }
 0x369   : > { %5214 = vmatprep.subr.bf16.mxu0 %v20581_v63  ;;  %v20624_v63 = vld [vmem:[#allocation10 + $0xe4] ss:$16 sps:$4 sm:$0xff]  }
 0x36a   : > { %v18834_v62 = vpack.c.bf16 %v4051_v55, %v4050_v51  ;;  %v4047_v34 = vadd.f32 %v4035_v32, %v4017_v60  ;;  %v4054_v37 = vmax.f32 %v4046_v25, 0.0 }
 0x36c   : > { %v4084_v47 = vshrl.u32 %v18834_v62, 16  ;;  %v4055_v13 = vmax.f32 %v4047_v34, 0.0  ;;  %5215 = vmatpush2.bf16.msra.mxu0 %v20579_v36  ;;  %v4087_v20 = vshll.u32 %v18834_v62, 16  ;;  %v20622_v36 = vld [vmem:[#allocation10 + $0xe0] ss:$16 sps:$4 sm:$0xff]  }
 0x36d   : > { %5216 = vmatprep.subr.bf16.mxu0 %v20587_v21 }
 0x36e   : > { %v4086_v19 = vrot.slane %v4084_v47, 7  ;;  %v18836_v39 = vpack.c.bf16 %v4055_v13, %v4054_v37  ;;  %v20628_v47 = vld [vmem:[#allocation10 + $0x6cc] ss:$16 sps:$4 sm:$0xff]  }
 0x370   : > { %v4089_v57 = vor.u32 %v4087_v20, %v4086_v19  ;;  %v4101_v28 = vshrl.u32 %v18836_v39, 16  ;;  %5217 = vmatpush2.bf16.msra.mxu0 %v20585_v7  ;;  %v4099_v24 = vrot.slane %v4086_v19, 4  ;;  %v4104_v33 = vshll.u32 %v18836_v39, 16  ;;  %v20626_v20 = vld [vmem:[#allocation10 + $0x6c8] ss:$16 sps:$4 sm:$0xff]  }
 0x371   : > { %5218 = vmatprep.subr.bf16.mxu0 %v20593_v14  ;;  %v20631_v39 = vld [vmem:[#allocation10 + $0xc4] ss:$16 sps:$4 sm:$0xff]  }
 0x372   : > { %v4119_v56 = vsel %vm23055_vm3, %v4089_v57, %v4118_v31  ;;  %v4103_v0 = vrot.slane %v4101_v28, 7  ;;  %v20629_v31 = vld [vmem:[#allocation10 + $0xc0] ss:$16 sps:$4 sm:$0xff]   ;;  %v20634_v57 = vld [vmem:[#allocation10 + $0x6ac] ss:$16 sps:$4 sm:$0xff]  }
 0x373   : > { %4120 = vst [vmem:[#allocation2 + $0x20] sm:$0xff] %v4119_v56  ;;  %v20637_v28 = vld [vmem:[#allocation10 + $0xa4] ss:$16 sps:$4 sm:$0xff]  }
 0x374   : > { %v4106_v35 = vor.u32 %v4104_v33, %v4103_v0  ;;  %v4109_v9 = vrot.slane %v4103_v0, 4  ;;  %5219 = vmatpush2.bf16.msra.mxu0 %v20591_v61  ;;  %v20632_v61 = vld [vmem:[#allocation10 + $0x6a8] ss:$16 sps:$4 sm:$0xff]   ;;  %v20646_v0 = vld [vmem:[#allocation10 + $0x66c] ss:$16 sps:$4 sm:$0xff]  }
 0x375   : > { %5220 = vmatprep.subr.bf16.mxu0 %v20599_v15  ;;  %v20640_v15 = vld [vmem:[#allocation10 + $0x68c] ss:$16 sps:$4 sm:$0xff]   ;;  %v20649_v33 = vld [vmem:[#allocation10 + $0x64] ss:$16 sps:$4 sm:$0xff]  }
 0x376   : > { %v4107_v2 = vsel %vm23061_vm4, %v4099_v24, %v4106_v35  ;;  %v4127_v11 = vsel %vm23002_vm10, %v4109_v9, %v4126_v58  ;;  %v20635_v58 = vld [vmem:[#allocation10 + $0xa0] ss:$16 sps:$4 sm:$0xff]   ;;  %v20643_v24 = vld [vmem:[#allocation10 + $0x84] ss:$16 sps:$4 sm:$0xff]   ;;  %v20652_v9 = vld [vmem:[#allocation10 + $0x64c] ss:$16 sps:$4 sm:$0xff]  }
 0x377   : > { %4128 = vst [vmem:[#allocation2] sm:$0x11] %v4127_v11  ;;  %v23315_v1 = vcombine.high %v4119_v56, %v4107_v2  ;;  %v23317_v23 = vcombine.low %v4119_v56, %v4107_v2  ;;  %v20641_v56 = vld [vmem:[#allocation10 + $0x80] ss:$16 sps:$4 sm:$0xff]   ;;  %vm14993_vm10 = vcmask 15360  }
 0x378   : > { %5221 = vmatpush2.bf16.msra.mxu0 %v20597_v3  ;;  %v20644_v3 = vld [vmem:[#allocation10 + $0x668] ss:$16 sps:$4 sm:$0xff]   ;;  %v20647_v35 = vld [vmem:[#allocation10 + $0x60] ss:$16 sps:$4 sm:$0xff]  }
 0x379   : > { %5222 = vmatprep.subr.bf16.mxu0 %v20605_v26  ;;  %v4457_v41 = vshll.u32 %v23315_v1, 16  ;;  %v4445_v52 = vshll.u32 %v23317_v23, 16  ;;  %v4455_v16 = vshrl.u32 %v23315_v1, 16  ;;  %v4443_v49 = vshrl.u32 %v23317_v23, 16  ;;  %v20655_v26 = vld [vmem:[#allocation10 + $0x44] ss:$16 sps:$4 sm:$0xff]  }
 0x37a   : > { %v6099_v18 = vld [vmem:[#allocation2 + $0x20] sm:$0xee]  ;;  %v20653_v11 = vld [vmem:[#allocation10 + $0x40] ss:$16 sps:$4 sm:$0xff]  }
 0x37b   : > { %v17811_v6 = vcombine.high %v6099_v18, %v4107_v2  ;;  %v17810_v40 = vcombine.low %v6099_v18, %v4107_v2  ;;  %v4459_v43 = vrot.slane %v4457_v41, 1  ;;  %v4447_v45 = vrot.slane %v4445_v52, 1  ;;  %v20650_v2 = vld [vmem:[#allocation10 + $0x648] ss:$16 sps:$4 sm:$0xff]   ;;  %v20659_v41 = vld [vmem:[#allocation10 + $0x20] ss:$16 sps:$4 sm:$0xff]  }
 0x37c   : > { %5223 = vmatpush2.bf16.msra.mxu0 %v20603_v12  ;;  %v20658_v12 = vld [vmem:[#allocation10 + $0x62c] ss:$16 sps:$4 sm:$0xff]   ;;  %v20667_v18 = vld [vmem:[#allocation10 + $0x4] ss:$16 sps:$4 sm:$0xff]  }
 0x37d   : > { %5224 = vmatprep.subr.bf16.mxu0 %v20611_v5  ;;  %v6248_v51 = vrot.slane %v17811_v6, 1  ;;  %v6245_v25 = vrot.slane %v17810_v40, 1  ;;  %v4460_v21 = vor.u32 %v4459_v43, %v4455_v16  ;;  %v4448_v34 = vor.u32 %v4447_v45, %v4443_v49  ;;  %v20661_v5 = vld [vmem:[#allocation10 + $0x24] ss:$16 sps:$4 sm:$0xff]   ;;  %v20664_v52 = vld [vmem:[#allocation10 + $0x60c] ss:$16 sps:$4 sm:$0xff]  }
 0x37e   : > { %v4262_v32 = vld [vmem:[#allocation2] sm:$0x11]  ;;  %v20673_v6 = vld [vmem:[#allocation10 + $0x1e4] ss:$16 sps:$4 sm:$0xff]   ;;  %v20677_v16 = vld [vmem:[#allocation10 + $0x1c0] ss:$16 sps:$4 sm:$0xff]  }
 0x37f   : > { %v17551_v29 = vcombine.high %v4262_v32, %v4262_v32  ;;  %v17550_v44 = vcombine.low %v4262_v32, %v4262_v32  ;;  %v20670_v32 = vld [vmem:[#allocation10 + $0x7ec] ss:$16 sps:$4 sm:$0xff]   ;;  %v20668_v40 = vld [vmem:[#allocation10 + $0x7e8] ss:$16 sps:$4 sm:$0xff]  }
 0x380   : > { %5225 = vmatpush2.bf16.msra.mxu0 %v20609_v38  ;;  %v20656_v38 = vld [vmem:[#allocation10 + $0x628] ss:$16 sps:$4 sm:$0xff]   ;;  %v20676_v43 = vld [vmem:[#allocation10 + $0x7cc] ss:$16 sps:$4 sm:$0xff]  }
 0x381   : > { %5226 = vmatprep.subr.bf16.mxu0 %v20617_v27  ;;  %v4462_v8 = vshll.u32 %v17551_v29, 16  ;;  %v4450_v42 = vshll.u32 %v17550_v44, 16  ;;  %v6249_v55 = vrot.slane %v17551_v29, 1  ;;  %v6246_v60 = vrot.slane %v17550_v44, 1  ;;  %v20662_v27 = vld [vmem:[#allocation10 + $0x608] ss:$16 sps:$4 sm:$0xff]  }
 0x382   : > { %v20671_v29 = vld [vmem:[#allocation10 + $0x1e0] ss:$16 sps:$4 sm:$0xff]   ;;  %v20679_v44 = vld [vmem:[#allocation10 + $0x1c4] ss:$16 sps:$4 sm:$0xff]   ;;  %v20674_v45 = vld [vmem:[#allocation10 + $0x7c8] ss:$16 sps:$4 sm:$0xff]  }
 0x383   : > { %v4464_v62 = vrot.slane %v4462_v8, 1  ;;  %v4452_v7 = vrot.slane %v4450_v42, 1  ;;  %v23324_v37 = vsel %vm3151_vm5, %v6248_v51, %v6249_v55  ;;  %v23327_v13 = vsel %vm3151_vm5, %v6245_v25, %v6246_v60  ;;  %v20682_v8 = vld [vmem:[#allocation10 + $0x7ac] ss:$16 sps:$4 sm:$0xff]   ;;  %v20680_v49 = vld [vmem:[#allocation10 + $0x7a8] ss:$16 sps:$4 sm:$0xff]  }
 0x384   : > { %5227 = vmatpush2.bf16.msra.mxu0 %v20615_v46  ;;  %v20665_v46 = vld [vmem:[#allocation10] ss:$16 sps:$4 sm:$0xff]   ;;  %v20686_v51 = vld [vmem:[#allocation10 + $0x788] ss:$16 sps:$4 sm:$0xff]   ;;  %v20694_v25 = vld [vmem:[#allocation10 + $0x76c] ss:$16 sps:$4 sm:$0xff]  }
 0x385   : > { %v4465_v14 = vsel %vm1329_vm0, %v4460_v21, %v4464_v62  ;;  %5926 = vmatprep.subr.bf16.mxu0 %v20624_v63  ;;  %v23331_v19 = vsel %vm1329_vm0, %v4448_v34, %v4452_v7  ;;  %v20685_v63 = vld [vmem:[#allocation10 + $0x1a4] ss:$16 sps:$4 sm:$0xff]   ;;  %v20683_v42 = vld [vmem:[#allocation10 + $0x1a0] ss:$16 sps:$4 sm:$0xff]   ;;  %v20692_v21 = vld [vmem:[#allocation10 + $0x768] ss:$16 sps:$4 sm:$0xff]  }
 0x386   : > { %5185 = vmatprep.mubr.bf16.mxu1 %v4465_v14  ;;  %v20689_v55 = vld [vmem:[#allocation10 + $0x180] ss:$16 sps:$4 sm:$0xff]   ;;  %v20697_v60 = vld [vmem:[#allocation10 + $0x164] ss:$16 sps:$4 sm:$0xff]   ;;  %v20700_v34 = vld [vmem:[#allocation10 + $0x74c] ss:$16 sps:$4 sm:$0xff]  }
 0x387   : > { %5229 = vmatmul.mubr.bf16.vlgmr.msra.gmra.mxu0 %v23283_v59  ;;  %5186 = vmatmul.mubr.bf16.vlgmr.msra.gmra.mxu1 %v23331_v19  ;;  %v20638_v59 = vld [vmem:[#allocation10 + $0x688] ss:$16 sps:$4 sm:$0xff]   ;;  %v20695_v62 = vld [vmem:[#allocation10 + $0x160] ss:$16 sps:$4 sm:$0xff]   ;;  %v20703_v7 = vld [vmem:[#allocation10 + $0x144] ss:$16 sps:$4 sm:$0xff]  }
 0x388   : > { %5240 = vmatpush1.bf16.msra.mxu1 %v20619_v10  ;;  %5927 = vmatpush1.bf16.msra.mxu0 %v20622_v36  ;;  %v20688_v10 = vld [vmem:[#allocation10 + $0x78c] ss:$16 sps:$4 sm:$0xff]   ;;  %v20691_v36 = vld [vmem:[#allocation10 + $0x184] ss:$16 sps:$4 sm:$0xff]  }
 0x389   : > { %5958 = vmatprep.mubr.bf16.mxu0 %v23267_v4  ;;  %5271 = vmatprep.mubr.bf16.mxu1 %v4465_v14  ;;  %v20701_v14 = vld [vmem:[#allocation10 + $0x140] ss:$16 sps:$4 sm:$0xff]  }
 0x38a   : > { %5241 = vmatprep.subr.bf16.mxu1 %v20628_v47  ;;  %5928 = vmatprep.subr.bf16.mxu0 %v20631_v39  ;;  %v20698_v47 = vld [vmem:[#allocation10 + $0x748] ss:$16 sps:$4 sm:$0xff]  }
 0x38b   : > { %v20704_v39 = vld [vmem:[#allocation10 + $0x728] ss:$16 sps:$4 sm:$0xff]  }
 0x38c   : > { %5242 = vmatpush1.bf16.msra.mxu1 %v20626_v20  ;;  %5929 = vmatpush1.bf16.msra.mxu0 %v20629_v31  ;;  %v20706_v20 = vld [vmem:[#allocation10 + $0x72c] ss:$16 sps:$4 sm:$0xff]   ;;  %v20709_v31 = vld [vmem:[#allocation10 + $0x124] ss:$16 sps:$4 sm:$0xff]  }
 0x38d   : > { %5243 = vmatprep.subr.bf16.mxu1 %v20634_v57  ;;  %5930 = vmatprep.subr.bf16.mxu0 %v20637_v28  ;;  %v20707_v57 = vld [vmem:[#allocation10 + $0x120] ss:$16 sps:$4 sm:$0xff]   ;;  %v20712_v28 = vld [vmem:[#allocation10 + $0x70c] ss:$16 sps:$4 sm:$0xff]  }
 0x390   : > { %5244 = vmatpush1.bf16.msra.mxu1 %v20632_v61  ;;  %5931 = vmatpush1.bf16.msra.mxu0 %v20635_v58  ;;  %v20715_v61 = vld [vmem:[#allocation10 + $0x104] ss:$16 sps:$4 sm:$0xff]   ;;  %v20710_v58 = vld [vmem:[#allocation10 + $0x708] ss:$16 sps:$4 sm:$0xff]  }
 0x391   : > { %5245 = vmatprep.subr.bf16.mxu1 %v20640_v15  ;;  %5932 = vmatprep.subr.bf16.mxu0 %v20643_v24  ;;  %v20713_v15 = vld [vmem:[#allocation10 + $0x100] ss:$16 sps:$4 sm:$0xff]   ;;  %v20718_v24 = vld [vmem:[#allocation10 + $0x2e4] ss:$16 sps:$4 sm:$0xff]  }
 0x394   : > { %5246 = vmatpush1.bf16.msra.mxu1 %v20638_v59  ;;  %5933 = vmatpush1.bf16.msra.mxu0 %v20641_v56  ;;  %v20721_v59 = vld [vmem:[#allocation10 + $0xec] ss:$16 sps:$4 sm:$0xff]   ;;  %v20716_v56 = vld [vmem:[#allocation10 + $0x2e0] ss:$16 sps:$4 sm:$0xff]  }
 0x395   : > { %5247 = vmatprep.subr.bf16.mxu1 %v20646_v0  ;;  %5934 = vmatprep.subr.bf16.mxu0 %v20649_v33  ;;  %v20719_v0 = vld [vmem:[#allocation10 + $0xe8] ss:$16 sps:$4 sm:$0xff]   ;;  %v20724_v33 = vld [vmem:[#allocation10 + $0x2c4] ss:$16 sps:$4 sm:$0xff]  }
 0x398   : > { %5248 = vmatpush1.bf16.msra.mxu1 %v20644_v3  ;;  %5935 = vmatpush1.bf16.msra.mxu0 %v20647_v35  ;;  %v20727_v3 = vld [vmem:[#allocation10 + $0xcc] ss:$16 sps:$4 sm:$0xff]   ;;  %v20722_v35 = vld [vmem:[#allocation10 + $0x2c0] ss:$16 sps:$4 sm:$0xff]  }
 0x399   : > { %5249 = vmatprep.subr.bf16.mxu1 %v20652_v9  ;;  %5936 = vmatprep.subr.bf16.mxu0 %v20655_v26  ;;  %v20725_v9 = vld [vmem:[#allocation10 + $0xc8] ss:$16 sps:$4 sm:$0xff]   ;;  %v20730_v26 = vld [vmem:[#allocation10 + $0x2a4] ss:$16 sps:$4 sm:$0xff]  }
 0x39c   : > { %5250 = vmatpush1.bf16.msra.mxu1 %v20650_v2  ;;  %5937 = vmatpush1.bf16.msra.mxu0 %v20653_v11  ;;  %v20733_v2 = vld [vmem:[#allocation10 + $0xac] ss:$16 sps:$4 sm:$0xff]   ;;  %v20728_v11 = vld [vmem:[#allocation10 + $0x2a0] ss:$16 sps:$4 sm:$0xff]  }
 0x39d   : > { %5251 = vmatprep.subr.bf16.mxu1 %v20658_v12  ;;  %5938 = vmatprep.subr.bf16.mxu0 %v20661_v5  ;;  %v20731_v12 = vld [vmem:[#allocation10 + $0xa8] ss:$16 sps:$4 sm:$0xff]   ;;  %v20736_v5 = vld [vmem:[#allocation10 + $0x284] ss:$16 sps:$4 sm:$0xff]  }
 0x3a0   : > { %5252 = vmatpush1.bf16.msra.mxu1 %v20656_v38  ;;  %5939 = vmatpush1.bf16.msra.mxu0 %v20659_v41  ;;  %v20734_v38 = vld [vmem:[#allocation10 + $0x280] ss:$16 sps:$4 sm:$0xff]   ;;  %v20737_v41 = vld [vmem:[#allocation10 + $0x88] ss:$16 sps:$4 sm:$0xff]  }
 0x3a1   : > { %5253 = vmatprep.subr.bf16.mxu1 %v20664_v52  ;;  %5940 = vmatprep.subr.bf16.mxu0 %v20667_v18  ;;  %v20742_v52 = vld [vmem:[#allocation10 + $0x264] ss:$16 sps:$4 sm:$0xff]   ;;  %v20740_v18 = vld [vmem:[#allocation10 + $0x260] ss:$16 sps:$4 sm:$0xff]  }
 0x3a4   : > { %5254 = vmatpush1.bf16.msra.mxu1 %v20662_v27  ;;  %5941 = vmatpush1.bf16.msra.mxu0 %v20665_v46  ;;  %v20745_v27 = vld [vmem:[#allocation10 + $0x6c] ss:$16 sps:$4 sm:$0xff]   ;;  %v20748_v46 = vld [vmem:[#allocation10 + $0x244] ss:$16 sps:$4 sm:$0xff]  }
 0x3a5   : > { %5255 = vmatprep.subr.bf16.mxu1 %v20670_v32  ;;  %5942 = vmatprep.subr.bf16.mxu0 %v20673_v6  ;;  %v20746_v32 = vld [vmem:[#allocation10 + $0x240] ss:$16 sps:$4 sm:$0xff]   ;;  %v20751_v6 = vld [vmem:[#allocation10 + $0x4c] ss:$16 sps:$4 sm:$0xff]  }
 0x3a8   : > { %5256 = vmatpush2.bf16.msra.mxu1 %v20668_v40  ;;  %5943 = vmatpush2.bf16.msra.mxu0 %v20671_v29  ;;  %v20749_v40 = vld [vmem:[#allocation10 + $0x48] ss:$16 sps:$4 sm:$0xff]   ;;  %v20754_v29 = vld [vmem:[#allocation10 + $0x224] ss:$16 sps:$4 sm:$0xff]  }
 0x3a9   : > { %5257 = vmatprep.subr.bf16.mxu1 %v20676_v43  ;;  %5944 = vmatprep.subr.bf16.mxu0 %v20679_v44  ;;  %v20752_v43 = vld [vmem:[#allocation10 + $0x220] ss:$16 sps:$4 sm:$0xff]   ;;  %v20757_v44 = vld [vmem:[#allocation10 + $0x2c] ss:$16 sps:$4 sm:$0xff]  }
 0x3ac   : > { %5258 = vmatpush2.bf16.msra.mxu1 %v20674_v45  ;;  %5945 = vmatpush2.bf16.msra.mxu0 %v20677_v16  ;;  %v20755_v45 = vld [vmem:[#allocation10 + $0x28] ss:$16 sps:$4 sm:$0xff]   ;;  %v20760_v16 = vld [vmem:[#allocation10 + $0x204] ss:$16 sps:$4 sm:$0xff]  }
 0x3ad   : > { %5259 = vmatprep.subr.bf16.mxu1 %v20682_v8  ;;  %5946 = vmatprep.subr.bf16.mxu0 %v20685_v63  ;;  %v20758_v8 = vld [vmem:[#allocation10 + $0x200] ss:$16 sps:$4 sm:$0xff]   ;;  %v20763_v63 = vld [vmem:[#allocation10 + $0xc] ss:$16 sps:$4 sm:$0xff]  }
 0x3b0   : > { %5260 = vmatpush2.bf16.msra.mxu1 %v20680_v49  ;;  %5947 = vmatpush2.bf16.msra.mxu0 %v20683_v42  ;;  %v20761_v49 = vld [vmem:[#allocation10 + $0x8] ss:$16 sps:$4 sm:$0xff]   ;;  %v20766_v42 = vld [vmem:[#allocation10 + $0x3e4] ss:$16 sps:$4 sm:$0xff]  }
 0x3b1   : > { %5261 = vmatprep.subr.bf16.mxu1 %v20688_v10  ;;  %5948 = vmatprep.subr.bf16.mxu0 %v20691_v36  ;;  %v20764_v10 = vld [vmem:[#allocation10 + $0x3e0] ss:$16 sps:$4 sm:$0xff]   ;;  %v20769_v36 = vld [vmem:[#allocation10 + $0x1ec] ss:$16 sps:$4 sm:$0xff]  }
 0x3b4   : > { %5262 = vmatpush2.bf16.msra.mxu1 %v20686_v51  ;;  %5949 = vmatpush2.bf16.msra.mxu0 %v20689_v55  ;;  %v20767_v51 = vld [vmem:[#allocation10 + $0x1e8] ss:$16 sps:$4 sm:$0xff]   ;;  %v20772_v55 = vld [vmem:[#allocation10 + $0x3c4] ss:$16 sps:$4 sm:$0xff]  }
 0x3b5   : > { %5263 = vmatprep.subr.bf16.mxu1 %v20694_v25  ;;  %5950 = vmatprep.subr.bf16.mxu0 %v20697_v60  ;;  %v20770_v25 = vld [vmem:[#allocation10 + $0x3c0] ss:$16 sps:$4 sm:$0xff]   ;;  %v20775_v60 = vld [vmem:[#allocation10 + $0x1cc] ss:$16 sps:$4 sm:$0xff]  }
 0x3b8   : > { %5264 = vmatpush2.bf16.msra.mxu1 %v20692_v21  ;;  %5951 = vmatpush2.bf16.msra.mxu0 %v20695_v62  ;;  %v20773_v21 = vld [vmem:[#allocation10 + $0x1c8] ss:$16 sps:$4 sm:$0xff]   ;;  %v20778_v62 = vld [vmem:[#allocation10 + $0x3a4] ss:$16 sps:$4 sm:$0xff]  }
 0x3b9   : > { %5265 = vmatprep.subr.bf16.mxu1 %v20700_v34  ;;  %5952 = vmatprep.subr.bf16.mxu0 %v20703_v7  ;;  %v20776_v34 = vld [vmem:[#allocation10 + $0x3a0] ss:$16 sps:$4 sm:$0xff]   ;;  %v20781_v7 = vld [vmem:[#allocation10 + $0x1ac] ss:$16 sps:$4 sm:$0xff]  }
 0x3bc   : > { %5266 = vmatpush2.bf16.msra.mxu1 %v20698_v47  ;;  %5953 = vmatpush2.bf16.msra.mxu0 %v20701_v14  ;;  %v20779_v47 = vld [vmem:[#allocation10 + $0x1a8] ss:$16 sps:$4 sm:$0xff]   ;;  %v20784_v14 = vld [vmem:[#allocation10 + $0x384] ss:$16 sps:$4 sm:$0xff]  }
 0x3bd   : > { %5267 = vmatprep.subr.bf16.mxu1 %v20706_v20  ;;  %5954 = vmatprep.subr.bf16.mxu0 %v20709_v31  ;;  %v20782_v20 = vld [vmem:[#allocation10 + $0x380] ss:$16 sps:$4 sm:$0xff]   ;;  %v20787_v31 = vld [vmem:[#allocation10 + $0x18c] ss:$16 sps:$4 sm:$0xff]  }
 0x3c0   : > { %5268 = vmatpush2.bf16.msra.mxu1 %v20704_v39  ;;  %5955 = vmatpush2.bf16.msra.mxu0 %v20707_v57  ;;  %v20785_v39 = vld [vmem:[#allocation10 + $0x188] ss:$16 sps:$4 sm:$0xff]   ;;  %v20790_v57 = vld [vmem:[#allocation10 + $0x364] ss:$16 sps:$4 sm:$0xff]  }
 0x3c1   : > { %5269 = vmatprep.subr.bf16.mxu1 %v20712_v28  ;;  %5956 = vmatprep.subr.bf16.mxu0 %v20715_v61  ;;  %v20788_v28 = vld [vmem:[#allocation10 + $0x360] ss:$16 sps:$4 sm:$0xff]   ;;  %v20793_v61 = vld [vmem:[#allocation10 + $0x16c] ss:$16 sps:$4 sm:$0xff]  }
 0x3c4   : > { %5270 = vmatpush2.bf16.msra.mxu1 %v20710_v58  ;;  %5957 = vmatpush2.bf16.msra.mxu0 %v20713_v15  ;;  %v20791_v58 = vld [vmem:[#allocation10 + $0x168] ss:$16 sps:$4 sm:$0xff]   ;;  %v20796_v15 = vld [vmem:[#allocation10 + $0x344] ss:$16 sps:$4 sm:$0xff]  }
 0x3c5   : > { %5969 = vmatprep.subr.bf16.mxu1 %v20718_v24  ;;  %6012 = vmatprep.subr.bf16.mxu0 %v20721_v59  ;;  %v20794_v24 = vld [vmem:[#allocation10 + $0x340] ss:$16 sps:$4 sm:$0xff]   ;;  %v20799_v59 = vld [vmem:[#allocation10 + $0x14c] ss:$16 sps:$4 sm:$0xff]  }
 0x3c7   : > { %5272 = vmatmul.mubr.bf16.vlgmr.msra.gmra.mxu1 %v23331_v19  ;;  %5959 = vmatmul.mubr.bf16.vlgmr.msra.gmra.mxu0 %v23269_v30  ;;  %v20739_v19 = vld [vmem:[#allocation10 + $0x8c] ss:$16 sps:$4 sm:$0xff]  }
 0x3c8   : > { %5970 = vmatpush1.bf16.msra.mxu1 %v20716_v56  ;;  %6001 = vmatprep.mubr.bf16.mxu1 %v23315_v1  ;;  %v20797_v56 = vld [vmem:[#allocation10 + $0x148] ss:$16 sps:$4 sm:$0xff]  }
 0x3c9   : > { %6013 = vmatpush1.bf16.msra.mxu0 %v20719_v0  ;;  %6044 = vmatprep.mubr.bf16.mxu0 %v23267_v4  ;;  %v20743_v4 = vld [vmem:[#allocation10 + $0x68] ss:$16 sps:$4 sm:$0xff]   ;;  %v20802_v0 = vld [vmem:[#allocation10 + $0x324] ss:$16 sps:$4 sm:$0xff]  }
 0x3ca   : > { %5971 = vmatprep.subr.bf16.mxu1 %v20724_v33  ;;  %6014 = vmatprep.subr.bf16.mxu0 %v20727_v3  ;;  %v20800_v33 = vld [vmem:[#allocation10 + $0x320] ss:$16 sps:$4 sm:$0xff]   ;;  %v20805_v3 = vld [vmem:[#allocation10 + $0x12c] ss:$16 sps:$4 sm:$0xff]  }
 0x3cc   : > { %5972 = vmatpush1.bf16.msra.mxu1 %v20722_v35  ;;  %v20803_v35 = vld [vmem:[#allocation10 + $0x128] ss:$16 sps:$4 sm:$0xff]  }
 0x3cd   : > { %6015 = vmatpush1.bf16.msra.mxu0 %v20725_v9  ;;  %5973 = vmatprep.subr.bf16.mxu1 %v20730_v26  ;;  %v20808_v9 = vld [vmem:[#allocation10 + $0x304] ss:$16 sps:$4 sm:$0xff]   ;;  %v20806_v26 = vld [vmem:[#allocation10 + $0x300] ss:$16 sps:$4 sm:$0xff]  }
 0x3ce   : > { %6016 = vmatprep.subr.bf16.mxu0 %v20733_v2  ;;  %v20811_v2 = vld [vmem:[#allocation10 + $0x10c] ss:$16 sps:$4 sm:$0xff]  }
 0x3d0   : > { %5974 = vmatpush1.bf16.msra.mxu1 %v20728_v11  ;;  %v20809_v11 = vld [vmem:[#allocation10 + $0x108] ss:$16 sps:$4 sm:$0xff]  }
 0x3d1   : > { %6017 = vmatpush1.bf16.msra.mxu0 %v20731_v12  ;;  %5975 = vmatprep.subr.bf16.mxu1 %v20736_v5  ;;  %v20814_v12 = vld [vmem:[#allocation10 + $0x2ec] ss:$16 sps:$4 sm:$0xff]   ;;  %v20817_v5 = vld [vmem:[#allocation10 + $0x8e4] ss:$16 sps:$4 sm:$0xff]  }
 0x3d2   : > { %6018 = vmatprep.subr.bf16.mxu0 %v20739_v19  ;;  %v20812_v19 = vld [vmem:[#allocation10 + $0x2e8] ss:$16 sps:$4 sm:$0xff]  }
 0x3d4   : > { %5976 = vmatpush1.bf16.msra.mxu1 %v20734_v38  ;;  %v20815_v38 = vld [vmem:[#allocation10 + $0x8e0] ss:$16 sps:$4 sm:$0xff]  }
 0x3d5   : > { %6019 = vmatpush1.bf16.msra.mxu0 %v20737_v41  ;;  %5977 = vmatprep.subr.bf16.mxu1 %v20742_v52  ;;  %v20820_v41 = vld [vmem:[#allocation10 + $0x2cc] ss:$16 sps:$4 sm:$0xff]   ;;  %v20823_v52 = vld [vmem:[#allocation10 + $0x8c4] ss:$16 sps:$4 sm:$0xff]  }
 0x3d6   : > { %6020 = vmatprep.subr.bf16.mxu0 %v20745_v27  ;;  %v20821_v27 = vld [vmem:[#allocation10 + $0x8c0] ss:$16 sps:$4 sm:$0xff]  }
 0x3d8   : > { %5978 = vmatpush1.bf16.msra.mxu1 %v20740_v18  ;;  %v20818_v18 = vld [vmem:[#allocation10 + $0x2c8] ss:$16 sps:$4 sm:$0xff]  }
 0x3d9   : > { %6021 = vmatpush1.bf16.msra.mxu0 %v20743_v4  ;;  %5979 = vmatprep.subr.bf16.mxu1 %v20748_v46  ;;  %v20826_v4 = vld [vmem:[#allocation10 + $0x2ac] ss:$16 sps:$4 sm:$0xff]   ;;  %v20829_v46 = vld [vmem:[#allocation10 + $0x8a4] ss:$16 sps:$4 sm:$0xff]  }
 0x3da   : > { %6022 = vmatprep.subr.bf16.mxu0 %v20751_v6  ;;  %v20827_v6 = vld [vmem:[#allocation10 + $0x8a0] ss:$16 sps:$4 sm:$0xff]  }
 0x3dc   : > { %5980 = vmatpush1.bf16.msra.mxu1 %v20746_v32  ;;  %v20824_v32 = vld [vmem:[#allocation10 + $0x2a8] ss:$16 sps:$4 sm:$0xff]  }
 0x3dd   : > { %6023 = vmatpush1.bf16.msra.mxu0 %v20749_v40  ;;  %5981 = vmatprep.subr.bf16.mxu1 %v20754_v29  ;;  %v20832_v40 = vld [vmem:[#allocation10 + $0x28c] ss:$16 sps:$4 sm:$0xff]   ;;  %v20830_v29 = vld [vmem:[#allocation10 + $0x288] ss:$16 sps:$4 sm:$0xff]  }
 0x3de   : > { %6024 = vmatprep.subr.bf16.mxu0 %v20757_v44  ;;  %v20833_v44 = vld [vmem:[#allocation10 + $0x880] ss:$16 sps:$4 sm:$0xff]  }
 0x3e0   : > { %5982 = vmatpush1.bf16.msra.mxu1 %v20752_v43  ;;  %v20835_v43 = vld [vmem:[#allocation10 + $0x884] ss:$16 sps:$4 sm:$0xff]  }
 0x3e1   : > { %6025 = vmatpush1.bf16.msra.mxu0 %v20755_v45  ;;  %5983 = vmatprep.subr.bf16.mxu1 %v20760_v16  ;;  %v20841_v45 = vld [vmem:[#allocation10 + $0x864] ss:$16 sps:$4 sm:$0xff]   ;;  %v20839_v16 = vld [vmem:[#allocation10 + $0x860] ss:$16 sps:$4 sm:$0xff]  }
 0x3e2   : > { %6026 = vmatprep.subr.bf16.mxu0 %v20763_v63  ;;  %v20847_v63 = vld [vmem:[#allocation10 + $0x844] ss:$16 sps:$4 sm:$0xff]  }
 0x3e4   : > { %5984 = vmatpush1.bf16.msra.mxu1 %v20758_v8  ;;  %v20844_v8 = vld [vmem:[#allocation10 + $0x24c] ss:$16 sps:$4 sm:$0xff]  }
 0x3e5   : > { %6027 = vmatpush1.bf16.msra.mxu0 %v20761_v49  ;;  %5985 = vmatprep.subr.bf16.mxu1 %v20766_v42  ;;  %v20842_v49 = vld [vmem:[#allocation10 + $0x248] ss:$16 sps:$4 sm:$0xff]   ;;  %v20845_v42 = vld [vmem:[#allocation10 + $0x840] ss:$16 sps:$4 sm:$0xff]  }
 0x3e6   : > { %6028 = vmatprep.subr.bf16.mxu0 %v20769_v36  ;;  %v20853_v36 = vld [vmem:[#allocation10 + $0x824] ss:$16 sps:$4 sm:$0xff]  }
 0x3e8   : > { %5986 = vmatpush2.bf16.msra.mxu1 %v20764_v10  ;;  %v20850_v10 = vld [vmem:[#allocation10 + $0x22c] ss:$16 sps:$4 sm:$0xff]  }
 0x3e9   : > { %6029 = vmatpush2.bf16.msra.mxu0 %v20767_v51  ;;  %5987 = vmatprep.subr.bf16.mxu1 %v20772_v55  ;;  %v20848_v51 = vld [vmem:[#allocation10 + $0x228] ss:$16 sps:$4 sm:$0xff]   ;;  %v20851_v55 = vld [vmem:[#allocation10 + $0x820] ss:$16 sps:$4 sm:$0xff]  }
 0x3ea   : > { %6030 = vmatprep.subr.bf16.mxu0 %v20775_v60  ;;  %v20859_v60 = vld [vmem:[#allocation10 + $0x804] ss:$16 sps:$4 sm:$0xff]  }
 0x3ec   : > { %5988 = vmatpush2.bf16.msra.mxu1 %v20770_v25  ;;  %v20856_v25 = vld [vmem:[#allocation10 + $0x20c] ss:$16 sps:$4 sm:$0xff]  }
 0x3ed   : > { %6031 = vmatpush2.bf16.msra.mxu0 %v20773_v21  ;;  %5989 = vmatprep.subr.bf16.mxu1 %v20778_v62  ;;  %v20854_v21 = vld [vmem:[#allocation10 + $0x208] ss:$16 sps:$4 sm:$0xff]   ;;  %v20857_v62 = vld [vmem:[#allocation10 + $0x800] ss:$16 sps:$4 sm:$0xff]  }
 0x3ee   : > { %6032 = vmatprep.subr.bf16.mxu0 %v20781_v7  ;;  %v20865_v7 = vld [vmem:[#allocation10 + $0x9e4] ss:$16 sps:$4 sm:$0xff]  }
 0x3f0   : > { %5990 = vmatpush2.bf16.msra.mxu1 %v20776_v34  ;;  %v20862_v34 = vld [vmem:[#allocation10 + $0x3ec] ss:$16 sps:$4 sm:$0xff]  }
 0x3f1   : > { %6033 = vmatpush2.bf16.msra.mxu0 %v20779_v47  ;;  %5991 = vmatprep.subr.bf16.mxu1 %v20784_v14  ;;  %v20860_v47 = vld [vmem:[#allocation10 + $0x3e8] ss:$16 sps:$4 sm:$0xff]   ;;  %v20863_v14 = vld [vmem:[#allocation10 + $0x9e0] ss:$16 sps:$4 sm:$0xff]  }
 0x3f2   : > { %6034 = vmatprep.subr.bf16.mxu0 %v20787_v31  ;;  %v20871_v31 = vld [vmem:[#allocation10 + $0x9c4] ss:$16 sps:$4 sm:$0xff]  }
 0x3f4   : > { %5992 = vmatpush2.bf16.msra.mxu1 %v20782_v20  ;;  %v20868_v20 = vld [vmem:[#allocation10 + $0x3cc] ss:$16 sps:$4 sm:$0xff]  }
 0x3f5   : > { %6035 = vmatpush2.bf16.msra.mxu0 %v20785_v39  ;;  %5993 = vmatprep.subr.bf16.mxu1 %v20790_v57  ;;  %v20866_v39 = vld [vmem:[#allocation10 + $0x3c8] ss:$16 sps:$4 sm:$0xff]   ;;  %v20869_v57 = vld [vmem:[#allocation10 + $0x9c0] ss:$16 sps:$4 sm:$0xff]  }
 0x3f6   : > { %6036 = vmatprep.subr.bf16.mxu0 %v20793_v61  ;;  %v20877_v61 = vld [vmem:[#allocation10 + $0x9a4] ss:$16 sps:$4 sm:$0xff]  }
 0x3f8   : > { %5994 = vmatpush2.bf16.msra.mxu1 %v20788_v28  ;;  %v20874_v28 = vld [vmem:[#allocation10 + $0x3ac] ss:$16 sps:$4 sm:$0xff]  }
 0x3f9   : > { %6037 = vmatpush2.bf16.msra.mxu0 %v20791_v58  ;;  %5995 = vmatprep.subr.bf16.mxu1 %v20796_v15  ;;  %v20872_v58 = vld [vmem:[#allocation10 + $0x3a8] ss:$16 sps:$4 sm:$0xff]   ;;  %v20875_v15 = vld [vmem:[#allocation10 + $0x9a0] ss:$16 sps:$4 sm:$0xff]  }
 0x3fa   : > { %6038 = vmatprep.subr.bf16.mxu0 %v20799_v59  ;;  %v20883_v59 = vld [vmem:[#allocation10 + $0x984] ss:$16 sps:$4 sm:$0xff]  }
 0x3fc   : > { %5996 = vmatpush2.bf16.msra.mxu1 %v20794_v24  ;;  %v20880_v24 = vld [vmem:[#allocation10 + $0x38c] ss:$16 sps:$4 sm:$0xff]  }
 0x3fd   : > { %6039 = vmatpush2.bf16.msra.mxu0 %v20797_v56  ;;  %5997 = vmatprep.subr.bf16.mxu1 %v20802_v0  ;;  %v20878_v56 = vld [vmem:[#allocation10 + $0x388] ss:$16 sps:$4 sm:$0xff]   ;;  %v20881_v0 = vld [vmem:[#allocation10 + $0x980] ss:$16 sps:$4 sm:$0xff]  }
 0x3fe   : > { %6040 = vmatprep.subr.bf16.mxu0 %v20805_v3  ;;  %v20889_v3 = vld [vmem:[#allocation10 + $0x964] ss:$16 sps:$4 sm:$0xff]  }
 0x400   : > { %5998 = vmatpush2.bf16.msra.mxu1 %v20800_v33  ;;  %v20886_v33 = vld [vmem:[#allocation10 + $0x36c] ss:$16 sps:$4 sm:$0xff]  }
 0x401   : > { %6041 = vmatpush2.bf16.msra.mxu0 %v20803_v35  ;;  %5999 = vmatprep.subr.bf16.mxu1 %v20808_v9  ;;  %v20884_v35 = vld [vmem:[#allocation10 + $0x368] ss:$16 sps:$4 sm:$0xff]   ;;  %v20887_v9 = vld [vmem:[#allocation10 + $0x960] ss:$16 sps:$4 sm:$0xff]  }
 0x402   : > { %6042 = vmatprep.subr.bf16.mxu0 %v20811_v2  ;;  %v20895_v2 = vld [vmem:[#allocation10 + $0x944] ss:$16 sps:$4 sm:$0xff]  }
 0x404   : > { %6000 = vmatpush2.bf16.msra.mxu1 %v20806_v26  ;;  %v20892_v26 = vld [vmem:[#allocation10 + $0x34c] ss:$16 sps:$4 sm:$0xff]  }
 0x405   : > { %6043 = vmatpush2.bf16.msra.mxu0 %v20809_v11  ;;  %6055 = vmatprep.subr.bf16.mxu1 %v20814_v12  ;;  %v20890_v11 = vld [vmem:[#allocation10 + $0x348] ss:$16 sps:$4 sm:$0xff]   ;;  %v20893_v12 = vld [vmem:[#allocation10 + $0x940] ss:$16 sps:$4 sm:$0xff]  }
 0x406   : > { %6895 = vmatprep.subr.bf16.mxu0 %v20817_v5  ;;  %v20898_v5 = vld [vmem:[#allocation10 + $0x32c] ss:$16 sps:$4 sm:$0xff]  }
 0x407   : > { %6002 = vmatmul.mubr.bf16.vlgmr.msra.gmra.mxu1 %v23317_v23 }
 0x408   : > { %6045 = vmatmul.mubr.bf16.vlgmr.msra.gmra.mxu0 %v23269_v30  ;;  %6056 = vmatpush1.bf16.msra.mxu1 %v20812_v19  ;;  %v20838_v30 = vld [vmem:[#allocation10 + $0x26c] ss:$16 sps:$4 sm:$0xff]   ;;  %v20901_v19 = vld [vmem:[#allocation10 + $0x924] ss:$16 sps:$4 sm:$0xff]  }
 0x409   : > { %6087 = vmatprep.mubr.bf16.mxu1 %v23315_v1  ;;  %6896 = vmatpush1.bf16.msra.mxu0 %v20815_v38  ;;  %v20836_v1 = vld [vmem:[#allocation10 + $0x268] ss:$16 sps:$4 sm:$0xff]  }
 0x40a   : > { %6927 = vmatprep.mubr.bf16.mxu0 %v23276_v53  ;;  %6057 = vmatprep.subr.bf16.mxu1 %v20820_v41  ;;  %v20896_v38 = vld [vmem:[#allocation10 + $0x328] ss:$16 sps:$4 sm:$0xff]   ;;  %v20899_v41 = vld [vmem:[#allocation10 + $0x920] ss:$16 sps:$4 sm:$0xff]  }
 0x40b   : > { %6897 = vmatprep.subr.bf16.mxu0 %v20823_v52  ;;  %v20904_v52 = vld [vmem:[#allocation10 + $0x30c] ss:$16 sps:$4 sm:$0xff]  }
 0x40c   : > { %6058 = vmatpush1.bf16.msra.mxu1 %v20818_v18  ;;  %v20907_v18 = vld [vmem:[#allocation10 + $0x904] ss:$16 sps:$4 sm:$0xff]  }
 0x40d   : > { %6898 = vmatpush1.bf16.msra.mxu0 %v20821_v27  ;;  %6059 = vmatprep.subr.bf16.mxu1 %v20826_v4  ;;  %v20902_v27 = vld [vmem:[#allocation10 + $0x308] ss:$16 sps:$4 sm:$0xff]   ;;  %v20905_v4 = vld [vmem:[#allocation10 + $0x900] ss:$16 sps:$4 sm:$0xff]  }
 0x40e   : > { %6899 = vmatprep.subr.bf16.mxu0 %v20829_v46  ;;  %v20910_v46 = vld [vmem:[#allocation10 + $0xae4] ss:$16 sps:$4 sm:$0xff]  }
 0x410   : > { %6060 = vmatpush1.bf16.msra.mxu1 %v20824_v32  ;;  %v20913_v32 = vld [vmem:[#allocation10 + $0x8ec] ss:$16 sps:$4 sm:$0xff]  }
 0x411   : > { %6900 = vmatpush1.bf16.msra.mxu0 %v20827_v6  ;;  %6061 = vmatprep.subr.bf16.mxu1 %v20832_v40  ;;  %v20908_v6 = vld [vmem:[#allocation10 + $0xae0] ss:$16 sps:$4 sm:$0xff]   ;;  %v20911_v40 = vld [vmem:[#allocation10 + $0x8e8] ss:$16 sps:$4 sm:$0xff]  }
 0x412   : > { %6901 = vmatprep.subr.bf16.mxu0 %v20835_v43  ;;  %v20919_v43 = vld [vmem:[#allocation10 + $0x8cc] ss:$16 sps:$4 sm:$0xff]  }
 0x414   : > { %6062 = vmatpush1.bf16.msra.mxu1 %v20830_v29  ;;  %v20916_v29 = vld [vmem:[#allocation10 + $0xac4] ss:$16 sps:$4 sm:$0xff]  }
 0x415   : > { %6902 = vmatpush1.bf16.msra.mxu0 %v20833_v44  ;;  %6063 = vmatprep.subr.bf16.mxu1 %v20838_v30  ;;  %v20914_v44 = vld [vmem:[#allocation10 + $0xac0] ss:$16 sps:$4 sm:$0xff]   ;;  %v20917_v30 = vld [vmem:[#allocation10 + $0x8c8] ss:$16 sps:$4 sm:$0xff]  }
 0x416   : > { %6903 = vmatprep.subr.bf16.mxu0 %v20841_v45  ;;  %v20922_v45 = vld [vmem:[#allocation10 + $0xaa4] ss:$16 sps:$4 sm:$0xff]  }
 0x418   : > { %6064 = vmatpush1.bf16.msra.mxu1 %v20836_v1  ;;  %v20925_v1 = vld [vmem:[#allocation10 + $0x8ac] ss:$16 sps:$4 sm:$0xff]  }
 0x419   : > { %6904 = vmatpush1.bf16.msra.mxu0 %v20839_v16  ;;  %6065 = vmatprep.subr.bf16.mxu1 %v20844_v8  ;;  %v20920_v16 = vld [vmem:[#allocation10 + $0xaa0] ss:$16 sps:$4 sm:$0xff]   ;;  %v20923_v8 = vld [vmem:[#allocation10 + $0x8a8] ss:$16 sps:$4 sm:$0xff]  }
 0x41a   : > { %6905 = vmatprep.subr.bf16.mxu0 %v20847_v63  ;;  %v20928_v63 = vld [vmem:[#allocation10 + $0xa84] ss:$16 sps:$4 sm:$0xff]  }
 0x41c   : > { %6066 = vmatpush1.bf16.msra.mxu1 %v20842_v49  ;;  %v20931_v49 = vld [vmem:[#allocation10 + $0x88c] ss:$16 sps:$4 sm:$0xff]  }
 0x41d   : > { %6906 = vmatpush1.bf16.msra.mxu0 %v20845_v42  ;;  %6067 = vmatprep.subr.bf16.mxu1 %v20850_v10  ;;  %v20929_v42 = vld [vmem:[#allocation10 + $0x888] ss:$16 sps:$4 sm:$0xff]   ;;  %v20934_v10 = vld [vmem:[#allocation10 + $0xa64] ss:$16 sps:$4 sm:$0xff]  }
 0x41e   : > { %6907 = vmatprep.subr.bf16.mxu0 %v20853_v36  ;;  %v20937_v36 = vld [vmem:[#allocation10 + $0x86c] ss:$16 sps:$4 sm:$0xff]  }
 0x420   : > { %6068 = vmatpush1.bf16.msra.mxu1 %v20848_v51  ;;  %v20932_v51 = vld [vmem:[#allocation10 + $0xa60] ss:$16 sps:$4 sm:$0xff]  }
 0x421   : > { %6908 = vmatpush1.bf16.msra.mxu0 %v20851_v55  ;;  %6069 = vmatprep.subr.bf16.mxu1 %v20856_v25  ;;  %v20940_v55 = vld [vmem:[#allocation10 + $0xa44] ss:$16 sps:$4 sm:$0xff]   ;;  %v20943_v25 = vld [vmem:[#allocation10 + $0x84c] ss:$16 sps:$4 sm:$0xff]  }
 0x422   : > { %6909 = vmatprep.subr.bf16.mxu0 %v20859_v60  ;;  %v20938_v60 = vld [vmem:[#allocation10 + $0xa40] ss:$16 sps:$4 sm:$0xff]  }
 0x424   : > { %6070 = vmatpush1.bf16.msra.mxu1 %v20854_v21  ;;  %v20941_v21 = vld [vmem:[#allocation10 + $0x848] ss:$16 sps:$4 sm:$0xff]  }
 0x425   : > { %6910 = vmatpush1.bf16.msra.mxu0 %v20857_v62  ;;  %6071 = vmatprep.subr.bf16.mxu1 %v20862_v34  ;;  %v20946_v62 = vld [vmem:[#allocation10 + $0xa24] ss:$16 sps:$4 sm:$0xff]   ;;  %v20949_v34 = vld [vmem:[#allocation10 + $0x82c] ss:$16 sps:$4 sm:$0xff]  }
 0x426   : > { %6911 = vmatprep.subr.bf16.mxu0 %v20865_v7  ;;  %v20944_v7 = vld [vmem:[#allocation10 + $0xa20] ss:$16 sps:$4 sm:$0xff]  }
 0x428   : > { %6072 = vmatpush2.bf16.msra.mxu1 %v20860_v47  ;;  %v20947_v47 = vld [vmem:[#allocation10 + $0x828] ss:$16 sps:$4 sm:$0xff]  }
 0x429   : > { %6912 = vmatpush2.bf16.msra.mxu0 %v20863_v14  ;;  %6073 = vmatprep.subr.bf16.mxu1 %v20868_v20  ;;  %v20952_v14 = vld [vmem:[#allocation10 + $0xa04] ss:$16 sps:$4 sm:$0xff]   ;;  %v20955_v20 = vld [vmem:[#allocation10 + $0x80c] ss:$16 sps:$4 sm:$0xff]  }
 0x42a   : > { %6913 = vmatprep.subr.bf16.mxu0 %v20871_v31  ;;  %v20950_v31 = vld [vmem:[#allocation10 + $0xa00] ss:$16 sps:$4 sm:$0xff]  }
 0x42c   : > { %6074 = vmatpush2.bf16.msra.mxu1 %v20866_v39  ;;  %v20953_v39 = vld [vmem:[#allocation10 + $0x808] ss:$16 sps:$4 sm:$0xff]  }
 0x42d   : > { %6914 = vmatpush2.bf16.msra.mxu0 %v20869_v57  ;;  %6075 = vmatprep.subr.bf16.mxu1 %v20874_v28  ;;  %v20958_v57 = vld [vmem:[#allocation10 + $0xbe4] ss:$16 sps:$4 sm:$0xff]   ;;  %v20961_v28 = vld [vmem:[#allocation10 + $0x9ec] ss:$16 sps:$4 sm:$0xff]  }
 0x42e   : > { %6915 = vmatprep.subr.bf16.mxu0 %v20877_v61  ;;  %v20956_v61 = vld [vmem:[#allocation10 + $0xbe0] ss:$16 sps:$4 sm:$0xff]  }
 0x430   : > { %6076 = vmatpush2.bf16.msra.mxu1 %v20872_v58  ;;  %v20959_v58 = vld [vmem:[#allocation10 + $0x9e8] ss:$16 sps:$4 sm:$0xff]  }
 0x431   : > { %6916 = vmatpush2.bf16.msra.mxu0 %v20875_v15  ;;  %6077 = vmatprep.subr.bf16.mxu1 %v20880_v24  ;;  %v20964_v15 = vld [vmem:[#allocation10 + $0xbc4] ss:$16 sps:$4 sm:$0xff]   ;;  %v20967_v24 = vld [vmem:[#allocation10 + $0x9cc] ss:$16 sps:$4 sm:$0xff]  }
 0x432   : > { %6917 = vmatprep.subr.bf16.mxu0 %v20883_v59  ;;  %v20962_v59 = vld [vmem:[#allocation10 + $0xbc0] ss:$16 sps:$4 sm:$0xff]  }
 0x434   : > { %6078 = vmatpush2.bf16.msra.mxu1 %v20878_v56  ;;  %v20965_v56 = vld [vmem:[#allocation10 + $0x9c8] ss:$16 sps:$4 sm:$0xff]  }
 0x435   : > { %6918 = vmatpush2.bf16.msra.mxu0 %v20881_v0  ;;  %6079 = vmatprep.subr.bf16.mxu1 %v20886_v33  ;;  %v20970_v0 = vld [vmem:[#allocation10 + $0xba4] ss:$16 sps:$4 sm:$0xff]   ;;  %v20973_v33 = vld [vmem:[#allocation10 + $0x9ac] ss:$16 sps:$4 sm:$0xff]  }
 0x436   : > { %6919 = vmatprep.subr.bf16.mxu0 %v20889_v3  ;;  %v20968_v3 = vld [vmem:[#allocation10 + $0xba0] ss:$16 sps:$4 sm:$0xff]  }
 0x438   : > { %6080 = vmatpush2.bf16.msra.mxu1 %v20884_v35  ;;  %v20971_v35 = vld [vmem:[#allocation10 + $0x9a8] ss:$16 sps:$4 sm:$0xff]  }
 0x439   : > { %6920 = vmatpush2.bf16.msra.mxu0 %v20887_v9  ;;  %6081 = vmatprep.subr.bf16.mxu1 %v20892_v26  ;;  %v20976_v9 = vld [vmem:[#allocation10 + $0xb84] ss:$16 sps:$4 sm:$0xff]   ;;  %v20979_v26 = vld [vmem:[#allocation10 + $0x98c] ss:$16 sps:$4 sm:$0xff]  }
 0x43a   : > { %6921 = vmatprep.subr.bf16.mxu0 %v20895_v2  ;;  %v20974_v2 = vld [vmem:[#allocation10 + $0xb80] ss:$16 sps:$4 sm:$0xff]  }
 0x43c   : > { %6082 = vmatpush2.bf16.msra.mxu1 %v20890_v11  ;;  %v20977_v11 = vld [vmem:[#allocation10 + $0x988] ss:$16 sps:$4 sm:$0xff]  }
 0x43d   : > { %6922 = vmatpush2.bf16.msra.mxu0 %v20893_v12  ;;  %6083 = vmatprep.subr.bf16.mxu1 %v20898_v5  ;;  %v20982_v12 = vld [vmem:[#allocation10 + $0xb64] ss:$16 sps:$4 sm:$0xff]   ;;  %v20985_v5 = vld [vmem:[#allocation10 + $0x96c] ss:$16 sps:$4 sm:$0xff]  }
 0x43e   : > { %6923 = vmatprep.subr.bf16.mxu0 %v20901_v19  ;;  %v20980_v19 = vld [vmem:[#allocation10 + $0xb60] ss:$16 sps:$4 sm:$0xff]  }
 0x440   : > { %6084 = vmatpush2.bf16.msra.mxu1 %v20896_v38  ;;  %v20983_v38 = vld [vmem:[#allocation10 + $0x968] ss:$16 sps:$4 sm:$0xff]  }
 0x441   : > { %6924 = vmatpush2.bf16.msra.mxu0 %v20899_v41  ;;  %6085 = vmatprep.subr.bf16.mxu1 %v20904_v52  ;;  %v20988_v41 = vld [vmem:[#allocation10 + $0xb44] ss:$16 sps:$4 sm:$0xff]   ;;  %v20991_v52 = vld [vmem:[#allocation10 + $0x94c] ss:$16 sps:$4 sm:$0xff]  }
 0x442   : > { %6925 = vmatprep.subr.bf16.mxu0 %v20907_v18  ;;  %v23348_v18 = vpop.f32.mrf.mxu0 }
 0x444   : > { %6086 = vmatpush2.bf16.msra.mxu1 %v20902_v27  ;;  %v20986_v27 = vld [vmem:[#allocation10 + $0xb40] ss:$16 sps:$4 sm:$0xff]  }
 0x445   : > { %6926 = vmatpush2.bf16.msra.mxu0 %v20905_v4  ;;  %6938 = vmatprep.subr.bf16.mxu1 %v20910_v46  ;;  %v20989_v4 = vld [vmem:[#allocation10 + $0x948] ss:$16 sps:$4 sm:$0xff]   ;;  %v20994_v46 = vld [vmem:[#allocation10 + $0xb24] ss:$16 sps:$4 sm:$0xff]  }
 0x446   : > { %6981 = vmatprep.subr.bf16.mxu0 %v20913_v32  ;;  %v20997_v32 = vld [vmem:[#allocation10 + $0x92c] ss:$16 sps:$4 sm:$0xff]  }
 0x447   : > { %6088 = vmatmul.mubr.bf16.vlgmr.msra.gmra.mxu1 %v23317_v23  ;;  %v20926_v23 = vld [vmem:[#allocation10 + $0xa80] ss:$16 sps:$4 sm:$0xff]  }
 0x448   : > { %6928 = vmatmul.mubr.bf16.vlgmr.msra.gmra.mxu0 %v23279_v54  ;;  %6939 = vmatpush1.bf16.msra.mxu1 %v20908_v6  ;;  %v23350_v6 = vpop.f32.mrf.mxu0 }
 0x449   : > { %6970 = vmatprep.mubr.bf16.mxu1 %v23324_v37  ;;  %6982 = vmatpush1.bf16.msra.mxu0 %v20911_v40  ;;  %v23352_v40 = vpop.f32.mrf.mxu1 }
 0x44a   : > { %7013 = vmatprep.mubr.bf16.mxu0 %v23276_v53  ;;  %6940 = vmatprep.subr.bf16.mxu1 %v20916_v29  ;;  %v20935_v53 = vld [vmem:[#allocation10 + $0x868] ss:$16 sps:$4 sm:$0xff]   ;;  %v20992_v29 = vld [vmem:[#allocation10 + $0xb20] ss:$16 sps:$4 sm:$0xff]  }
 0x44b   : > { %6983 = vmatprep.subr.bf16.mxu0 %v20919_v43  ;;  %v20995_v43 = vld [vmem:[#allocation10 + $0x928] ss:$16 sps:$4 sm:$0xff]  }
 0x44c   : > { %6941 = vmatpush1.bf16.msra.mxu1 %v20914_v44  ;;  %v21000_v44 = vld [vmem:[#allocation10 + $0xb04] ss:$16 sps:$4 sm:$0xff]  }
 0x44d   : > { %6984 = vmatpush1.bf16.msra.mxu0 %v20917_v30  ;;  %6942 = vmatprep.subr.bf16.mxu1 %v20922_v45  ;;  %v21003_v30 = vld [vmem:[#allocation10 + $0x90c] ss:$16 sps:$4 sm:$0xff]   ;;  %v23354_v45 = vpop.f32.mrf.mxu0 }
 0x44e   : > { %6985 = vmatprep.subr.bf16.mxu0 %v20925_v1  ;;  %v23356_v1 = vpop.f32.mrf.mxu1 }
 0x450   : > { %6943 = vmatpush1.bf16.msra.mxu1 %v20920_v16  ;;  %v20998_v16 = vld [vmem:[#allocation10 + $0xb00] ss:$16 sps:$4 sm:$0xff]  }
 0x451   : > { %6986 = vmatpush1.bf16.msra.mxu0 %v20923_v8  ;;  %6944 = vmatprep.subr.bf16.mxu1 %v20928_v63  ;;  %v21001_v8 = vld [vmem:[#allocation10 + $0x908] ss:$16 sps:$4 sm:$0xff]   ;;  %v21006_v63 = vld [vmem:[#allocation10 + $0xaec] ss:$16 sps:$4 sm:$0xff]  }
 0x452   : > { %6987 = vmatprep.subr.bf16.mxu0 %v20931_v49  ;;  %v23358_v49 = vpop.f32.mrf.mxu0 }
 0x454   : > { %6945 = vmatpush1.bf16.msra.mxu1 %v20926_v23  ;;  %v23360_v23 = vpop.f32.mrf.mxu1 }
 0x455   : > { %6988 = vmatpush1.bf16.msra.mxu0 %v20929_v42  ;;  %6946 = vmatprep.subr.bf16.mxu1 %v20934_v10  ;;  %v21004_v42 = vld [vmem:[#allocation10 + $0xae8] ss:$16 sps:$4 sm:$0xff]   ;;  %v5230_v10 = vpop.f32.mrf.mxu0 }
 0x456   : > { %6989 = vmatprep.subr.bf16.mxu0 %v20937_v36  ;;  %v21009_v36 = vld [vmem:[#allocation10 + $0xacc] ss:$16 sps:$4 sm:$0xff]  }
 0x458   : > { %6947 = vmatpush1.bf16.msra.mxu1 %v20932_v51  ;;  %v23362_v51 = vpop.f32.mrf.mxu1 }
 0x459   : > { %6990 = vmatpush1.bf16.msra.mxu0 %v20935_v53  ;;  %6948 = vmatprep.subr.bf16.mxu1 %v20940_v55  ;;  %v21007_v53 = vld [vmem:[#allocation10 + $0xac8] ss:$16 sps:$4 sm:$0xff]   ;;  %v23364_v55 = vpop.f32.mrf.mxu0 }
 0x45a   : > { %6991 = vmatprep.subr.bf16.mxu0 %v20943_v25 }
 0x45c   : > { %6949 = vmatpush1.bf16.msra.mxu1 %v20938_v60  ;;  %v21012_v60 = vld [vmem:[#allocation10 + $0xaac] ss:$16 sps:$4 sm:$0xff]  }
 0x45d   : > { %6992 = vmatpush1.bf16.msra.mxu0 %v20941_v21  ;;  %6950 = vmatprep.subr.bf16.mxu1 %v20946_v62 }
 0x45e   : > { %6993 = vmatprep.subr.bf16.mxu0 %v20949_v34  ;;  %v21010_v34 = vld [vmem:[#allocation10 + $0xaa8] ss:$16 sps:$4 sm:$0xff]  }
 0x460   : > { %6951 = vmatpush1.bf16.msra.mxu1 %v20944_v7  ;;  %v5234_v7 = vpop.f32.mrf.mxu0 }
 0x461   : > { %6994 = vmatpush1.bf16.msra.mxu0 %v20947_v47  ;;  %6952 = vmatprep.subr.bf16.mxu1 %v20952_v14  ;;  %v21015_v14 = vld [vmem:[#allocation10 + $0xa8c] ss:$16 sps:$4 sm:$0xff]  }
 0x462   : > { %6995 = vmatprep.subr.bf16.mxu0 %v20955_v20 }
 0x464   : > { %6953 = vmatpush1.bf16.msra.mxu1 %v20950_v31  ;;  %v21052_v31 = vld [vmem:[#allocation15 + $0x4e0] ss:$16 sps:$4 sm:$0xff]  }
 0x465   : > { %6996 = vmatpush1.bf16.msra.mxu0 %v20953_v39  ;;  %6954 = vmatprep.subr.bf16.mxu1 %v20958_v57  ;;  %v21054_v39 = vld [vmem:[#allocation15 + $0x4e4] ss:$16 sps:$4 sm:$0xff]  }
 0x466   : > { %6997 = vmatprep.subr.bf16.mxu0 %v20961_v28  ;;  %v21057_v57 = vld [vmem:[#allocation15 + $0x4c4] ss:$16 sps:$4 sm:$0xff]   ;;  %v21013_v28 = vld [vmem:[#allocation10 + $0xa88] ss:$16 sps:$4 sm:$0xff]  }
 0x468   : > { %6955 = vmatpush2.bf16.msra.mxu1 %v20956_v61  ;;  %v21060_v61 = vld [vmem:[#allocation15 + $0x4a4] ss:$16 sps:$4 sm:$0xff]  }
 0x469   : > { %6998 = vmatpush2.bf16.msra.mxu0 %v20959_v58  ;;  %6956 = vmatprep.subr.bf16.mxu1 %v20964_v15  ;;  %v21016_v58 = vld [vmem:[#allocation10 + $0xa68] ss:$16 sps:$4 sm:$0xff]   ;;  %v21021_v15 = vld [vmem:[#allocation10 + $0xa4c] ss:$16 sps:$4 sm:$0xff]  }
 0x46a   : > { %6999 = vmatprep.subr.bf16.mxu0 %v20967_v24  ;;  %v21058_v24 = vld [vmem:[#allocation15 + $0x4a0] ss:$16 sps:$4 sm:$0xff]  }
 0x46c   : > { %6957 = vmatpush2.bf16.msra.mxu1 %v20962_v59  ;;  %v21063_v59 = vld [vmem:[#allocation15 + $0x484] ss:$16 sps:$4 sm:$0xff]  }
 0x46d   : > { %7000 = vmatpush2.bf16.msra.mxu0 %v20965_v56  ;;  %6958 = vmatprep.subr.bf16.mxu1 %v20970_v0  ;;  %v21019_v56 = vld [vmem:[#allocation10 + $0xa48] ss:$16 sps:$4 sm:$0xff]   ;;  %v21024_v0 = vld [vmem:[#allocation10 + $0xa2c] ss:$16 sps:$4 sm:$0xff]  }
 0x46e   : > { %7001 = vmatprep.subr.bf16.mxu0 %v20973_v33  ;;  %v21061_v33 = vld [vmem:[#allocation15 + $0x480] ss:$16 sps:$4 sm:$0xff]  }
 0x470   : > { %6959 = vmatpush2.bf16.msra.mxu1 %v20968_v3  ;;  %v21066_v3 = vld [vmem:[#allocation15 + $0x464] ss:$16 sps:$4 sm:$0xff]  }
 0x471   : > { %7002 = vmatpush2.bf16.msra.mxu0 %v20971_v35  ;;  %6960 = vmatprep.subr.bf16.mxu1 %v20976_v9  ;;  %v21022_v35 = vld [vmem:[#allocation10 + $0xa28] ss:$16 sps:$4 sm:$0xff]   ;;  %v21027_v9 = vld [vmem:[#allocation10 + $0xa0c] ss:$16 sps:$4 sm:$0xff]  }
 0x472   : > { %7003 = vmatprep.subr.bf16.mxu0 %v20979_v26  ;;  %v21064_v26 = vld [vmem:[#allocation15 + $0x460] ss:$16 sps:$4 sm:$0xff]  }
 0x474   : > { %6961 = vmatpush2.bf16.msra.mxu1 %v20974_v2  ;;  %v21069_v2 = vld [vmem:[#allocation15 + $0x444] ss:$16 sps:$4 sm:$0xff]  }
 0x475   : > { %7004 = vmatpush2.bf16.msra.mxu0 %v20977_v11  ;;  %6962 = vmatprep.subr.bf16.mxu1 %v20982_v12  ;;  %v21025_v11 = vld [vmem:[#allocation10 + $0xa08] ss:$16 sps:$4 sm:$0xff]   ;;  %v21030_v12 = vld [vmem:[#allocation10 + $0xbec] ss:$16 sps:$4 sm:$0xff]  }
 0x476   : > { %7005 = vmatprep.subr.bf16.mxu0 %v20985_v5  ;;  %v21067_v5 = vld [vmem:[#allocation15 + $0x440] ss:$16 sps:$4 sm:$0xff]  }
 0x478   : > { %6963 = vmatpush2.bf16.msra.mxu1 %v20980_v19  ;;  %v21072_v19 = vld [vmem:[#allocation15 + $0x424] ss:$16 sps:$4 sm:$0xff]  }
 0x479   : > { %7006 = vmatpush2.bf16.msra.mxu0 %v20983_v38  ;;  %6964 = vmatprep.subr.bf16.mxu1 %v20988_v41  ;;  %v21028_v38 = vld [vmem:[#allocation10 + $0xbe8] ss:$16 sps:$4 sm:$0xff]   ;;  %v21033_v41 = vld [vmem:[#allocation10 + $0xbcc] ss:$16 sps:$4 sm:$0xff]  }
 0x47a   : > { %7007 = vmatprep.subr.bf16.mxu0 %v20991_v52  ;;  %v21070_v52 = vld [vmem:[#allocation15 + $0x420] ss:$16 sps:$4 sm:$0xff]  }
 0x47c   : > { %6965 = vmatpush2.bf16.msra.mxu1 %v20986_v27  ;;  %v21075_v27 = vld [vmem:[#allocation15 + $0x404] ss:$16 sps:$4 sm:$0xff]  }
 0x47d   : > { %7008 = vmatpush2.bf16.msra.mxu0 %v20989_v4  ;;  %6966 = vmatprep.subr.bf16.mxu1 %v20994_v46  ;;  %v21031_v4 = vld [vmem:[#allocation10 + $0xbc8] ss:$16 sps:$4 sm:$0xff]   ;;  %v21036_v46 = vld [vmem:[#allocation10 + $0xbac] ss:$16 sps:$4 sm:$0xff]  }
 0x47e   : > { %7009 = vmatprep.subr.bf16.mxu0 %v20997_v32  ;;  %v21073_v32 = vld [vmem:[#allocation15 + $0x400] ss:$16 sps:$4 sm:$0xff]  }
 0x480   : > { %6967 = vmatpush2.bf16.msra.mxu1 %v20992_v29  ;;  %v21078_v29 = vld [vmem:[#allocation15 + $0x5e4] ss:$16 sps:$4 sm:$0xff]  }
 0x481   : > { %7010 = vmatpush2.bf16.msra.mxu0 %v20995_v43  ;;  %6968 = vmatprep.subr.bf16.mxu1 %v21000_v44  ;;  %v21034_v43 = vld [vmem:[#allocation10 + $0xba8] ss:$16 sps:$4 sm:$0xff]   ;;  %v21039_v44 = vld [vmem:[#allocation10 + $0xb8c] ss:$16 sps:$4 sm:$0xff]  }
 0x482   : > { %7011 = vmatprep.subr.bf16.mxu0 %v21003_v30  ;;  %v21076_v30 = vld [vmem:[#allocation15 + $0x5e0] ss:$16 sps:$4 sm:$0xff]  }
 0x484   : > { %6969 = vmatpush2.bf16.msra.mxu1 %v20998_v16  ;;  %v21037_v16 = vld [vmem:[#allocation10 + $0xb88] ss:$16 sps:$4 sm:$0xff]  }
 0x485   : > { %7012 = vmatpush2.bf16.msra.mxu0 %v21001_v8  ;;  %7024 = vmatprep.subr.bf16.mxu1 %v21006_v63  ;;  %v21042_v8 = vld [vmem:[#allocation10 + $0xb6c] ss:$16 sps:$4 sm:$0xff]   ;;  %v21040_v63 = vld [vmem:[#allocation10 + $0xb68] ss:$16 sps:$4 sm:$0xff]  }
 0x486   : > { %8102 = vmatprep.subr.bf16.mxu0 %v21054_v39 }
 0x487   : > { %v5273_v25 = vpop.f32.mrf.mxu1  ;;  %6971 = vmatmul.mubr.bf16.vlgmr.msra.gmra.mxu1 %v23327_v13 }
 0x488   : > { %v23367_v21 = vadd.f32 %v5273_v25, %v5230_v10  ;;  %7014 = vmatmul.mubr.bf16.vlgmr.msra.gmra.mxu0 %v23279_v54  ;;  %7025 = vmatpush1.bf16.msra.mxu1 %v21004_v42  ;;  %v21018_v54 = vld [vmem:[#allocation10 + $0xa6c] ss:$16 sps:$4 sm:$0xff]   ;;  %v23375_v10 = vpop.f32.mrf.mxu0 }
 0x489   : > { %7056 = vmatprep.mubr.bf16.mxu1 %v23324_v37  ;;  %v23371_v62 = vpop.f32.mrf.mxu1  ;;  %7026 = vmatprep.subr.bf16.mxu1 %v21009_v36  ;;  %v21055_v37 = vld [vmem:[#allocation15 + $0x4c0] ss:$16 sps:$4 sm:$0xff]   ;;  %v21045_v42 = vld [vmem:[#allocation10 + $0xb4c] ss:$16 sps:$4 sm:$0xff]  }
 0x48a   : > { %8103 = vmatpush1.bf16.msra.mxu0 %v21052_v31  ;;  %v21043_v36 = vld [vmem:[#allocation10 + $0xb48] ss:$16 sps:$4 sm:$0xff]   ;;  %v23377_v25 = vpop.f32.mrf.mxu0 }
 0x48b   : > { %v5277_v47 = vpop.f32.mrf.mxu1  ;;  %8104 = vmatprep.subr.bf16.mxu0 %v21057_v57  ;;  %v21079_v31 = vld [vmem:[#allocation15 + $0x5c0] ss:$16 sps:$4 sm:$0xff]   ;;  %v21084_v57 = vld [vmem:[#allocation15 + $0x5a4] ss:$16 sps:$4 sm:$0xff]  }
 0x48c   : > { %v23373_v20 = vadd.f32 %v5277_v47, %v5234_v7  ;;  %7027 = vmatpush1.bf16.msra.mxu1 %v21007_v53  ;;  %v21048_v53 = vld [vmem:[#allocation10 + $0xb2c] ss:$16 sps:$4 sm:$0xff]   ;;  %v23379_v7 = vpop.f32.mrf.mxu0  ;;  %v21049_v47 = vld [vmem:[#allocation10 + $0xb08] ss:$16 sps:$4 sm:$0xff]  }
 0x48d   : > { %7028 = vmatprep.subr.bf16.mxu1 %v21012_v60  ;;  %v21046_v60 = vld [vmem:[#allocation10 + $0xb28] ss:$16 sps:$4 sm:$0xff]  }
 0x48e   : > { %8105 = vmatpush1.bf16.msra.mxu0 %v21055_v37  ;;  %v23381_v39 = vpop.f32.mrf.mxu0 }
 0x48f   : > { %8106 = vmatprep.subr.bf16.mxu0 %v21060_v61  ;;  %v21087_v61 = vld [vmem:[#allocation15 + $0x584] ss:$16 sps:$4 sm:$0xff]  }
 0x490   : > { %7029 = vmatpush1.bf16.msra.mxu1 %v21010_v34  ;;  %v21051_v34 = vld [vmem:[#allocation10 + $0xb0c] ss:$16 sps:$4 sm:$0xff]  }
 0x491   : > { %7030 = vmatprep.subr.bf16.mxu1 %v21015_v14  ;;  %v21081_v14 = vld [vmem:[#allocation15 + $0x5c4] ss:$16 sps:$4 sm:$0xff]  }
 0x492   : > { %8107 = vmatpush1.bf16.msra.mxu0 %v21058_v24 }
 0x493   : > { %8108 = vmatprep.subr.bf16.mxu0 %v21063_v59 }
 0x494   : > { %7031 = vmatpush1.bf16.msra.mxu1 %v21013_v28  ;;  %v21082_v28 = vld [vmem:[#allocation15 + $0x5a0] ss:$16 sps:$4 sm:$0xff]  }
 0x495   : > { %7032 = vmatprep.subr.bf16.mxu1 %v21018_v54  ;;  %v23383_v54 = vpop.f32.mrf.mxu0 }
 0x496   : > { %8109 = vmatpush1.bf16.msra.mxu0 %v21061_v33  ;;  %v21088_v33 = vld [vmem:[#allocation15 + $0x560] ss:$16 sps:$4 sm:$0xff]  }
 0x497   : > { %8110 = vmatprep.subr.bf16.mxu0 %v21066_v3  ;;  %v22618_v3 = vmov 0  }
 0x498   : > { %7033 = vmatpush1.bf16.msra.mxu1 %v21016_v58  ;;  %7145 = vst [vmem:[#allocation3 + $0x40] sm:$0xff] %v22618_v3  ;;  %7146 = vst [vmem:[#allocation3 + $0x38] sm:$0xff] %v22618_v3 }
 0x499   : > { %7034 = vmatprep.subr.bf16.mxu1 %v21021_v15  ;;  %v21085_v15 = vld [vmem:[#allocation15 + $0x580] ss:$16 sps:$4 sm:$0xff]   ;;  %7147 = vst [vmem:[#allocation3 + $0x48] sm:$0xff] %v22618_v3  ;;  %7148 = vst [vmem:[#allocation3 + $0x50] sm:$0xff] %v22618_v3 }
 0x49a   : > { %8111 = vmatpush1.bf16.msra.mxu0 %v21064_v26  ;;  %v21099_v26 = vld [vmem:[#allocation15 + $0x504] ss:$16 sps:$4 sm:$0xff]  }
 0x49b   : > { %8112 = vmatprep.subr.bf16.mxu0 %v21069_v2  ;;  %v21097_v2 = vld [vmem:[#allocation15 + $0x500] ss:$16 sps:$4 sm:$0xff]  }
 0x49c   : > { %7035 = vmatpush1.bf16.msra.mxu1 %v21019_v56  ;;  %v21090_v56 = vld [vmem:[#allocation15 + $0x564] ss:$16 sps:$4 sm:$0xff]  }
 0x49d   : > { %7036 = vmatprep.subr.bf16.mxu1 %v21024_v0 }
 0x49e   : > { %8113 = vmatpush1.bf16.msra.mxu0 %v21067_v5  ;;  %v21108_v5 = vld [vmem:[#allocation15 + $0x6c4] ss:$16 sps:$4 sm:$0xff]  }
 0x49f   : > { %8114 = vmatprep.subr.bf16.mxu0 %v21072_v19  ;;  %v21106_v19 = vld [vmem:[#allocation15 + $0x6c0] ss:$16 sps:$4 sm:$0xff]  }
 0x4a0   : > { %7037 = vmatpush1.bf16.msra.mxu1 %v21022_v35  ;;  %v21096_v35 = vld [vmem:[#allocation15 + $0x524] ss:$16 sps:$4 sm:$0xff]  }
 0x4a1   : > { %7038 = vmatprep.subr.bf16.mxu1 %v21027_v9  ;;  %v21094_v9 = vld [vmem:[#allocation15 + $0x520] ss:$16 sps:$4 sm:$0xff]  }
 0x4a2   : > { %8115 = vmatpush1.bf16.msra.mxu0 %v21070_v52  ;;  %v21120_v52 = vld [vmem:[#allocation15 + $0x684] ss:$16 sps:$4 sm:$0xff]  }
 0x4a3   : > { %8116 = vmatprep.subr.bf16.mxu0 %v21075_v27  ;;  %v21118_v27 = vld [vmem:[#allocation15 + $0x680] ss:$16 sps:$4 sm:$0xff]  }
 0x4a4   : > { %7039 = vmatpush1.bf16.msra.mxu1 %v21025_v11  ;;  %v21102_v11 = vld [vmem:[#allocation15 + $0x6e4] ss:$16 sps:$4 sm:$0xff]  }
 0x4a5   : > { %7040 = vmatprep.subr.bf16.mxu1 %v21030_v12  ;;  %v21105_v12 = vld [vmem:[#allocation15 + $0x4ec] ss:$16 sps:$4 sm:$0xff]  }
 0x4a6   : > { %8117 = vmatpush1.bf16.msra.mxu0 %v21073_v32  ;;  %v21132_v32 = vld [vmem:[#allocation15 + $0x644] ss:$16 sps:$4 sm:$0xff]  }
 0x4a7   : > { %8118 = vmatprep.subr.bf16.mxu0 %v21078_v29  ;;  %v21130_v29 = vld [vmem:[#allocation15 + $0x640] ss:$16 sps:$4 sm:$0xff]  }
 0x4a8   : > { %7041 = vmatpush2.bf16.msra.mxu1 %v21028_v38  ;;  %v21114_v38 = vld [vmem:[#allocation15 + $0x6a4] ss:$16 sps:$4 sm:$0xff]  }
 0x4a9   : > { %7042 = vmatprep.subr.bf16.mxu1 %v21033_v41  ;;  %v21112_v41 = vld [vmem:[#allocation15 + $0x6a0] ss:$16 sps:$4 sm:$0xff]  }
 0x4aa   : > { %8119 = vmatpush2.bf16.msra.mxu0 %v21076_v30  ;;  %v21144_v30 = vld [vmem:[#allocation15 + $0x604] ss:$16 sps:$4 sm:$0xff]  }
 0x4ab   : > { %8120 = vmatprep.subr.bf16.mxu0 %v21081_v14  ;;  %v21162_v14 = vld [vmem:[#allocation15 + $0x7a4] ss:$16 sps:$4 sm:$0xff]  }
 0x4ac   : > { %7043 = vmatpush2.bf16.msra.mxu1 %v21031_v4  ;;  %v21126_v4 = vld [vmem:[#allocation15 + $0x664] ss:$16 sps:$4 sm:$0xff]  }
 0x4ad   : > { %7044 = vmatprep.subr.bf16.mxu1 %v21036_v46  ;;  %v21124_v46 = vld [vmem:[#allocation15 + $0x660] ss:$16 sps:$4 sm:$0xff]  }
 0x4ae   : > { %8121 = vmatpush2.bf16.msra.mxu0 %v21079_v31 }
 0x4af   : > { %8122 = vmatprep.subr.bf16.mxu0 %v21084_v57  ;;  %v21160_v57 = vld [vmem:[#allocation15 + $0x7a0] ss:$16 sps:$4 sm:$0xff]  }
 0x4b0   : > { %7045 = vmatpush2.bf16.msra.mxu1 %v21034_v43  ;;  %v21138_v43 = vld [vmem:[#allocation15 + $0x624] ss:$16 sps:$4 sm:$0xff]  }
 0x4b1   : > { %7046 = vmatprep.subr.bf16.mxu1 %v21039_v44  ;;  %v21136_v44 = vld [vmem:[#allocation15 + $0x620] ss:$16 sps:$4 sm:$0xff]  }
 0x4b2   : > { %8123 = vmatpush2.bf16.msra.mxu0 %v21082_v28  ;;  %v5276_v28 = vadd.f32 %v23371_v62, %v23364_v55 }
 0x4b3   : > { %8124 = vmatprep.subr.bf16.mxu0 %v21087_v61 }
 0x4b4   : > { %7047 = vmatpush2.bf16.msra.mxu1 %v21037_v16  ;;  %v5279_v16 = vpop.f32.mrf.mxu1 }
 0x4b5   : > { %7048 = vmatprep.subr.bf16.mxu1 %v21042_v8  ;;  %v21142_v8 = vld [vmem:[#allocation15 + $0x600] ss:$16 sps:$4 sm:$0xff]   ;;  %v5280_v3 = vadd.f32 %v5279_v16, %v23375_v10  ;;  %v21186_v10 = vld [vmem:[#allocation15 + $0x724] ss:$16 sps:$4 sm:$0xff]  }
 0x4b6   : > { %8125 = vmatpush2.bf16.msra.mxu0 %v21085_v15 }
 0x4b7   : > { %8126 = vmatprep.subr.bf16.mxu0 %v21090_v56 }
 0x4b8   : > { %7049 = vmatpush2.bf16.msra.mxu1 %v21040_v63 }
 0x4b9   : > { %7050 = vmatprep.subr.bf16.mxu1 %v21045_v42  ;;  %v21150_v42 = vld [vmem:[#allocation15 + $0x7e4] ss:$16 sps:$4 sm:$0xff]  }
 0x4ba   : > { %8127 = vmatpush2.bf16.msra.mxu0 %v21088_v33 }
 0x4bc   : > { %7051 = vmatpush2.bf16.msra.mxu1 %v21043_v36  ;;  %v21148_v36 = vld [vmem:[#allocation15 + $0x7e0] ss:$16 sps:$4 sm:$0xff]  }
 0x4bd   : > { %7052 = vmatprep.subr.bf16.mxu1 %v21048_v53 }
 0x4c0   : > { %7053 = vmatpush2.bf16.msra.mxu1 %v21046_v60  ;;  %v21156_v60 = vld [vmem:[#allocation15 + $0x7c4] ss:$16 sps:$4 sm:$0xff]  }
 0x4c1   : > { %7054 = vmatprep.subr.bf16.mxu1 %v21051_v34 }
 0x4c4   : > { %7055 = vmatpush2.bf16.msra.mxu1 %v21049_v47  ;;  %v21154_v47 = vld [vmem:[#allocation15 + $0x7c0] ss:$16 sps:$4 sm:$0xff]  }
 0x4c5   : > { %8145 = vmatprep.subr.bf16.mxu1 %v21102_v11  ;;  %v21184_v11 = vld [vmem:[#allocation15 + $0x720] ss:$16 sps:$4 sm:$0xff]  }
 0x4c7   : > { %7057 = vmatmul.mubr.bf16.vlgmr.msra.gmra.mxu1 %v23327_v13  ;;  %v21093_v13 = vld [vmem:[#allocation15 + $0x544] ss:$16 sps:$4 sm:$0xff]   ;;  %v6003_v63 = vpop.f32.mrf.mxu1 }
 0x4c8   : > { %v6046_v37 = vpop.f32.mrf.mxu0  ;;  %8128 = vmatprep.subr.bf16.mxu0 %v21093_v13  ;;  %v21166_v13 = vld [vmem:[#allocation15 + $0x780] ss:$16 sps:$4 sm:$0xff]  }
 0x4c9   : > { %v23387_v58 = vadd.f32 %v6046_v37, %v23367_v21  ;;  %v21091_v21 = vld [vmem:[#allocation15 + $0x540] ss:$16 sps:$4 sm:$0xff]   ;;  %v6005_v53 = vpop.f32.mrf.mxu1 }
 0x4ca   : > { %v23389_v24 = vpop.f32.mrf.mxu0  ;;  %8129 = vmatpush2.bf16.msra.mxu0 %v21091_v21 }
 0x4cb   : > { %8130 = vmatprep.subr.bf16.mxu0 %v21096_v35  ;;  %v23394_v34 = vpop.f32.mrf.mxu1  ;;  %v6049_v61 = vadd.f32 %v23389_v24, %v5276_v28 }
 0x4cc   : > { %v6050_v59 = vpop.f32.mrf.mxu0 }
 0x4cd   : > { %v23392_v0 = vadd.f32 %v6050_v59, %v23373_v20  ;;  %v21100_v20 = vld [vmem:[#allocation15 + $0x6e0] ss:$16 sps:$4 sm:$0xff]   ;;  %v23396_v31 = vpop.f32.mrf.mxu1  ;;  %v21168_v59 = vld [vmem:[#allocation15 + $0x784] ss:$16 sps:$4 sm:$0xff]  }
 0x4ce   : > { %8131 = vmatpush2.bf16.msra.mxu0 %v21094_v9  ;;  %8146 = vmatpush1.bf16.msra.mxu1 %v21100_v20  ;;  %v6052_v56 = vpop.f32.mrf.mxu0  ;;  %v21174_v9 = vld [vmem:[#allocation15 + $0x764] ss:$16 sps:$4 sm:$0xff]   ;;  %v21178_v20 = vld [vmem:[#allocation15 + $0x740] ss:$16 sps:$4 sm:$0xff]  }
 0x4cf   : > { %8132 = vmatprep.subr.bf16.mxu0 %v21099_v26  ;;  %8147 = vmatprep.subr.bf16.mxu1 %v21108_v5  ;;  %v6053_v55 = vadd.f32 %v6052_v56, %v5280_v3  ;;  %v21172_v26 = vld [vmem:[#allocation15 + $0x760] ss:$16 sps:$4 sm:$0xff]  }
 0x4d0   : > { %v21190_v5 = vld [vmem:[#allocation15 + $0x700] ss:$16 sps:$4 sm:$0xff]  }
 0x4d2   : > { %8133 = vmatpush2.bf16.msra.mxu0 %v21097_v2  ;;  %8148 = vmatpush1.bf16.msra.mxu1 %v21106_v19  ;;  %v21180_v2 = vld [vmem:[#allocation15 + $0x744] ss:$16 sps:$4 sm:$0xff]  }
 0x4d3   : > { %8188 = vmatprep.subr.bf16.mxu0 %v21105_v12  ;;  %8149 = vmatprep.subr.bf16.mxu1 %v21114_v38  ;;  %v21192_v12 = vld [vmem:[#allocation15 + $0x704] ss:$16 sps:$4 sm:$0xff]   ;;  %v5188_v38 = vadd.f32 %v23352_v40, %v23348_v18 }
 0x4d6   : > { %8150 = vmatpush1.bf16.msra.mxu1 %v21112_v41  ;;  %v5190_v41 = vadd.f32 %v23356_v1, %v23350_v6  ;;  %v5194_v6 = vadd.f32 %v23362_v51, %v23358_v49 }
 0x4d7   : > { %8151 = vmatprep.subr.bf16.mxu1 %v21120_v52 }
 0x4da   : > { %8152 = vmatpush1.bf16.msra.mxu1 %v21118_v27  ;;  %v23416_v27 = vld [vmem:[#allocation12] sm:$0xf] }
 0x4db   : > { %8153 = vmatprep.subr.bf16.mxu1 %v21126_v4  ;;  %v5961_v4 = vadd.f32 %v23377_v25, %v5188_v38  ;;  %v7080_v18 = vrot.slane %v23416_v27, %v23233_v17 }
 0x4de   : > { %8154 = vmatpush1.bf16.msra.mxu1 %v21124_v46  ;;  %v5192_v46 = vadd.f32 %v23360_v23, %v23354_v45 }
 0x4df   : > { %8155 = vmatprep.subr.bf16.mxu1 %v21132_v32  ;;  %v5963_v32 = vadd.f32 %v23379_v7, %v5190_v41  ;;  %v7084_v7 = vrot.slane %v23416_v27, %v23241_v22 }
 0x4e0   : > { %v5965_v40 = vadd.f32 %v23381_v39, %v5192_v46  ;;  %v9176_v46 = vld [vmem:[#allocation3 + $0x48] sm:$0x11] }
 0x4e1   : > { %v6006_v1 = vadd.f32 %v6005_v53, %v5963_v32  ;;  %v21109_v32 = vld [vmem:[#allocation15 + $0x4c8] ss:$16 sps:$4 sm:$0xff]  }
 0x4e2   : > { %8156 = vmatpush1.bf16.msra.mxu1 %v21130_v29 }
 0x4e3   : > { %8157 = vmatprep.subr.bf16.mxu1 %v21138_v43  ;;  %v23422_v43 = vld [vmem:[#allocation13] sm:$0xf] }
 0x4e4   : > { %v7110_v45 = vrot.slane %v23422_v43, %v23233_v17  ;;  %v7114_v51 = vrot.slane %v23422_v43, %v23241_v22 }
 0x4e6   : > { %8158 = vmatpush1.bf16.msra.mxu1 %v21136_v44  ;;  %v6004_v44 = vadd.f32 %v6003_v63, %v5961_v4  ;;  %v5967_v63 = vadd.f32 %v23383_v54, %v5194_v6  ;;  %v23462_v6 = vcombine.low %v9176_v46, %v9176_v46 }
 0x4e7   : > { %8159 = vmatprep.subr.bf16.mxu1 %v21144_v30 }
 0x4e8   : > { %v6010_v53 = vadd.f32 %v23396_v31, %v5967_v63 }
 0x4ea   : > { %8160 = vmatpush1.bf16.msra.mxu1 %v21142_v8 }
 0x4eb   : > { %8161 = vmatprep.subr.bf16.mxu1 %v21150_v42  ;;  %v6008_v42 = vadd.f32 %v23394_v34, %v5965_v40 }
 0x4ee   : > { %8162 = vmatpush2.bf16.msra.mxu1 %v21148_v36 }
 0x4ef   : > { %8163 = vmatprep.subr.bf16.mxu1 %v21156_v60 }
 0x4f2   : > { %8164 = vmatpush2.bf16.msra.mxu1 %v21154_v47 }
 0x4f3   : > { %8165 = vmatprep.subr.bf16.mxu1 %v21162_v14 }
 0x4f6   : > { %8166 = vmatpush2.bf16.msra.mxu1 %v21160_v57 }
 0x4f7   : > { %8167 = vmatprep.subr.bf16.mxu1 %v21168_v59 }
 0x4fa   : > { %8168 = vmatpush2.bf16.msra.mxu1 %v21166_v13 }
 0x4fb   : > { %8169 = vmatprep.subr.bf16.mxu1 %v21174_v9 }
 0x4fe   : > { %8170 = vmatpush2.bf16.msra.mxu1 %v21172_v26 }
 0x4ff   : > { %8171 = vmatprep.subr.bf16.mxu1 %v21180_v2 }
 0x502   : > { %8172 = vmatpush2.bf16.msra.mxu1 %v21178_v20 }
 0x503   : > { %8173 = vmatprep.subr.bf16.mxu1 %v21186_v10 }
 0x506   : > { %8174 = vmatpush2.bf16.msra.mxu1 %v21184_v11 }
 0x507   : > { %v6089_v37 = vpop.f32.mrf.mxu1  ;;  %8175 = vmatprep.subr.bf16.mxu1 %v21192_v12 }
 0x508   : > { %v23402_v15 = vadd.f32 %v6089_v37, %v23387_v58  ;;  %v6929_v19 = vpop.f32.mrf.mxu0 }
 0x509   : > { %v6091_v33 = vpop.f32.mrf.mxu1 }
 0x50a   : > { %v23405_v21 = vadd.f32 %v6091_v33, %v6049_v61  ;;  %8176 = vmatpush2.bf16.msra.mxu1 %v21190_v5  ;;  %v6931_v52 = vpop.f32.mrf.mxu0  ;;  %v21103_v5 = vld [vmem:[#allocation15 + $0x4e8] ss:$16 sps:$4 sm:$0xff]  }
 0x50b   : > { %v6093_v35 = vpop.f32.mrf.mxu1 }
 0x50c   : > { %v23408_v62 = vadd.f32 %v6093_v35, %v23392_v0  ;;  %v21198_v0 = vld [vmem:[#allocation15 + $0x6ec] ss:$16 sps:$4 sm:$0xff]   ;;  %v6933_v25 = vpop.f32.mrf.mxu0  ;;  %v23438_v35 = vld [vmem:[#allocation3 + $0x40] sm:$0x88] }
 0x50d   : > { %v6095_v24 = vpop.f32.mrf.mxu1  ;;  %8231 = vmatprep.subr.bf16.mxu1 %v21198_v0 }
 0x50e   : > { %v23410_v58 = vadd.f32 %v6095_v24, %v6053_v55  ;;  %v6935_v47 = vpop.f32.mrf.mxu0 }
 0x547   : > { %v6972_v29 = vpop.f32.mrf.mxu1 }
 0x548   : > { %v6973_v30 = vadd.f32 %v6972_v29, %v6929_v19  ;;  %v21111_v19 = vld [vmem:[#allocation15 + $0x4cc] ss:$16 sps:$4 sm:$0xff]  }
 0x549   : > { %v6974_v16 = vpop.f32.mrf.mxu1 }
 0x54a   : > { %v7067_v8 = vadd.f32 %v6973_v30, %v6004_v44  ;;  %v6975_v23 = vadd.f32 %v6974_v16, %v6931_v52  ;;  %v21117_v30 = vld [vmem:[#allocation15 + $0x4ac] ss:$16 sps:$4 sm:$0xff]   ;;  %v21115_v16 = vld [vmem:[#allocation15 + $0x4a8] ss:$16 sps:$4 sm:$0xff]  }
 0x54b   : > { %v6976_v36 = vpop.f32.mrf.mxu1 }
 0x54c   : > { %v7097_v60 = vmul.f32 %v7080_v18, %v7067_v8  ;;  %v7068_v49 = vadd.f32 %v6975_v23, %v6006_v1  ;;  %v6977_v39 = vadd.f32 %v6976_v36, %v6933_v25  ;;  %v21123_v23 = vld [vmem:[#allocation15 + $0x48c] ss:$16 sps:$4 sm:$0xff]   ;;  %v10989_v36 = vrot.slane %v23462_v6, 1 }
 0x54d   : > { %v6978_v14 = vpop.f32.mrf.mxu1 }
 0x54e   : > { %v7127_v57 = vadd.f32 %v7110_v45, %v7097_v60  ;;  %v7098_v28 = vmul.f32 %v7084_v7, %v7068_v49  ;;  %v7071_v37 = vadd.f32 %v6977_v39, %v6008_v42  ;;  %v6979_v61 = vadd.f32 %v6978_v14, %v6935_v47  ;;  %v21129_v39 = vld [vmem:[#allocation15 + $0x46c] ss:$16 sps:$4 sm:$0xff]   ;;  %v21127_v14 = vld [vmem:[#allocation15 + $0x468] ss:$16 sps:$4 sm:$0xff]  }
 0x550   : > { %v7128_v59 = vadd.f32 %v7114_v51, %v7098_v28  ;;  %v7101_v56 = vmul.f32 %v7080_v18, %v7071_v37  ;;  %v7072_v54 = vadd.f32 %v6979_v61, %v6010_v53  ;;  %v7135_v33 = vmax.f32 %v7127_v57, 0.0  ;;  %v21135_v57 = vld [vmem:[#allocation15 + $0x44c] ss:$16 sps:$4 sm:$0xff]   ;;  %v21133_v28 = vld [vmem:[#allocation15 + $0x448] ss:$16 sps:$4 sm:$0xff]  }
 0x551   : > { %v23460_v18 = vcombine.high %v9176_v46, %v9176_v46  ;;  %v21141_v37 = vld [vmem:[#allocation15 + $0x42c] ss:$16 sps:$4 sm:$0xff]   ;;  %v21139_v61 = vld [vmem:[#allocation15 + $0x428] ss:$16 sps:$4 sm:$0xff]   ;;  %v7118_v46 = vrot.slane %v23422_v43, %v23287_v48 }
 0x552   : > { %v7136_v34 = vmax.f32 %v7128_v59, 0.0  ;;  %v7131_v13 = vadd.f32 %v7110_v45, %v7101_v56  ;;  %v7102_v3 = vmul.f32 %v7084_v7, %v7072_v54  ;;  %v21147_v59 = vld [vmem:[#allocation15 + $0x40c] ss:$16 sps:$4 sm:$0xff]   ;;  %v21145_v56 = vld [vmem:[#allocation15 + $0x408] ss:$16 sps:$4 sm:$0xff]  }
 0x553   : > { %v10992_v63 = vrot.slane %v23460_v18, 1  ;;  %v21153_v54 = vld [vmem:[#allocation15 + $0x5ec] ss:$16 sps:$4 sm:$0xff]  }
 0x554   : > { %v23440_v55 = vpack.c.bf16 %v7136_v34, %v7135_v33  ;;  %v7132_v9 = vadd.f32 %v7114_v51, %v7102_v3  ;;  %v7139_v31 = vmax.f32 %v7131_v13, 0.0  ;;  %v21121_v51 = vld [vmem:[#allocation15 + $0x488] ss:$16 sps:$4 sm:$0xff]   ;;  %v21165_v3 = vld [vmem:[#allocation15 + $0x5ac] ss:$16 sps:$4 sm:$0xff]  }
 0x555   : > { %v21157_v13 = vld [vmem:[#allocation15 + $0x5c8] ss:$16 sps:$4 sm:$0xff]  }
 0x556   : > { %7175 = vst [vmem:[#allocation3 + $0x28] sm:$0xff] %v23440_v55  ;;  %v23443_v24 = vmax.f32 %v7132_v9, 0.0  ;;  %v23447_v26 = vcombine.low %v23438_v35, %v23440_v55  ;;  %v22069_v12 = vpack.c.bf16 %v7139_v31, %v7139_v31  ;;  %v23455_v0 = vpack.c.bf16 %v7139_v31, %v7135_v33  ;;  %v21151_v33 = vld [vmem:[#allocation15 + $0x5e8] ss:$16 sps:$4 sm:$0xff]   ;;  %v7015_v9 = vpop.f32.mrf.mxu0 }
 0x558   : > { %v18839_v2 = vpack.c.bf16 %v23443_v24, %v7139_v31  ;;  %v8289_v20 = vshrl.u32 %v23447_v26, 16  ;;  %v8292_v10 = vshll.u32 %v23447_v26, 16  ;;  %v23453_v11 = vpack.c.bf16 %v23443_v24, %v7136_v34  ;;  %v21159_v34 = vld [vmem:[#allocation15 + $0x5cc] ss:$16 sps:$4 sm:$0xff]   ;;  %v21163_v31 = vld [vmem:[#allocation15 + $0x5a8] ss:$16 sps:$4 sm:$0xff]  }
 0x559   : > { %v8297_v52 = vshrl.u32 %v22069_v12, 16  ;;  %v8300_v4 = vshll.u32 %v22069_v12, 16 }
 0x55a   : > { %7177 = vst [vmem:[#allocation3] sm:$0xff] %v18839_v2  ;;  %8134 = vmatprep.mubr.bf16.mxu0 %v23453_v11  ;;  %v8291_v38 = vrot.slane %v8289_v20, 3  ;;  %v8294_v41 = vrot.slane %v8292_v10, 4  ;;  %v21171_v2 = vld [vmem:[#allocation15 + $0x58c] ss:$16 sps:$4 sm:$0xff]   ;;  %v7017_v20 = vpop.f32.mrf.mxu0 }
 0x55b   : > { %8135 = vmatmul.mubr.bf16.vlgmr.msra.gmra.mxu0 %v23455_v0  ;;  %v8299_v29 = vrot.slane %v8297_v52, 3  ;;  %v8302_v44 = vrot.slane %v8300_v4, 4  ;;  %v21169_v10 = vld [vmem:[#allocation15 + $0x588] ss:$16 sps:$4 sm:$0xff]  }
 0x55c   : > { %8189 = vmatpush1.bf16.msra.mxu0 %v21103_v5  ;;  %8220 = vmatprep.mubr.bf16.mxu0 %v23453_v11  ;;  %v8295_v40 = vor.u32 %v8294_v41, %v8291_v38  ;;  %v21177_v5 = vld [vmem:[#allocation15 + $0x56c] ss:$16 sps:$4 sm:$0xff]   ;;  %v7088_v38 = vrot.slane %v23416_v27, %v23287_v48  ;;  %v7019_v41 = vpop.f32.mrf.mxu0 }
 0x55d   : > { %8190 = vmatprep.subr.bf16.mxu0 %v21111_v19  ;;  %v8303_v1 = vor.u32 %v8302_v44, %v8299_v29  ;;  %v10911_v45 = vld [vmem:[#allocation3 + $0x28] sm:$0xee]  ;;  %v7092_v29 = vrot.slane %v23416_v27, %v23292_v50  ;;  %v22071_v27 = vpack.c.bf16 %v23443_v24, %v23443_v24 }
 0x55e   : > { %v21175_v44 = vld [vmem:[#allocation15 + $0x568] ss:$16 sps:$4 sm:$0xff]  }
 0x55f   : > { %v23467_v8 = vsel %vm931_vm2, %v8295_v40, %v8303_v1  ;;  %v21183_v40 = vld [vmem:[#allocation15 + $0x54c] ss:$16 sps:$4 sm:$0xff]  }
 0x560   : > { %8191 = vmatpush1.bf16.msra.mxu0 %v21109_v32 }
 0x561   : > { %v23464_v25 = vld [vmem:[#allocation3] sm:$0xff]  ;;  %8192 = vmatprep.subr.bf16.mxu0 %v21117_v30 }
 0x562   : > { %v18417_v7 = vcombine.high %v10911_v45, %v23464_v25  ;;  %v18416_v42 = vcombine.low %v10911_v45, %v23464_v25  ;;  %v7122_v45 = vrot.slane %v23422_v43, %v23292_v50 }
 0x564   : > { %v10991_v60 = vrot.slane %v18417_v7, 1  ;;  %v10988_v49 = vrot.slane %v18416_v42, 1  ;;  %8193 = vmatpush1.bf16.msra.mxu0 %v21115_v16  ;;  %v23491_v7 = vcombine.high %v23438_v35, %v23440_v55 }
 0x565   : > { %8194 = vmatprep.subr.bf16.mxu0 %v21123_v23 }
 0x566   : > { %v23474_v53 = vsel %vm3151_vm5, %v10991_v60, %v10992_v63  ;;  %v23477_v47 = vsel %vm3151_vm5, %v10988_v49, %v10989_v36  ;;  %v8306_v35 = vshrl.u32 %v23491_v7, 16  ;;  %v8309_v55 = vshll.u32 %v23491_v7, 16 }
 0x568   : > { %8195 = vmatpush1.bf16.msra.mxu0 %v21121_v51  ;;  %v21189_v51 = vld [vmem:[#allocation15 + $0x52c] ss:$16 sps:$4 sm:$0xff]  }
 0x569   : > { %8196 = vmatprep.subr.bf16.mxu0 %v21129_v39 }
 0x56c   : > { %8197 = vmatpush1.bf16.msra.mxu0 %v21127_v14 }
 0x56d   : > { %8198 = vmatprep.subr.bf16.mxu0 %v21135_v57  ;;  %v8314_v57 = vshrl.u32 %v22071_v27, 16 }
 0x570   : > { %8199 = vmatpush1.bf16.msra.mxu0 %v21133_v28  ;;  %v8317_v28 = vshll.u32 %v22071_v27, 16 }
 0x571   : > { %8200 = vmatprep.subr.bf16.mxu0 %v21141_v37 }
 0x574   : > { %8201 = vmatpush1.bf16.msra.mxu0 %v21139_v61 }
 0x575   : > { %8202 = vmatprep.subr.bf16.mxu0 %v21147_v59 }
 0x578   : > { %8203 = vmatpush1.bf16.msra.mxu0 %v21145_v56  ;;  %v21195_v56 = vld [vmem:[#allocation15 + $0x50c] ss:$16 sps:$4 sm:$0xff]  }
 0x579   : > { %8204 = vmatprep.subr.bf16.mxu0 %v21153_v54  ;;  %v7180_v54 = vld [vmem:[#allocation3 + $0x38] sm:$0x88] }
 0x57c   : > { %8205 = vmatpush2.bf16.msra.mxu0 %v21151_v33 }
 0x57d   : > { %8206 = vmatprep.subr.bf16.mxu0 %v21159_v34 }
 0x580   : > { %8207 = vmatpush2.bf16.msra.mxu0 %v21157_v13  ;;  %v8308_v13 = vrot.slane %v8306_v35, 3 }
 0x581   : > { %8208 = vmatprep.subr.bf16.mxu0 %v21165_v3  ;;  %v8311_v3 = vrot.slane %v8309_v55, 4 }
 0x584   : > { %8209 = vmatpush2.bf16.msra.mxu0 %v21163_v31 }
 0x585   : > { %8210 = vmatprep.subr.bf16.mxu0 %v21171_v2 }
 0x587   : > { %v7058_v12 = vpop.f32.mrf.mxu1 }
 0x588   : > { %v7059_v19 = vadd.f32 %v7058_v12, %v7015_v9  ;;  %8211 = vmatpush2.bf16.msra.mxu0 %v21169_v10  ;;  %v8319_v9 = vrot.slane %v8317_v28, 4 }
 0x589   : > { %v7060_v52 = vpop.f32.mrf.mxu1  ;;  %8212 = vmatprep.subr.bf16.mxu0 %v21177_v5  ;;  %v21201_v5 = vld [vmem:[#allocation15 + $0xe4] ss:$16 sps:$4 sm:$0xff]  }
 0x58a   : > { %v7069_v4 = vadd.f32 %v7059_v19, %v23402_v15  ;;  %v7061_v32 = vadd.f32 %v7060_v52, %v7017_v20  ;;  %v7021_v15 = vpop.f32.mrf.mxu0  ;;  %v21193_v20 = vld [vmem:[#allocation15 + $0x508] ss:$16 sps:$4 sm:$0xff]  }
 0x58b   : > { %v7062_v30 = vpop.f32.mrf.mxu1 }
 0x58c   : > { %v7099_v1 = vmul.f32 %v7088_v38, %v7069_v4  ;;  %v7070_v16 = vadd.f32 %v7061_v32, %v23405_v21  ;;  %v7063_v23 = vadd.f32 %v7062_v30, %v7019_v41  ;;  %8213 = vmatpush2.bf16.msra.mxu0 %v21175_v44  ;;  %v21181_v21 = vld [vmem:[#allocation15 + $0x548] ss:$16 sps:$4 sm:$0xff]   ;;  %v8312_v4 = vor.u32 %v8311_v3, %v8308_v13 }
 0x58d   : > { %v7064_v63 = vpop.f32.mrf.mxu1  ;;  %8214 = vmatprep.subr.bf16.mxu0 %v21183_v40  ;;  %v21196_v30 = vld [vmem:[#allocation15 + $0x6e8] ss:$16 sps:$4 sm:$0xff]   ;;  %v21199_v40 = vld [vmem:[#allocation15 + $0xe0] ss:$16 sps:$4 sm:$0xff]  }
 0x58e   : > { %v7129_v42 = vadd.f32 %v7118_v46, %v7099_v1  ;;  %v7100_v36 = vmul.f32 %v7092_v29, %v7070_v16  ;;  %v7073_v60 = vadd.f32 %v7063_v23, %v23408_v62  ;;  %v7065_v49 = vadd.f32 %v7064_v63, %v7021_v15  ;;  %v21187_v62 = vld [vmem:[#allocation15 + $0x528] ss:$16 sps:$4 sm:$0xff]   ;;  %v21204_v16 = vld [vmem:[#allocation15 + $0x6cc] ss:$16 sps:$4 sm:$0xff]   ;;  %v21207_v23 = vld [vmem:[#allocation15 + $0xc4] ss:$16 sps:$4 sm:$0xff]  }
 0x58f   : > { %v21208_v3 = vld [vmem:[#allocation15 + $0x6a8] ss:$16 sps:$4 sm:$0xff]  }
 0x590   : > { %v7130_v43 = vadd.f32 %v7122_v45, %v7100_v36  ;;  %v7103_v39 = vmul.f32 %v7088_v38, %v7073_v60  ;;  %v7074_v14 = vadd.f32 %v7065_v49, %v23410_v58  ;;  %v7137_v24 = vmax.f32 %v7129_v42, 0.0  ;;  %8215 = vmatpush2.bf16.msra.mxu0 %v21181_v21 }
 0x591   : > { %8216 = vmatprep.subr.bf16.mxu0 %v21189_v51  ;;  %v8316_v58 = vrot.slane %v8314_v57, 3  ;;  %v9177_v51 = vld [vmem:[#allocation3 + $0x50] sm:$0x11] }
 0x592   : > { %v7138_v37 = vmax.f32 %v7130_v43, 0.0  ;;  %v7133_v61 = vadd.f32 %v7118_v46, %v7103_v39  ;;  %v7104_v59 = vmul.f32 %v7092_v29, %v7074_v14  ;;  %v21202_v39 = vld [vmem:[#allocation15 + $0x6c8] ss:$16 sps:$4 sm:$0xff]   ;;  %v21205_v14 = vld [vmem:[#allocation15 + $0xc0] ss:$16 sps:$4 sm:$0xff]  }
 0x593   : > { %v8320_v46 = vor.u32 %v8319_v9, %v8316_v58  ;;  %v21211_v58 = vld [vmem:[#allocation15 + $0xa0] ss:$16 sps:$4 sm:$0xff]  }
 0x594   : > { %v18838_v33 = vpack.c.bf16 %v7138_v37, %v7137_v24  ;;  %v7134_v34 = vadd.f32 %v7122_v45, %v7104_v59  ;;  %v7141_v31 = vmax.f32 %v7133_v61, 0.0  ;;  %8217 = vmatpush2.bf16.msra.mxu0 %v21187_v62  ;;  %v23519_v59 = vcombine.high %v9177_v51, %v9177_v51 }
 0x595   : > { %8218 = vmatprep.subr.bf16.mxu0 %v21195_v56  ;;  %v23515_v43 = vsel %vm931_vm2, %v8312_v4, %v8320_v46  ;;  %v23521_v62 = vcombine.low %v9177_v51, %v9177_v51  ;;  %v21231_v51 = vld [vmem:[#allocation15 + $0x44] ss:$16 sps:$4 sm:$0xff]  }
 0x596   : > { %7176 = vst [vmem:[#allocation3 + $0x30] sm:$0xff] %v18838_v33  ;;  %v7142_v2 = vmax.f32 %v7134_v34, 0.0  ;;  %v23499_v10 = vcombine.low %v7180_v54, %v18838_v33  ;;  %v23501_v12 = vcombine.high %v7180_v54, %v18838_v33  ;;  %v22073_v44 = vpack.c.bf16 %v7141_v31, %v7141_v31 }
 0x597   : > { %v23509_v1 = vpack.c.bf16 %v7141_v31, %v7137_v24  ;;  %v21210_v24 = vld [vmem:[#allocation15 + $0x6ac] ss:$16 sps:$4 sm:$0xff]   ;;  %v10995_v46 = vrot.slane %v23521_v62, 1 }
 0x598   : > { %v18840_v19 = vpack.c.bf16 %v7142_v2, %v7141_v31  ;;  %v8340_v38 = vshrl.u32 %v23501_v12, 16  ;;  %v8343_v41 = vshll.u32 %v23501_v12, 16  ;;  %v8323_v52 = vshrl.u32 %v23499_v10, 16  ;;  %8219 = vmatpush2.bf16.msra.mxu0 %v21193_v20  ;;  %v21219_v20 = vld [vmem:[#allocation15 + $0x84] ss:$16 sps:$4 sm:$0xff]  }
 0x599   : > { %v8326_v32 = vshll.u32 %v23499_v10, 16  ;;  %v23507_v29 = vpack.c.bf16 %v7142_v2, %v7138_v37  ;;  %v22075_v45 = vpack.c.bf16 %v7142_v2, %v7142_v2  ;;  %9000 = vmatprep.subr.bf16.mxu0 %v21201_v5  ;;  %v8331_v49 = vshrl.u32 %v22073_v44, 16  ;;  %v21213_v37 = vld [vmem:[#allocation15 + $0xa4] ss:$16 sps:$4 sm:$0xff]   ;;  %v21216_v2 = vld [vmem:[#allocation15 + $0x68c] ss:$16 sps:$4 sm:$0xff]  }
 0x59a   : > { %7178 = vst [vmem:[#allocation3 + $0x18] sm:$0xff] %v18840_v19  ;;  %v8342_v15 = vrot.slane %v8340_v38, 3  ;;  %v8345_v63 = vrot.slane %v8343_v41, 4  ;;  %v8325_v27 = vrot.slane %v8323_v52, 3  ;;  %v8334_v21 = vshll.u32 %v22073_v44, 16 }
 0x59b   : > { %v8328_v42 = vrot.slane %v8326_v32, 4  ;;  %8177 = vmatprep.mubr.bf16.mxu1 %v23507_v29  ;;  %v8348_v36 = vshrl.u32 %v22075_v45, 16  ;;  %v8351_v60 = vshll.u32 %v22075_v45, 16  ;;  %8221 = vmatmul.mubr.bf16.vlgmr.msra.gmra.mxu0 %v23455_v0  ;;  %v8333_v57 = vrot.slane %v8331_v49, 3  ;;  %v21217_v45 = vld [vmem:[#allocation15 + $0x80] ss:$16 sps:$4 sm:$0xff]  }
 0x59c   : > { %8178 = vmatmul.mubr.bf16.vlgmr.msra.gmra.mxu1 %v23509_v1  ;;  %9001 = vmatpush1.bf16.msra.mxu0 %v21199_v40  ;;  %v8336_v28 = vrot.slane %v8334_v21, 4  ;;  %v8346_v61 = vor.u32 %v8345_v63, %v8342_v15  ;;  %v10998_v52 = vrot.slane %v23519_v59, 1  ;;  %v10630_v32 = vrot.slane %v23501_v12, 3  ;;  %v21222_v63 = vld [vmem:[#allocation15 + $0x66c] ss:$16 sps:$4 sm:$0xff]  }
 0x59d   : > { %8232 = vmatpush1.bf16.msra.mxu1 %v21196_v30  ;;  %v8350_v35 = vrot.slane %v8348_v36, 3  ;;  %v8353_v55 = vrot.slane %v8351_v60, 4  ;;  %9032 = vmatprep.mubr.bf16.mxu0 %v23515_v43  ;;  %v8329_v54 = vor.u32 %v8328_v42, %v8325_v27  ;;  %v10912_v38 = vld [vmem:[#allocation3 + $0x30] sm:$0xee]  ;;  %v10627_v30 = vrot.slane %v23499_v10, 3 }
 0x59e   : > { %8263 = vmatprep.mubr.bf16.mxu1 %v23507_v29  ;;  %8233 = vmatprep.subr.bf16.mxu1 %v21204_v16  ;;  %v8337_v33 = vor.u32 %v8336_v28, %v8333_v57  ;;  %v21214_v16 = vld [vmem:[#allocation15 + $0x688] ss:$16 sps:$4 sm:$0xff]   ;;  %v21225_v27 = vld [vmem:[#allocation15 + $0x64] ss:$16 sps:$4 sm:$0xff]   ;;  %v21223_v49 = vld [vmem:[#allocation15 + $0x60] ss:$16 sps:$4 sm:$0xff]  }
 0x59f   : > { %9002 = vmatprep.subr.bf16.mxu0 %v21207_v23  ;;  %v8354_v56 = vor.u32 %v8353_v55, %v8350_v35  ;;  %v21220_v60 = vld [vmem:[#allocation15 + $0x668] ss:$16 sps:$4 sm:$0xff]   ;;  %v21228_v21 = vld [vmem:[#allocation15 + $0x64c] ss:$16 sps:$4 sm:$0xff]   ;;  %v21237_v55 = vld [vmem:[#allocation15 + $0x24] ss:$16 sps:$4 sm:$0xff]  }
 0x5a0   : > { %9003 = vmatpush1.bf16.msra.mxu0 %v21205_v14  ;;  %v23529_v31 = vsel %vm931_vm2, %v8329_v54, %v8337_v33  ;;  %v21229_v14 = vld [vmem:[#allocation15 + $0x40] ss:$16 sps:$4 sm:$0xff]   ;;  %v21234_v35 = vld [vmem:[#allocation15 + $0x62c] ss:$16 sps:$4 sm:$0xff]   ;;  %v21232_v57 = vld [vmem:[#allocation15 + $0x628] ss:$16 sps:$4 sm:$0xff]  }
 0x5a1   : > { %v23523_v34 = vld [vmem:[#allocation3 + $0x18] sm:$0xff]  ;;  %8234 = vmatpush1.bf16.msra.mxu1 %v21202_v39  ;;  %v23526_v9 = vsel %vm931_vm2, %v8346_v61, %v8354_v56  ;;  %9004 = vmatprep.subr.bf16.mxu0 %v21213_v37  ;;  %v21235_v28 = vld [vmem:[#allocation15 + $0x20] ss:$16 sps:$4 sm:$0xff]   ;;  %v21243_v37 = vld [vmem:[#allocation15 + $0x4] ss:$16 sps:$4 sm:$0xff]   ;;  %vm11734_vm2 = vcmask 1045504  }
 0x5a2   : > { %v10206_v13 = vld [vmem:[#allocation3 + $0x18] sm:$0x77]  ;;  %8235 = vmatprep.subr.bf16.mxu1 %v21210_v24  ;;  %v18419_v41 = vcombine.high %v10912_v38, %v23523_v34  ;;  %v18418_v4 = vcombine.low %v10912_v38, %v23523_v34  ;;  %v21241_v56 = vld [vmem:[#allocation15] ss:$16 sps:$4 sm:$0xff]   ;;  %v21249_v33 = vld [vmem:[#allocation15 + $0x1e4] ss:$16 sps:$4 sm:$0xff]  }
 0x5a3   : > { %v18383_v5 = vcombine.high %v10206_v13, %v10206_v13  ;;  %v18382_v19 = vcombine.low %v10206_v13, %v10206_v13  ;;  %v21226_v39 = vld [vmem:[#allocation15 + $0x648] ss:$16 sps:$4 sm:$0xff]   ;;  %v21240_v24 = vld [vmem:[#allocation15 + $0x60c] ss:$16 sps:$4 sm:$0xff]   ;;  %v21261_v38 = vld [vmem:[#allocation15 + $0x1a4] ss:$16 sps:$4 sm:$0xff]  }
 0x5a4   : > { %9005 = vmatpush1.bf16.msra.mxu0 %v21211_v58  ;;  %v10997_v23 = vrot.slane %v18419_v41, 1  ;;  %v10994_v15 = vrot.slane %v18418_v4, 1  ;;  %v21238_v61 = vld [vmem:[#allocation15 + $0x608] ss:$16 sps:$4 sm:$0xff]   ;;  %v21246_v54 = vld [vmem:[#allocation15 + $0x7ec] ss:$16 sps:$4 sm:$0xff]  }
 0x5a5   : > { %v10631_v44 = vrot.slane %v18383_v5, 3  ;;  %v10628_v40 = vrot.slane %v18382_v19, 3  ;;  %8236 = vmatpush1.bf16.msra.mxu1 %v21208_v3  ;;  %9006 = vmatprep.subr.bf16.mxu0 %v21219_v20  ;;  %v21244_v13 = vld [vmem:[#allocation15 + $0x7e8] ss:$16 sps:$4 sm:$0xff]   ;;  %v21247_v3 = vld [vmem:[#allocation15 + $0x1e0] ss:$16 sps:$4 sm:$0xff]  }
 0x5a6   : > { %8237 = vmatprep.subr.bf16.mxu1 %v21216_v2  ;;  %v23544_v12 = vsel %vm3151_vm5, %v10997_v23, %v10998_v52  ;;  %v23547_v10 = vsel %vm3151_vm5, %v10994_v15, %v10995_v46  ;;  %v21252_v58 = vld [vmem:[#allocation15 + $0x7cc] ss:$16 sps:$4 sm:$0xff]   ;;  %v21255_v2 = vld [vmem:[#allocation15 + $0x1c4] ss:$16 sps:$4 sm:$0xff]   ;;  %v21250_v20 = vld [vmem:[#allocation15 + $0x7c8] ss:$16 sps:$4 sm:$0xff]  }
 0x5a7   : > { %v23538_v42 = vsel %vm10620_vm6, %v10630_v32, %v10631_v44  ;;  %v23541_v36 = vsel %vm10620_vm6, %v10627_v30, %v10628_v40  ;;  %v21253_v5 = vld [vmem:[#allocation15 + $0x1c0] ss:$16 sps:$4 sm:$0xff]   ;;  %v21258_v19 = vld [vmem:[#allocation15 + $0x7ac] ss:$16 sps:$4 sm:$0xff]   ;;  %v21256_v41 = vld [vmem:[#allocation15 + $0x7a8] ss:$16 sps:$4 sm:$0xff]  }
 0x5a8   : > { %9007 = vmatpush1.bf16.msra.mxu0 %v21217_v45  ;;  %v21259_v52 = vld [vmem:[#allocation15 + $0x1a0] ss:$16 sps:$4 sm:$0xff]   ;;  %v21264_v4 = vld [vmem:[#allocation15 + $0x78c] ss:$16 sps:$4 sm:$0xff]   ;;  %v21267_v46 = vld [vmem:[#allocation15 + $0x184] ss:$16 sps:$4 sm:$0xff]  }
 0x5a9   : > { %8238 = vmatpush1.bf16.msra.mxu1 %v21214_v16  ;;  %9008 = vmatprep.subr.bf16.mxu0 %v21225_v27  ;;  %v21262_v32 = vld [vmem:[#allocation15 + $0x788] ss:$16 sps:$4 sm:$0xff]   ;;  %v21265_v44 = vld [vmem:[#allocation15 + $0x180] ss:$16 sps:$4 sm:$0xff]   ;;  %v21270_v30 = vld [vmem:[#allocation15 + $0x76c] ss:$16 sps:$4 sm:$0xff]  }
 0x5aa   : > { %8239 = vmatprep.subr.bf16.mxu1 %v21222_v63  ;;  %v21273_v40 = vld [vmem:[#allocation15 + $0x164] ss:$16 sps:$4 sm:$0xff]   ;;  %v21268_v16 = vld [vmem:[#allocation15 + $0x768] ss:$16 sps:$4 sm:$0xff]   ;;  %v21271_v45 = vld [vmem:[#allocation15 + $0x160] ss:$16 sps:$4 sm:$0xff]  }
 0x5ab   : > { %v21276_v23 = vld [vmem:[#allocation15 + $0x74c] ss:$16 sps:$4 sm:$0xff]   ;;  %v21279_v15 = vld [vmem:[#allocation15 + $0x144] ss:$16 sps:$4 sm:$0xff]   ;;  %v21274_v63 = vld [vmem:[#allocation15 + $0x748] ss:$16 sps:$4 sm:$0xff]  }
 0x5ac   : > { %9009 = vmatpush1.bf16.msra.mxu0 %v21223_v49  ;;  %v21277_v27 = vld [vmem:[#allocation15 + $0x140] ss:$16 sps:$4 sm:$0xff]   ;;  %v21285_v49 = vld [vmem:[#allocation15 + $0x124] ss:$16 sps:$4 sm:$0xff]  }
 0x5ad   : > { %8240 = vmatpush1.bf16.msra.mxu1 %v21220_v60  ;;  %9010 = vmatprep.subr.bf16.mxu0 %v21231_v51  ;;  %v21282_v60 = vld [vmem:[#allocation15 + $0x72c] ss:$16 sps:$4 sm:$0xff]   ;;  %v21283_v51 = vld [vmem:[#allocation15 + $0x120] ss:$16 sps:$4 sm:$0xff]  }
 0x5ae   : > { %8241 = vmatprep.subr.bf16.mxu1 %v21228_v21  ;;  %v21280_v21 = vld [vmem:[#allocation15 + $0x728] ss:$16 sps:$4 sm:$0xff]  }
 0x5b0   : > { %9011 = vmatpush1.bf16.msra.mxu0 %v21229_v14  ;;  %v21291_v14 = vld [vmem:[#allocation15 + $0x104] ss:$16 sps:$4 sm:$0xff]  }
 0x5b1   : > { %8242 = vmatpush1.bf16.msra.mxu1 %v21226_v39  ;;  %9012 = vmatprep.subr.bf16.mxu0 %v21237_v55  ;;  %v21288_v39 = vld [vmem:[#allocation15 + $0x70c] ss:$16 sps:$4 sm:$0xff]   ;;  %v21289_v55 = vld [vmem:[#allocation15 + $0x100] ss:$16 sps:$4 sm:$0xff]  }
 0x5b2   : > { %8243 = vmatprep.subr.bf16.mxu1 %v21234_v35  ;;  %v21286_v35 = vld [vmem:[#allocation15 + $0x708] ss:$16 sps:$4 sm:$0xff]  }
 0x5b4   : > { %9013 = vmatpush1.bf16.msra.mxu0 %v21235_v28  ;;  %v21297_v28 = vld [vmem:[#allocation15 + $0xec] ss:$16 sps:$4 sm:$0xff]  }
 0x5b5   : > { %8244 = vmatpush1.bf16.msra.mxu1 %v21232_v57  ;;  %9014 = vmatprep.subr.bf16.mxu0 %v21243_v37  ;;  %v21294_v57 = vld [vmem:[#allocation15 + $0x2e4] ss:$16 sps:$4 sm:$0xff]   ;;  %v21295_v37 = vld [vmem:[#allocation15 + $0xe8] ss:$16 sps:$4 sm:$0xff]  }
 0x5b6   : > { %8245 = vmatprep.subr.bf16.mxu1 %v21240_v24  ;;  %v21292_v24 = vld [vmem:[#allocation15 + $0x2e0] ss:$16 sps:$4 sm:$0xff]  }
 0x5b8   : > { %9015 = vmatpush1.bf16.msra.mxu0 %v21241_v56  ;;  %v21303_v56 = vld [vmem:[#allocation15 + $0xcc] ss:$16 sps:$4 sm:$0xff]  }
 0x5b9   : > { %8246 = vmatpush1.bf16.msra.mxu1 %v21238_v61  ;;  %9016 = vmatprep.subr.bf16.mxu0 %v21249_v33  ;;  %v21300_v61 = vld [vmem:[#allocation15 + $0x2c4] ss:$16 sps:$4 sm:$0xff]   ;;  %v21301_v33 = vld [vmem:[#allocation15 + $0xc8] ss:$16 sps:$4 sm:$0xff]  }
 0x5ba   : > { %8247 = vmatprep.subr.bf16.mxu1 %v21246_v54  ;;  %v21298_v54 = vld [vmem:[#allocation15 + $0x2c0] ss:$16 sps:$4 sm:$0xff]  }
 0x5bc   : > { %9017 = vmatpush2.bf16.msra.mxu0 %v21247_v3  ;;  %v21309_v3 = vld [vmem:[#allocation15 + $0xac] ss:$16 sps:$4 sm:$0xff]  }
 0x5bd   : > { %8248 = vmatpush2.bf16.msra.mxu1 %v21244_v13  ;;  %9018 = vmatprep.subr.bf16.mxu0 %v21255_v2  ;;  %v21306_v13 = vld [vmem:[#allocation15 + $0x2a4] ss:$16 sps:$4 sm:$0xff]   ;;  %v21307_v2 = vld [vmem:[#allocation15 + $0xa8] ss:$16 sps:$4 sm:$0xff]  }
 0x5be   : > { %8249 = vmatprep.subr.bf16.mxu1 %v21252_v58  ;;  %v21304_v58 = vld [vmem:[#allocation15 + $0x2a0] ss:$16 sps:$4 sm:$0xff]  }
 0x5c0   : > { %9019 = vmatpush2.bf16.msra.mxu0 %v21253_v5  ;;  %v21315_v5 = vld [vmem:[#allocation15 + $0x8c] ss:$16 sps:$4 sm:$0xff]  }
 0x5c1   : > { %8250 = vmatpush2.bf16.msra.mxu1 %v21250_v20  ;;  %9020 = vmatprep.subr.bf16.mxu0 %v21261_v38  ;;  %v21312_v20 = vld [vmem:[#allocation15 + $0x284] ss:$16 sps:$4 sm:$0xff]   ;;  %v21313_v38 = vld [vmem:[#allocation15 + $0x88] ss:$16 sps:$4 sm:$0xff]  }
 0x5c2   : > { %8251 = vmatprep.subr.bf16.mxu1 %v21258_v19  ;;  %v21310_v19 = vld [vmem:[#allocation15 + $0x280] ss:$16 sps:$4 sm:$0xff]  }
 0x5c4   : > { %9021 = vmatpush2.bf16.msra.mxu0 %v21259_v52  ;;  %v21316_v52 = vld [vmem:[#allocation15 + $0x260] ss:$16 sps:$4 sm:$0xff]  }
 0x5c5   : > { %8252 = vmatpush2.bf16.msra.mxu1 %v21256_v41  ;;  %9022 = vmatprep.subr.bf16.mxu0 %v21267_v46  ;;  %v21318_v41 = vld [vmem:[#allocation15 + $0x264] ss:$16 sps:$4 sm:$0xff]  }
 0x5c6   : > { %8253 = vmatprep.subr.bf16.mxu1 %v21264_v4  ;;  %v21319_v4 = vld [vmem:[#allocation15 + $0x68] ss:$16 sps:$4 sm:$0xff]   ;;  %v21324_v46 = vld [vmem:[#allocation15 + $0x244] ss:$16 sps:$4 sm:$0xff]  }
 0x5c8   : > { %9023 = vmatpush2.bf16.msra.mxu0 %v21265_v44  ;;  %v21322_v44 = vld [vmem:[#allocation15 + $0x240] ss:$16 sps:$4 sm:$0xff]  }
 0x5c9   : > { %8254 = vmatpush2.bf16.msra.mxu1 %v21262_v32  ;;  %9024 = vmatprep.subr.bf16.mxu0 %v21273_v40  ;;  %v21327_v32 = vld [vmem:[#allocation15 + $0x4c] ss:$16 sps:$4 sm:$0xff]   ;;  %v21330_v40 = vld [vmem:[#allocation15 + $0x224] ss:$16 sps:$4 sm:$0xff]  }
 0x5ca   : > { %8255 = vmatprep.subr.bf16.mxu1 %v21270_v30  ;;  %v21325_v30 = vld [vmem:[#allocation15 + $0x48] ss:$16 sps:$4 sm:$0xff]  }
 0x5cc   : > { %9025 = vmatpush2.bf16.msra.mxu0 %v21271_v45  ;;  %v21328_v45 = vld [vmem:[#allocation15 + $0x220] ss:$16 sps:$4 sm:$0xff]  }
 0x5cd   : > { %8256 = vmatpush2.bf16.msra.mxu1 %v21268_v16  ;;  %9026 = vmatprep.subr.bf16.mxu0 %v21279_v15  ;;  %v21333_v16 = vld [vmem:[#allocation15 + $0x2c] ss:$16 sps:$4 sm:$0xff]   ;;  %v21336_v15 = vld [vmem:[#allocation15 + $0x204] ss:$16 sps:$4 sm:$0xff]  }
 0x5ce   : > { %8257 = vmatprep.subr.bf16.mxu1 %v21276_v23  ;;  %v21331_v23 = vld [vmem:[#allocation15 + $0x28] ss:$16 sps:$4 sm:$0xff]  }
 0x5d0   : > { %9027 = vmatpush2.bf16.msra.mxu0 %v21277_v27  ;;  %v21334_v27 = vld [vmem:[#allocation15 + $0x200] ss:$16 sps:$4 sm:$0xff]  }
 0x5d1   : > { %8258 = vmatpush2.bf16.msra.mxu1 %v21274_v63  ;;  %9028 = vmatprep.subr.bf16.mxu0 %v21285_v49  ;;  %v21339_v63 = vld [vmem:[#allocation15 + $0xc] ss:$16 sps:$4 sm:$0xff]   ;;  %v21342_v49 = vld [vmem:[#allocation15 + $0x3e4] ss:$16 sps:$4 sm:$0xff]  }
 0x5d2   : > { %8259 = vmatprep.subr.bf16.mxu1 %v21282_v60  ;;  %v21337_v60 = vld [vmem:[#allocation15 + $0x8] ss:$16 sps:$4 sm:$0xff]  }
 0x5d4   : > { %9029 = vmatpush2.bf16.msra.mxu0 %v21283_v51  ;;  %v21340_v51 = vld [vmem:[#allocation15 + $0x3e0] ss:$16 sps:$4 sm:$0xff]  }
 0x5d5   : > { %8260 = vmatpush2.bf16.msra.mxu1 %v21280_v21  ;;  %9030 = vmatprep.subr.bf16.mxu0 %v21291_v14  ;;  %v21345_v21 = vld [vmem:[#allocation15 + $0x1ec] ss:$16 sps:$4 sm:$0xff]   ;;  %v21348_v14 = vld [vmem:[#allocation15 + $0x3c4] ss:$16 sps:$4 sm:$0xff]  }
 0x5d6   : > { %8261 = vmatprep.subr.bf16.mxu1 %v21288_v39  ;;  %v21343_v39 = vld [vmem:[#allocation15 + $0x1e8] ss:$16 sps:$4 sm:$0xff]  }
 0x5d8   : > { %9031 = vmatpush2.bf16.msra.mxu0 %v21289_v55  ;;  %v21346_v55 = vld [vmem:[#allocation15 + $0x3c0] ss:$16 sps:$4 sm:$0xff]  }
 0x5d9   : > { %8262 = vmatpush2.bf16.msra.mxu1 %v21286_v35  ;;  %9086 = vmatprep.subr.bf16.mxu0 %v21297_v28  ;;  %v21351_v35 = vld [vmem:[#allocation15 + $0x1cc] ss:$16 sps:$4 sm:$0xff]   ;;  %v21354_v28 = vld [vmem:[#allocation15 + $0x3a4] ss:$16 sps:$4 sm:$0xff]  }
 0x5da   : > { %9043 = vmatprep.subr.bf16.mxu1 %v21294_v57  ;;  %v21349_v57 = vld [vmem:[#allocation15 + $0x1c8] ss:$16 sps:$4 sm:$0xff]  }
 0x5db   : > { %9033 = vmatmul.mubr.bf16.vlgmr.msra.gmra.mxu0 %v23467_v8 }
 0x5dc   : > { %8264 = vmatmul.mubr.bf16.vlgmr.msra.gmra.mxu1 %v23509_v1  ;;  %9087 = vmatpush1.bf16.msra.mxu0 %v21295_v37  ;;  %v21352_v37 = vld [vmem:[#allocation15 + $0x3a0] ss:$16 sps:$4 sm:$0xff]  }
 0x5dd   : > { %9044 = vmatpush1.bf16.msra.mxu1 %v21292_v24  ;;  %9075 = vmatprep.mubr.bf16.mxu1 %v23526_v9  ;;  %v21357_v24 = vld [vmem:[#allocation15 + $0x1ac] ss:$16 sps:$4 sm:$0xff]  }
 0x5de   : > { %9118 = vmatprep.mubr.bf16.mxu0 %v23515_v43  ;;  %9045 = vmatprep.subr.bf16.mxu1 %v21300_v61  ;;  %v21321_v43 = vld [vmem:[#allocation15 + $0x6c] ss:$16 sps:$4 sm:$0xff]   ;;  %v21355_v61 = vld [vmem:[#allocation15 + $0x1a8] ss:$16 sps:$4 sm:$0xff]  }
 0x5df   : > { %9088 = vmatprep.subr.bf16.mxu0 %v21303_v56  ;;  %v21360_v56 = vld [vmem:[#allocation15 + $0x384] ss:$16 sps:$4 sm:$0xff]  }
 0x5e0   : > { %9089 = vmatpush1.bf16.msra.mxu0 %v21301_v33  ;;  %v21358_v33 = vld [vmem:[#allocation15 + $0x380] ss:$16 sps:$4 sm:$0xff]  }
 0x5e1   : > { %9046 = vmatpush1.bf16.msra.mxu1 %v21298_v54  ;;  %9090 = vmatprep.subr.bf16.mxu0 %v21309_v3  ;;  %v21363_v54 = vld [vmem:[#allocation15 + $0x18c] ss:$16 sps:$4 sm:$0xff]   ;;  %v21366_v3 = vld [vmem:[#allocation15 + $0x364] ss:$16 sps:$4 sm:$0xff]  }
 0x5e2   : > { %9047 = vmatprep.subr.bf16.mxu1 %v21306_v13  ;;  %v21361_v13 = vld [vmem:[#allocation15 + $0x188] ss:$16 sps:$4 sm:$0xff]  }
 0x5e4   : > { %9091 = vmatpush1.bf16.msra.mxu0 %v21307_v2  ;;  %v21364_v2 = vld [vmem:[#allocation15 + $0x360] ss:$16 sps:$4 sm:$0xff]  }
 0x5e5   : > { %9048 = vmatpush1.bf16.msra.mxu1 %v21304_v58  ;;  %9092 = vmatprep.subr.bf16.mxu0 %v21315_v5  ;;  %v21369_v58 = vld [vmem:[#allocation15 + $0x16c] ss:$16 sps:$4 sm:$0xff]   ;;  %v21372_v5 = vld [vmem:[#allocation15 + $0x344] ss:$16 sps:$4 sm:$0xff]  }
 0x5e6   : > { %9049 = vmatprep.subr.bf16.mxu1 %v21312_v20  ;;  %v21367_v20 = vld [vmem:[#allocation15 + $0x168] ss:$16 sps:$4 sm:$0xff]  }
 0x5e8   : > { %9093 = vmatpush1.bf16.msra.mxu0 %v21313_v38  ;;  %v21370_v38 = vld [vmem:[#allocation15 + $0x340] ss:$16 sps:$4 sm:$0xff]  }
 0x5e9   : > { %9050 = vmatpush1.bf16.msra.mxu1 %v21310_v19  ;;  %9094 = vmatprep.subr.bf16.mxu0 %v21321_v43  ;;  %v21375_v19 = vld [vmem:[#allocation15 + $0x14c] ss:$16 sps:$4 sm:$0xff]   ;;  %v21373_v43 = vld [vmem:[#allocation15 + $0x148] ss:$16 sps:$4 sm:$0xff]  }
 0x5ea   : > { %9051 = vmatprep.subr.bf16.mxu1 %v21318_v41  ;;  %v23553_v41 = vld [vmem:[#allocation3 + $0x28] sm:$0xff] }
 0x5ec   : > { %9095 = vmatpush1.bf16.msra.mxu0 %v21319_v4  ;;  %v18213_v4 = vcombine.high %v23553_v41, %v23464_v25  ;;  %v9353_v25 = vshll.u32 %v23460_v18, 16 }
 0x5ed   : > { %9052 = vmatpush1.bf16.msra.mxu1 %v21316_v52  ;;  %9096 = vmatprep.subr.bf16.mxu0 %v21327_v32  ;;  %v21378_v52 = vld [vmem:[#allocation15 + $0x324] ss:$16 sps:$4 sm:$0xff]   ;;  %v21376_v32 = vld [vmem:[#allocation15 + $0x320] ss:$16 sps:$4 sm:$0xff]  }
 0x5ee   : > { %9053 = vmatprep.subr.bf16.mxu1 %v21324_v46  ;;  %v21381_v46 = vld [vmem:[#allocation15 + $0x12c] ss:$16 sps:$4 sm:$0xff]  }
 0x5f0   : > { %9097 = vmatpush1.bf16.msra.mxu0 %v21325_v30  ;;  %v21384_v30 = vld [vmem:[#allocation15 + $0x304] ss:$16 sps:$4 sm:$0xff]  }
 0x5f1   : > { %9054 = vmatpush1.bf16.msra.mxu1 %v21322_v44  ;;  %9098 = vmatprep.subr.bf16.mxu0 %v21333_v16  ;;  %v21379_v44 = vld [vmem:[#allocation15 + $0x128] ss:$16 sps:$4 sm:$0xff]   ;;  %v21387_v16 = vld [vmem:[#allocation15 + $0x10c] ss:$16 sps:$4 sm:$0xff]  }
 0x5f2   : > { %9055 = vmatprep.subr.bf16.mxu1 %v21330_v40  ;;  %v9348_v40 = vshll.u32 %v18213_v4, 16 }
 0x5f4   : > { %9099 = vmatpush1.bf16.msra.mxu0 %v21331_v23  ;;  %v21385_v23 = vld [vmem:[#allocation15 + $0x108] ss:$16 sps:$4 sm:$0xff]  }
 0x5f5   : > { %9056 = vmatpush1.bf16.msra.mxu1 %v21328_v45  ;;  %9100 = vmatprep.subr.bf16.mxu0 %v21339_v63  ;;  %v21382_v45 = vld [vmem:[#allocation15 + $0x300] ss:$16 sps:$4 sm:$0xff]   ;;  %v9350_v63 = vrot.slane %v9348_v40, 1  ;;  %v21440_v40 = vld [vmem:[#allocation15 + $0x3ec] ss:$16 sps:$4 sm:$0xff]  }
 0x5f6   : > { %9057 = vmatprep.subr.bf16.mxu1 %v21336_v15  ;;  %v21390_v15 = vld [vmem:[#allocation15 + $0x2ec] ss:$16 sps:$4 sm:$0xff]  }
 0x5f8   : > { %9101 = vmatpush1.bf16.msra.mxu0 %v21337_v60  ;;  %v9346_v60 = vshrl.u32 %v18213_v4, 16  ;;  %v21429_v4 = vld [vmem:[#allocation15 + $0x820] ss:$16 sps:$4 sm:$0xff]  }
 0x5f9   : > { %9058 = vmatpush1.bf16.msra.mxu1 %v21334_v27  ;;  %9102 = vmatprep.subr.bf16.mxu0 %v21345_v21  ;;  %v21393_v27 = vld [vmem:[#allocation15 + $0x8e4] ss:$16 sps:$4 sm:$0xff]   ;;  %v21391_v21 = vld [vmem:[#allocation15 + $0x8e0] ss:$16 sps:$4 sm:$0xff]  }
 0x5fa   : > { %9059 = vmatprep.subr.bf16.mxu1 %v21342_v49  ;;  %v21388_v49 = vld [vmem:[#allocation15 + $0x2e8] ss:$16 sps:$4 sm:$0xff]  }
 0x5fc   : > { %9103 = vmatpush2.bf16.msra.mxu0 %v21343_v39  ;;  %v9355_v39 = vrot.slane %v9353_v25, 1  ;;  %v21444_v25 = vld [vmem:[#allocation15 + $0x3c8] ss:$16 sps:$4 sm:$0xff]  }
 0x5fd   : > { %9060 = vmatpush2.bf16.msra.mxu1 %v21340_v51  ;;  %9104 = vmatprep.subr.bf16.mxu0 %v21351_v35  ;;  %v9351_v51 = vor.u32 %v9350_v63, %v9346_v60  ;;  %v21401_v35 = vld [vmem:[#allocation15 + $0x8c4] ss:$16 sps:$4 sm:$0xff]   ;;  %v21452_v60 = vld [vmem:[#allocation15 + $0x3ac] ss:$16 sps:$4 sm:$0xff]  }
 0x5fe   : > { %9061 = vmatprep.subr.bf16.mxu1 %v21348_v14  ;;  %v21398_v14 = vld [vmem:[#allocation15 + $0x2cc] ss:$16 sps:$4 sm:$0xff]   ;;  %v21449_v63 = vld [vmem:[#allocation15 + $0x9c4] ss:$16 sps:$4 sm:$0xff]  }
 0x5ff   : > { %v23562_v18 = vsel %vm1329_vm0, %v9351_v51, %v9355_v39  ;;  %v21453_v51 = vld [vmem:[#allocation15 + $0x9a0] ss:$16 sps:$4 sm:$0xff]   ;;  %v21458_v39 = vld [vmem:[#allocation15 + $0x38c] ss:$16 sps:$4 sm:$0xff]  }
 0x600   : > { %9105 = vmatpush2.bf16.msra.mxu0 %v21349_v57  ;;  %v21399_v57 = vld [vmem:[#allocation15 + $0x8c0] ss:$16 sps:$4 sm:$0xff]  }
 0x601   : > { %9062 = vmatpush2.bf16.msra.mxu1 %v21346_v55  ;;  %9106 = vmatprep.subr.bf16.mxu0 %v21357_v24  ;;  %v21396_v55 = vld [vmem:[#allocation15 + $0x2c8] ss:$16 sps:$4 sm:$0xff]   ;;  %v21407_v24 = vld [vmem:[#allocation15 + $0x8a4] ss:$16 sps:$4 sm:$0xff]  }
 0x602   : > { %9063 = vmatprep.subr.bf16.mxu1 %v21354_v28  ;;  %v21404_v28 = vld [vmem:[#allocation15 + $0x2ac] ss:$16 sps:$4 sm:$0xff]  }
 0x604   : > { %9107 = vmatpush2.bf16.msra.mxu0 %v21355_v61  ;;  %v21410_v61 = vld [vmem:[#allocation15 + $0x28c] ss:$16 sps:$4 sm:$0xff]  }
 0x605   : > { %9064 = vmatpush2.bf16.msra.mxu1 %v21352_v37  ;;  %9108 = vmatprep.subr.bf16.mxu0 %v21363_v54  ;;  %v21402_v37 = vld [vmem:[#allocation15 + $0x2a8] ss:$16 sps:$4 sm:$0xff]   ;;  %v21411_v54 = vld [vmem:[#allocation15 + $0x880] ss:$16 sps:$4 sm:$0xff]  }
 0x606   : > { %9065 = vmatprep.subr.bf16.mxu1 %v21360_v56  ;;  %v21413_v56 = vld [vmem:[#allocation15 + $0x884] ss:$16 sps:$4 sm:$0xff]  }
 0x608   : > { %9109 = vmatpush2.bf16.msra.mxu0 %v21361_v13  ;;  %v21419_v13 = vld [vmem:[#allocation15 + $0x864] ss:$16 sps:$4 sm:$0xff]  }
 0x609   : > { %9066 = vmatpush2.bf16.msra.mxu1 %v21358_v33  ;;  %9110 = vmatprep.subr.bf16.mxu0 %v21369_v58  ;;  %v21416_v33 = vld [vmem:[#allocation15 + $0x26c] ss:$16 sps:$4 sm:$0xff]   ;;  %v21417_v58 = vld [vmem:[#allocation15 + $0x860] ss:$16 sps:$4 sm:$0xff]  }
 0x60a   : > { %9067 = vmatprep.subr.bf16.mxu1 %v21366_v3  ;;  %v21414_v3 = vld [vmem:[#allocation15 + $0x268] ss:$16 sps:$4 sm:$0xff]  }
 0x60c   : > { %9111 = vmatpush2.bf16.msra.mxu0 %v21367_v20  ;;  %v21425_v20 = vld [vmem:[#allocation15 + $0x844] ss:$16 sps:$4 sm:$0xff]  }
 0x60d   : > { %9068 = vmatpush2.bf16.msra.mxu1 %v21364_v2  ;;  %9112 = vmatprep.subr.bf16.mxu0 %v21375_v19  ;;  %v21422_v2 = vld [vmem:[#allocation15 + $0x24c] ss:$16 sps:$4 sm:$0xff]   ;;  %v21423_v19 = vld [vmem:[#allocation15 + $0x840] ss:$16 sps:$4 sm:$0xff]  }
 0x60e   : > { %9069 = vmatprep.subr.bf16.mxu1 %v21372_v5  ;;  %v21420_v5 = vld [vmem:[#allocation15 + $0x248] ss:$16 sps:$4 sm:$0xff]  }
 0x610   : > { %9113 = vmatpush2.bf16.msra.mxu0 %v21373_v43  ;;  %v21431_v43 = vld [vmem:[#allocation15 + $0x824] ss:$16 sps:$4 sm:$0xff]  }
 0x611   : > { %9070 = vmatpush2.bf16.msra.mxu1 %v21370_v38  ;;  %9114 = vmatprep.subr.bf16.mxu0 %v21381_v46  ;;  %v21428_v38 = vld [vmem:[#allocation15 + $0x22c] ss:$16 sps:$4 sm:$0xff]  }
 0x612   : > { %9071 = vmatprep.subr.bf16.mxu1 %v21378_v52  ;;  %v21426_v52 = vld [vmem:[#allocation15 + $0x228] ss:$16 sps:$4 sm:$0xff]   ;;  %v21434_v46 = vld [vmem:[#allocation15 + $0x20c] ss:$16 sps:$4 sm:$0xff]  }
 0x614   : > { %9115 = vmatpush2.bf16.msra.mxu0 %v21379_v44  ;;  %v21432_v44 = vld [vmem:[#allocation15 + $0x208] ss:$16 sps:$4 sm:$0xff]  }
 0x615   : > { %9072 = vmatpush2.bf16.msra.mxu1 %v21376_v32  ;;  %9116 = vmatprep.subr.bf16.mxu0 %v21387_v16  ;;  %v21437_v32 = vld [vmem:[#allocation15 + $0x804] ss:$16 sps:$4 sm:$0xff]  }
 0x616   : > { %9073 = vmatprep.subr.bf16.mxu1 %v21384_v30  ;;  %v21435_v30 = vld [vmem:[#allocation15 + $0x800] ss:$16 sps:$4 sm:$0xff]   ;;  %v21443_v16 = vld [vmem:[#allocation15 + $0x9e4] ss:$16 sps:$4 sm:$0xff]  }
 0x618   : > { %9117 = vmatpush2.bf16.msra.mxu0 %v21385_v23  ;;  %v21441_v23 = vld [vmem:[#allocation15 + $0x9e0] ss:$16 sps:$4 sm:$0xff]  }
 0x619   : > { %9074 = vmatpush2.bf16.msra.mxu1 %v21382_v45  ;;  %10025 = vmatprep.subr.bf16.mxu0 %v21393_v27  ;;  %v21438_v45 = vld [vmem:[#allocation15 + $0x3e8] ss:$16 sps:$4 sm:$0xff]   ;;  %v21447_v27 = vld [vmem:[#allocation15 + $0x9c0] ss:$16 sps:$4 sm:$0xff]  }
 0x61a   : > { %9129 = vmatprep.subr.bf16.mxu1 %v21390_v15  ;;  %v21446_v15 = vld [vmem:[#allocation15 + $0x3cc] ss:$16 sps:$4 sm:$0xff]  }
 0x61b   : > { %9119 = vmatmul.mubr.bf16.vlgmr.msra.gmra.mxu0 %v23467_v8  ;;  %v21405_v8 = vld [vmem:[#allocation15 + $0x8a0] ss:$16 sps:$4 sm:$0xff]  }
 0x61c   : > { %9076 = vmatmul.mubr.bf16.vlgmr.msra.gmra.mxu1 %v23529_v31  ;;  %10026 = vmatpush1.bf16.msra.mxu0 %v21391_v21  ;;  %v21450_v21 = vld [vmem:[#allocation15 + $0x3a8] ss:$16 sps:$4 sm:$0xff]  }
 0x61d   : > { %9130 = vmatpush1.bf16.msra.mxu1 %v21388_v49  ;;  %9161 = vmatprep.mubr.bf16.mxu1 %v23526_v9  ;;  %v21408_v9 = vld [vmem:[#allocation15 + $0x288] ss:$16 sps:$4 sm:$0xff]   ;;  %v21455_v49 = vld [vmem:[#allocation15 + $0x9a4] ss:$16 sps:$4 sm:$0xff]  }
 0x61e   : > { %10057 = vmatprep.mubr.bf16.mxu0 %v23562_v18  ;;  %9131 = vmatprep.subr.bf16.mxu1 %v21398_v14  ;;  %v21461_v14 = vld [vmem:[#allocation15 + $0x984] ss:$16 sps:$4 sm:$0xff]  }
 0x61f   : > { %10027 = vmatprep.subr.bf16.mxu0 %v21401_v35  ;;  %v21456_v35 = vld [vmem:[#allocation15 + $0x388] ss:$16 sps:$4 sm:$0xff]  }
 0x620   : > { %10028 = vmatpush1.bf16.msra.mxu0 %v21399_v57  ;;  %v21464_v57 = vld [vmem:[#allocation15 + $0x36c] ss:$16 sps:$4 sm:$0xff]  }
 0x621   : > { %9132 = vmatpush1.bf16.msra.mxu1 %v21396_v55  ;;  %10029 = vmatprep.subr.bf16.mxu0 %v21407_v24  ;;  %v21459_v55 = vld [vmem:[#allocation15 + $0x980] ss:$16 sps:$4 sm:$0xff]   ;;  %v21462_v24 = vld [vmem:[#allocation15 + $0x368] ss:$16 sps:$4 sm:$0xff]  }
 0x622   : > { %9133 = vmatprep.subr.bf16.mxu1 %v21404_v28  ;;  %v21467_v28 = vld [vmem:[#allocation15 + $0x964] ss:$16 sps:$4 sm:$0xff]  }
 0x624   : > { %10030 = vmatpush1.bf16.msra.mxu0 %v21405_v8  ;;  %v21470_v8 = vld [vmem:[#allocation15 + $0x34c] ss:$16 sps:$4 sm:$0xff]  }
 0x625   : > { %9134 = vmatpush1.bf16.msra.mxu1 %v21402_v37  ;;  %10031 = vmatprep.subr.bf16.mxu0 %v21413_v56  ;;  %v21465_v37 = vld [vmem:[#allocation15 + $0x960] ss:$16 sps:$4 sm:$0xff]  }
 0x626   : > { %9135 = vmatprep.subr.bf16.mxu1 %v21410_v61  ;;  %v21473_v61 = vld [vmem:[#allocation15 + $0x944] ss:$16 sps:$4 sm:$0xff]  }
 0x627   : > { %v22065_v56 = vld [vmem:[#allocation3] sm:$0xff] }
 0x628   : > { %10032 = vmatpush1.bf16.msra.mxu0 %v21411_v54  ;;  %v23566_v54 = vld [vmem:[#allocation3 + $0x30] sm:$0xff] }
 0x629   : > { %9136 = vmatpush1.bf16.msra.mxu1 %v21408_v9  ;;  %10033 = vmatprep.subr.bf16.mxu0 %v21419_v13  ;;  %v18212_v9 = vcombine.low %v23553_v41, %v22065_v56  ;;  %v18215_v13 = vcombine.high %v23566_v54, %v23523_v34  ;;  %v21477_v41 = vld [vmem:[#allocation15 + $0x920] ss:$16 sps:$4 sm:$0xff]   ;;  %v21480_v34 = vld [vmem:[#allocation15 + $0x308] ss:$16 sps:$4 sm:$0xff]  }
 0x62a   : > { %9137 = vmatprep.subr.bf16.mxu1 %v21416_v33  ;;  %v21468_v33 = vld [vmem:[#allocation15 + $0x348] ss:$16 sps:$4 sm:$0xff]  }
 0x62c   : > { %10034 = vmatpush1.bf16.msra.mxu0 %v21417_v58  ;;  %v21476_v58 = vld [vmem:[#allocation15 + $0x32c] ss:$16 sps:$4 sm:$0xff]  }
 0x62d   : > { %9138 = vmatpush1.bf16.msra.mxu1 %v21414_v3  ;;  %10035 = vmatprep.subr.bf16.mxu0 %v21425_v20  ;;  %v21471_v3 = vld [vmem:[#allocation15 + $0x940] ss:$16 sps:$4 sm:$0xff]   ;;  %v9336_v20 = vshll.u32 %v18212_v9, 16 }
 0x62e   : > { %9139 = vmatprep.subr.bf16.mxu1 %v21422_v2  ;;  %v21479_v2 = vld [vmem:[#allocation15 + $0x924] ss:$16 sps:$4 sm:$0xff]  }
 0x630   : > { %10036 = vmatpush1.bf16.msra.mxu0 %v21423_v19  ;;  %v9372_v19 = vshll.u32 %v18215_v13, 16 }
 0x631   : > { %9140 = vmatpush1.bf16.msra.mxu1 %v21420_v5  ;;  %10037 = vmatprep.subr.bf16.mxu0 %v21431_v43  ;;  %v21474_v5 = vld [vmem:[#allocation15 + $0x328] ss:$16 sps:$4 sm:$0xff]   ;;  %v21485_v43 = vld [vmem:[#allocation15 + $0x904] ss:$16 sps:$4 sm:$0xff]  }
 0x632   : > { %9141 = vmatprep.subr.bf16.mxu1 %v21428_v38  ;;  %v21482_v38 = vld [vmem:[#allocation15 + $0x30c] ss:$16 sps:$4 sm:$0xff]  }
 0x634   : > { %10038 = vmatpush1.bf16.msra.mxu0 %v21429_v4  ;;  %v9341_v4 = vshll.u32 %v23462_v6, 16 }
 0x635   : > { %9142 = vmatpush1.bf16.msra.mxu1 %v21426_v52  ;;  %10039 = vmatprep.subr.bf16.mxu0 %v21437_v32  ;;  %v9338_v52 = vrot.slane %v9336_v20, 1  ;;  %v9377_v32 = vshll.u32 %v23519_v59, 16  ;;  %v21498_v59 = vld [vmem:[#allocation15 + $0xac4] ss:$16 sps:$4 sm:$0xff]   ;;  %v21508_v20 = vld [vmem:[#allocation15 + $0xa80] ss:$16 sps:$4 sm:$0xff]  }
 0x636   : > { %9143 = vmatprep.subr.bf16.mxu1 %v21434_v46  ;;  %v9374_v46 = vrot.slane %v9372_v19, 1  ;;  %v21516_v19 = vld [vmem:[#allocation15 + $0xa64] ss:$16 sps:$4 sm:$0xff]  }
 0x637   : > { %v9379_v6 = vrot.slane %v9377_v32, 1  ;;  %v21528_v32 = vld [vmem:[#allocation15 + $0xa24] ss:$16 sps:$4 sm:$0xff]  }
 0x638   : > { %10040 = vmatpush1.bf16.msra.mxu0 %v21435_v30  ;;  %v21483_v30 = vld [vmem:[#allocation15 + $0x900] ss:$16 sps:$4 sm:$0xff]  }
 0x639   : > { %9144 = vmatpush1.bf16.msra.mxu1 %v21432_v44  ;;  %10041 = vmatprep.subr.bf16.mxu0 %v21443_v16  ;;  %v8136_v44 = vpop.f32.mrf.mxu0  ;;  %v21490_v16 = vld [vmem:[#allocation15 + $0xae4] ss:$16 sps:$4 sm:$0xff]  }
 0x63a   : > { %9145 = vmatprep.subr.bf16.mxu1 %v21440_v40  ;;  %v9334_v40 = vshrl.u32 %v18212_v9, 16  ;;  %v21502_v9 = vld [vmem:[#allocation15 + $0xaa0] ss:$16 sps:$4 sm:$0xff]  }
 0x63c   : > { %10042 = vmatpush2.bf16.msra.mxu0 %v21441_v23  ;;  %v9370_v23 = vshrl.u32 %v18215_v13, 16 }
 0x63d   : > { %9146 = vmatpush2.bf16.msra.mxu1 %v21438_v45  ;;  %10043 = vmatprep.subr.bf16.mxu0 %v21449_v63  ;;  %v21493_v45 = vld [vmem:[#allocation15 + $0x8ec] ss:$16 sps:$4 sm:$0xff]   ;;  %v9343_v63 = vrot.slane %v9341_v4, 1 }
 0x63e   : > { %9147 = vmatprep.subr.bf16.mxu1 %v21446_v15  ;;  %v9339_v15 = vor.u32 %v9338_v52, %v9334_v40  ;;  %v21522_v52 = vld [vmem:[#allocation15 + $0xa44] ss:$16 sps:$4 sm:$0xff]   ;;  %v21525_v4 = vld [vmem:[#allocation15 + $0x84c] ss:$16 sps:$4 sm:$0xff]   ;;  %v21529_v40 = vld [vmem:[#allocation15 + $0x828] ss:$16 sps:$4 sm:$0xff]  }
 0x640   : > { %10044 = vmatpush2.bf16.msra.mxu0 %v21447_v27  ;;  %v9375_v27 = vor.u32 %v9374_v46, %v9370_v23  ;;  %v21523_v46 = vld [vmem:[#allocation15 + $0x848] ss:$16 sps:$4 sm:$0xff]   ;;  %v21532_v23 = vld [vmem:[#allocation15 + $0xa00] ss:$16 sps:$4 sm:$0xff]  }
 0x641   : > { %9148 = vmatpush2.bf16.msra.mxu1 %v21444_v25  ;;  %10045 = vmatprep.subr.bf16.mxu0 %v21455_v49  ;;  %v21488_v25 = vld [vmem:[#allocation15 + $0xae0] ss:$16 sps:$4 sm:$0xff]   ;;  %v21491_v49 = vld [vmem:[#allocation15 + $0x8e8] ss:$16 sps:$4 sm:$0xff]  }
 0x642   : > { %9149 = vmatprep.subr.bf16.mxu1 %v21452_v60  ;;  %v8138_v60 = vpop.f32.mrf.mxu0 }
 0x644   : > { %10046 = vmatpush2.bf16.msra.mxu0 %v21453_v51 }
 0x645   : > { %9150 = vmatpush2.bf16.msra.mxu1 %v21450_v21  ;;  %10047 = vmatprep.subr.bf16.mxu0 %v21461_v14  ;;  %v23574_v21 = vsel %vm1329_vm0, %v9339_v15, %v9343_v63  ;;  %v21535_v15 = vld [vmem:[#allocation15 + $0x808] ss:$16 sps:$4 sm:$0xff]   ;;  %v21540_v63 = vld [vmem:[#allocation15 + $0xbe4] ss:$16 sps:$4 sm:$0xff]  }
 0x646   : > { %9151 = vmatprep.subr.bf16.mxu1 %v21458_v39  ;;  %v21501_v39 = vld [vmem:[#allocation15 + $0x8cc] ss:$16 sps:$4 sm:$0xff]  }
 0x648   : > { %10048 = vmatpush2.bf16.msra.mxu0 %v21459_v55  ;;  %v21496_v55 = vld [vmem:[#allocation15 + $0xac0] ss:$16 sps:$4 sm:$0xff]  }
 0x649   : > { %9152 = vmatpush2.bf16.msra.mxu1 %v21456_v35  ;;  %10049 = vmatprep.subr.bf16.mxu0 %v21467_v28  ;;  %v23580_v35 = vsel %vm1329_vm0, %v9375_v27, %v9379_v6  ;;  %v21538_v27 = vld [vmem:[#allocation15 + $0xbe0] ss:$16 sps:$4 sm:$0xff]   ;;  %v21541_v6 = vld [vmem:[#allocation15 + $0x9e8] ss:$16 sps:$4 sm:$0xff]  }
 0x64a   : > { %9153 = vmatprep.subr.bf16.mxu1 %v21464_v57  ;;  %v8140_v57 = vpop.f32.mrf.mxu0 }
 0x64c   : > { %10050 = vmatpush2.bf16.msra.mxu0 %v21465_v37 }
 0x64d   : > { %9154 = vmatpush2.bf16.msra.mxu1 %v21462_v24  ;;  %10051 = vmatprep.subr.bf16.mxu0 %v21473_v61  ;;  %v21504_v24 = vld [vmem:[#allocation15 + $0xaa4] ss:$16 sps:$4 sm:$0xff]  }
 0x64e   : > { %9155 = vmatprep.subr.bf16.mxu1 %v21470_v8  ;;  %v21507_v8 = vld [vmem:[#allocation15 + $0x8ac] ss:$16 sps:$4 sm:$0xff]  }
 0x650   : > { %10052 = vmatpush2.bf16.msra.mxu0 %v21471_v3  ;;  %v21505_v3 = vld [vmem:[#allocation15 + $0x8a8] ss:$16 sps:$4 sm:$0xff]  }
 0x651   : > { %9156 = vmatpush2.bf16.msra.mxu1 %v21468_v33  ;;  %10053 = vmatprep.subr.bf16.mxu0 %v21479_v2  ;;  %v8142_v33 = vpop.f32.mrf.mxu0 }
 0x652   : > { %9157 = vmatprep.subr.bf16.mxu1 %v21476_v58  ;;  %v21510_v58 = vld [vmem:[#allocation15 + $0xa84] ss:$16 sps:$4 sm:$0xff]  }
 0x654   : > { %10054 = vmatpush2.bf16.msra.mxu0 %v21477_v41  ;;  %v21519_v41 = vld [vmem:[#allocation15 + $0x86c] ss:$16 sps:$4 sm:$0xff]  }
 0x655   : > { %9158 = vmatpush2.bf16.msra.mxu1 %v21474_v5  ;;  %10055 = vmatprep.subr.bf16.mxu0 %v21485_v43  ;;  %v21511_v5 = vld [vmem:[#allocation15 + $0x888] ss:$16 sps:$4 sm:$0xff]  }
 0x656   : > { %9159 = vmatprep.subr.bf16.mxu1 %v21482_v38  ;;  %v21514_v38 = vld [vmem:[#allocation15 + $0xa60] ss:$16 sps:$4 sm:$0xff]   ;;  %v21517_v43 = vld [vmem:[#allocation15 + $0x868] ss:$16 sps:$4 sm:$0xff]  }
 0x658   : > { %10056 = vmatpush2.bf16.msra.mxu0 %v21483_v30  ;;  %v21526_v30 = vld [vmem:[#allocation15 + $0xa20] ss:$16 sps:$4 sm:$0xff]  }
 0x659   : > { %9160 = vmatpush2.bf16.msra.mxu1 %v21480_v34  ;;  %10111 = vmatprep.subr.bf16.mxu0 %v21493_v45  ;;  %v21520_v34 = vld [vmem:[#allocation15 + $0xa40] ss:$16 sps:$4 sm:$0xff]   ;;  %v21537_v45 = vld [vmem:[#allocation15 + $0x80c] ss:$16 sps:$4 sm:$0xff]  }
 0x65a   : > { %10068 = vmatprep.subr.bf16.mxu1 %v21490_v16  ;;  %v21534_v16 = vld [vmem:[#allocation15 + $0xa04] ss:$16 sps:$4 sm:$0xff]  }
 0x65b   : > { %10058 = vmatmul.mubr.bf16.vlgmr.msra.gmra.mxu0 %v23574_v21 }
 0x65c   : > { %9162 = vmatmul.mubr.bf16.vlgmr.msra.gmra.mxu1 %v23529_v31  ;;  %v8179_v51 = vpop.f32.mrf.mxu1  ;;  %10112 = vmatpush1.bf16.msra.mxu0 %v21491_v49  ;;  %v21499_v31 = vld [vmem:[#allocation15 + $0x8c8] ss:$16 sps:$4 sm:$0xff]   ;;  %v21549_v49 = vld [vmem:[#allocation15 + $0x9cc] ss:$16 sps:$4 sm:$0xff]  }
 0x65d   : > { %v23577_v14 = vadd.f32 %v8179_v51, %v8136_v44  ;;  %10069 = vmatpush1.bf16.msra.mxu1 %v21488_v25  ;;  %10100 = vmatprep.mubr.bf16.mxu1 %v23580_v35  ;;  %v21531_v44 = vld [vmem:[#allocation15 + $0x82c] ss:$16 sps:$4 sm:$0xff]   ;;  %v21547_v51 = vld [vmem:[#allocation15 + $0x9c8] ss:$16 sps:$4 sm:$0xff]  }
 0x65e   : > { %v8181_v28 = vpop.f32.mrf.mxu1  ;;  %10143 = vmatprep.mubr.bf16.mxu0 %v23562_v18  ;;  %10070 = vmatprep.subr.bf16.mxu1 %v21498_v59  ;;  %v21513_v18 = vld [vmem:[#allocation15 + $0x88c] ss:$16 sps:$4 sm:$0xff]   ;;  %v21544_v59 = vld [vmem:[#allocation15 + $0xbc0] ss:$16 sps:$4 sm:$0xff]  }
 0x65f   : > { %v23584_v37 = vadd.f32 %v8181_v28, %v8138_v60  ;;  %10113 = vmatprep.subr.bf16.mxu0 %v21501_v39  ;;  %v21543_v25 = vld [vmem:[#allocation15 + $0x9ec] ss:$16 sps:$4 sm:$0xff]   ;;  %v21546_v60 = vld [vmem:[#allocation15 + $0xbc4] ss:$16 sps:$4 sm:$0xff]   ;;  %v21553_v28 = vld [vmem:[#allocation15 + $0x9a8] ss:$16 sps:$4 sm:$0xff]  }
 0x660   : > { %v8183_v61 = vpop.f32.mrf.mxu1  ;;  %10114 = vmatpush1.bf16.msra.mxu0 %v21499_v31  ;;  %v21552_v39 = vld [vmem:[#allocation15 + $0xba4] ss:$16 sps:$4 sm:$0xff]  }
 0x661   : > { %v23586_v56 = vadd.f32 %v8183_v61, %v8140_v57  ;;  %10071 = vmatpush1.bf16.msra.mxu1 %v21496_v55  ;;  %10115 = vmatprep.subr.bf16.mxu0 %v21507_v8  ;;  %v21555_v55 = vld [vmem:[#allocation15 + $0x9ac] ss:$16 sps:$4 sm:$0xff]   ;;  %v21550_v57 = vld [vmem:[#allocation15 + $0xba0] ss:$16 sps:$4 sm:$0xff]   ;;  %v21558_v31 = vld [vmem:[#allocation15 + $0xb84] ss:$16 sps:$4 sm:$0xff]  }
 0x662   : > { %v8185_v13 = vpop.f32.mrf.mxu1  ;;  %10072 = vmatprep.subr.bf16.mxu1 %v21504_v24  ;;  %v21561_v24 = vld [vmem:[#allocation15 + $0x98c] ss:$16 sps:$4 sm:$0xff]   ;;  %v21556_v8 = vld [vmem:[#allocation15 + $0xb80] ss:$16 sps:$4 sm:$0xff]   ;;  %v21559_v61 = vld [vmem:[#allocation15 + $0x988] ss:$16 sps:$4 sm:$0xff]  }
 0x663   : > { %v23588_v2 = vadd.f32 %v8185_v13, %v8142_v33  ;;  %v21567_v33 = vld [vmem:[#allocation15 + $0x96c] ss:$16 sps:$4 sm:$0xff]   ;;  %v21562_v13 = vld [vmem:[#allocation15 + $0xb60] ss:$16 sps:$4 sm:$0xff]  }
 0x664   : > { %10116 = vmatpush1.bf16.msra.mxu0 %v21505_v3  ;;  %v21565_v3 = vld [vmem:[#allocation15 + $0x968] ss:$16 sps:$4 sm:$0xff]  }
 0x665   : > { %10073 = vmatpush1.bf16.msra.mxu1 %v21502_v9  ;;  %10117 = vmatprep.subr.bf16.mxu0 %v21513_v18  ;;  %v21564_v9 = vld [vmem:[#allocation15 + $0xb64] ss:$16 sps:$4 sm:$0xff]   ;;  %v21573_v18 = vld [vmem:[#allocation15 + $0x94c] ss:$16 sps:$4 sm:$0xff]  }
 0x666   : > { %10074 = vmatprep.subr.bf16.mxu1 %v21510_v58  ;;  %v21570_v58 = vld [vmem:[#allocation15 + $0xb44] ss:$16 sps:$4 sm:$0xff]  }
 0x668   : > { %10118 = vmatpush1.bf16.msra.mxu0 %v21511_v5 }
 0x669   : > { %10075 = vmatpush1.bf16.msra.mxu1 %v21508_v20  ;;  %10119 = vmatprep.subr.bf16.mxu0 %v21519_v41  ;;  %v22066_v20 = vld [vmem:[#allocation3 + $0x18] sm:$0xff]  ;;  %v8222_v41 = vpop.f32.mrf.mxu0 }
 0x66a   : > { %10076 = vmatprep.subr.bf16.mxu1 %v21516_v19  ;;  %v18214_v5 = vcombine.low %v23566_v54, %v22066_v20  ;;  %v21568_v19 = vld [vmem:[#allocation15 + $0xb40] ss:$16 sps:$4 sm:$0xff]   ;;  %v21598_v20 = vld [vmem:[#allocation15 + $0xaa8] ss:$16 sps:$4 sm:$0xff]  }
 0x66c   : > { %10120 = vmatpush1.bf16.msra.mxu0 %v21517_v43  ;;  %v21576_v43 = vld [vmem:[#allocation15 + $0xb24] ss:$16 sps:$4 sm:$0xff]  }
 0x66d   : > { %10077 = vmatpush1.bf16.msra.mxu1 %v21514_v38  ;;  %10121 = vmatprep.subr.bf16.mxu0 %v21525_v4  ;;  %v21571_v38 = vld [vmem:[#allocation15 + $0x948] ss:$16 sps:$4 sm:$0xff]   ;;  %v9360_v4 = vshll.u32 %v18214_v5, 16 }
 0x66e   : > { %10078 = vmatprep.subr.bf16.mxu1 %v21522_v52  ;;  %v21579_v52 = vld [vmem:[#allocation15 + $0x92c] ss:$16 sps:$4 sm:$0xff]  }
 0x66f   : > { %v9362_v54 = vrot.slane %v9360_v4, 1  ;;  %v21610_v4 = vld [vmem:[#allocation15 + $0xa6c] ss:$16 sps:$4 sm:$0xff]  }
 0x670   : > { %10122 = vmatpush1.bf16.msra.mxu0 %v21523_v46  ;;  %v8224_v46 = vpop.f32.mrf.mxu0 }
 0x671   : > { %10079 = vmatpush1.bf16.msra.mxu1 %v21520_v34  ;;  %10123 = vmatprep.subr.bf16.mxu0 %v21531_v44  ;;  %v21574_v34 = vld [vmem:[#allocation15 + $0xb20] ss:$16 sps:$4 sm:$0xff]   ;;  %v21582_v44 = vld [vmem:[#allocation15 + $0xb04] ss:$16 sps:$4 sm:$0xff]  }
 0x672   : > { %10080 = vmatprep.subr.bf16.mxu1 %v21528_v32  ;;  %v21577_v32 = vld [vmem:[#allocation15 + $0x928] ss:$16 sps:$4 sm:$0xff]  }
 0x674   : > { %10124 = vmatpush1.bf16.msra.mxu0 %v21529_v40  ;;  %v9365_v40 = vshll.u32 %v23521_v62, 16 }
 0x675   : > { %10081 = vmatpush1.bf16.msra.mxu1 %v21526_v30  ;;  %10125 = vmatprep.subr.bf16.mxu0 %v21537_v45  ;;  %v21585_v30 = vld [vmem:[#allocation15 + $0x90c] ss:$16 sps:$4 sm:$0xff]   ;;  %v9358_v45 = vshrl.u32 %v18214_v5, 16 }
 0x676   : > { %10082 = vmatprep.subr.bf16.mxu1 %v21534_v16  ;;  %v21580_v16 = vld [vmem:[#allocation15 + $0xb00] ss:$16 sps:$4 sm:$0xff]  }
 0x678   : > { %10126 = vmatpush1.bf16.msra.mxu0 %v21535_v15  ;;  %v21583_v15 = vld [vmem:[#allocation15 + $0x908] ss:$16 sps:$4 sm:$0xff]  }
 0x679   : > { %10083 = vmatpush1.bf16.msra.mxu1 %v21532_v23  ;;  %10127 = vmatprep.subr.bf16.mxu0 %v21543_v25  ;;  %v8226_v23 = vpop.f32.mrf.mxu0  ;;  %v9363_v25 = vor.u32 %v9362_v54, %v9358_v45  ;;  %v21617_v54 = vld [vmem:[#allocation16 + $0x110] sm:$0xff]   ;;  %v21618_v45 = vld [vmem:[#allocation15 + $0xa28] ss:$16 sps:$4 sm:$0xff]  }
 0x67a   : > { %10084 = vmatprep.subr.bf16.mxu1 %v21540_v63  ;;  %v21590_v63 = vld [vmem:[#allocation15 + $0xaec] ss:$16 sps:$4 sm:$0xff]  }
 0x67c   : > { %10128 = vmatpush2.bf16.msra.mxu0 %v21541_v6  ;;  %v21591_v6 = vld [vmem:[#allocation16 + $0x178] sm:$0xff]  }
 0x67d   : > { %10085 = vmatpush2.bf16.msra.mxu1 %v21538_v27  ;;  %10129 = vmatprep.subr.bf16.mxu0 %v21549_v49  ;;  %v9367_v27 = vrot.slane %v9365_v40, 1  ;;  %v8228_v49 = vpop.f32.mrf.mxu0  ;;  %v21620_v40 = vld [vmem:[#allocation15 + $0xa2c] ss:$16 sps:$4 sm:$0xff]  }
 0x67e   : > { %10086 = vmatprep.subr.bf16.mxu1 %v21546_v60  ;;  %v21588_v60 = vld [vmem:[#allocation15 + $0xae8] ss:$16 sps:$4 sm:$0xff]  }
 0x67f   : > { %v23593_v62 = vsel %vm1329_vm0, %v9363_v25, %v9367_v27  ;;  %v21626_v25 = vld [vmem:[#allocation16 + $0x140] sm:$0xff]   ;;  %v21623_v27 = vld [vmem:[#allocation15 + $0xa08] ss:$16 sps:$4 sm:$0xff]  }
 0x680   : > { %10130 = vmatpush2.bf16.msra.mxu0 %v21547_v51  ;;  %v21595_v51 = vld [vmem:[#allocation15 + $0xacc] ss:$16 sps:$4 sm:$0xff]  }
 0x681   : > { %10087 = vmatpush2.bf16.msra.mxu1 %v21544_v59  ;;  %10131 = vmatprep.subr.bf16.mxu0 %v21555_v55  ;;  %v21592_v59 = vld [vmem:[#allocation16 + $0x138] sm:$0xff]  }
 0x682   : > { %10088 = vmatprep.subr.bf16.mxu1 %v21552_v39 }
 0x684   : > { %10132 = vmatpush2.bf16.msra.mxu0 %v21553_v28 }
 0x685   : > { %10089 = vmatpush2.bf16.msra.mxu1 %v21550_v57  ;;  %10133 = vmatprep.subr.bf16.mxu0 %v21561_v24  ;;  %v21596_v57 = vld [vmem:[#allocation16 + $0x170] sm:$0xff]   ;;  %v21593_v24 = vld [vmem:[#allocation15 + $0xac8] ss:$16 sps:$4 sm:$0xff]  }
 0x686   : > { %10090 = vmatprep.subr.bf16.mxu1 %v21558_v31 }
 0x688   : > { %10134 = vmatpush2.bf16.msra.mxu0 %v21559_v61 }
 0x689   : > { %10091 = vmatpush2.bf16.msra.mxu1 %v21556_v8  ;;  %10135 = vmatprep.subr.bf16.mxu0 %v21567_v33  ;;  %v21600_v33 = vld [vmem:[#allocation15 + $0xaac] ss:$16 sps:$4 sm:$0xff]  }
 0x68a   : > { %10092 = vmatprep.subr.bf16.mxu1 %v21564_v9  ;;  %v21597_v9 = vld [vmem:[#allocation16 + $0x130] sm:$0xff]  }
 0x68c   : > { %10136 = vmatpush2.bf16.msra.mxu0 %v21565_v3 }
 0x68d   : > { %10093 = vmatpush2.bf16.msra.mxu1 %v21562_v13  ;;  %10137 = vmatprep.subr.bf16.mxu0 %v21573_v18 }
 0x68e   : > { %10094 = vmatprep.subr.bf16.mxu1 %v21570_v58 }
 0x690   : > { %10138 = vmatpush2.bf16.msra.mxu0 %v21571_v38 }
 0x691   : > { %10095 = vmatpush2.bf16.msra.mxu1 %v21568_v19  ;;  %10139 = vmatprep.subr.bf16.mxu0 %v21579_v52  ;;  %v21602_v19 = vld [vmem:[#allocation16 + $0x128] sm:$0xff]  }
 0x692   : > { %10096 = vmatprep.subr.bf16.mxu1 %v21576_v43  ;;  %v21606_v43 = vld [vmem:[#allocation16 + $0x160] sm:$0xff]   ;;  %v21603_v52 = vld [vmem:[#allocation15 + $0xa88] ss:$16 sps:$4 sm:$0xff]  }
 0x694   : > { %10140 = vmatpush2.bf16.msra.mxu0 %v21577_v32  ;;  %v21612_v32 = vld [vmem:[#allocation16 + $0x118] sm:$0xff]  }
 0x695   : > { %10097 = vmatpush2.bf16.msra.mxu1 %v21574_v34  ;;  %10141 = vmatprep.subr.bf16.mxu0 %v21585_v30  ;;  %v21611_v34 = vld [vmem:[#allocation16 + $0x158] sm:$0xff]   ;;  %v21616_v30 = vld [vmem:[#allocation16 + $0x150] sm:$0xff]  }
 0x696   : > { %10098 = vmatprep.subr.bf16.mxu1 %v21582_v44  ;;  %v21615_v44 = vld [vmem:[#allocation15 + $0xa4c] ss:$16 sps:$4 sm:$0xff]  }
 0x698   : > { %10142 = vmatpush2.bf16.msra.mxu0 %v21583_v15  ;;  %v21625_v15 = vld [vmem:[#allocation15 + $0xa0c] ss:$16 sps:$4 sm:$0xff]  }
 0x699   : > { %10099 = vmatpush2.bf16.msra.mxu1 %v21580_v16  ;;  %18841 = vmatprep.subr.bf16.mxu0 %v21591_v6  ;;  %v21621_v16 = vld [vmem:[#allocation16 + $0x148] sm:$0xff]  }
 0x69a   : > { %10154 = vmatprep.subr.bf16.mxu1 %v21590_v63  ;;  %v23619_v63 = vld [vmem:[#allocation3] sm:$0x77] }
 0x69b   : > { %v9034_v55 = vpop.f32.mrf.mxu0  ;;  %10144 = vmatmul.mubr.bf16.vlgmr.msra.gmra.mxu0 %v23574_v21  ;;  %v18381_v6 = vcombine.high %v23619_v63, %v23619_v63 }
 0x69c   : > { %v8265_v39 = vpop.f32.mrf.mxu1  ;;  %10101 = vmatmul.mubr.bf16.vlgmr.msra.gmra.mxu1 %v23593_v62  ;;  %v23599_v31 = vadd.f32 %v9034_v55, %v23577_v14  ;;  %18842 = vmatpush3.bf16.msra.mxu0 %v21592_v59  ;;  %v21601_v14 = vld [vmem:[#allocation16 + $0x168] sm:$0xff]   ;;  %v21631_v59 = vld [vmem:[#allocation16 + $0x78] sm:$0xff]  }
 0x69d   : > { %v23596_v28 = vadd.f32 %v8265_v39, %v8222_v41  ;;  %10155 = vmatpush1.bf16.msra.mxu1 %v21588_v60  ;;  %10186 = vmatprep.mubr.bf16.mxu1 %v23580_v35  ;;  %v9036_v61 = vpop.f32.mrf.mxu0  ;;  %v21605_v41 = vld [vmem:[#allocation15 + $0xa8c] ss:$16 sps:$4 sm:$0xff]   ;;  %v21627_v60 = vld [vmem:[#allocation16 + $0x100] sm:$0xff]   ;;  %v10625_v39 = vrot.slane %v18381_v6, 3 }
 0x69e   : > { %v8267_v8 = vpop.f32.mrf.mxu1  ;;  %10560 = vmatprep.mubr.bf16.mxu0 %v23453_v11  ;;  %v23607_v3 = vadd.f32 %v9036_v61, %v23584_v37  ;;  %10156 = vmatprep.subr.bf16.mxu1 %v21595_v51  ;;  %v21628_v51 = vld [vmem:[#allocation15 + $0xbe8] ss:$16 sps:$4 sm:$0xff]  }
 0x69f   : > { %v23604_v13 = vadd.f32 %v8267_v8, %v8224_v46  ;;  %v9038_v21 = vpop.f32.mrf.mxu0  ;;  %18843 = vmatprep.subr.bf16.mxu0 %v21596_v57  ;;  %v21608_v46 = vld [vmem:[#allocation15 + $0xa68] ss:$16 sps:$4 sm:$0xff]   ;;  %v10624_v57 = vrot.slane %v23491_v7, 3  ;;  %v21637_v8 = vld [vmem:[#allocation16 + $0x70] sm:$0xff]  }
 0x6a0   : > { %v8269_v58 = vpop.f32.mrf.mxu1  ;;  %v23612_v35 = vadd.f32 %v9038_v21, %v23586_v56  ;;  %18844 = vmatpush3.bf16.msra.mxu0 %v21597_v9  ;;  %v21607_v56 = vld [vmem:[#allocation16 + $0x120] sm:$0xff]   ;;  %v21632_v55 = vld [vmem:[#allocation16 + $0x38] sm:$0xff]   ;;  %v21643_v7 = vld [vmem:[#allocation16 + $0x28] sm:$0xff]  }
 0x6a1   : > { %v23609_v18 = vadd.f32 %v8269_v58, %v8226_v23  ;;  %10157 = vmatpush1.bf16.msra.mxu1 %v21593_v24  ;;  %v9040_v11 = vpop.f32.mrf.mxu0  ;;  %18845 = vmatprep.subr.bf16.mxu0 %v21601_v14  ;;  %v21622_v23 = vld [vmem:[#allocation16 + $0x108] sm:$0xff]   ;;  %v10626_v61 = vsel %vm10620_vm6, %v10624_v57, %v10625_v39  ;;  %v21672_v6 = vld [vmem:[#allocation16 + $0x1b8] sm:$0xff]   ;;  %v21676_v39 = vld [vmem:[#allocation16 + $0x270] sm:$0xff]  }
 0x6a2   : > { %v8271_v5 = vpop.f32.mrf.mxu1  ;;  %10158 = vmatprep.subr.bf16.mxu1 %v21600_v33  ;;  %v23617_v38 = vadd.f32 %v9040_v11, %v23588_v2  ;;  %v21613_v2 = vld [vmem:[#allocation15 + $0xa48] ss:$16 sps:$4 sm:$0xff]   ;;  %v21636_v24 = vld [vmem:[#allocation15 + $0xbcc] ss:$16 sps:$4 sm:$0xff]   ;;  %v21638_v33 = vld [vmem:[#allocation16 + $0x30] sm:$0xff]  }
 0x6a3   : > { %v23614_v37 = vadd.f32 %v8271_v5, %v8228_v49  ;;  %v21630_v49 = vld [vmem:[#allocation15 + $0xbec] ss:$16 sps:$4 sm:$0xff]   ;;  %v21634_v9 = vld [vmem:[#allocation15 + $0xbc8] ss:$16 sps:$4 sm:$0xff]   ;;  %v21647_v5 = vld [vmem:[#allocation16 + $0x60] sm:$0xff]  }
 0x6a4   : > { %18846 = vmatpush3.bf16.msra.mxu0 %v21602_v19  ;;  %v21641_v14 = vld [vmem:[#allocation15 + $0xbac] ss:$16 sps:$4 sm:$0xff]   ;;  %v21639_v21 = vld [vmem:[#allocation15 + $0xba8] ss:$16 sps:$4 sm:$0xff]   ;;  %v21648_v11 = vld [vmem:[#allocation16 + $0x20] sm:$0xff]  }
 0x6a5   : > { %10159 = vmatpush1.bf16.msra.mxu1 %v21598_v20  ;;  %18847 = vmatprep.subr.bf16.mxu0 %v21606_v43  ;;  %v21642_v58 = vld [vmem:[#allocation16 + $0x68] sm:$0xff]  }
 0x6a6   : > { %10160 = vmatprep.subr.bf16.mxu1 %v21605_v41  ;;  %v21646_v20 = vld [vmem:[#allocation15 + $0xb8c] ss:$16 sps:$4 sm:$0xff]   ;;  %v21649_v43 = vld [vmem:[#allocation15 + $0xb68] ss:$16 sps:$4 sm:$0xff]  }
 0x6a7   : > { %v21651_v19 = vld [vmem:[#allocation15 + $0xb6c] ss:$16 sps:$4 sm:$0xff]  }
 0x6a8   : > { %18848 = vmatpush3.bf16.msra.mxu0 %v21607_v56  ;;  %v21652_v41 = vld [vmem:[#allocation16 + $0x58] sm:$0xff]  }
 0x6a9   : > { %10161 = vmatpush1.bf16.msra.mxu1 %v21603_v52  ;;  %18849 = vmatprep.subr.bf16.mxu0 %v21611_v34  ;;  %v21653_v52 = vld [vmem:[#allocation16 + $0x18] sm:$0xff]  }
 0x6aa   : > { %10162 = vmatprep.subr.bf16.mxu1 %v21610_v4  ;;  %v21656_v56 = vld [vmem:[#allocation15 + $0xb4c] ss:$16 sps:$4 sm:$0xff]   ;;  %v21657_v4 = vld [vmem:[#allocation16 + $0x50] sm:$0xff]   ;;  %v21654_v34 = vld [vmem:[#allocation15 + $0xb48] ss:$16 sps:$4 sm:$0xff]  }
 0x6ac   : > { %18850 = vmatpush3.bf16.msra.mxu0 %v21612_v32  ;;  %v21661_v32 = vld [vmem:[#allocation15 + $0xb2c] ss:$16 sps:$4 sm:$0xff]  }
 0x6ad   : > { %10163 = vmatpush1.bf16.msra.mxu1 %v21608_v46  ;;  %18851 = vmatprep.subr.bf16.mxu0 %v21616_v30  ;;  %v21658_v46 = vld [vmem:[#allocation16 + $0x10] sm:$0xff]   ;;  %v21659_v30 = vld [vmem:[#allocation15 + $0xb28] ss:$16 sps:$4 sm:$0xff]  }
 0x6ae   : > { %10164 = vmatprep.subr.bf16.mxu1 %v21615_v44  ;;  %v21662_v44 = vld [vmem:[#allocation16 + $0x48] sm:$0xff]  }
 0x6b0   : > { %18852 = vmatpush3.bf16.msra.mxu0 %v21617_v54  ;;  %v21666_v54 = vld [vmem:[#allocation15 + $0xb0c] ss:$16 sps:$4 sm:$0xff]  }
 0x6b1   : > { %10165 = vmatpush1.bf16.msra.mxu1 %v21613_v2  ;;  %18853 = vmatprep.subr.bf16.mxu0 %v21621_v16  ;;  %v21663_v2 = vld [vmem:[#allocation16 + $0x8] sm:$0xff]   ;;  %v18380_v16 = vcombine.low %v23619_v63, %v23619_v63 }
 0x6b2   : > { %10166 = vmatprep.subr.bf16.mxu1 %v21620_v40  ;;  %v21667_v40 = vld [vmem:[#allocation16 + $0x40] sm:$0xff]  }
 0x6b4   : > { %18854 = vmatpush3.bf16.msra.mxu0 %v21622_v23  ;;  %v21668_v23 = vld [vmem:[#allocation16] sm:$0xff]  }
 0x6b5   : > { %10167 = vmatpush1.bf16.msra.mxu1 %v21618_v45  ;;  %18855 = vmatprep.subr.bf16.mxu0 %v21626_v25  ;;  %v21664_v45 = vld [vmem:[#allocation15 + $0xb08] ss:$16 sps:$4 sm:$0xff]  }
 0x6b6   : > { %10168 = vmatprep.subr.bf16.mxu1 %v21625_v15  ;;  %v21669_v15 = vld [vmem:[#allocation16 + $0x1f8] sm:$0xff]  }
 0x6b7   : > { %v21671_v25 = vld [vmem:[#allocation16 + $0x278] sm:$0xff]  }
 0x6b8   : > { %18856 = vmatpush3.bf16.msra.mxu0 %v21627_v60  ;;  %v10621_v60 = vrot.slane %v23447_v26, 3 }
 0x6b9   : > { %10169 = vmatpush1.bf16.msra.mxu1 %v21623_v27  ;;  %18885 = vmatprep.subr.bf16.mxu0 %v21631_v59  ;;  %v10622_v27 = vrot.slane %v18380_v16, 3  ;;  %v21675_v59 = vld [vmem:[#allocation16 + $0x1f0] sm:$0xff]   ;;  %v21703_v16 = vld [vmem:[#allocation16 + $0xf8] sm:$0xff]  }
 0x6ba   : > { %10170 = vmatprep.subr.bf16.mxu1 %v21630_v49  ;;  %v21673_v49 = vld [vmem:[#allocation16 + $0x238] sm:$0xff]  }
 0x6bb   : > { %10561 = vmatmul.mubr.bf16.vlgmr.msra.gmra.mxu0 %v23455_v0  ;;  %v21644_v0 = vld [vmem:[#allocation15 + $0xb88] ss:$16 sps:$4 sm:$0xff]   ;;  %v10623_v63 = vsel %vm10620_vm6, %v10621_v60, %v10622_v27  ;;  %v21711_v27 = vld [vmem:[#allocation16 + $0xf0] sm:$0xff]  }
 0x6bc   : > { %18886 = vmatpush3.bf16.msra.mxu0 %v21632_v55  ;;  %10861 = vmatprep.mubr.bf16.mxu0 %v10626_v61  ;;  %v21678_v61 = vld [vmem:[#allocation16 + $0x230] sm:$0xff]  }
 0x6bd   : > { %10171 = vmatpush2.bf16.msra.mxu1 %v21628_v51  ;;  %18887 = vmatprep.subr.bf16.mxu0 %v21637_v8  ;;  %v21712_v60 = vld [vmem:[#allocation16 + $0x470] sm:$0xff]  }
 0x6be   : > { %10172 = vmatprep.subr.bf16.mxu1 %v21636_v24  ;;  %v21677_v24 = vld [vmem:[#allocation16 + $0x1b0] sm:$0xff]  }
 0x6c0   : > { %18888 = vmatpush3.bf16.msra.mxu0 %v21638_v33  ;;  %v21680_v33 = vld [vmem:[#allocation16 + $0x268] sm:$0xff]  }
 0x6c1   : > { %10173 = vmatpush2.bf16.msra.mxu1 %v21634_v9  ;;  %18889 = vmatprep.subr.bf16.mxu0 %v21642_v58  ;;  %v21679_v9 = vld [vmem:[#allocation16 + $0x1e8] sm:$0xff]  }
 0x6c2   : > { %10174 = vmatprep.subr.bf16.mxu1 %v21641_v14 }
 0x6c4   : > { %18890 = vmatpush3.bf16.msra.mxu0 %v21643_v7 }
 0x6c5   : > { %10175 = vmatpush2.bf16.msra.mxu1 %v21639_v21  ;;  %18891 = vmatprep.subr.bf16.mxu0 %v21647_v5  ;;  %v21681_v21 = vld [vmem:[#allocation16 + $0x1a8] sm:$0xff]  }
 0x6c6   : > { %10176 = vmatprep.subr.bf16.mxu1 %v21646_v20  ;;  %v21683_v20 = vld [vmem:[#allocation16 + $0x1e0] sm:$0xff]  }
 0x6c8   : > { %18892 = vmatpush3.bf16.msra.mxu0 %v21648_v11  ;;  %v21685_v11 = vld [vmem:[#allocation16 + $0x1a0] sm:$0xff]  }
 0x6c9   : > { %10177 = vmatpush2.bf16.msra.mxu1 %v21644_v0  ;;  %18893 = vmatprep.subr.bf16.mxu0 %v21652_v41  ;;  %v21684_v0 = vld [vmem:[#allocation16 + $0x260] sm:$0xff]   ;;  %v21688_v41 = vld [vmem:[#allocation16 + $0x258] sm:$0xff]  }
 0x6ca   : > { %10178 = vmatprep.subr.bf16.mxu1 %v21651_v19  ;;  %v21687_v19 = vld [vmem:[#allocation16 + $0x1d8] sm:$0xff]  }
 0x6cc   : > { %18894 = vmatpush3.bf16.msra.mxu0 %v21653_v52  ;;  %v21691_v52 = vld [vmem:[#allocation16 + $0x1d0] sm:$0xff]  }
 0x6cd   : > { %10179 = vmatpush2.bf16.msra.mxu1 %v21649_v43  ;;  %18895 = vmatprep.subr.bf16.mxu0 %v21657_v4  ;;  %v21689_v43 = vld [vmem:[#allocation16 + $0x198] sm:$0xff]   ;;  %v21693_v4 = vld [vmem:[#allocation16 + $0x190] sm:$0xff]  }
 0x6ce   : > { %10180 = vmatprep.subr.bf16.mxu1 %v21656_v56  ;;  %v21692_v56 = vld [vmem:[#allocation16 + $0x250] sm:$0xff]  }
 0x6d0   : > { %18896 = vmatpush3.bf16.msra.mxu0 %v21658_v46  ;;  %v21696_v46 = vld [vmem:[#allocation16 + $0x248] sm:$0xff]  }
 0x6d1   : > { %10181 = vmatpush2.bf16.msra.mxu1 %v21654_v34  ;;  %18897 = vmatprep.subr.bf16.mxu0 %v21662_v44  ;;  %v21695_v34 = vld [vmem:[#allocation16 + $0x1c8] sm:$0xff]  }
 0x6d2   : > { %10182 = vmatprep.subr.bf16.mxu1 %v21661_v32  ;;  %v21697_v32 = vld [vmem:[#allocation16 + $0x188] sm:$0xff]  }
 0x6d3   : > { %v21698_v44 = vld [vmem:[#allocation16 + $0x208] sm:$0xff]  }
 0x6d4   : > { %18898 = vmatpush3.bf16.msra.mxu0 %v21663_v2  ;;  %v21700_v2 = vld [vmem:[#allocation16 + $0x240] sm:$0xff]  }
 0x6d5   : > { %10183 = vmatpush2.bf16.msra.mxu1 %v21659_v30  ;;  %18899 = vmatprep.subr.bf16.mxu0 %v21667_v40  ;;  %v21699_v30 = vld [vmem:[#allocation16 + $0x1c0] sm:$0xff]  }
 0x6d6   : > { %10184 = vmatprep.subr.bf16.mxu1 %v21666_v54  ;;  %v21701_v54 = vld [vmem:[#allocation16 + $0x180] sm:$0xff]  }
 0x6d7   : > { %v21702_v40 = vld [vmem:[#allocation16 + $0x200] sm:$0xff]  }
 0x6d8   : > { %18900 = vmatpush3.bf16.msra.mxu0 %v21668_v23  ;;  %v21706_v23 = vld [vmem:[#allocation16 + $0xb8] sm:$0xff]  }
 0x6d9   : > { %10185 = vmatpush2.bf16.msra.mxu1 %v21664_v45  ;;  %18929 = vmatprep.subr.bf16.mxu0 %v21671_v25  ;;  %v21705_v45 = vld [vmem:[#allocation16 + $0x478] sm:$0xff]   ;;  %v23657_v25 = vld [vmem:[#allocation3] sm:$0xff] }
 0x6da   : > { %18863 = vmatprep.subr.bf16.mxu1 %v21669_v15  ;;  %v21708_v15 = vld [vmem:[#allocation16 + $0x438] sm:$0xff]  }
 0x6db   : > { %v9120_v57 = vpop.f32.mrf.mxu0  ;;  %10862 = vmatmul.mubr.bf16.vlgmr.msra.gmra.mxu0 %v10623_v63  ;;  %v21715_v63 = vld [vmem:[#allocation16 + $0xe8] sm:$0xff]  }
 0x6dc   : > { %v9077_v51 = vpop.f32.mrf.mxu1  ;;  %10187 = vmatmul.mubr.bf16.vlgmr.msra.gmra.mxu1 %v23593_v62  ;;  %v23635_v8 = vadd.f32 %v9120_v57, %v23596_v28  ;;  %18930 = vmatpush3.bf16.msra.mxu0 %v21673_v49  ;;  %v21719_v57 = vld [vmem:[#allocation16 + $0xe0] sm:$0xff]  }
 0x6dd   : > { %v23632_v55 = vadd.f32 %v9077_v51, %v23599_v31  ;;  %18864 = vmatpush3.bf16.msra.mxu1 %v21672_v6  ;;  %10601 = vmatprep.mubr.bf16.mxu1 %v23507_v29  ;;  %v9122_v31 = vpop.f32.mrf.mxu0  ;;  %v23660_v6 = vld [vmem:[#allocation3 + $0x28] sm:$0xff]  ;;  %v21714_v51 = vld [vmem:[#allocation16 + $0x430] sm:$0xff]  }
 0x6de   : > { %v9079_v26 = vpop.f32.mrf.mxu1  ;;  %11228 = vmatprep.mubr.bf16.mxu0 %v23474_v53  ;;  %18865 = vmatprep.subr.bf16.mxu1 %v21675_v59  ;;  %v23643_v14 = vadd.f32 %v9122_v31, %v23604_v13  ;;  %v23665_v49 = vcombine.high %v23660_v6, %v23657_v25  ;;  %v21713_v59 = vld [vmem:[#allocation16 + $0xb0] sm:$0xff]   ;;  %v21725_v31 = vld [vmem:[#allocation16 + $0x98] sm:$0xff]  }
 0x6df   : > { %v23640_v62 = vadd.f32 %v9079_v26, %v23607_v3  ;;  %18931 = vmatprep.subr.bf16.mxu0 %v21676_v39  ;;  %v9124_v29 = vpop.f32.mrf.mxu0  ;;  %v21682_v3 = vld [vmem:[#allocation16 + $0x228] sm:$0xff]   ;;  %v21721_v26 = vld [vmem:[#allocation16 + $0xa0] sm:$0xff]  }
 0x6e0   : > { %v9081_v58 = vpop.f32.mrf.mxu1  ;;  %v23649_v7 = vadd.f32 %v9124_v29, %v23609_v18  ;;  %18932 = vmatpush3.bf16.msra.mxu0 %v21678_v61  ;;  %v21686_v18 = vld [vmem:[#allocation16 + $0x220] sm:$0xff]   ;;  %v21717_v39 = vld [vmem:[#allocation16 + $0xa8] sm:$0xff]   ;;  %v21723_v61 = vld [vmem:[#allocation16 + $0xd8] sm:$0xff]  }
 0x6e1   : > { %v23646_v28 = vadd.f32 %v9081_v58, %v23612_v35  ;;  %18866 = vmatpush3.bf16.msra.mxu1 %v21677_v24  ;;  %v9126_v13 = vpop.f32.mrf.mxu0  ;;  %18933 = vmatprep.subr.bf16.mxu0 %v21680_v33  ;;  %v21720_v24 = vld [vmem:[#allocation16 + $0x460] sm:$0xff]   ;;  %v21726_v33 = vld [vmem:[#allocation16 + $0x418] sm:$0xff]   ;;  %v21727_v58 = vld [vmem:[#allocation16 + $0xd0] sm:$0xff]  }
 0x6e2   : > { %v9083_v53 = vpop.f32.mrf.mxu1  ;;  %18867 = vmatprep.subr.bf16.mxu1 %v21679_v9  ;;  %v23655_v35 = vadd.f32 %v9126_v13, %v23614_v37  ;;  %v21694_v37 = vld [vmem:[#allocation16 + $0x210] sm:$0xff]   ;;  %v21724_v9 = vld [vmem:[#allocation16 + $0x458] sm:$0xff]   ;;  %v21733_v13 = vld [vmem:[#allocation16 + $0x88] sm:$0xff]  }
 0x6e3   : > { %v23652_v5 = vadd.f32 %v9083_v53, %v23617_v38  ;;  %v21690_v38 = vld [vmem:[#allocation16 + $0x218] sm:$0xff]   ;;  %v21728_v29 = vld [vmem:[#allocation16 + $0x450] sm:$0xff]  }
 0x6e4   : > { %18934 = vmatpush3.bf16.msra.mxu0 %v21682_v3  ;;  %v21730_v53 = vld [vmem:[#allocation16 + $0x410] sm:$0xff]   ;;  %v21731_v3 = vld [vmem:[#allocation16 + $0xc8] sm:$0xff]  }
 0x6e5   : > { %18868 = vmatpush3.bf16.msra.mxu1 %v21681_v21  ;;  %18935 = vmatprep.subr.bf16.mxu0 %v21684_v0  ;;  %v21729_v21 = vld [vmem:[#allocation16 + $0x90] sm:$0xff]   ;;  %v21734_v0 = vld [vmem:[#allocation16 + $0x408] sm:$0xff]  }
 0x6e6   : > { %18869 = vmatprep.subr.bf16.mxu1 %v21683_v20  ;;  %v21732_v20 = vld [vmem:[#allocation16 + $0x448] sm:$0xff]  }
 0x6e8   : > { %18936 = vmatpush3.bf16.msra.mxu0 %v21686_v18  ;;  %v21736_v18 = vld [vmem:[#allocation16 + $0x440] sm:$0xff]  }
 0x6e9   : > { %18870 = vmatpush3.bf16.msra.mxu1 %v21685_v11  ;;  %18937 = vmatprep.subr.bf16.mxu0 %v21688_v41  ;;  %v21735_v11 = vld [vmem:[#allocation16 + $0xc0] sm:$0xff]  }
 0x6ea   : > { %18871 = vmatprep.subr.bf16.mxu1 %v21687_v19  ;;  %v23669_v19 = vld [vmem:[#allocation3] sm:$0x33]  ;;  %v21737_v41 = vld [vmem:[#allocation16 + $0x80] sm:$0xff]  }
 0x6ec   : > { %18938 = vmatpush3.bf16.msra.mxu0 %v21690_v38  ;;  %v21738_v38 = vld [vmem:[#allocation16 + $0x400] sm:$0xff]  }
 0x6ed   : > { %18872 = vmatpush3.bf16.msra.mxu1 %v21689_v43  ;;  %18939 = vmatprep.subr.bf16.mxu0 %v21692_v56  ;;  %v23671_v43 = vld [vmem:[#allocation3 + $0x40] sm:$0xcc]  ;;  %v18493_v56 = vcombine.high %v23669_v19, %v23669_v19 }
 0x6ee   : > { %18873 = vmatprep.subr.bf16.mxu1 %v21691_v52  ;;  %v21740_v52 = vld [vmem:[#allocation16 + $0x2f8] sm:$0xff]  }
 0x6f0   : > { %18940 = vmatpush3.bf16.msra.mxu0 %v21694_v37  ;;  %v18489_v37 = vcombine.high %v23671_v43, %v23660_v6 }
 0x6f1   : > { %18874 = vmatpush3.bf16.msra.mxu1 %v21693_v4  ;;  %18941 = vmatprep.subr.bf16.mxu0 %v21696_v46  ;;  %v21741_v4 = vld [vmem:[#allocation16 + $0x378] sm:$0xff]  }
 0x6f2   : > { %18875 = vmatprep.subr.bf16.mxu1 %v21695_v34  ;;  %v21742_v34 = vld [vmem:[#allocation16 + $0x2b8] sm:$0xff]  }
 0x6f3   : > { %v21744_v46 = vld [vmem:[#allocation16 + $0x338] sm:$0xff]  }
 0x6f4   : > { %18942 = vmatpush3.bf16.msra.mxu0 %v21698_v44  ;;  %v23679_v44 = vcombine.low %v23660_v6, %v23657_v25 }
 0x6f5   : > { %18876 = vmatpush3.bf16.msra.mxu1 %v21697_v32  ;;  %18943 = vmatprep.subr.bf16.mxu0 %v21700_v2  ;;  %v11739_v32 = vrot.slane %v18493_v56, 2 }
 0x6f6   : > { %18877 = vmatprep.subr.bf16.mxu1 %v21699_v30  ;;  %v21747_v30 = vld [vmem:[#allocation16 + $0x2f0] sm:$0xff]  }
 0x6f8   : > { %18944 = vmatpush3.bf16.msra.mxu0 %v21702_v40  ;;  %v21748_v40 = vld [vmem:[#allocation16 + $0x370] sm:$0xff]  }
 0x6f9   : > { %18878 = vmatpush3.bf16.msra.mxu1 %v21701_v54  ;;  %18973 = vmatprep.subr.bf16.mxu0 %v21705_v45  ;;  %v11738_v54 = vrot.slane %v18489_v37, 2  ;;  %v21749_v45 = vld [vmem:[#allocation16 + $0x2b0] sm:$0xff]   ;;  %v21779_v37 = vld [vmem:[#allocation16 + $0x578] sm:$0xff]  }
 0x6fa   : > { %18907 = vmatprep.subr.bf16.mxu1 %v21703_v16 }
 0x6fb   : > { %11229 = vmatmul.mubr.bf16.vlgmr.msra.gmra.mxu0 %v23477_v47  ;;  %v21718_v47 = vld [vmem:[#allocation16 + $0x428] sm:$0xff]  }
 0x6fc   : > { %10602 = vmatmul.mubr.bf16.vlgmr.msra.gmra.mxu1 %v23509_v1  ;;  %18974 = vmatpush3.bf16.msra.mxu0 %v21708_v15  ;;  %v21716_v1 = vld [vmem:[#allocation16 + $0x468] sm:$0xff]  }
 0x6fd   : > { %18908 = vmatpush3.bf16.msra.mxu1 %v21706_v23  ;;  %10902 = vmatprep.mubr.bf16.mxu1 %v23538_v42  ;;  %v21722_v42 = vld [vmem:[#allocation16 + $0x420] sm:$0xff]   ;;  %v11740_v23 = vsel %vm11734_vm2, %v11738_v54, %v11739_v32 }
 0x6fe   : > { %11664 = vmatprep.mubr.bf16.mxu0 %v23665_v49  ;;  %18909 = vmatprep.subr.bf16.mxu1 %v21711_v27  ;;  %v21750_v27 = vld [vmem:[#allocation16 + $0x330] sm:$0xff]  }
 0x6ff   : > { %18975 = vmatprep.subr.bf16.mxu0 %v21712_v60  ;;  %v21751_v60 = vld [vmem:[#allocation16 + $0x2e8] sm:$0xff]  }
 0x700   : > { %18976 = vmatpush3.bf16.msra.mxu0 %v21714_v51 }
 0x701   : > { %18910 = vmatpush3.bf16.msra.mxu1 %v21713_v59  ;;  %18977 = vmatprep.subr.bf16.mxu0 %v21716_v1  ;;  %v21752_v59 = vld [vmem:[#allocation16 + $0x368] sm:$0xff]  }
 0x702   : > { %18911 = vmatprep.subr.bf16.mxu1 %v21715_v63  ;;  %v21753_v63 = vld [vmem:[#allocation16 + $0x2a8] sm:$0xff]  }
 0x703   : > { %v21754_v1 = vld [vmem:[#allocation16 + $0x328] sm:$0xff]  }
 0x704   : > { %18978 = vmatpush3.bf16.msra.mxu0 %v21718_v47 }
 0x705   : > { %18912 = vmatpush3.bf16.msra.mxu1 %v21717_v39  ;;  %18979 = vmatprep.subr.bf16.mxu0 %v21720_v24  ;;  %v21755_v39 = vld [vmem:[#allocation16 + $0x2e0] sm:$0xff]  }
 0x706   : > { %18913 = vmatprep.subr.bf16.mxu1 %v21719_v57  ;;  %v21757_v57 = vld [vmem:[#allocation16 + $0x2a0] sm:$0xff]  }
 0x707   : > { %v21758_v24 = vld [vmem:[#allocation16 + $0x320] sm:$0xff]  }
 0x708   : > { %18980 = vmatpush3.bf16.msra.mxu0 %v21722_v42  ;;  %v21761_v42 = vld [vmem:[#allocation16 + $0x298] sm:$0xff]  }
 0x709   : > { %18914 = vmatpush3.bf16.msra.mxu1 %v21721_v26  ;;  %18981 = vmatprep.subr.bf16.mxu0 %v21724_v9  ;;  %v21759_v26 = vld [vmem:[#allocation16 + $0x2d8] sm:$0xff]   ;;  %v21763_v9 = vld [vmem:[#allocation16 + $0x2d0] sm:$0xff]  }
 0x70a   : > { %18915 = vmatprep.subr.bf16.mxu1 %v21723_v61  ;;  %v21762_v61 = vld [vmem:[#allocation16 + $0x318] sm:$0xff]  }
 0x70c   : > { %18982 = vmatpush3.bf16.msra.mxu0 %v21726_v33  ;;  %v21766_v33 = vld [vmem:[#allocation16 + $0x310] sm:$0xff]  }
 0x70d   : > { %18916 = vmatpush3.bf16.msra.mxu1 %v21725_v31  ;;  %18983 = vmatprep.subr.bf16.mxu0 %v21728_v29  ;;  %v21764_v31 = vld [vmem:[#allocation16 + $0x350] sm:$0xff]   ;;  %v21768_v29 = vld [vmem:[#allocation16 + $0x348] sm:$0xff]  }
 0x70e   : > { %18917 = vmatprep.subr.bf16.mxu1 %v21727_v58  ;;  %v21767_v58 = vld [vmem:[#allocation16 + $0x2c8] sm:$0xff]  }
 0x710   : > { %18984 = vmatpush3.bf16.msra.mxu0 %v21730_v53  ;;  %v21770_v53 = vld [vmem:[#allocation16 + $0x308] sm:$0xff]  }
 0x711   : > { %18918 = vmatpush3.bf16.msra.mxu1 %v21729_v21  ;;  %18985 = vmatprep.subr.bf16.mxu0 %v21732_v20  ;;  %v21769_v21 = vld [vmem:[#allocation16 + $0x288] sm:$0xff]   ;;  %v21772_v20 = vld [vmem:[#allocation16 + $0x340] sm:$0xff]  }
 0x712   : > { %18919 = vmatprep.subr.bf16.mxu1 %v21731_v3  ;;  %v21771_v3 = vld [vmem:[#allocation16 + $0x2c0] sm:$0xff]  }
 0x714   : > { %18986 = vmatpush3.bf16.msra.mxu0 %v21734_v0  ;;  %v18492_v0 = vcombine.low %v23669_v19, %v23669_v19 }
 0x715   : > { %18920 = vmatpush3.bf16.msra.mxu1 %v21733_v13  ;;  %18987 = vmatprep.subr.bf16.mxu0 %v21736_v18  ;;  %v23697_v13 = vld [vmem:[#allocation3 + $0x48] sm:$0x33]  ;;  %v23701_v18 = vld [vmem:[#allocation3 + $0x28] sm:$0xcc] }
 0x716   : > { %18921 = vmatprep.subr.bf16.mxu1 %v21735_v11  ;;  %v21773_v11 = vld [vmem:[#allocation16 + $0x280] sm:$0xff]   ;;  %v18529_v56 = vcombine.high %v23701_v18, %v23657_v25  ;;  %v11736_v19 = vrot.slane %v18492_v0, 2  ;;  %v18528_v0 = vcombine.low %v23701_v18, %v23657_v25 }
 0x718   : > { %18988 = vmatpush3.bf16.msra.mxu0 %v21738_v38  ;;  %v21776_v38 = vld [vmem:[#allocation16 + $0x4f8] sm:$0xff]   ;;  %v12122_v25 = vrot.slane %v18528_v0, 2  ;;  %v23744_v0 = vld [vmem:[#allocation3 + $0x50] sm:$0x33] }
 0x719   : > { %18922 = vmatpush3.bf16.msra.mxu1 %v21737_v41  ;;  %19017 = vmatprep.subr.bf16.mxu0 %v21741_v4  ;;  %v21774_v41 = vld [vmem:[#allocation16 + $0x300] sm:$0xff]   ;;  %v18533_v4 = vcombine.high %v23697_v13, %v23697_v13 }
 0x71a   : > { %18951 = vmatprep.subr.bf16.mxu1 %v21740_v52  ;;  %v18488_v52 = vcombine.low %v23671_v43, %v23660_v6  ;;  %v23711_v43 = vld [vmem:[#allocation3 + $0x30] sm:$0xff] }
 0x71b   : > { %11665 = vmatmul.mubr.bf16.vlgmr.msra.gmra.mxu0 %v23679_v44  ;;  %v12126_v54 = vrot.slane %v18533_v4, 2  ;;  %v21814_v4 = vld [vmem:[#allocation16 + $0x3f8] sm:$0xff]  }
 0x71c   : > { %v9163_v2 = vpop.f32.mrf.mxu1  ;;  %10903 = vmatmul.mubr.bf16.vlgmr.msra.gmra.mxu1 %v23541_v36  ;;  %19018 = vmatpush3.bf16.msra.mxu0 %v21744_v46  ;;  %v23709_v46 = vld [vmem:[#allocation3 + $0x18] sm:$0xff]  ;;  %v11735_v32 = vrot.slane %v18488_v52, 2 }
 0x71d   : > { %v23683_v16 = vadd.f32 %v9163_v2, %v23635_v8  ;;  %18952 = vmatpush3.bf16.msra.mxu1 %v21742_v34  ;;  %11269 = vmatprep.mubr.bf16.mxu1 %v23544_v12  ;;  %v21780_v34 = vld [vmem:[#allocation16 + $0x4b8] sm:$0xff]   ;;  %v12125_v2 = vrot.slane %v18529_v56, 2  ;;  %v21813_v56 = vld [vmem:[#allocation16 + $0x500] sm:$0xff]  }
 0x71e   : > { %v9165_v15 = vpop.f32.mrf.mxu1  ;;  %11975 = vmatprep.mubr.bf16.mxu0 %v11740_v23  ;;  %18953 = vmatprep.subr.bf16.mxu1 %v21747_v30  ;;  %v21783_v30 = vld [vmem:[#allocation16 + $0x538] sm:$0xff]   ;;  %v23717_v23 = vcombine.high %v23711_v43, %v23709_v46 }
 0x71f   : > { %v23689_v36 = vadd.f32 %v9165_v15, %v23643_v14  ;;  %19019 = vmatprep.subr.bf16.mxu0 %v21748_v40  ;;  %v21756_v14 = vld [vmem:[#allocation16 + $0x360] sm:$0xff]   ;;  %v21786_v40 = vld [vmem:[#allocation16 + $0x4f0] sm:$0xff]  }
 0x720   : > { %v9167_v8 = vpop.f32.mrf.mxu1  ;;  %19020 = vmatpush3.bf16.msra.mxu0 %v21750_v27  ;;  %v21787_v15 = vld [vmem:[#allocation16 + $0x570] sm:$0xff]  }
 0x721   : > { %v23692_v51 = vadd.f32 %v9167_v8, %v23649_v7  ;;  %18954 = vmatpush3.bf16.msra.mxu1 %v21749_v45  ;;  %19021 = vmatprep.subr.bf16.mxu0 %v21752_v59  ;;  %v21760_v7 = vld [vmem:[#allocation16 + $0x358] sm:$0xff]   ;;  %v11737_v45 = vsel %vm11734_vm2, %v11735_v32, %v11736_v19  ;;  %v21788_v27 = vld [vmem:[#allocation16 + $0x4b0] sm:$0xff]   ;;  %v21790_v8 = vld [vmem:[#allocation16 + $0x4e8] sm:$0xff]   ;;  %v23735_v32 = vcombine.low %v23711_v43, %v23709_v46 }
 0x722   : > { %v9169_v12 = vpop.f32.mrf.mxu1  ;;  %18955 = vmatprep.subr.bf16.mxu1 %v21751_v60  ;;  %v12127_v60 = vsel %vm11734_vm2, %v12125_v2, %v12126_v54  ;;  %v21789_v59 = vld [vmem:[#allocation16 + $0x530] sm:$0xff]  }
 0x723   : > { %v23695_v47 = vadd.f32 %v9169_v12, %v23655_v35  ;;  %v21765_v35 = vld [vmem:[#allocation16 + $0x290] sm:$0xff]   ;;  %v21793_v12 = vld [vmem:[#allocation16 + $0x528] sm:$0xff]  }
 0x724   : > { %19022 = vmatpush3.bf16.msra.mxu0 %v21754_v1  ;;  %v21794_v1 = vld [vmem:[#allocation16 + $0x4e0] sm:$0xff]   ;;  %v21822_v54 = vld [vmem:[#allocation16 + $0x3f0] sm:$0xff]  }
 0x725   : > { %18956 = vmatpush3.bf16.msra.mxu1 %v21753_v63  ;;  %19023 = vmatprep.subr.bf16.mxu0 %v21756_v14  ;;  %v21792_v63 = vld [vmem:[#allocation16 + $0x4a8] sm:$0xff]   ;;  %v21796_v14 = vld [vmem:[#allocation16 + $0x4a0] sm:$0xff]  }
 0x726   : > { %18957 = vmatprep.subr.bf16.mxu1 %v21755_v39  ;;  %v21795_v39 = vld [vmem:[#allocation16 + $0x560] sm:$0xff]  }
 0x728   : > { %19024 = vmatpush3.bf16.msra.mxu0 %v21758_v24  ;;  %v21798_v24 = vld [vmem:[#allocation16 + $0x4d8] sm:$0xff]  }
 0x729   : > { %18958 = vmatpush3.bf16.msra.mxu1 %v21757_v57  ;;  %19025 = vmatprep.subr.bf16.mxu0 %v21760_v7  ;;  %v21797_v57 = vld [vmem:[#allocation16 + $0x520] sm:$0xff]   ;;  %v21800_v7 = vld [vmem:[#allocation16 + $0x498] sm:$0xff]  }
 0x72a   : > { %18959 = vmatprep.subr.bf16.mxu1 %v21759_v26  ;;  %v21799_v26 = vld [vmem:[#allocation16 + $0x558] sm:$0xff]  }
 0x72c   : > { %19026 = vmatpush3.bf16.msra.mxu0 %v21762_v61  ;;  %v21802_v61 = vld [vmem:[#allocation16 + $0x4d0] sm:$0xff]  }
 0x72d   : > { %18960 = vmatpush3.bf16.msra.mxu1 %v21761_v42  ;;  %19027 = vmatprep.subr.bf16.mxu0 %v21764_v31  ;;  %v21801_v42 = vld [vmem:[#allocation16 + $0x518] sm:$0xff]   ;;  %v21804_v31 = vld [vmem:[#allocation16 + $0x490] sm:$0xff]  }
 0x72e   : > { %18961 = vmatprep.subr.bf16.mxu1 %v21763_v9  ;;  %v21803_v9 = vld [vmem:[#allocation16 + $0x550] sm:$0xff]  }
 0x730   : > { %19028 = vmatpush3.bf16.msra.mxu0 %v21766_v33  ;;  %v21806_v33 = vld [vmem:[#allocation16 + $0x4c8] sm:$0xff]  }
 0x731   : > { %18962 = vmatpush3.bf16.msra.mxu1 %v21765_v35  ;;  %19029 = vmatprep.subr.bf16.mxu0 %v21768_v29  ;;  %v21805_v35 = vld [vmem:[#allocation16 + $0x510] sm:$0xff]   ;;  %v21808_v29 = vld [vmem:[#allocation16 + $0x488] sm:$0xff]  }
 0x732   : > { %18963 = vmatprep.subr.bf16.mxu1 %v21767_v58  ;;  %v21807_v58 = vld [vmem:[#allocation16 + $0x548] sm:$0xff]  }
 0x734   : > { %19030 = vmatpush3.bf16.msra.mxu0 %v21770_v53  ;;  %v21810_v53 = vld [vmem:[#allocation16 + $0x4c0] sm:$0xff]  }
 0x735   : > { %18964 = vmatpush3.bf16.msra.mxu1 %v21769_v21  ;;  %19031 = vmatprep.subr.bf16.mxu0 %v21772_v20  ;;  %v21809_v21 = vld [vmem:[#allocation16 + $0x508] sm:$0xff]   ;;  %v21811_v20 = vld [vmem:[#allocation16 + $0x540] sm:$0xff]  }
 0x736   : > { %18965 = vmatprep.subr.bf16.mxu1 %v21771_v3  ;;  %v23721_v3 = vld [vmem:[#allocation3 + $0x18] sm:$0x33] }
 0x737   : > { %v18495_v52 = vcombine.high %v23721_v3, %v23721_v3 }
 0x738   : > { %19032 = vmatpush3.bf16.msra.mxu0 %v21774_v41  ;;  %v23727_v41 = vld [vmem:[#allocation3 + $0x38] sm:$0xcc] }
 0x739   : > { %18966 = vmatpush3.bf16.msra.mxu1 %v21773_v11  ;;  %19061 = vmatprep.subr.bf16.mxu0 %v21779_v37  ;;  %v18532_v11 = vcombine.low %v23697_v13, %v23697_v13  ;;  %v21817_v37 = vld [vmem:[#allocation16 + $0x778] sm:$0xff]   ;;  %v18491_v19 = vcombine.high %v23727_v41, %v23711_v43 }
 0x73a   : > { %18995 = vmatprep.subr.bf16.mxu1 %v21776_v38  ;;  %v21812_v38 = vld [vmem:[#allocation16 + $0x480] sm:$0xff]   ;;  %v21818_v13 = vld [vmem:[#allocation16 + $0x3b8] sm:$0xff]  }
 0x73b   : > { %11976 = vmatmul.mubr.bf16.vlgmr.msra.gmra.mxu0 %v11737_v45  ;;  %v12123_v18 = vrot.slane %v18532_v11, 2  ;;  %v11744_v2 = vrot.slane %v18491_v19, 2  ;;  %v21847_v11 = vld [vmem:[#allocation16 + $0x740] sm:$0xff]   ;;  %v18535_v19 = vcombine.high %v23744_v0, %v23744_v0 }
 0x73c   : > { %11270 = vmatmul.mubr.bf16.vlgmr.msra.gmra.mxu1 %v23547_v10  ;;  %19062 = vmatpush3.bf16.msra.mxu0 %v21783_v30  ;;  %v21791_v10 = vld [vmem:[#allocation16 + $0x568] sm:$0xff]   ;;  %v21821_v30 = vld [vmem:[#allocation16 + $0x738] sm:$0xff]  }
 0x73d   : > { %18996 = vmatpush3.bf16.msra.mxu1 %v21780_v34  ;;  %11705 = vmatprep.mubr.bf16.mxu1 %v23717_v23  ;;  %v11745_v34 = vrot.slane %v18495_v52, 2  ;;  %v23748_v52 = vld [vmem:[#allocation3 + $0x30] sm:$0xcc] }
 0x73e   : > { %12362 = vmatprep.mubr.bf16.mxu0 %v12127_v60  ;;  %18997 = vmatprep.subr.bf16.mxu1 %v21786_v40  ;;  %v10059_v40 = vpop.f32.mrf.mxu0 }
 0x73f   : > { %19063 = vmatprep.subr.bf16.mxu0 %v21787_v15  ;;  %v12124_v15 = vsel %vm11734_vm2, %v12122_v25, %v12123_v18  ;;  %v21849_v25 = vld [vmem:[#allocation16 + $0x700] sm:$0xff]   ;;  %v21852_v18 = vld [vmem:[#allocation16 + $0x5f8] sm:$0xff]  }
 0x740   : > { %19064 = vmatpush3.bf16.msra.mxu0 %v21789_v59  ;;  %v11746_v59 = vsel %vm11734_vm2, %v11744_v2, %v11745_v34 }
 0x741   : > { %18998 = vmatpush3.bf16.msra.mxu1 %v21788_v27  ;;  %19065 = vmatprep.subr.bf16.mxu0 %v21791_v10  ;;  %v21823_v27 = vld [vmem:[#allocation16 + $0x770] sm:$0xff]  }
 0x742   : > { %18999 = vmatprep.subr.bf16.mxu1 %v21790_v8  ;;  %v21824_v8 = vld [vmem:[#allocation16 + $0x3b0] sm:$0xff]  }
 0x743   : > { %v21825_v10 = vld [vmem:[#allocation16 + $0x730] sm:$0xff]  }
 0x744   : > { %19066 = vmatpush3.bf16.msra.mxu0 %v21793_v12 }
 0x745   : > { %19000 = vmatpush3.bf16.msra.mxu1 %v21792_v63  ;;  %19067 = vmatprep.subr.bf16.mxu0 %v21795_v39  ;;  %v21826_v63 = vld [vmem:[#allocation16 + $0x3e8] sm:$0xff]  }
 0x746   : > { %19001 = vmatprep.subr.bf16.mxu1 %v21794_v1  ;;  %v21827_v1 = vld [vmem:[#allocation16 + $0x768] sm:$0xff]  }
 0x747   : > { %v21828_v39 = vld [vmem:[#allocation16 + $0x3a8] sm:$0xff]  }
 0x748   : > { %19068 = vmatpush3.bf16.msra.mxu0 %v21797_v57  ;;  %v21830_v57 = vld [vmem:[#allocation16 + $0x3e0] sm:$0xff]  }
 0x749   : > { %19002 = vmatpush3.bf16.msra.mxu1 %v21796_v14  ;;  %19069 = vmatprep.subr.bf16.mxu0 %v21799_v26  ;;  %v21829_v14 = vld [vmem:[#allocation16 + $0x728] sm:$0xff]   ;;  %v21832_v26 = vld [vmem:[#allocation16 + $0x3a0] sm:$0xff]  }
 0x74a   : > { %19003 = vmatprep.subr.bf16.mxu1 %v21798_v24  ;;  %v21831_v24 = vld [vmem:[#allocation16 + $0x760] sm:$0xff]  }
 0x74c   : > { %19070 = vmatpush3.bf16.msra.mxu0 %v21801_v42  ;;  %v21835_v42 = vld [vmem:[#allocation16 + $0x758] sm:$0xff]  }
 0x74d   : > { %19004 = vmatpush3.bf16.msra.mxu1 %v21800_v7  ;;  %19071 = vmatprep.subr.bf16.mxu0 %v21803_v9  ;;  %v21833_v7 = vld [vmem:[#allocation16 + $0x720] sm:$0xff]   ;;  %v21838_v9 = vld [vmem:[#allocation16 + $0x3d0] sm:$0xff]  }
 0x74e   : > { %19005 = vmatprep.subr.bf16.mxu1 %v21802_v61  ;;  %v21837_v61 = vld [vmem:[#allocation16 + $0x718] sm:$0xff]  }
 0x750   : > { %19072 = vmatpush3.bf16.msra.mxu0 %v21805_v35  ;;  %v21840_v35 = vld [vmem:[#allocation16 + $0x390] sm:$0xff]  }
 0x751   : > { %19006 = vmatpush3.bf16.msra.mxu1 %v21804_v31  ;;  %19073 = vmatprep.subr.bf16.mxu0 %v21807_v58  ;;  %v21839_v31 = vld [vmem:[#allocation16 + $0x750] sm:$0xff]   ;;  %v21842_v58 = vld [vmem:[#allocation16 + $0x3c8] sm:$0xff]  }
 0x752   : > { %19007 = vmatprep.subr.bf16.mxu1 %v21806_v33  ;;  %v21841_v33 = vld [vmem:[#allocation16 + $0x710] sm:$0xff]  }
 0x754   : > { %19074 = vmatpush3.bf16.msra.mxu0 %v21809_v21  ;;  %v21844_v21 = vld [vmem:[#allocation16 + $0x388] sm:$0xff]  }
 0x755   : > { %19008 = vmatpush3.bf16.msra.mxu1 %v21808_v29  ;;  %19075 = vmatprep.subr.bf16.mxu0 %v21811_v20  ;;  %v21843_v29 = vld [vmem:[#allocation16 + $0x748] sm:$0xff]   ;;  %v21846_v20 = vld [vmem:[#allocation16 + $0x3c0] sm:$0xff]  }
 0x756   : > { %19009 = vmatprep.subr.bf16.mxu1 %v21810_v53  ;;  %v21845_v53 = vld [vmem:[#allocation16 + $0x708] sm:$0xff]  }
 0x758   : > { %19076 = vmatpush3.bf16.msra.mxu0 %v21813_v56  ;;  %v21848_v56 = vld [vmem:[#allocation16 + $0x380] sm:$0xff]  }
 0x759   : > { %19010 = vmatpush3.bf16.msra.mxu1 %v21812_v38  ;;  %19105 = vmatprep.subr.bf16.mxu0 %v21817_v37  ;;  %v18494_v38 = vcombine.low %v23721_v3, %v23721_v3  ;;  %v18531_v37 = vcombine.high %v23748_v52, %v23709_v46  ;;  %v21853_v3 = vld [vmem:[#allocation16 + $0x678] sm:$0xff]  }
 0x75a   : > { %19039 = vmatprep.subr.bf16.mxu1 %v21814_v4  ;;  %v18490_v4 = vcombine.low %v23727_v41, %v23711_v43  ;;  %v21857_v41 = vld [vmem:[#allocation16 + $0x638] sm:$0xff]  }
 0x75b   : > { %12363 = vmatmul.mubr.bf16.vlgmr.msra.gmra.mxu0 %v12124_v15  ;;  %v12131_v2 = vrot.slane %v18531_v37, 2  ;;  %v21859_v15 = vld [vmem:[#allocation16 + $0x670] sm:$0xff]   ;;  %v18534_v37 = vcombine.low %v23744_v0, %v23744_v0  ;;  %v21891_v0 = vld [vmem:[#allocation16 + $0x838] sm:$0xff]  }
 0x75c   : > { %v10102_v45 = vpop.f32.mrf.mxu1  ;;  %11706 = vmatmul.mubr.bf16.vlgmr.msra.gmra.mxu1 %v23735_v32  ;;  %19106 = vmatpush3.bf16.msra.mxu0 %v21821_v30  ;;  %v11741_v34 = vrot.slane %v18490_v4, 2  ;;  %v21854_v30 = vld [vmem:[#allocation16 + $0x5b8] sm:$0xff]   ;;  %v18530_v4 = vcombine.low %v23748_v52, %v23709_v46 }
 0x75d   : > { %v10103_v60 = vadd.f32 %v10102_v45, %v10059_v40  ;;  %19040 = vmatpush3.bf16.msra.mxu1 %v21818_v13  ;;  %12016 = vmatprep.mubr.bf16.mxu1 %v11746_v59  ;;  %v11742_v13 = vrot.slane %v18494_v38, 2  ;;  %v21858_v45 = vld [vmem:[#allocation16 + $0x5f0] sm:$0xff]   ;;  %v21882_v38 = vld [vmem:[#allocation16 + $0x5c0] sm:$0xff]   ;;  %v21890_v46 = vld [vmem:[#allocation16 + $0x7b8] sm:$0xff]  }
 0x75e   : > { %12796 = vmatprep.mubr.bf16.mxu0 %v23665_v49  ;;  %19041 = vmatprep.subr.bf16.mxu1 %v21822_v54  ;;  %v21836_v49 = vld [vmem:[#allocation16 + $0x398] sm:$0xff]   ;;  %v12132_v54 = vrot.slane %v18535_v19, 2 }
 0x75f   : > { %v23741_v12 = vadd.f32 %v10103_v60, %v23632_v55  ;;  %19107 = vmatprep.subr.bf16.mxu0 %v21823_v27  ;;  %v21834_v55 = vld [vmem:[#allocation16 + $0x3d8] sm:$0xff]   ;;  %v11743_v40 = vsel %vm11734_vm2, %v11741_v34, %v11742_v13  ;;  %v23759_v60 = vld [vmem:[#allocation3 + $0x40] sm:$0xff] }
 0x760   : > { %19108 = vmatpush3.bf16.msra.mxu0 %v21825_v10  ;;  %v12133_v27 = vsel %vm11734_vm2, %v12131_v2, %v12132_v54  ;;  %v18605_v59 = vcombine.high %v23759_v60, %v23660_v6  ;;  %v21861_v10 = vld [vmem:[#allocation16 + $0x630] sm:$0xff]   ;;  %v21888_v34 = vld [vmem:[#allocation16 + $0x7f8] sm:$0xff]   ;;  %v12129_v2 = vrot.slane %v18534_v37, 2 }
 0x761   : > { %19042 = vmatpush3.bf16.msra.mxu1 %v21824_v8  ;;  %19109 = vmatprep.subr.bf16.mxu0 %v21827_v1  ;;  %v21860_v8 = vld [vmem:[#allocation16 + $0x5b0] sm:$0xff]   ;;  %v21863_v1 = vld [vmem:[#allocation16 + $0x668] sm:$0xff]   ;;  %v21889_v54 = vld [vmem:[#allocation16 + $0x878] sm:$0xff]  }
 0x762   : > { %19043 = vmatprep.subr.bf16.mxu1 %v21826_v63  ;;  %v21862_v63 = vld [vmem:[#allocation16 + $0x5e8] sm:$0xff]   ;;  %v21909_v37 = vld [vmem:[#allocation16 + $0x850] sm:$0xff]  }
 0x764   : > { %19110 = vmatpush3.bf16.msra.mxu0 %v21829_v14  ;;  %v21866_v14 = vld [vmem:[#allocation16 + $0x5e0] sm:$0xff]  }
 0x765   : > { %19044 = vmatpush3.bf16.msra.mxu1 %v21828_v39  ;;  %19111 = vmatprep.subr.bf16.mxu0 %v21831_v24  ;;  %v21864_v39 = vld [vmem:[#allocation16 + $0x5a8] sm:$0xff]   ;;  %v21868_v24 = vld [vmem:[#allocation16 + $0x5a0] sm:$0xff]  }
 0x766   : > { %19045 = vmatprep.subr.bf16.mxu1 %v21830_v57  ;;  %v21867_v57 = vld [vmem:[#allocation16 + $0x660] sm:$0xff]  }
 0x768   : > { %19112 = vmatpush3.bf16.msra.mxu0 %v21833_v7  ;;  %v21870_v7 = vld [vmem:[#allocation16 + $0x5d8] sm:$0xff]  }
 0x769   : > { %19046 = vmatpush3.bf16.msra.mxu1 %v21832_v26  ;;  %19113 = vmatprep.subr.bf16.mxu0 %v21835_v42  ;;  %v21869_v26 = vld [vmem:[#allocation16 + $0x620] sm:$0xff]   ;;  %v21872_v42 = vld [vmem:[#allocation16 + $0x598] sm:$0xff]  }
 0x76a   : > { %19047 = vmatprep.subr.bf16.mxu1 %v21834_v55  ;;  %v21871_v55 = vld [vmem:[#allocation16 + $0x658] sm:$0xff]  }
 0x76c   : > { %19114 = vmatpush3.bf16.msra.mxu0 %v21837_v61  ;;  %v21874_v61 = vld [vmem:[#allocation16 + $0x5d0] sm:$0xff]  }
 0x76d   : > { %19048 = vmatpush3.bf16.msra.mxu1 %v21836_v49  ;;  %19115 = vmatprep.subr.bf16.mxu0 %v21839_v31  ;;  %v21873_v49 = vld [vmem:[#allocation16 + $0x618] sm:$0xff]   ;;  %v23763_v31 = vpop.f32.mrf.mxu0 }
 0x76e   : > { %19049 = vmatprep.subr.bf16.mxu1 %v21838_v9  ;;  %v21875_v9 = vld [vmem:[#allocation16 + $0x650] sm:$0xff]  }
 0x770   : > { %19116 = vmatpush3.bf16.msra.mxu0 %v21841_v33  ;;  %v21877_v33 = vld [vmem:[#allocation16 + $0x610] sm:$0xff]  }
 0x771   : > { %19050 = vmatpush3.bf16.msra.mxu1 %v21840_v35  ;;  %19117 = vmatprep.subr.bf16.mxu0 %v21843_v29  ;;  %v21876_v35 = vld [vmem:[#allocation16 + $0x590] sm:$0xff]   ;;  %v21879_v29 = vld [vmem:[#allocation16 + $0x648] sm:$0xff]  }
 0x772   : > { %19051 = vmatprep.subr.bf16.mxu1 %v21842_v58  ;;  %v21878_v58 = vld [vmem:[#allocation16 + $0x5c8] sm:$0xff]  }
 0x774   : > { %19118 = vmatpush3.bf16.msra.mxu0 %v21845_v53  ;;  %v21880_v53 = vld [vmem:[#allocation16 + $0x588] sm:$0xff]  }
 0x775   : > { %19052 = vmatpush3.bf16.msra.mxu1 %v21844_v21  ;;  %19119 = vmatprep.subr.bf16.mxu0 %v21847_v11  ;;  %v23765_v21 = vpop.f32.mrf.mxu0  ;;  %v21881_v11 = vld [vmem:[#allocation16 + $0x608] sm:$0xff]  }
 0x776   : > { %19053 = vmatprep.subr.bf16.mxu1 %v21846_v20  ;;  %v23767_v20 = vpop.f32.mrf.mxu1 }
 0x777   : > { %v23773_v19 = vpop.f32.mrf.mxu0 }
 0x778   : > { %19120 = vmatpush3.bf16.msra.mxu0 %v21849_v25  ;;  %v21884_v25 = vld [vmem:[#allocation16 + $0x580] sm:$0xff]   ;;  %v23775_v13 = vpop.f32.mrf.mxu1 }
 0x779   : > { %19054 = vmatpush3.bf16.msra.mxu1 %v21848_v56  ;;  %19149 = vmatprep.subr.bf16.mxu0 %v21853_v3  ;;  %v21883_v56 = vld [vmem:[#allocation16 + $0x640] sm:$0xff]  }
 0x77a   : > { %19083 = vmatprep.subr.bf16.mxu1 %v21852_v18  ;;  %v10145_v18 = vpop.f32.mrf.mxu0  ;;  %v21885_v3 = vld [vmem:[#allocation16 + $0x600] sm:$0xff]  }
 0x77b   : > { %12797 = vmatmul.mubr.bf16.vlgmr.msra.gmra.mxu0 %v23679_v44  ;;  %v21865_v44 = vld [vmem:[#allocation16 + $0x628] sm:$0xff]  }
 0x77c   : > { %12017 = vmatmul.mubr.bf16.vlgmr.msra.gmra.mxu1 %v11743_v40  ;;  %19150 = vmatpush3.bf16.msra.mxu0 %v21857_v41  ;;  %v10147_v52 = vpop.f32.mrf.mxu0  ;;  %v23777_v41 = vpop.f32.mrf.mxu1  ;;  %v23779_v40 = vld [vmem:[#allocation3] sm:$0xff] }
 0x77d   : > { %19084 = vmatpush3.bf16.msra.mxu1 %v21854_v30  ;;  %12403 = vmatprep.mubr.bf16.mxu1 %v12133_v27  ;;  %v12128_v30 = vrot.slane %v18530_v4, 2  ;;  %v21892_v27 = vld [vmem:[#allocation16 + $0x7f0] sm:$0xff]  }
 0x77e   : > { %13084 = vmatprep.mubr.bf16.mxu0 %v18605_v59  ;;  %19085 = vmatprep.subr.bf16.mxu1 %v21858_v45  ;;  %v18604_v45 = vcombine.low %v23759_v60, %v23660_v6  ;;  %v21895_v6 = vld [vmem:[#allocation16 + $0x830] sm:$0xff]  }
 0x77f   : > { %19151 = vmatprep.subr.bf16.mxu0 %v21859_v15  ;;  %v12130_v15 = vsel %vm11734_vm2, %v12128_v30, %v12129_v2  ;;  %v21908_v4 = vld [vmem:[#allocation16 + $0x7d0] sm:$0xff]   ;;  %v21915_v30 = vld [vmem:[#allocation16 + $0x808] sm:$0xff]   ;;  %v21916_v2 = vld [vmem:[#allocation16 + $0x7c0] sm:$0xff]  }
 0x780   : > { %19152 = vmatpush3.bf16.msra.mxu0 %v21861_v10 }
 0x781   : > { %19086 = vmatpush3.bf16.msra.mxu1 %v21860_v8  ;;  %19153 = vmatprep.subr.bf16.mxu0 %v21863_v1  ;;  %v21893_v8 = vld [vmem:[#allocation16 + $0x870] sm:$0xff]  }
 0x782   : > { %19087 = vmatprep.subr.bf16.mxu1 %v21862_v63  ;;  %v18641_v63 = vcombine.high %v23779_v40, %v23759_v60  ;;  %v21894_v1 = vld [vmem:[#allocation16 + $0x7b0] sm:$0xff]  }
 0x784   : > { %19154 = vmatpush3.bf16.msra.mxu0 %v21865_v44 }
 0x785   : > { %19088 = vmatpush3.bf16.msra.mxu1 %v21864_v39  ;;  %19155 = vmatprep.subr.bf16.mxu0 %v21867_v57  ;;  %v10149_v39 = vpop.f32.mrf.mxu0 }
 0x786   : > { %19089 = vmatprep.subr.bf16.mxu1 %v21866_v14  ;;  %v21896_v14 = vld [vmem:[#allocation16 + $0x7e8] sm:$0xff]  }
 0x788   : > { %19156 = vmatpush3.bf16.msra.mxu0 %v21869_v26  ;;  %v21897_v26 = vld [vmem:[#allocation16 + $0x868] sm:$0xff]  }
 0x789   : > { %19090 = vmatpush3.bf16.msra.mxu1 %v21868_v24  ;;  %19157 = vmatprep.subr.bf16.mxu0 %v21871_v55 }
 0x78a   : > { %19091 = vmatprep.subr.bf16.mxu1 %v21870_v7 }
 0x78c   : > { %19158 = vmatpush3.bf16.msra.mxu0 %v21873_v49  ;;  %v21898_v49 = vld [vmem:[#allocation16 + $0x7a8] sm:$0xff]  }
 0x78d   : > { %19092 = vmatpush3.bf16.msra.mxu1 %v21872_v42  ;;  %19159 = vmatprep.subr.bf16.mxu0 %v21875_v9  ;;  %v21899_v9 = vld [vmem:[#allocation16 + $0x828] sm:$0xff]  }
 0x78e   : > { %19093 = vmatprep.subr.bf16.mxu1 %v21874_v61 }
 0x790   : > { %19160 = vmatpush3.bf16.msra.mxu0 %v21877_v33 }
 0x791   : > { %19094 = vmatpush3.bf16.msra.mxu1 %v21876_v35  ;;  %19161 = vmatprep.subr.bf16.mxu0 %v21879_v29  ;;  %v21900_v35 = vld [vmem:[#allocation16 + $0x7e0] sm:$0xff]  }
 0x792   : > { %19095 = vmatprep.subr.bf16.mxu1 %v21878_v58  ;;  %v21901_v58 = vld [vmem:[#allocation16 + $0x860] sm:$0xff]  }
 0x794   : > { %19162 = vmatpush3.bf16.msra.mxu0 %v21881_v11  ;;  %v21904_v11 = vld [vmem:[#allocation16 + $0x7d8] sm:$0xff]  }
 0x795   : > { %19096 = vmatpush3.bf16.msra.mxu1 %v21880_v53  ;;  %19163 = vmatprep.subr.bf16.mxu0 %v21883_v56  ;;  %v21903_v53 = vld [vmem:[#allocation16 + $0x820] sm:$0xff]   ;;  %v21906_v56 = vld [vmem:[#allocation16 + $0x798] sm:$0xff]  }
 0x796   : > { %19097 = vmatprep.subr.bf16.mxu1 %v21882_v38  ;;  %v21905_v38 = vld [vmem:[#allocation16 + $0x858] sm:$0xff]  }
 0x798   : > { %19164 = vmatpush3.bf16.msra.mxu0 %v21885_v3  ;;  %v21913_v3 = vld [vmem:[#allocation16 + $0x848] sm:$0xff]  }
 0x799   : > { %19098 = vmatpush3.bf16.msra.mxu1 %v21884_v25  ;;  %19193 = vmatprep.subr.bf16.mxu0 %v21889_v54  ;;  %v21910_v25 = vld [vmem:[#allocation16 + $0x790] sm:$0xff]   ;;  %v21917_v54 = vld [vmem:[#allocation16 + $0x840] sm:$0xff]  }
 0x79a   : > { %19127 = vmatprep.subr.bf16.mxu1 %v21888_v34  ;;  %v21914_v34 = vld [vmem:[#allocation16 + $0x788] sm:$0xff]  }
 0x79b   : > { %13085 = vmatmul.mubr.bf16.vlgmr.msra.gmra.mxu0 %v18604_v45  ;;  %v21921_v45 = vld [vmem:[#allocation16 + $0xa78] sm:$0xff]  }
 0x79c   : > { %v10188_v59 = vpop.f32.mrf.mxu1  ;;  %12404 = vmatmul.mubr.bf16.vlgmr.msra.gmra.mxu1 %v12130_v15  ;;  %19194 = vmatpush3.bf16.msra.mxu0 %v21891_v0  ;;  %v21920_v0 = vld [vmem:[#allocation16 + $0x6f8] sm:$0xff]  }
 0x79d   : > { %v10189_v10 = vadd.f32 %v10188_v59, %v10145_v18  ;;  %19128 = vmatpush3.bf16.msra.mxu1 %v21890_v46  ;;  %12837 = vmatprep.mubr.bf16.mxu1 %v23717_v23  ;;  %v10151_v23 = vpop.f32.mrf.mxu0  ;;  %v21912_v18 = vld [vmem:[#allocation16 + $0x7c8] sm:$0xff]   ;;  %v21918_v46 = vld [vmem:[#allocation16 + $0x780] sm:$0xff]   ;;  %v21922_v15 = vld [vmem:[#allocation16 + $0x6b8] sm:$0xff]   ;;  %v18640_v59 = vcombine.low %v23779_v40, %v23759_v60 }
 0x79e   : > { %v10190_v44 = vpop.f32.mrf.mxu1  ;;  %13447 = vmatprep.mubr.bf16.mxu0 %v18641_v63  ;;  %19129 = vmatprep.subr.bf16.mxu1 %v21892_v27  ;;  %v21923_v27 = vld [vmem:[#allocation16 + $0xa38] sm:$0xff]  }
 0x79f   : > { %v23788_v57 = vadd.f32 %v10189_v10, %v23683_v16  ;;  %v10191_v24 = vadd.f32 %v10190_v44, %v10147_v52  ;;  %19195 = vmatprep.subr.bf16.mxu0 %v21893_v8  ;;  %v21919_v52 = vld [vmem:[#allocation16 + $0x800] sm:$0xff]   ;;  %v21926_v8 = vld [vmem:[#allocation16 + $0x6f0] sm:$0xff]   ;;  %v18607_v10 = vcombine.high %v23759_v60, %v23711_v43  ;;  %v23804_v63 = vld [vmem:[#allocation3 + $0x28] sm:$0xff] }
 0x7a0   : > { %v10192_v7 = vpop.f32.mrf.mxu1  ;;  %19196 = vmatpush3.bf16.msra.mxu0 %v21895_v6  ;;  %v21928_v44 = vld [vmem:[#allocation16 + $0x6b0] sm:$0xff]  }
 0x7a1   : > { %v23791_v55 = vadd.f32 %v10191_v24, %v23689_v36  ;;  %v10193_v42 = vadd.f32 %v10192_v7, %v10149_v39  ;;  %19130 = vmatpush3.bf16.msra.mxu1 %v21894_v1  ;;  %19197 = vmatprep.subr.bf16.mxu0 %v21897_v26  ;;  %v21902_v36 = vld [vmem:[#allocation16 + $0x7a0] sm:$0xff]   ;;  %v21927_v1 = vld [vmem:[#allocation16 + $0xa70] sm:$0xff]   ;;  %v18677_v39 = vcombine.high %v23804_v63, %v23779_v40  ;;  %v21931_v24 = vld [vmem:[#allocation16 + $0xa68] sm:$0xff]  }
 0x7a2   : > { %v10194_v61 = vpop.f32.mrf.mxu1  ;;  %19131 = vmatprep.subr.bf16.mxu1 %v21896_v14  ;;  %v21929_v6 = vld [vmem:[#allocation16 + $0xa30] sm:$0xff]   ;;  %v21930_v14 = vld [vmem:[#allocation16 + $0x6e8] sm:$0xff]   ;;  %v21934_v7 = vld [vmem:[#allocation16 + $0x6e0] sm:$0xff]  }
 0x7a3   : > { %v23794_v16 = vadd.f32 %v10193_v42, %v23692_v51  ;;  %v10195_v33 = vadd.f32 %v10194_v61, %v10151_v23  ;;  %v21907_v51 = vld [vmem:[#allocation16 + $0x818] sm:$0xff]   ;;  %v21933_v26 = vld [vmem:[#allocation16 + $0xa28] sm:$0xff]   ;;  %v21935_v42 = vld [vmem:[#allocation16 + $0xa60] sm:$0xff]  }
 0x7a4   : > { %19198 = vmatpush3.bf16.msra.mxu0 %v21899_v9  ;;  %v21937_v23 = vld [vmem:[#allocation16 + $0xa20] sm:$0xff]   ;;  %v21938_v61 = vld [vmem:[#allocation16 + $0x6d8] sm:$0xff]  }
 0x7a5   : > { %v23797_v29 = vadd.f32 %v10195_v33, %v23695_v47  ;;  %19132 = vmatpush3.bf16.msra.mxu1 %v21898_v49  ;;  %19199 = vmatprep.subr.bf16.mxu0 %v21901_v58  ;;  %v21911_v47 = vld [vmem:[#allocation16 + $0x810] sm:$0xff]   ;;  %v21936_v49 = vld [vmem:[#allocation16 + $0x6a0] sm:$0xff]   ;;  %v21939_v9 = vld [vmem:[#allocation16 + $0xa58] sm:$0xff]  }
 0x7a6   : > { %19133 = vmatprep.subr.bf16.mxu1 %v21900_v35  ;;  %v21940_v35 = vld [vmem:[#allocation16 + $0x698] sm:$0xff]   ;;  %v21942_v58 = vld [vmem:[#allocation16 + $0x6d0] sm:$0xff]  }
 0x7a7   : > { %v21941_v33 = vld [vmem:[#allocation16 + $0xa18] sm:$0xff]  }
 0x7a8   : > { %19200 = vmatpush3.bf16.msra.mxu0 %v21903_v53  ;;  %v21944_v53 = vld [vmem:[#allocation16 + $0x690] sm:$0xff]  }
 0x7a9   : > { %19134 = vmatpush3.bf16.msra.mxu1 %v21902_v36  ;;  %19201 = vmatprep.subr.bf16.mxu0 %v21905_v38  ;;  %v21943_v36 = vld [vmem:[#allocation16 + $0xa50] sm:$0xff]   ;;  %v21946_v38 = vld [vmem:[#allocation16 + $0x6c8] sm:$0xff]  }
 0x7aa   : > { %19135 = vmatprep.subr.bf16.mxu1 %v21904_v11  ;;  %v21945_v11 = vld [vmem:[#allocation16 + $0xa10] sm:$0xff]  }
 0x7ac   : > { %19202 = vmatpush3.bf16.msra.mxu0 %v21907_v51  ;;  %v21948_v51 = vld [vmem:[#allocation16 + $0x688] sm:$0xff]  }
 0x7ad   : > { %19136 = vmatpush3.bf16.msra.mxu1 %v21906_v56  ;;  %19203 = vmatprep.subr.bf16.mxu0 %v21909_v37  ;;  %v21947_v56 = vld [vmem:[#allocation16 + $0xa48] sm:$0xff]   ;;  %v21950_v37 = vld [vmem:[#allocation16 + $0x6c0] sm:$0xff]  }
 0x7ae   : > { %19137 = vmatprep.subr.bf16.mxu1 %v21908_v4  ;;  %v21949_v4 = vld [vmem:[#allocation16 + $0xa08] sm:$0xff]  }
 0x7b0   : > { %19204 = vmatpush3.bf16.msra.mxu0 %v21911_v47  ;;  %v21952_v47 = vld [vmem:[#allocation16 + $0x680] sm:$0xff]  }
 0x7b1   : > { %19138 = vmatpush3.bf16.msra.mxu1 %v21910_v25  ;;  %19205 = vmatprep.subr.bf16.mxu0 %v21913_v3  ;;  %v21951_v25 = vld [vmem:[#allocation16 + $0xa40] sm:$0xff]   ;;  %v21954_v3 = vld [vmem:[#allocation16 + $0x8f8] sm:$0xff]  }
 0x7b2   : > { %19139 = vmatprep.subr.bf16.mxu1 %v21912_v18  ;;  %v21953_v18 = vld [vmem:[#allocation16 + $0xa00] sm:$0xff]  }
 0x7b4   : > { %19206 = vmatpush3.bf16.msra.mxu0 %v21915_v30  ;;  %v21955_v30 = vld [vmem:[#allocation16 + $0x8b8] sm:$0xff]  }
 0x7b5   : > { %19140 = vmatpush3.bf16.msra.mxu1 %v21914_v34  ;;  %19207 = vmatprep.subr.bf16.mxu0 %v21917_v54  ;;  %v21974_v34 = vld [vmem:[#allocation16 + $0x978] sm:$0xff]   ;;  %v18606_v54 = vcombine.low %v23759_v60, %v23711_v43  ;;  %v21957_v43 = vld [vmem:[#allocation16 + $0x8b0] sm:$0xff]  }
 0x7b6   : > { %19141 = vmatprep.subr.bf16.mxu1 %v21916_v2  ;;  %v23808_v2 = vld [vmem:[#allocation3 + $0x18] sm:$0xff] }
 0x7b8   : > { %19208 = vmatpush3.bf16.msra.mxu0 %v21919_v52  ;;  %v18676_v52 = vcombine.low %v23804_v63, %v23779_v40  ;;  %v21982_v40 = vld [vmem:[#allocation16 + $0x968] sm:$0xff]   ;;  %v21960_v63 = vld [vmem:[#allocation16 + $0x8e0] sm:$0xff]  }
 0x7b9   : > { %19142 = vmatpush3.bf16.msra.mxu1 %v21918_v46  ;;  %19237 = vmatprep.subr.bf16.mxu0 %v21921_v45  ;;  %v21956_v46 = vld [vmem:[#allocation16 + $0x8f0] sm:$0xff]   ;;  %v23816_v45 = vcombine.high %v23759_v60, %v23759_v60 }
 0x7ba   : > { %19171 = vmatprep.subr.bf16.mxu1 %v21920_v0  ;;  %v21975_v0 = vld [vmem:[#allocation16 + $0x938] sm:$0xff]  }
 0x7bb   : > { %13448 = vmatmul.mubr.bf16.vlgmr.msra.gmra.mxu0 %v18640_v59  ;;  %v21958_v59 = vld [vmem:[#allocation16 + $0x8e8] sm:$0xff]  }
 0x7bc   : > { %12838 = vmatmul.mubr.bf16.vlgmr.msra.gmra.mxu1 %v23735_v32  ;;  %19238 = vmatpush3.bf16.msra.mxu0 %v21923_v27  ;;  %v21932_v32 = vld [vmem:[#allocation16 + $0x6a8] sm:$0xff]   ;;  %v21978_v27 = vld [vmem:[#allocation16 + $0x970] sm:$0xff]  }
 0x7bd   : > { %19172 = vmatpush3.bf16.msra.mxu1 %v21922_v15  ;;  %13125 = vmatprep.mubr.bf16.mxu1 %v18607_v10  ;;  %v18643_v15 = vcombine.high %v23808_v2, %v23759_v60  ;;  %v21959_v10 = vld [vmem:[#allocation16 + $0x8a8] sm:$0xff]  }
 0x7be   : > { %13883 = vmatprep.mubr.bf16.mxu0 %v18677_v39  ;;  %19173 = vmatprep.subr.bf16.mxu1 %v21926_v8  ;;  %v21979_v8 = vld [vmem:[#allocation16 + $0x930] sm:$0xff]   ;;  %v21986_v39 = vld [vmem:[#allocation16 + $0x960] sm:$0xff]  }
 0x7bf   : > { %19239 = vmatprep.subr.bf16.mxu0 %v21927_v1  ;;  %v21983_v1 = vld [vmem:[#allocation16 + $0x928] sm:$0xff]  }
 0x7c0   : > { %19240 = vmatpush3.bf16.msra.mxu0 %v21929_v6  ;;  %v21962_v6 = vld [vmem:[#allocation16 + $0x8d8] sm:$0xff]  }
 0x7c1   : > { %19174 = vmatpush3.bf16.msra.mxu1 %v21928_v44  ;;  %19241 = vmatprep.subr.bf16.mxu0 %v21931_v24  ;;  %v21961_v44 = vld [vmem:[#allocation16 + $0x8a0] sm:$0xff]   ;;  %v21990_v24 = vld [vmem:[#allocation16 + $0x958] sm:$0xff]  }
 0x7c2   : > { %19175 = vmatprep.subr.bf16.mxu1 %v21930_v14  ;;  %v21987_v14 = vld [vmem:[#allocation16 + $0x920] sm:$0xff]  }
 0x7c4   : > { %19242 = vmatpush3.bf16.msra.mxu0 %v21933_v26  ;;  %v21964_v26 = vld [vmem:[#allocation16 + $0x8d0] sm:$0xff]  }
 0x7c5   : > { %19176 = vmatpush3.bf16.msra.mxu1 %v21932_v32  ;;  %19243 = vmatprep.subr.bf16.mxu0 %v21935_v42  ;;  %v21963_v32 = vld [vmem:[#allocation16 + $0x898] sm:$0xff]   ;;  %v21994_v42 = vld [vmem:[#allocation16 + $0x950] sm:$0xff]  }
 0x7c6   : > { %19177 = vmatprep.subr.bf16.mxu1 %v21934_v7  ;;  %v21991_v7 = vld [vmem:[#allocation16 + $0x918] sm:$0xff]  }
 0x7c8   : > { %19244 = vmatpush3.bf16.msra.mxu0 %v21937_v23  ;;  %v21966_v23 = vld [vmem:[#allocation16 + $0x8c8] sm:$0xff]  }
 0x7c9   : > { %19178 = vmatpush3.bf16.msra.mxu1 %v21936_v49  ;;  %19245 = vmatprep.subr.bf16.mxu0 %v21939_v9  ;;  %v21965_v49 = vld [vmem:[#allocation16 + $0x890] sm:$0xff]   ;;  %v21998_v9 = vld [vmem:[#allocation16 + $0x948] sm:$0xff]  }
 0x7ca   : > { %19179 = vmatprep.subr.bf16.mxu1 %v21938_v61  ;;  %v21995_v61 = vld [vmem:[#allocation16 + $0x910] sm:$0xff]  }
 0x7cc   : > { %19246 = vmatpush3.bf16.msra.mxu0 %v21941_v33  ;;  %v21968_v33 = vld [vmem:[#allocation16 + $0x8c0] sm:$0xff]  }
 0x7cd   : > { %19180 = vmatpush3.bf16.msra.mxu1 %v21940_v35  ;;  %19247 = vmatprep.subr.bf16.mxu0 %v21943_v36  ;;  %v21967_v35 = vld [vmem:[#allocation16 + $0x888] sm:$0xff]   ;;  %v22002_v36 = vld [vmem:[#allocation16 + $0x940] sm:$0xff]  }
 0x7ce   : > { %19181 = vmatprep.subr.bf16.mxu1 %v21942_v58  ;;  %v21999_v58 = vld [vmem:[#allocation16 + $0x908] sm:$0xff]  }
 0x7d0   : > { %19248 = vmatpush3.bf16.msra.mxu0 %v21945_v11  ;;  %v21970_v11 = vld [vmem:[#allocation16 + $0xaf8] sm:$0xff]  }
 0x7d1   : > { %19182 = vmatpush3.bf16.msra.mxu1 %v21944_v53  ;;  %19249 = vmatprep.subr.bf16.mxu0 %v21947_v56  ;;  %v21969_v53 = vld [vmem:[#allocation16 + $0x880] sm:$0xff]   ;;  %v22018_v56 = vld [vmem:[#allocation16 + $0xb78] sm:$0xff]  }
 0x7d2   : > { %19183 = vmatprep.subr.bf16.mxu1 %v21946_v38  ;;  %v22003_v38 = vld [vmem:[#allocation16 + $0x900] sm:$0xff]  }
 0x7d4   : > { %19250 = vmatpush3.bf16.msra.mxu0 %v21949_v4  ;;  %v18642_v4 = vcombine.low %v23808_v2, %v23759_v60 }
 0x7d5   : > { %19184 = vmatpush3.bf16.msra.mxu1 %v21948_v51  ;;  %19251 = vmatprep.subr.bf16.mxu0 %v21951_v25  ;;  %v21971_v51 = vld [vmem:[#allocation16 + $0xab8] sm:$0xff]   ;;  %v21976_v25 = vld [vmem:[#allocation16 + $0xaf0] sm:$0xff]  }
 0x7d6   : > { %19185 = vmatprep.subr.bf16.mxu1 %v21950_v37  ;;  %v23823_v37 = vld [vmem:[#allocation3 + $0x30] sm:$0xff] }
 0x7d8   : > { %19252 = vmatpush3.bf16.msra.mxu0 %v21953_v18  ;;  %v18679_v18 = vcombine.high %v23823_v37, %v23808_v2 }
 0x7d9   : > { %19186 = vmatpush3.bf16.msra.mxu1 %v21952_v47  ;;  %19281 = vmatprep.subr.bf16.mxu0 %v21974_v34  ;;  %v23827_v47 = vcombine.low %v23759_v60, %v23759_v60  ;;  %v22022_v34 = vld [vmem:[#allocation16 + $0xb70] sm:$0xff]   ;;  %v22026_v60 = vld [vmem:[#allocation16 + $0xb68] sm:$0xff]  }
 0x7da   : > { %19215 = vmatprep.subr.bf16.mxu1 %v21954_v3  ;;  %v22019_v3 = vld [vmem:[#allocation16 + $0xb38] sm:$0xff]  }
 0x7db   : > { %13884 = vmatmul.mubr.bf16.vlgmr.msra.gmra.mxu0 %v18676_v52  ;;  %v21981_v52 = vld [vmem:[#allocation16 + $0xaa8] sm:$0xff]  }
 0x7dc   : > { %13126 = vmatmul.mubr.bf16.vlgmr.msra.gmra.mxu1 %v18606_v54  ;;  %19282 = vmatpush3.bf16.msra.mxu0 %v21975_v0  ;;  %v21980_v54 = vld [vmem:[#allocation16 + $0xae8] sm:$0xff]   ;;  %v21984_v0 = vld [vmem:[#allocation16 + $0xae0] sm:$0xff]  }
 0x7dd   : > { %19216 = vmatpush3.bf16.msra.mxu1 %v21955_v30  ;;  %13488 = vmatprep.mubr.bf16.mxu1 %v18643_v15  ;;  %v21977_v30 = vld [vmem:[#allocation16 + $0xab0] sm:$0xff]   ;;  %v22027_v15 = vld [vmem:[#allocation16 + $0xb28] sm:$0xff]  }
 0x7de   : > { %19217 = vmatprep.subr.bf16.mxu1 %v21956_v46  ;;  %14177 = vmatprep.mubr.bf16.mxu0 %v23816_v45  ;;  %v22023_v46 = vld [vmem:[#allocation16 + $0xb30] sm:$0xff]  }
 0x7df   : > { %19283 = vmatprep.subr.bf16.mxu0 %v21978_v27  ;;  %v22030_v27 = vld [vmem:[#allocation16 + $0xb60] sm:$0xff]  }
 0x7e0   : > { %19284 = vmatpush3.bf16.msra.mxu0 %v21979_v8  ;;  %v22031_v8 = vld [vmem:[#allocation16 + $0xb20] sm:$0xff]  }
 0x7e1   : > { %19218 = vmatpush3.bf16.msra.mxu1 %v21957_v43  ;;  %19285 = vmatprep.subr.bf16.mxu0 %v21982_v40  ;;  %v21985_v43 = vld [vmem:[#allocation16 + $0xaa0] sm:$0xff]   ;;  %v22034_v40 = vld [vmem:[#allocation16 + $0xb58] sm:$0xff]  }
 0x7e2   : > { %19219 = vmatprep.subr.bf16.mxu1 %v21958_v59  ;;  %v21988_v59 = vld [vmem:[#allocation16 + $0xad8] sm:$0xff]  }
 0x7e4   : > { %19286 = vmatpush3.bf16.msra.mxu0 %v21983_v1  ;;  %v22035_v1 = vld [vmem:[#allocation16 + $0xb18] sm:$0xff]  }
 0x7e5   : > { %19220 = vmatpush3.bf16.msra.mxu1 %v21959_v10  ;;  %19287 = vmatprep.subr.bf16.mxu0 %v21986_v39  ;;  %v21989_v10 = vld [vmem:[#allocation16 + $0xa98] sm:$0xff]   ;;  %v22038_v39 = vld [vmem:[#allocation16 + $0xb50] sm:$0xff]  }
 0x7e6   : > { %19221 = vmatprep.subr.bf16.mxu1 %v21960_v63  ;;  %v21992_v63 = vld [vmem:[#allocation16 + $0xad0] sm:$0xff]  }
 0x7e8   : > { %19288 = vmatpush3.bf16.msra.mxu0 %v21987_v14  ;;  %v21996_v14 = vld [vmem:[#allocation16 + $0xac8] sm:$0xff]  }
 0x7e9   : > { %19222 = vmatpush3.bf16.msra.mxu1 %v21961_v44  ;;  %19289 = vmatprep.subr.bf16.mxu0 %v21990_v24  ;;  %v21993_v44 = vld [vmem:[#allocation16 + $0xa90] sm:$0xff]  }
 0x7ea   : > { %19223 = vmatprep.subr.bf16.mxu1 %v21962_v6  ;;  %v23833_v6 = vpop.f32.mrf.mxu0  ;;  %v22039_v24 = vld [vmem:[#allocation16 + $0xb10] sm:$0xff]  }
 0x7ec   : > { %19290 = vmatpush3.bf16.msra.mxu0 %v21991_v7  ;;  %v23835_v7 = vpop.f32.mrf.mxu0 }
 0x7ed   : > { %19224 = vmatpush3.bf16.msra.mxu1 %v21963_v32  ;;  %19291 = vmatprep.subr.bf16.mxu0 %v21994_v42  ;;  %v22042_v32 = vld [vmem:[#allocation16 + $0xb48] sm:$0xff]   ;;  %v22000_v42 = vld [vmem:[#allocation16 + $0xac0] sm:$0xff]  }
 0x7ee   : > { %19225 = vmatprep.subr.bf16.mxu1 %v21964_v26  ;;  %v21997_v26 = vld [vmem:[#allocation16 + $0xa88] sm:$0xff]  }
 0x7f0   : > { %19292 = vmatpush3.bf16.msra.mxu0 %v21995_v61  ;;  %v22001_v61 = vld [vmem:[#allocation16 + $0xa80] sm:$0xff]  }
 0x7f1   : > { %19226 = vmatpush3.bf16.msra.mxu1 %v21965_v49  ;;  %19293 = vmatprep.subr.bf16.mxu0 %v21998_v9  ;;  %v22043_v49 = vld [vmem:[#allocation16 + $0xb08] sm:$0xff]   ;;  %v23837_v9 = vpop.f32.mrf.mxu0 }
 0x7f2   : > { %19227 = vmatprep.subr.bf16.mxu1 %v21966_v23  ;;  %v22046_v23 = vld [vmem:[#allocation16 + $0xb40] sm:$0xff]  }
 0x7f4   : > { %19294 = vmatpush3.bf16.msra.mxu0 %v21999_v58  ;;  %v22047_v58 = vld [vmem:[#allocation16 + $0xb00] sm:$0xff]  }
 0x7f5   : > { %19228 = vmatpush3.bf16.msra.mxu1 %v21967_v35  ;;  %19295 = vmatprep.subr.bf16.mxu0 %v22002_v36  ;;  %v23839_v35 = vpop.f32.mrf.mxu1  ;;  %v22005_v36 = vld [vmem:[#allocation16 + $0x9b8] sm:$0xff]  }
 0x7f6   : > { %19229 = vmatprep.subr.bf16.mxu1 %v21968_v33  ;;  %v22004_v33 = vld [vmem:[#allocation16 + $0x9f8] sm:$0xff]  }
 0x7f8   : > { %19296 = vmatpush3.bf16.msra.mxu0 %v22003_v38  ;;  %v23846_v38 = vpop.f32.mrf.mxu1 }
 0x7f9   : > { %19230 = vmatpush3.bf16.msra.mxu1 %v21969_v53  ;;  %19325 = vmatprep.subr.bf16.mxu0 %v22018_v56  ;;  %v14737_v53 = vld [vmem:[%s24542_s11 + $0xf8] sm:$0xff]  ;;  %v18678_v56 = vcombine.low %v23823_v37, %v23808_v2  ;;  %v22008_v37 = vld [vmem:[#allocation16 + $0x9e8] sm:$0xff]  }
 0x7fa   : > { %19259 = vmatprep.subr.bf16.mxu1 %v21970_v11  ;;  %v23844_v11 = vpop.f32.mrf.mxu0  ;;  %v23859_v2 = vpop.f32.mrf.mxu1 }
 0x7fb   : > { %14178 = vmatmul.mubr.bf16.vlgmr.msra.gmra.mxu0 %v23827_v47 }
 0x7fc   : > { %13489 = vmatmul.mubr.bf16.vlgmr.msra.gmra.mxu1 %v18642_v4  ;;  %19326 = vmatpush3.bf16.msra.mxu0 %v22019_v3  ;;  %v23850_v4 = vpop.f32.mrf.mxu0  ;;  %v14736_v3 = vld [vmem:[%s24542_s11 + $0xf0] sm:$0xff] }
 0x7fd   : > { %19260 = vmatpush3.bf16.msra.mxu1 %v21971_v51  ;;  %13924 = vmatprep.mubr.bf16.mxu1 %v18679_v18  ;;  %v22006_v51 = vld [vmem:[#allocation16 + $0x9f0] sm:$0xff]  }
 0x7fe   : > { %19261 = vmatprep.subr.bf16.mxu1 %v21976_v25  ;;  %14540 = vmatprep.mubr.bf16.mxu0 %v23816_v45  ;;  %v14721_v25 = vld [vmem:[%s24542_s11 + $0x78] sm:$0xff]  ;;  %v22007_v18 = vld [vmem:[#allocation16 + $0x9b0] sm:$0xff]  }
 0x7ff   : > { %19327 = vmatprep.subr.bf16.mxu0 %v22022_v34  ;;  %v14720_v34 = vld [vmem:[%s24542_s11 + $0x70] sm:$0xff] }
 0x800   : > { %19328 = vmatpush3.bf16.msra.mxu0 %v22023_v46  ;;  %v14719_v46 = vld [vmem:[%s24542_s11 + $0x68] sm:$0xff] }
 0x801   : > { %19262 = vmatpush3.bf16.msra.mxu1 %v21977_v30  ;;  %19329 = vmatprep.subr.bf16.mxu0 %v22026_v60  ;;  %v14735_v30 = vld [vmem:[%s24542_s11 + $0xe8] sm:$0xff] }
 0x802   : > { %19263 = vmatprep.subr.bf16.mxu1 %v21980_v54  ;;  %v23868_v54 = vpop.f32.mrf.mxu0  ;;  %v22009_v60 = vld [vmem:[#allocation16 + $0x9a8] sm:$0xff]  }
 0x804   : > { %19330 = vmatpush3.bf16.msra.mxu0 %v22027_v15  ;;  %v22010_v15 = vld [vmem:[#allocation16 + $0x9e0] sm:$0xff]  }
 0x805   : > { %19264 = vmatpush3.bf16.msra.mxu1 %v21981_v52  ;;  %19331 = vmatprep.subr.bf16.mxu0 %v22030_v27  ;;  %v14734_v52 = vld [vmem:[%s24542_s11 + $0xe0] sm:$0xff] }
 0x806   : > { %19265 = vmatprep.subr.bf16.mxu1 %v21984_v0  ;;  %v23876_v0 = vpop.f32.mrf.mxu1  ;;  %v14718_v27 = vld [vmem:[%s24542_s11 + $0x60] sm:$0xff] }
 0x808   : > { %19332 = vmatpush3.bf16.msra.mxu0 %v22031_v8  ;;  %v23886_v8 = vpop.f32.mrf.mxu1 }
 0x809   : > { %19266 = vmatpush3.bf16.msra.mxu1 %v21985_v43  ;;  %19333 = vmatprep.subr.bf16.mxu0 %v22034_v40  ;;  %v14733_v43 = vld [vmem:[%s24542_s11 + $0xd8] sm:$0xff] }
 0x80a   : > { %19267 = vmatprep.subr.bf16.mxu1 %v21988_v59  ;;  %v23884_v59 = vpop.f32.mrf.mxu0  ;;  %v14717_v40 = vld [vmem:[%s24542_s11 + $0x58] sm:$0xff] }
 0x80c   : > { %19334 = vmatpush3.bf16.msra.mxu0 %v22035_v1  ;;  %v22012_v1 = vld [vmem:[#allocation16 + $0x9d8] sm:$0xff]  }
 0x80d   : > { %19268 = vmatpush3.bf16.msra.mxu1 %v21989_v10  ;;  %19335 = vmatprep.subr.bf16.mxu0 %v22038_v39  ;;  %v22011_v10 = vld [vmem:[#allocation16 + $0x9a0] sm:$0xff]   ;;  %v14716_v39 = vld [vmem:[%s24542_s11 + $0x50] sm:$0xff] }
 0x80e   : > { %19269 = vmatprep.subr.bf16.mxu1 %v21992_v63  ;;  %v14732_v63 = vld [vmem:[%s24542_s11 + $0xd0] sm:$0xff] }
 0x810   : > { %19336 = vmatpush3.bf16.msra.mxu0 %v22039_v24  ;;  %v23902_v24 = vpop.f32.mrf.mxu1 }
 0x811   : > { %19270 = vmatpush3.bf16.msra.mxu1 %v21993_v44  ;;  %19337 = vmatprep.subr.bf16.mxu0 %v22042_v32  ;;  %v14731_v44 = vld [vmem:[%s24542_s11 + $0xc8] sm:$0xff] }
 0x812   : > { %19271 = vmatprep.subr.bf16.mxu1 %v21996_v14  ;;  %v23900_v14 = vpop.f32.mrf.mxu0  ;;  %v14715_v32 = vld [vmem:[%s24542_s11 + $0x48] sm:$0xff] }
 0x814   : > { %19338 = vmatpush3.bf16.msra.mxu0 %v22043_v49  ;;  %v23910_v49 = vpop.f32.mrf.mxu0 }
 0x815   : > { %19272 = vmatpush3.bf16.msra.mxu1 %v21997_v26  ;;  %19339 = vmatprep.subr.bf16.mxu0 %v22046_v23  ;;  %v22013_v26 = vld [vmem:[#allocation16 + $0x998] sm:$0xff]   ;;  %v22014_v23 = vld [vmem:[#allocation16 + $0x9d0] sm:$0xff]  }
 0x816   : > { %19273 = vmatprep.subr.bf16.mxu1 %v22000_v42  ;;  %v14730_v42 = vld [vmem:[%s24542_s11 + $0xc0] sm:$0xff] }
 0x818   : > { %19340 = vmatpush3.bf16.msra.mxu0 %v22047_v58  ;;  %v23918_v58 = vpop.f32.mrf.mxu1 }
 0x819   : > { %19274 = vmatpush3.bf16.msra.mxu1 %v22001_v61  ;;  %19369 = vmatprep.subr.mxu0 %v14737_v53  ;;  %v14714_v61 = vld [vmem:[%s24542_s11 + $0x40] sm:$0xff]  ;;  %v22015_v53 = vld [vmem:[#allocation16 + $0x990] sm:$0xff]  }
 0x81a   : > { %19303 = vmatprep.subr.bf16.mxu1 %v22004_v33  ;;  %v14729_v33 = vld [vmem:[%s24542_s11 + $0xb8] sm:$0xff] }
 0x81b   : > { %14541 = vmatmul.mubr.bf16.vlgmr.msra.gmra.mxu0 %v23827_v47 }
 0x81c   : > { %13925 = vmatmul.mubr.bf16.vlgmr.msra.gmra.mxu1 %v18678_v56  ;;  %19370 = vmatpush3.msra.mxu0 %v14721_v25  ;;  %v14728_v56 = vld [vmem:[%s24542_s11 + $0xb0] sm:$0xff]  ;;  %v22016_v25 = vld [vmem:[#allocation16 + $0x9c8] sm:$0xff]  }
 0x81d   : > { %19304 = vmatpush3.bf16.msra.mxu1 %v22005_v36  ;;  %14218 = vmatprep.mubr.bf16.mxu1 %v23816_v45  ;;  %v14713_v36 = vld [vmem:[%s24542_s11 + $0x38] sm:$0xff] }
 0x81e   : > { %19305 = vmatprep.subr.bf16.mxu1 %v22006_v51  ;;  %19371 = vmatprep.subr.mxu0 %v14736_v3  ;;  %v23926_v51 = vpop.f32.mrf.mxu0  ;;  %v14727_v3 = vld [vmem:[%s24542_s11 + $0xa8] sm:$0xff] }
 0x81f   : > { %19372 = vmatpush3.msra.mxu0 %v14720_v34  ;;  %v14711_v34 = vld [vmem:[%s24542_s11 + $0x28] sm:$0xff] }
 0x820   : > { %19373 = vmatprep.subr.mxu0 %v14735_v30  ;;  %v22017_v30 = vld [vmem:[#allocation16 + $0x988] sm:$0xff]  }
 0x821   : > { %19306 = vmatpush3.bf16.msra.mxu1 %v22007_v18  ;;  %19374 = vmatpush3.msra.mxu0 %v14719_v46  ;;  %v14712_v18 = vld [vmem:[%s24542_s11 + $0x30] sm:$0xff]  ;;  %v14726_v46 = vld [vmem:[%s24542_s11 + $0xa0] sm:$0xff] }
 0x822   : > { %19307 = vmatprep.subr.bf16.mxu1 %v22008_v37  ;;  %19375 = vmatprep.subr.mxu0 %v14734_v52  ;;  %v23934_v37 = vpop.f32.mrf.mxu1 }
 0x823   : > { %19376 = vmatpush3.msra.mxu0 %v14718_v27  ;;  %v14710_v27 = vld [vmem:[%s24542_s11 + $0x20] sm:$0xff] }
 0x824   : > { %19377 = vmatprep.subr.mxu0 %v14733_v43  ;;  %v23944_v52 = vpop.f32.mrf.mxu1  ;;  %v14725_v43 = vld [vmem:[%s24542_s11 + $0x98] sm:$0xff] }
 0x825   : > { %19308 = vmatpush3.bf16.msra.mxu1 %v22009_v60  ;;  %19378 = vmatpush3.msra.mxu0 %v14717_v40  ;;  %v23942_v60 = vpop.f32.mrf.mxu0  ;;  %v14709_v40 = vld [vmem:[%s24542_s11 + $0x18] sm:$0xff] }
 0x826   : > { %19309 = vmatprep.subr.bf16.mxu1 %v22010_v15  ;;  %19379 = vmatprep.subr.mxu0 %v14732_v63  ;;  %v22020_v15 = vld [vmem:[#allocation16 + $0x9c0] sm:$0xff]   ;;  %v14724_v63 = vld [vmem:[%s24542_s11 + $0x90] sm:$0xff] }
 0x827   : > { %19380 = vmatpush3.msra.mxu0 %v14716_v39  ;;  %v18968_v39 = vpop.f32.mrf.mxu1 }
 0x828   : > { %19381 = vmatprep.subr.mxu0 %v14731_v44  ;;  %v22024_v44 = vld [vmem:[#allocation16 + $0xbf8] sm:$0xff]  }
 0x829   : > { %19310 = vmatpush3.bf16.msra.mxu1 %v22011_v10  ;;  %19382 = vmatpush3.msra.mxu0 %v14715_v32  ;;  %v22021_v10 = vld [vmem:[#allocation16 + $0x980] sm:$0xff]   ;;  %v14708_v32 = vld [vmem:[%s24542_s11 + $0x10] sm:$0xff] }
 0x82a   : > { %19311 = vmatprep.subr.bf16.mxu1 %v22012_v1  ;;  %19383 = vmatprep.subr.mxu0 %v14730_v42  ;;  %v18949_v1 = vpop.f32.mrf.mxu0 }
 0x82b   : > { %19384 = vmatpush3.msra.mxu0 %v14714_v61  ;;  %v22025_v61 = vld [vmem:[#allocation16 + $0xbb8] sm:$0xff]  }
 0x82c   : > { %19385 = vmatprep.subr.mxu0 %v14729_v33  ;;  %v23964_v42 = vpop.f32.mrf.mxu0  ;;  %v14722_v33 = vld [vmem:[%s24542_s11 + $0x80] sm:$0xff] }
 0x82d   : > { %19312 = vmatpush3.bf16.msra.mxu1 %v22013_v26  ;;  %19386 = vmatpush3.msra.mxu0 %v14713_v36  ;;  %v14723_v26 = vld [vmem:[%s24542_s11 + $0x88] sm:$0xff]  ;;  %v18970_v36 = vpop.f32.mrf.mxu1 }
 0x82e   : > { %19313 = vmatprep.subr.bf16.mxu1 %v22014_v23  ;;  %19387 = vmatprep.subr.mxu0 %v14728_v56  ;;  %v14707_v23 = vld [vmem:[%s24542_s11 + $0x8] sm:$0xff]  ;;  %v14706_v56 = vld [vmem:[%s24542_s11] sm:$0xff] }
 0x82f   : > { %19388 = vmatpush3.msra.mxu0 %v14712_v18  ;;  %v22029_v18 = vld [vmem:[#allocation16 + $0xbb0] sm:$0xff]  }
 0x830   : > { %19389 = vmatprep.subr.mxu0 %v14727_v3  ;;  %v18971_v3 = vpop.f32.mrf.mxu1 }
 0x831   : > { %19314 = vmatpush3.bf16.msra.mxu1 %v22015_v53  ;;  %19390 = vmatpush3.msra.mxu0 %v14711_v34  ;;  %v22028_v53 = vld [vmem:[#allocation16 + $0xbf0] sm:$0xff]   ;;  %v22032_v34 = vld [vmem:[#allocation16 + $0xbe8] sm:$0xff]  }
 0x832   : > { %19315 = vmatprep.subr.bf16.mxu1 %v22016_v25  ;;  %19391 = vmatprep.subr.mxu0 %v14726_v46  ;;  %v23975_v25 = vpop.f32.mrf.mxu0  ;;  %v19011_v46 = vpop.f32.mrf.mxu1 }
 0x833   : > { %19392 = vmatpush3.msra.mxu0 %v14710_v27  ;;  %v22036_v27 = vld [vmem:[#allocation16 + $0xbe0] sm:$0xff]  }
 0x834   : > { %19393 = vmatprep.subr.mxu0 %v14725_v43 }
 0x835   : > { %19316 = vmatpush3.bf16.msra.mxu1 %v22017_v30  ;;  %19394 = vmatpush3.msra.mxu0 %v14709_v40  ;;  %v23979_v30 = vpop.f32.mrf.mxu0  ;;  %v19012_v40 = vpop.f32.mrf.mxu1 }
 0x836   : > { %19317 = vmatprep.subr.bf16.mxu1 %v22020_v15  ;;  %19395 = vmatprep.subr.mxu0 %v14724_v63  ;;  %v22033_v15 = vld [vmem:[#allocation16 + $0xba8] sm:$0xff]   ;;  %v18884_v63 = vadd.f32 %v23876_v0, %v23859_v2  ;;  %v22044_v2 = vld [vmem:[#allocation16 + $0xbd0] sm:$0xff]   ;;  %v18906_v0 = vadd.f32 %v23900_v14, %v23884_v59  ;;  %v18925_v59 = vadd.f32 %v23902_v24, %v23886_v8  ;;  %v22050_v8 = vld [vmem:[#allocation16 + $0xbc0] sm:$0xff]  }
 0x837   : > { %19396 = vmatpush3.msra.mxu0 %v14708_v32  ;;  %v23981_v43 = vpop.f32.mrf.mxu0  ;;  %v18862_v32 = vadd.f32 %v23844_v11, %v23837_v9  ;;  %v18950_v9 = vadd.f32 %v18949_v1, %v23942_v60  ;;  %v18969_v11 = vadd.f32 %v18968_v39, %v23944_v52 }
 0x838   : > { %19397 = vmatprep.subr.mxu0 %v14723_v26  ;;  %v18881_v26 = vadd.f32 %v23846_v38, %v23839_v35  ;;  %v18928_v35 = vadd.f32 %v23934_v37, %v23918_v58  ;;  %v22048_v58 = vld [vmem:[#allocation16 + $0xbc8] sm:$0xff]   ;;  %v10107_v37 = vadd.f32 %v23775_v13, %v23765_v21 }
 0x839   : > { %19318 = vmatpush3.bf16.msra.mxu1 %v22021_v10  ;;  %19398 = vmatpush3.msra.mxu0 %v14707_v23  ;;  %v22037_v10 = vld [vmem:[#allocation16 + $0xba0] sm:$0xff]   ;;  %v19014_v23 = vpop.f32.mrf.mxu1 }
 0x83a   : > { %19347 = vmatprep.subr.bf16.mxu1 %v22024_v44  ;;  %19399 = vmatprep.subr.mxu0 %v14722_v33  ;;  %v22040_v44 = vld [vmem:[#allocation16 + $0xbd8] sm:$0xff]   ;;  %v18859_v33 = vadd.f32 %v23835_v7, %v23833_v6  ;;  %v18903_v6 = vadd.f32 %v23868_v54, %v23850_v4  ;;  %v22045_v7 = vld [vmem:[#allocation16 + $0xb90] sm:$0xff]   ;;  %v22049_v54 = vld [vmem:[#allocation16 + $0xb88] sm:$0xff]   ;;  %v10201_v24 = vadd.f32 %v10107_v37, %v23646_v28 }
 0x83b   : > { %19400 = vmatpush3.msra.mxu0 %v14706_v56  ;;  %v19015_v38 = vpop.f32.mrf.mxu1  ;;  %v24015_v28 = vld [vmem:[#allocation19] sm:$0xf] }
 0x83c   : > { %14219 = vmatmul.mubr.bf16.vlgmr.msra.gmra.mxu1 %v23827_v47 }
 0x83d   : > { %19348 = vmatpush3.bf16.msra.mxu1 %v22025_v61  ;;  %14581 = vmatprep.mubr.bf16.mxu1 %v23816_v45  ;;  %v23985_v45 = vpop.f32.mrf.mxu0  ;;  %v22041_v61 = vld [vmem:[#allocation16 + $0xb98] sm:$0xff]   ;;  %v19055_v1 = vpop.f32.mrf.mxu1 }
 0x83e   : > { %19349 = vmatprep.subr.bf16.mxu1 %v22028_v53  ;;  %v10607_v53 = vadd.f32 %v18884_v63, %v18862_v32  ;;  %v22051_v32 = vld [vmem:[#allocation16 + $0xb80] sm:$0xff]  }
 0x83f   : > { %v19034_v56 = vpop.f32.mrf.mxu0 }
 0x840   : > { %v10867_v14 = vadd.f32 %v18906_v0, %v10607_v53 }
 0x841   : > { %19350 = vmatpush3.bf16.msra.mxu1 %v22029_v18  ;;  %v18972_v18 = vadd.f32 %v18971_v3, %v18970_v36  ;;  %v18947_v36 = vadd.f32 %v23926_v51, %v23910_v49  ;;  %v19036_v3 = vpop.f32.mrf.mxu0  ;;  %v19056_v51 = vpop.f32.mrf.mxu1 }
 0x842   : > { %19351 = vmatprep.subr.bf16.mxu1 %v22032_v34  ;;  %v10604_v34 = vadd.f32 %v18881_v26, %v18859_v33  ;;  %v10908_v39 = vadd.f32 %v18928_v35, %v10867_v14  ;;  %v19013_v26 = vadd.f32 %v19012_v40, %v19011_v46  ;;  %v14645_v46 = vrot.slane %v24015_v28, %v23233_v17 }
 0x843   : > { %v11275_v60 = vadd.f32 %v18972_v18, %v18950_v9  ;;  %v11272_v4 = vadd.f32 %v18969_v11, %v18947_v36  ;;  %v19037_v49 = vpop.f32.mrf.mxu0  ;;  %v19058_v13 = vpop.f32.mrf.mxu1  ;;  %v18991_v18 = vadd.f32 %v23975_v25, %v23964_v42  ;;  %v19016_v9 = vadd.f32 %v19015_v38, %v19014_v23 }
 0x844   : > { %v10864_v52 = vadd.f32 %v18903_v6, %v10604_v34  ;;  %v18994_v11 = vadd.f32 %v23981_v43, %v23979_v30  ;;  %v19035_v42 = vadd.f32 %v19034_v56, %v23985_v45  ;;  %v19057_v25 = vadd.f32 %v19056_v51, %v19055_v1 }
 0x845   : > { %19352 = vmatpush3.bf16.msra.mxu1 %v22033_v15  ;;  %v19077_v63 = vpop.f32.mrf.mxu0  ;;  %v19059_v0 = vpop.f32.mrf.mxu1  ;;  %v11708_v34 = vadd.f32 %v19013_v26, %v18991_v18  ;;  %v10105_v6 = vadd.f32 %v23767_v20, %v23763_v31  ;;  %v19038_v37 = vadd.f32 %v19037_v49, %v19036_v3  ;;  %v10109_v31 = vadd.f32 %v23777_v41, %v23773_v19 }
 0x846   : > { %19353 = vmatprep.subr.bf16.mxu1 %v22036_v27  ;;  %v10905_v15 = vadd.f32 %v18925_v59, %v10864_v52  ;;  %v11279_v27 = vadd.f32 %v11275_v60, %v10908_v39  ;;  %v11711_v36 = vadd.f32 %v19016_v9, %v18994_v11  ;;  %v19060_v30 = vadd.f32 %v19059_v0, %v19058_v13  ;;  %v14753_v11 = vld [vmem:[%s24542_s11 + $0x178] sm:$0xff] }
 0x847   : > { %v19078_v53 = vpop.f32.mrf.mxu0  ;;  %v11978_v59 = vadd.f32 %v19035_v42, %v11708_v34  ;;  %v10198_v45 = vadd.f32 %v10105_v6, %v23640_v62  ;;  %v10202_v19 = vadd.f32 %v10109_v31, %v23652_v5  ;;  %v14768_v42 = vld [vmem:[%s24542_s11 + $0x1f0] sm:$0xff]  ;;  %v14767_v6 = vld [vmem:[%s24542_s11 + $0x1e8] sm:$0xff]  ;;  %v14745_v31 = vld [vmem:[%s24542_s11 + $0x138] sm:$0xff] }
 0x848   : > { %v14606_v21 = vsub.f32 %v10201_v24, %v11279_v27  ;;  %v19079_v38 = vadd.f32 %v19078_v53, %v19077_v63 }
 0x849   : > { %19354 = vmatpush3.bf16.msra.mxu1 %v22037_v10  ;;  %v11278_v10 = vadd.f32 %v11272_v4, %v10905_v15  ;;  %v19080_v40 = vpop.f32.mrf.mxu0  ;;  %v12019_v52 = vadd.f32 %v19057_v25, %v11978_v59  ;;  %v11981_v4 = vadd.f32 %v19038_v37, %v11711_v36  ;;  %v14752_v25 = vld [vmem:[%s24542_s11 + $0x170] sm:$0xff]  ;;  %v14750_v36 = vld [vmem:[%s24542_s11 + $0x160] sm:$0xff]  ;;  %v14765_v59 = vld [vmem:[%s24542_s11 + $0x1d8] sm:$0xff] }
 0x84a   : > { %19355 = vmatprep.subr.bf16.mxu1 %v22040_v44  ;;  %v24008_v44 = vld [vmem:[#allocation18] sm:$0xf]  ;;  %v14763_v37 = vld [vmem:[%s24542_s11 + $0x1c8] sm:$0xff] }
 0x84b   : > { %v14615_v33 = vrot.slane %v24008_v44, %v23233_v17  ;;  %v14619_v56 = vrot.slane %v24008_v44, %v23241_v22  ;;  %v12022_v27 = vadd.f32 %v19060_v30, %v11981_v4  ;;  %v14762_v30 = vld [vmem:[%s24542_s11 + $0x1c0] sm:$0xff]  ;;  %v14743_v4 = vld [vmem:[%s24542_s11 + $0x128] sm:$0xff] }
 0x84d   : > { %19356 = vmatpush3.bf16.msra.mxu1 %v22041_v61  ;;  %v14602_v61 = vsub.f32 %v23741_v12, %v11278_v10 }
 0x84e   : > { %19357 = vmatprep.subr.bf16.mxu1 %v22044_v2  ;;  %v14636_v2 = vmul.f32 %v14615_v33, %v14606_v21 }
 0x84f   : > { %v14632_v35 = vmul.f32 %v14615_v33, %v14602_v61 }
 0x851   : > { %19358 = vmatpush3.bf16.msra.mxu1 %v22045_v7  ;;  %v24025_v7 = vadd.f32 %v14645_v46, %v14636_v2  ;;  %v24027_v60 = vadd.f32 %v14645_v46, %v14632_v35 }
 0x852   : > { %19359 = vmatprep.subr.bf16.mxu1 %v22048_v58  ;;  %v19081_v58 = vpop.f32.mrf.mxu0 }
 0x853   : > { %v24563_v20 = vmax.f32 %v24025_v7, 0.0  ;;  %v19082_v39 = vadd.f32 %v19081_v58, %v19080_v40  ;;  %v24565_v3 = vmax.f32 %v24027_v60, 0.0  ;;  %v14764_v58 = vld [vmem:[%s24542_s11 + $0x1d0] sm:$0xff] }
 0x855   : > { %19360 = vmatpush3.bf16.msra.mxu1 %v22049_v54  ;;  %v14678_v62 = vadd.f32 %v24563_v20, %v24565_v3 }
 0x856   : > { %19361 = vmatprep.subr.bf16.mxu1 %v22050_v8  ;;  %v14649_v8 = vrot.slane %v24015_v28, %v23241_v22 }
 0x857   : > { %v14679_v63 = vrot.slane %v14678_v62, 4 }
 0x859   : > { %19362 = vmatpush3.bf16.msra.mxu1 %v22051_v32  ;;  %v14680_v26 = vadd.f32 %v14679_v63, %v14678_v62  ;;  %v14740_v62 = vld [vmem:[%s24542_s11 + $0x110] sm:$0xff] }
 0x85b   : > { %v14681_v53 = vrot.slane %v14680_v26, 2 }
 0x85c   : > { %v19099_v12 = vpop.f32.mrf.mxu1  ;;  %14582 = vmatmul.mubr.bf16.vlgmr.msra.gmra.mxu1 %v23827_v47 }
 0x85d   : > { %v14682_v2 = vadd.f32 %v14681_v53, %v14680_v26 }
 0x85e   : > { %v19100_v23 = vpop.f32.mrf.mxu1 }
 0x85f   : > { %v19101_v14 = vadd.f32 %v19100_v23, %v19099_v12  ;;  %v14683_v9 = vrot.slane %v14682_v2, 1  ;;  %v14769_v12 = vld [vmem:[%s24542_s11 + $0x1f8] sm:$0xff]  ;;  %v14751_v23 = vld [vmem:[%s24542_s11 + $0x168] sm:$0xff] }
 0x860   : > { %v19102_v47 = vpop.f32.mrf.mxu1  ;;  %19404 = vmatprep.subr.mxu1 %v14769_v12 }
 0x861   : > { %v12406_v43 = vadd.f32 %v19101_v14, %v19079_v38  ;;  %v14684_v40 = vadd.f32 %v14683_v9, %v14682_v2  ;;  %19405 = vmatpush3.msra.mxu1 %v14753_v11  ;;  %v14766_v38 = vld [vmem:[%s24542_s11 + $0x1e0] sm:$0xff]  ;;  %v14749_v14 = vld [vmem:[%s24542_s11 + $0x158] sm:$0xff] }
 0x862   : > { %v19103_v1 = vpop.f32.mrf.mxu1  ;;  %19406 = vmatprep.subr.mxu1 %v14768_v42 }
 0x863   : > { %v12412_v54 = vadd.f32 %v12406_v43, %v12019_v52  ;;  %v19104_v15 = vadd.f32 %v19103_v1, %v19102_v47  ;;  %19407 = vmatpush3.msra.mxu1 %v14752_v25  ;;  %v14748_v47 = vld [vmem:[%s24542_s11 + $0x150] sm:$0xff]  ;;  %v14747_v52 = vld [vmem:[%s24542_s11 + $0x148] sm:$0xff]  ;;  %v14746_v43 = vld [vmem:[%s24542_s11 + $0x140] sm:$0xff] }
 0x864   : > { %19408 = vmatprep.subr.mxu1 %v14767_v6  ;;  %v14744_v1 = vld [vmem:[%s24542_s11 + $0x130] sm:$0xff] }
 0x865   : > { %v14603_v49 = vsub.f32 %v10198_v45, %v12412_v54  ;;  %v12409_v51 = vadd.f32 %v19104_v15, %v19082_v39  ;;  %19409 = vmatpush3.msra.mxu1 %v14751_v23  ;;  %v14761_v45 = vld [vmem:[%s24542_s11 + $0x1b8] sm:$0xff]  ;;  %v14759_v39 = vld [vmem:[%s24542_s11 + $0x1a8] sm:$0xff]  ;;  %v14758_v54 = vld [vmem:[%s24542_s11 + $0x1a0] sm:$0xff] }
 0x866   : > { %19410 = vmatprep.subr.mxu1 %v14766_v38  ;;  %v14742_v15 = vld [vmem:[%s24542_s11 + $0x120] sm:$0xff] }
 0x867   : > { %v14633_v41 = vmul.f32 %v14619_v56, %v14603_v49  ;;  %v12413_v24 = vadd.f32 %v12409_v51, %v12022_v27  ;;  %19411 = vmatpush3.msra.mxu1 %v14750_v36  ;;  %v14757_v27 = vld [vmem:[%s24542_s11 + $0x198] sm:$0xff]  ;;  %v14756_v51 = vld [vmem:[%s24542_s11 + $0x190] sm:$0xff] }
 0x868   : > { %19412 = vmatprep.subr.mxu1 %v14765_v59  ;;  %v14741_v49 = vld [vmem:[%s24542_s11 + $0x118] sm:$0xff] }
 0x869   : > { %v14607_v10 = vsub.f32 %v10202_v19, %v12413_v24  ;;  %v24043_v32 = vadd.f32 %v14649_v8, %v14633_v41  ;;  %19413 = vmatpush3.msra.mxu1 %v14749_v14  ;;  %v14755_v19 = vld [vmem:[%s24542_s11 + $0x188] sm:$0xff]  ;;  %v14738_v24 = vld [vmem:[%s24542_s11 + $0x100] sm:$0xff] }
 0x86a   : > { %19414 = vmatprep.subr.mxu1 %v14764_v58  ;;  %v14739_v41 = vld [vmem:[%s24542_s11 + $0x108] sm:$0xff] }
 0x86b   : > { %v14637_v21 = vmul.f32 %v14619_v56, %v14607_v10  ;;  %v14671_v61 = vmax.f32 %v24043_v32, 0.0  ;;  %19415 = vmatpush3.msra.mxu1 %v14748_v47  ;;  %v14760_v56 = vld [vmem:[%s24542_s11 + $0x1b0] sm:$0xff]  ;;  %v19121_v10 = vpop.f32.mrf.mxu0 }
 0x86c   : > { %19416 = vmatprep.subr.mxu1 %v14763_v37 }
 0x86d   : > { %v24045_v13 = vadd.f32 %v14649_v8, %v14637_v21  ;;  %19417 = vmatpush3.msra.mxu1 %v14747_v52  ;;  %v14754_v8 = vld [vmem:[%s24542_s11 + $0x180] sm:$0xff]  ;;  %v19122_v63 = vpop.f32.mrf.mxu0 }
 0x86e   : > { %19418 = vmatprep.subr.mxu1 %v14762_v30 }
 0x86f   : > { %v24564_v33 = vmax.f32 %v24045_v13, 0.0  ;;  %19419 = vmatpush3.msra.mxu1 %v14746_v43  ;;  %v19124_v21 = vpop.f32.mrf.mxu0 }
 0x870   : > { %19420 = vmatprep.subr.mxu1 %v14761_v45 }
 0x871   : > { %v14685_v5 = vadd.f32 %v24564_v33, %v14671_v61  ;;  %19421 = vmatpush3.msra.mxu1 %v14745_v31 }
 0x872   : > { %19422 = vmatprep.subr.mxu1 %v14760_v56 }
 0x873   : > { %v14686_v22 = vrot.slane %v14685_v5, 4  ;;  %19423 = vmatpush3.msra.mxu1 %v14744_v1 }
 0x874   : > { %19424 = vmatprep.subr.mxu1 %v14759_v39  ;;  %v19123_v39 = vadd.f32 %v19122_v63, %v19121_v10 }
 0x875   : > { %v14687_v18 = vadd.f32 %v14686_v22, %v14685_v5  ;;  %19425 = vmatpush3.msra.mxu1 %v14743_v4  ;;  %v19125_v5 = vpop.f32.mrf.mxu0 }
 0x876   : > { %19426 = vmatprep.subr.mxu1 %v14758_v54  ;;  %v19126_v31 = vadd.f32 %v19125_v5, %v19124_v21 }
 0x877   : > { %v14688_v0 = vrot.slane %v14687_v18, 2  ;;  %19427 = vmatpush3.msra.mxu1 %v14742_v15  ;;  %v19165_v22 = vpop.f32.mrf.mxu0 }
 0x878   : > { %19428 = vmatprep.subr.mxu1 %v14757_v27 }
 0x879   : > { %v14689_v34 = vadd.f32 %v14688_v0, %v14687_v18  ;;  %19429 = vmatpush3.msra.mxu1 %v14741_v49  ;;  %v19166_v2 = vpop.f32.mrf.mxu0 }
 0x87a   : > { %19430 = vmatprep.subr.mxu1 %v14756_v51 }
 0x87b   : > { %v14690_v35 = vrot.slane %v14689_v34, 1  ;;  %19431 = vmatpush3.msra.mxu1 %v14740_v62 }
 0x87c   : > { %19432 = vmatprep.subr.mxu1 %v14755_v19  ;;  %v19143_v26 = vpop.f32.mrf.mxu1 }
 0x87d   : > { %v14691_v46 = vadd.f32 %v14690_v35, %v14689_v34  ;;  %19433 = vmatpush3.msra.mxu1 %v14739_v41  ;;  %v19168_v34 = vpop.f32.mrf.mxu0 }
 0x87e   : > { %19434 = vmatprep.subr.mxu1 %v14754_v8  ;;  %v19144_v53 = vpop.f32.mrf.mxu1  ;;  %v19167_v8 = vadd.f32 %v19166_v2, %v19165_v22  ;;  %v14623_v2 = vrot.slane %v24008_v44, %v23287_v48 }
 0x87f   : > { %14834 = vmatprep.mubr.f32.mxu0 %v14691_v46  ;;  %19435 = vmatpush3.msra.mxu1 %v14738_v24  ;;  %v19169_v35 = vpop.f32.mrf.mxu0  ;;  %v19145_v56 = vadd.f32 %v19144_v53, %v19143_v26 }
 0x880   : > { %14835 = vmatmul.mubr.f32.vlgmr.msra.gmra.mxu0 %v14684_v40  ;;  %v19146_v18 = vpop.f32.mrf.mxu1  ;;  %v19170_v27 = vadd.f32 %v19169_v35, %v19168_v34 }
 0x881   : > { %v19209_v40 = vpop.f32.mrf.mxu0  ;;  %v12840_v49 = vadd.f32 %v19145_v56, %v19123_v39 }
 0x882   : > { %v19147_v0 = vpop.f32.mrf.mxu1 }
 0x883   : > { %v19210_v11 = vpop.f32.mrf.mxu0  ;;  %v19148_v43 = vadd.f32 %v19147_v0, %v19146_v18  ;;  %v13087_v21 = vadd.f32 %v19167_v8, %v12840_v49 }
 0x884   : > { %v19211_v24 = vadd.f32 %v19210_v11, %v19209_v40 }
 0x885   : > { %v19212_v25 = vpop.f32.mrf.mxu0  ;;  %v12843_v4 = vadd.f32 %v19148_v43, %v19126_v31 }
 0x887   : > { %v19213_v23 = vpop.f32.mrf.mxu0  ;;  %v13090_v33 = vadd.f32 %v19170_v27, %v12843_v4 }
 0x888   : > { %v19214_v51 = vadd.f32 %v19213_v23, %v19212_v25  ;;  %v14653_v23 = vrot.slane %v24015_v28, %v23287_v48 }
 0x89b   : > { %v19253_v36 = vpop.f32.mrf.mxu0 }
 0x89c   : > { %v19187_v9 = vpop.f32.mrf.mxu1 }
 0x89d   : > { %v19254_v14 = vpop.f32.mrf.mxu0 }
 0x89e   : > { %v19188_v46 = vpop.f32.mrf.mxu1 }
 0x89f   : > { %v19256_v47 = vpop.f32.mrf.mxu0  ;;  %v19189_v20 = vadd.f32 %v19188_v46, %v19187_v9  ;;  %v19255_v46 = vadd.f32 %v19254_v14, %v19253_v36 }
 0x8a0   : > { %v19190_v12 = vpop.f32.mrf.mxu1 }
 0x8a1   : > { %v19257_v52 = vpop.f32.mrf.mxu0  ;;  %v13128_v10 = vadd.f32 %v19189_v20, %v13087_v21 }
 0x8a2   : > { %v19191_v42 = vpop.f32.mrf.mxu1 }
 0x8a3   : > { %v19192_v62 = vadd.f32 %v19191_v42, %v19190_v12 }
 0x8a5   : > { %v13131_v26 = vadd.f32 %v19192_v62, %v13090_v33 }
 0x8bb   : > { %v19297_v45 = vpop.f32.mrf.mxu0 }
 0x8bc   : > { %v19231_v6 = vpop.f32.mrf.mxu1 }
 0x8bd   : > { %v19298_v15 = vpop.f32.mrf.mxu0 }
 0x8be   : > { %v19232_v38 = vpop.f32.mrf.mxu1  ;;  %v19299_v20 = vadd.f32 %v19298_v15, %v19297_v45 }
 0x8bf   : > { %v19233_v19 = vadd.f32 %v19232_v38, %v19231_v6  ;;  %v19300_v18 = vpop.f32.mrf.mxu0 }
 0x8c0   : > { %v19234_v59 = vpop.f32.mrf.mxu1 }
 0x8c1   : > { %v13491_v5 = vadd.f32 %v19233_v19, %v19211_v24  ;;  %v19301_v53 = vpop.f32.mrf.mxu0 }
 0x8c2   : > { %v19235_v58 = vpop.f32.mrf.mxu1 }
 0x8c3   : > { %v19236_v54 = vadd.f32 %v19235_v58, %v19234_v59  ;;  %v13497_v34 = vadd.f32 %v13491_v5, %v13128_v10  ;;  %v19258_v58 = vadd.f32 %v19257_v52, %v19256_v47  ;;  %v14627_v47 = vrot.slane %v24008_v44, %v23292_v50 }
 0x8c4   : > { %v14657_v44 = vrot.slane %v24015_v28, %v23292_v50 }
 0x8c5   : > { %v13494_v3 = vadd.f32 %v19236_v54, %v19214_v51  ;;  %v14604_v22 = vsub.f32 %v23788_v57, %v13497_v34  ;;  %v19302_v57 = vadd.f32 %v19301_v53, %v19300_v18 }
 0x8c7   : > { %v13498_v63 = vadd.f32 %v13494_v3, %v13131_v26  ;;  %v14634_v6 = vmul.f32 %v14623_v2, %v14604_v22 }
 0x8c9   : > { %v14608_v12 = vsub.f32 %v23794_v16, %v13498_v63  ;;  %v24157_v39 = vadd.f32 %v14653_v23, %v14634_v6 }
 0x8cb   : > { %v14638_v40 = vmul.f32 %v14623_v2, %v14608_v12  ;;  %v14672_v19 = vmax.f32 %v24157_v39, 0.0  ;;  %v15563_v39 = vld [vmem:[#allocation24 + $0x10] sm:$0xff] }
 0x8db   : > { %v19341_v35 = vpop.f32.mrf.mxu0 }
 0x8dc   : > { %v19275_v37 = vpop.f32.mrf.mxu1 }
 0x8dd   : > { %v19342_v9 = vpop.f32.mrf.mxu0 }
 0x8de   : > { %v19276_v30 = vpop.f32.mrf.mxu1  ;;  %v19343_v36 = vadd.f32 %v19342_v9, %v19341_v35 }
 0x8df   : > { %v19277_v25 = vadd.f32 %v19276_v30, %v19275_v37  ;;  %v19344_v38 = vpop.f32.mrf.mxu0  ;;  %v24155_v30 = vadd.f32 %v14653_v23, %v14638_v40  ;;  %v22619_v40 = vmov 0.0  }
 0x8e0   : > { %v19278_v1 = vpop.f32.mrf.mxu1  ;;  %19578 = vmatprep.subr.mxu0 %v22619_v40  ;;  %19589 = vmatprep.subr.mxu1 %v22619_v40 }
 0x8e1   : > { %v13927_v11 = vadd.f32 %v19277_v25, %v19255_v46  ;;  %v19345_v45 = vpop.f32.mrf.mxu0  ;;  %v14676_v48 = vmax.f32 %v24155_v30, 0.0  ;;  %19586 = vmatprep.mubr.msk.f32.mxu0 %vm22620_vm7, %v22619_v40 }
 0x8e2   : > { %v19279_v41 = vpop.f32.mrf.mxu1  ;;  %v19346_v49 = vadd.f32 %v19345_v45, %v19344_v38 }
 0x8e3   : > { %v19280_v3 = vadd.f32 %v19279_v41, %v19278_v1  ;;  %v14180_v31 = vadd.f32 %v19299_v20, %v13927_v11  ;;  %v14692_v18 = vadd.f32 %v14676_v48, %v14672_v19  ;;  %v14913_v11 = vld [vmem:[%s24548_s17 + $0x10] sm:$0xff]  ;;  %v14912_v20 = vld [vmem:[%s24548_s17 + $0x8] sm:$0xff] }
 0x8e5   : > { %v13930_v56 = vadd.f32 %v19280_v3, %v19258_v58  ;;  %v14693_v5 = vrot.slane %v14692_v18, 4  ;;  %v14911_v3 = vld [vmem:[%s24548_s17] sm:$0xff] }
 0x8e7   : > { %v14183_v27 = vadd.f32 %v19302_v57, %v13930_v56  ;;  %v14915_v56 = vld [vmem:[#allocation27] sm:$0x1] }
 0x8fc   : > { %v19319_v0 = vpop.f32.mrf.mxu1 }
 0x8fe   : > { %v19320_v59 = vpop.f32.mrf.mxu1 }
 0x8ff   : > { %v19321_v37 = vadd.f32 %v19320_v59, %v19319_v0 }
 0x900   : > { %v19322_v42 = vpop.f32.mrf.mxu1 }
 0x901   : > { %v14221_v4 = vadd.f32 %v19321_v37, %v14180_v31  ;;  %v14991_v31 = vld [vmem:[#allocation28] sm:$0x3] }
 0x902   : > { %v19323_v33 = vpop.f32.mrf.mxu1 }
 0x903   : > { %v19324_v54 = vadd.f32 %v19323_v33, %v19322_v42  ;;  %v14914_v33 = vld [vmem:[%s24548_s17 + $0x18] sm:$0xff] }
 0x904   : > { %19579 = vmatpush3.msra.mxu0 %v14914_v33  ;;  %v15308_v33 = vld [vmem:[%s24544_s13 + $0x170] sm:$0xff] }
 0x905   : > { %v14224_v41 = vadd.f32 %v19324_v54, %v14183_v27  ;;  %19580 = vmatprep.subr.mxu0 %v22619_v40  ;;  %v15092_v54 = vld [vmem:[#allocation21 + $0x78] sm:$0xff] }
 0x906   : > { %19581 = vmatpush3.msra.mxu0 %v14913_v11  ;;  %v15088_v27 = vld [vmem:[#allocation21 + $0x58] sm:$0xff]  ;;  %v15291_v11 = vld [vmem:[%s24544_s13 + $0xe8] sm:$0xff] }
 0x907   : > { %19582 = vmatprep.subr.mxu0 %v22619_v40 }
 0x908   : > { %19583 = vmatpush3.msra.mxu0 %v14912_v20  ;;  %v15323_v20 = vld [vmem:[%s24544_s13 + $0x1e8] sm:$0xff] }
 0x909   : > { %19584 = vmatprep.subr.mxu0 %v22619_v40 }
 0x90a   : > { %19585 = vmatpush3.msra.mxu0 %v14911_v3  ;;  %v15275_v3 = vld [vmem:[%s24544_s13 + $0x68] sm:$0xff] }
 0x90b   : > { %15191 = vmatprep.subr.mxu0 %v15092_v54  ;;  %v15271_v54 = vld [vmem:[%s24544_s13 + $0x48] sm:$0xff] }
 0x91c   : > { %v19363_v16 = vpop.f32.mrf.mxu1 }
 0x91e   : > { %v19364_v43 = vpop.f32.mrf.mxu1 }
 0x91f   : > { %v19365_v14 = vadd.f32 %v19364_v43, %v19363_v16 }
 0x920   : > { %v19366_v1 = vpop.f32.mrf.mxu1 }
 0x921   : > { %v14584_v15 = vadd.f32 %v19365_v14, %v19343_v36 }
 0x922   : > { %v19367_v52 = vpop.f32.mrf.mxu1 }
 0x923   : > { %v14590_v51 = vadd.f32 %v14584_v15, %v14221_v4  ;;  %v19368_v62 = vadd.f32 %v19367_v52, %v19366_v1  ;;  %v15090_v4 = vld [vmem:[#allocation21 + $0x68] sm:$0xff]  ;;  %v15089_v15 = vld [vmem:[#allocation21 + $0x60] sm:$0xff] }
 0x924   : > { %v15086_v52 = vld [vmem:[#allocation21 + $0x48] sm:$0xff] }
 0x925   : > { %v14605_v8 = vsub.f32 %v23791_v55, %v14590_v51  ;;  %v14587_v24 = vadd.f32 %v19368_v62, %v19346_v49  ;;  %v14694_v55 = vadd.f32 %v14693_v5, %v14692_v18  ;;  %v15085_v49 = vld [vmem:[#allocation21 + $0x40] sm:$0xff]  ;;  %v15087_v51 = vld [vmem:[#allocation21 + $0x50] sm:$0xff]  ;;  %v15082_v62 = vld [vmem:[#allocation21 + $0x28] sm:$0xff] }
 0x926   : > { %v15078_v18 = vld [vmem:[#allocation21 + $0x8] sm:$0xff]  ;;  %v15325_v5 = vld [vmem:[%s24544_s13 + $0x1f8] sm:$0xff] }
 0x927   : > { %v14635_v0 = vmul.f32 %v14627_v47, %v14605_v8  ;;  %v14591_v21 = vadd.f32 %v14587_v24, %v14224_v41  ;;  %v14695_v50 = vrot.slane %v14694_v55, 2  ;;  %v15084_v41 = vld [vmem:[#allocation21 + $0x38] sm:$0xff]  ;;  %v15081_v8 = vld [vmem:[#allocation21 + $0x20] sm:$0xff]  ;;  %v15083_v24 = vld [vmem:[#allocation21 + $0x30] sm:$0xff] }
 0x929   : > { %v14609_v26 = vsub.f32 %v23797_v29, %v14591_v21  ;;  %v24171_v10 = vadd.f32 %v14657_v44, %v14635_v0  ;;  %v14696_v29 = vadd.f32 %v14695_v50, %v14694_v55  ;;  %v15080_v0 = vld [vmem:[#allocation21 + $0x18] sm:$0xff]  ;;  %v15079_v21 = vld [vmem:[#allocation21 + $0x10] sm:$0xff] }
 0x92b   : > { %v14639_v63 = vmul.f32 %v14627_v47, %v14609_v26  ;;  %v14673_v59 = vmax.f32 %v24171_v10, 0.0  ;;  %v14697_v22 = vrot.slane %v14696_v29, 1  ;;  %v15091_v47 = vld [vmem:[#allocation21 + $0x70] sm:$0xff] }
 0x92c   : > { %v15293_v26 = vld [vmem:[%s24544_s13 + $0xf8] sm:$0xff] }
 0x92d   : > { %v24173_v53 = vadd.f32 %v14657_v44, %v14639_v63  ;;  %v14698_v46 = vadd.f32 %v14697_v22, %v14696_v29  ;;  %v15077_v44 = vld [vmem:[#allocation21] sm:$0xff] }
 0x92e   : > { %v14992_v63 = vld [vmem:[#allocation30] sm:$0x1] }
 0x92f   : > { %v14677_v34 = vmax.f32 %v24173_v53, 0.0 }
 0x931   : > { %v14699_v35 = vadd.f32 %v14677_v34, %v14673_v59 }
 0x933   : > { %v14700_v28 = vrot.slane %v14699_v35, 4 }
 0x935   : > { %v14701_v12 = vadd.f32 %v14700_v28, %v14699_v35 }
 0x937   : > { %v14702_v42 = vrot.slane %v14701_v12, 2 }
 0x939   : > { %v14703_v25 = vadd.f32 %v14702_v42, %v14701_v12  ;;  %v15277_v42 = vld [vmem:[%s24544_s13 + $0x78] sm:$0xff] }
 0x93b   : > { %v14704_v2 = vrot.slane %v14703_v25, 1 }
 0x93d   : > { %v14705_v9 = vadd.f32 %v14704_v2, %v14703_v25  ;;  %v15309_v25 = vld [vmem:[%s24544_s13 + $0x178] sm:$0xff]  ;;  %v15292_v2 = vld [vmem:[%s24544_s13 + $0xf0] sm:$0xff] }
 0x93f   : > { %14904 = vmatprep.mubr.f32.mxu1 %v14705_v9  ;;  %v15324_v9 = vld [vmem:[%s24544_s13 + $0x1f0] sm:$0xff] }
 0x940   : > { %14905 = vmatmul.mubr.f32.vlgmr.msra.gmra.mxu1 %v14698_v46  ;;  %v19401_v6 = vpop.f32.mrf.mxu0  ;;  %v15276_v46 = vld [vmem:[%s24544_s13 + $0x70] sm:$0xff] }
 0x941   : > { %19591 = vmatprep.mubr.msk.f32.mxu1 %vm22620_vm7, %v22619_v40  ;;  %19590 = vmatpush3.msk.msra.mxu1 %vm14997_vm9, %v14991_v31  ;;  %v15305_v31 = vld [vmem:[%s24544_s13 + $0x158] sm:$0xff] }
 0x942   : > { %v19402_v23 = vpop.f32.mrf.mxu0  ;;  %15120 = vmatprep.subr.mxu1 %v15090_v4  ;;  %v15319_v4 = vld [vmem:[%s24544_s13 + $0x1c8] sm:$0xff] }
 0x943   : > { %v19403_v58 = vadd.f32 %v19402_v23, %v19401_v6  ;;  %v15307_v6 = vld [vmem:[%s24544_s13 + $0x168] sm:$0xff]  ;;  %v15290_v23 = vld [vmem:[%s24544_s13 + $0xe0] sm:$0xff] }
 0xa00   : > { %v19436_v38 = vpop.f32.mrf.mxu1 }
 0xa02   : > { %v19437_v16 = vpop.f32.mrf.mxu1 }
 0xa03   : > { %v19438_v37 = vadd.f32 %v19437_v16, %v19436_v38  ;;  %v15322_v38 = vld [vmem:[%s24544_s13 + $0x1e0] sm:$0xff] }
 0xa04   : > { %v15274_v16 = vld [vmem:[%s24544_s13 + $0x60] sm:$0xff] }
 0xa05   : > { %v14907_v57 = vadd.f32 %v19438_v37, %v19403_v58  ;;  %v15306_v58 = vld [vmem:[%s24544_s13 + $0x160] sm:$0xff]  ;;  %v15289_v37 = vld [vmem:[%s24544_s13 + $0xd8] sm:$0xff] }
 0xa07   : > { %v14910_v43 = vmul.f32 0.00390625, %v14907_v57  ;;  %v15321_v57 = vld [vmem:[%s24544_s13 + $0x1d8] sm:$0xff] }
 0xa09   : > { %19587 = vmatmul.mubr.msk.f32.vlgmr.msra.gmra.mxu0 %vm14916_vm8, %v14910_v43  ;;  %v15273_v43 = vld [vmem:[%s24544_s13 + $0x58] sm:$0xff] }
 0xa0a   : > { %15231 = vmatprep.mubr.f32.mxu0 %v22619_v40  ;;  %15192 = vmatpush1.msra.mxu0 %v15091_v47  ;;  %v15286_v47 = vld [vmem:[%s24544_s13 + $0xc0] sm:$0xff] }
 0xa0b   : > { %15193 = vmatprep.subr.mxu0 %v15088_v27  ;;  %v15270_v27 = vld [vmem:[%s24544_s13 + $0x40] sm:$0xff] }
 0xa0c   : > { %15194 = vmatpush1.msra.mxu0 %v15087_v51  ;;  %v15285_v51 = vld [vmem:[%s24544_s13 + $0xb8] sm:$0xff] }
 0xa0d   : > { %15195 = vmatprep.subr.mxu0 %v15084_v41  ;;  %v15269_v41 = vld [vmem:[%s24544_s13 + $0x38] sm:$0xff] }
 0xa0e   : > { %15196 = vmatpush1.msra.mxu0 %v15083_v24  ;;  %v15284_v24 = vld [vmem:[%s24544_s13 + $0xb0] sm:$0xff] }
 0xa0f   : > { %15197 = vmatprep.subr.mxu0 %v15080_v0  ;;  %v15268_v0 = vld [vmem:[%s24544_s13 + $0x30] sm:$0xff] }
 0xa10   : > { %15198 = vmatpush1.msra.mxu0 %v15079_v21  ;;  %v15283_v21 = vld [vmem:[%s24544_s13 + $0xa8] sm:$0xff] }
 0xa11   : > { %19484 = vmatprep.subr.mxu0 %v15325_v5  ;;  %v15267_v5 = vld [vmem:[%s24544_s13 + $0x28] sm:$0xff] }
 0xac9   : > { %v14986_v36 = vpop.f32.mrf.mxu0 }
 0xaca   : > { %v14987_v14 = vadd.f32 %v14986_v36, %v14915_v56  ;;  %v15288_v56 = vld [vmem:[%s24544_s13 + $0xd0] sm:$0xff] }
 0xacb   : > { %v19588_v45 = vpop.f32.mrf.mxu0  ;;  %v15320_v36 = vld [vmem:[%s24544_s13 + $0x1d0] sm:$0xff] }
 0xacc   : > { %v14990_v1 = vmax.f32 %v14987_v14, 0.0  ;;  %v15272_v14 = vld [vmem:[%s24544_s13 + $0x50] sm:$0xff] }
 0xacd   : > { %v15304_v45 = vld [vmem:[%s24544_s13 + $0x150] sm:$0xff] }
 0xace   : > { %19592 = vmatmul.mubr.msk.f32.vlgmr.msra.gmra.mxu1 %vm14993_vm10, %v14990_v1  ;;  %v15287_v1 = vld [vmem:[%s24544_s13 + $0xc8] sm:$0xff] }
 0xacf   : > { %15160 = vmatprep.mubr.f32.mxu1 %v22619_v40  ;;  %15121 = vmatpush1.msra.mxu1 %v15089_v15  ;;  %v15303_v15 = vld [vmem:[%s24544_s13 + $0x148] sm:$0xff] }
 0xad0   : > { %15122 = vmatprep.subr.mxu1 %v15086_v52  ;;  %v15318_v52 = vld [vmem:[%s24544_s13 + $0x1c0] sm:$0xff] }
 0xad1   : > { %15123 = vmatpush1.msra.mxu1 %v15085_v49  ;;  %v15302_v49 = vld [vmem:[%s24544_s13 + $0x140] sm:$0xff] }
 0xad2   : > { %15124 = vmatprep.subr.mxu1 %v15082_v62  ;;  %v15317_v62 = vld [vmem:[%s24544_s13 + $0x1b8] sm:$0xff] }
 0xad3   : > { %15125 = vmatpush1.msra.mxu1 %v15081_v8  ;;  %v15301_v8 = vld [vmem:[%s24544_s13 + $0x138] sm:$0xff] }
 0xad4   : > { %15126 = vmatprep.subr.mxu1 %v15078_v18  ;;  %v15316_v18 = vld [vmem:[%s24544_s13 + $0x1b0] sm:$0xff] }
 0xad5   : > { %15127 = vmatpush1.msra.mxu1 %v15077_v44  ;;  %v15300_v44 = vld [vmem:[%s24544_s13 + $0x130] sm:$0xff] }
 0xad6   : > { %19446 = vmatprep.subr.mxu1 %v15293_v26  ;;  %v15315_v26 = vld [vmem:[%s24544_s13 + $0x1a8] sm:$0xff] }
 0xb8e   : > { %v15067_v55 = vpop.f32.mrf.mxu1 }
 0xb8f   : > { %v15068_v35 = vadd.f32 %v15067_v55, %v14992_v63  ;;  %v15299_v63 = vld [vmem:[%s24544_s13 + $0x128] sm:$0xff]  ;;  %v15282_v55 = vld [vmem:[%s24544_s13 + $0xa0] sm:$0xff] }
 0xb90   : > { %v19593_v50 = vpop.f32.mrf.mxu1 }
 0xb91   : > { %v18787_v28 = vmul.f32 -1.442695, %v15068_v35  ;;  %v15314_v35 = vld [vmem:[%s24544_s13 + $0x1a0] sm:$0xff] }
 0xb92   : > { %v15266_v50 = vld [vmem:[%s24544_s13 + $0x20] sm:$0xff] }
 0xb93   : > { %22052 = vpow2.f32 %v18787_v28  ;;  %v15298_v28 = vld [vmem:[%s24544_s13 + $0x120] sm:$0xff] }
 0xba0   : > { %v22053_v12 = vpop.eup %22052 }
 0xba1   : > { %v15074_v29 = vadd.f32 1.0, %v22053_v12  ;;  %v15281_v12 = vld [vmem:[%s24544_s13 + $0x98] sm:$0xff] }
 0xba3   : > { %22054 = vrcp.f32 %v15074_v29  ;;  %v15313_v29 = vld [vmem:[%s24544_s13 + $0x198] sm:$0xff] }
 0xbb0   : > { %v22055_v22 = vpop.eup %22054 }
 0xbb1   : > { %18788 = vmatmul.mubr.msk.f32.vlgmr.msra.gmra.mxu1 %vm14916_vm8, %v22055_v22  ;;  %18789 = vmatmul.mubr.msk.f32.vlgmr.msra.gmra.mxu0 %vm14916_vm8, %v22055_v22  ;;  %v15280_v22 = vld [vmem:[%s24544_s13 + $0x90] sm:$0xff] }
 0xbb2   : > { %19447 = vmatpush3.msra.mxu1 %v15277_v42  ;;  %19485 = vmatpush3.msra.mxu0 %v15309_v25  ;;  %v15265_v42 = vld [vmem:[%s24544_s13 + $0x18] sm:$0xff] }
 0xbb3   : > { %19448 = vmatprep.subr.mxu1 %v15292_v2  ;;  %19486 = vmatprep.subr.mxu0 %v15324_v9  ;;  %v15297_v25 = vld [vmem:[%s24544_s13 + $0x118] sm:$0xff]  ;;  %v15312_v2 = vld [vmem:[%s24544_s13 + $0x190] sm:$0xff] }
 0xbb4   : > { %19449 = vmatpush3.msra.mxu1 %v15276_v46  ;;  %19487 = vmatpush3.msra.mxu0 %v15308_v33  ;;  %v15264_v9 = vld [vmem:[%s24544_s13 + $0x10] sm:$0xff]  ;;  %v15279_v33 = vld [vmem:[%s24544_s13 + $0x88] sm:$0xff] }
 0xbb5   : > { %19450 = vmatprep.subr.mxu1 %v15291_v11  ;;  %19488 = vmatprep.subr.mxu0 %v15323_v20  ;;  %v15296_v46 = vld [vmem:[%s24544_s13 + $0x110] sm:$0xff]  ;;  %v15311_v11 = vld [vmem:[%s24544_s13 + $0x188] sm:$0xff] }
 0xbb6   : > { %19451 = vmatpush3.msra.mxu1 %v15275_v3  ;;  %19489 = vmatpush3.msra.mxu0 %v15307_v6  ;;  %v15263_v20 = vld [vmem:[%s24544_s13 + $0x8] sm:$0xff]  ;;  %v15278_v6 = vld [vmem:[%s24544_s13 + $0x80] sm:$0xff] }
 0xbb7   : > { %19452 = vmatprep.subr.mxu1 %v15290_v23  ;;  %19490 = vmatprep.subr.mxu0 %v15322_v38  ;;  %v15295_v3 = vld [vmem:[%s24544_s13 + $0x108] sm:$0xff]  ;;  %v15310_v23 = vld [vmem:[%s24544_s13 + $0x180] sm:$0xff] }
 0xbb8   : > { %19453 = vmatpush3.msra.mxu1 %v15274_v16  ;;  %19491 = vmatpush3.msra.mxu0 %v15306_v58  ;;  %v15262_v38 = vld [vmem:[%s24544_s13] sm:$0xff] }
 0xbb9   : > { %19454 = vmatprep.subr.mxu1 %v15289_v37  ;;  %19492 = vmatprep.subr.mxu0 %v15321_v57  ;;  %v15294_v16 = vld [vmem:[%s24544_s13 + $0x100] sm:$0xff] }
 0xbba   : > { %19455 = vmatpush3.msra.mxu1 %v15273_v43  ;;  %19493 = vmatpush3.msra.mxu0 %v15305_v31 }
 0xbbb   : > { %19456 = vmatprep.subr.mxu1 %v15288_v56  ;;  %19494 = vmatprep.subr.mxu0 %v15320_v36 }
 0xbbc   : > { %19457 = vmatpush3.msra.mxu1 %v15272_v14  ;;  %19495 = vmatpush3.msra.mxu0 %v15304_v45 }
 0xbbd   : > { %19458 = vmatprep.subr.mxu1 %v15287_v1  ;;  %19496 = vmatprep.subr.mxu0 %v15319_v4  ;;  %v24629_v4 = vmax.f32 %v24027_v60, 0.0  ;;  %v24631_v60 = vmax.f32 %v24025_v7, 0.0 }
 0xbbe   : > { %19459 = vmatpush3.msra.mxu1 %v15271_v54  ;;  %19497 = vmatpush3.msra.mxu0 %v15303_v15 }
 0xbbf   : > { %19460 = vmatprep.subr.mxu1 %v15286_v47  ;;  %19498 = vmatprep.subr.mxu0 %v15318_v52  ;;  %v24630_v47 = vmax.f32 %v24045_v13, 0.0 }
 0xbc0   : > { %19461 = vmatpush3.msra.mxu1 %v15270_v27  ;;  %19499 = vmatpush3.msra.mxu0 %v15302_v49 }
 0xbc1   : > { %19462 = vmatprep.subr.mxu1 %v15285_v51  ;;  %19500 = vmatprep.subr.mxu0 %v15317_v62 }
 0xbc2   : > { %19463 = vmatpush3.msra.mxu1 %v15269_v41  ;;  %19501 = vmatpush3.msra.mxu0 %v15301_v8 }
 0xbc3   : > { %19464 = vmatprep.subr.mxu1 %v15284_v24  ;;  %19502 = vmatprep.subr.mxu0 %v15316_v18  ;;  %v15477_v24 = vld [vmem:[#allocation24 + $0x8] sm:$0xff]  ;;  %v15564_v18 = vld [vmem:[#allocation24 + $0x18] sm:$0xff] }
 0xbc4   : > { %19465 = vmatpush3.msra.mxu1 %v15268_v0  ;;  %19503 = vmatpush3.msra.mxu0 %v15300_v44  ;;  %v15648_v0 = vld [vmem:[#allocation25 + $0x18] sm:$0xff]  ;;  %v15647_v44 = vld [vmem:[#allocation25 + $0x10] sm:$0xff] }
 0xbc5   : > { %19466 = vmatprep.subr.mxu1 %v15283_v21  ;;  %19504 = vmatprep.subr.mxu0 %v15315_v26  ;;  %v15561_v21 = vld [vmem:[#allocation25 + $0x8] sm:$0xff]  ;;  %v15560_v26 = vld [vmem:[#allocation25] sm:$0xff] }
 0xbc6   : > { %19467 = vmatpush3.msra.mxu1 %v15267_v5  ;;  %19505 = vmatpush3.msra.mxu0 %v15299_v63 }
 0xbc7   : > { %19468 = vmatprep.subr.mxu1 %v15282_v55  ;;  %19506 = vmatprep.subr.mxu0 %v15314_v35 }
 0xbc8   : > { %19469 = vmatpush3.msra.mxu1 %v15266_v50  ;;  %19507 = vmatpush3.msra.mxu0 %v15298_v28  ;;  %v15812_v50 = vld [vmem:[#allocation24 + $0x20] sm:$0xff]  ;;  %v15813_v28 = vld [vmem:[#allocation24 + $0x28] sm:$0xff] }
 0xbc9   : > { %19470 = vmatprep.subr.mxu1 %v15281_v12  ;;  %19508 = vmatprep.subr.mxu0 %v15313_v29  ;;  %v15982_v12 = vld [vmem:[#allocation24 + $0x30] sm:$0xff]  ;;  %v15983_v29 = vld [vmem:[#allocation24 + $0x38] sm:$0xff] }
 0xbca   : > { %19471 = vmatpush3.msra.mxu1 %v15265_v42  ;;  %19509 = vmatpush3.msra.mxu0 %v15297_v25  ;;  %v16152_v42 = vld [vmem:[#allocation24 + $0x40] sm:$0xff]  ;;  %v16153_v25 = vld [vmem:[#allocation24 + $0x48] sm:$0xff] }
 0xbcb   : > { %19472 = vmatprep.subr.mxu1 %v15280_v22  ;;  %19510 = vmatprep.subr.mxu0 %v15312_v2  ;;  %v16322_v22 = vld [vmem:[#allocation24 + $0x50] sm:$0xff]  ;;  %v16323_v2 = vld [vmem:[#allocation24 + $0x58] sm:$0xff] }
 0xbcc   : > { %19473 = vmatpush3.msra.mxu1 %v15264_v9  ;;  %19511 = vmatpush3.msra.mxu0 %v15296_v46  ;;  %v16492_v9 = vld [vmem:[#allocation24 + $0x60] sm:$0xff]  ;;  %v16493_v46 = vld [vmem:[#allocation24 + $0x68] sm:$0xff] }
 0xbcd   : > { %19474 = vmatprep.subr.mxu1 %v15279_v33  ;;  %19512 = vmatprep.subr.mxu0 %v15311_v11  ;;  %v15897_v33 = vld [vmem:[#allocation25 + $0x28] sm:$0xff]  ;;  %v15896_v11 = vld [vmem:[#allocation25 + $0x20] sm:$0xff] }
 0xbce   : > { %19475 = vmatpush3.msra.mxu1 %v15263_v20  ;;  %19513 = vmatpush3.msra.mxu0 %v15295_v3  ;;  %v16067_v20 = vld [vmem:[#allocation25 + $0x38] sm:$0xff] }
 0xbcf   : > { %19476 = vmatprep.subr.mxu1 %v15278_v6  ;;  %19514 = vmatprep.subr.mxu0 %v15310_v23 }
 0xbd0   : > { %19477 = vmatpush3.msra.mxu1 %v15262_v38  ;;  %19515 = vmatpush3.msra.mxu0 %v15294_v16  ;;  %v16066_v16 = vld [vmem:[#allocation25 + $0x30] sm:$0xff] }
 0xc71   : > { %v15162_v58 = vpop.f32.mrf.mxu1  ;;  %v15233_v37 = vpop.f32.mrf.mxu0 }
 0xc72   : > { %v15241_v31 = vrot.slane %v15162_v58, %v23233_v17  ;;  %v15249_v56 = vrot.slane %v15233_v37, %v23233_v17  ;;  %v16237_v37 = vld [vmem:[#allocation25 + $0x48] sm:$0xff] }
 0xc73   : > { %v15164_v57 = vpop.f32.mrf.mxu1  ;;  %v15235_v43 = vpop.f32.mrf.mxu0 }
 0xc74   : > { %v15245_v36 = vrot.slane %v15164_v57, %v23233_v17  ;;  %v15253_v14 = vrot.slane %v15235_v43, %v23233_v17  ;;  %v24411_v54 = vmul.f32 %v15241_v31, %v24629_v4  ;;  %v24415_v15 = vmul.f32 %v15249_v56, %v14672_v19  ;;  %v16236_v43 = vld [vmem:[#allocation25 + $0x40] sm:$0xff] }
 0xc75   : > { %v24433_v32 = vmul.f32 %v15241_v31, %v24631_v60  ;;  %v24437_v13 = vmul.f32 %v15249_v56, %v14676_v48  ;;  %v16407_v56 = vld [vmem:[#allocation25 + $0x58] sm:$0xff] }
 0xc76   : > { %v24403_v45 = vmul.f32 %v15245_v36, %v14671_v61  ;;  %v24407_v1 = vmul.f32 %v15253_v14, %v14673_v59  ;;  %v24419_v52 = vmul.f32 %v15245_v36, %v24630_v47  ;;  %v24423_v17 = vmul.f32 %v15253_v14, %v14677_v34  ;;  %v15476_v61 = vld [vmem:[#allocation24] sm:$0xff]  ;;  %v16577_v47 = vld [vmem:[#allocation25 + $0x68] sm:$0xff] }
 0xc77   : > { %v16406_v14 = vld [vmem:[#allocation25 + $0x50] sm:$0xff] }
 0xc78   : > { %15390 = vmatprep.mubr.f32.mxu1 %v24403_v45  ;;  %15465 = vmatprep.mubr.f32.mxu0 %v24407_v1 }
 0xc79   : > { %15391 = vmatmul.mubr.f32.vlgmr.msra.gmra.mxu1 %v24411_v54  ;;  %15466 = vmatmul.mubr.f32.vlgmr.msra.gmra.mxu0 %v24415_v15 }
 0xc7a   : > { %15395 = vmatprep.mubr.f32.mxu1 %v24419_v52  ;;  %15470 = vmatprep.mubr.f32.mxu0 %v24423_v17 }
 0xc7d   : > { %15396 = vmatmul.mubr.f32.gmra.mxu1 %v24433_v32  ;;  %15471 = vmatmul.mubr.f32.gmra.mxu0 %v24437_v13 }
 0xc7e   : > { %19598 = vmatprep.mubr.msk.f32.mxu1 %vm15478_vm11, %v15476_v61  ;;  %19605 = vmatprep.mubr.msk.f32.mxu0 %vm15478_vm11, %v15563_v39  ;;  %v16576_v61 = vld [vmem:[#allocation25 + $0x60] sm:$0xff] }
 0xd39   : > { %v19478_v19 = vpop.f32.mrf.mxu1  ;;  %v19516_v10 = vpop.f32.mrf.mxu0 }
 0xd3b   : > { %v19479_v7 = vpop.f32.mrf.mxu1  ;;  %v19517_v53 = vpop.f32.mrf.mxu0 }
 0xd3c   : > { %v19480_v27 = vadd.f32 %v19479_v7, %v19478_v19  ;;  %v19518_v49 = vadd.f32 %v19517_v53, %v19516_v10  ;;  %v16687_v10 = vld [vmem:[#allocation22 + $0x28] sm:$0xff]  ;;  %v16689_v7 = vld [vmem:[#allocation22 + $0x38] sm:$0xff]  ;;  %v16686_v53 = vld [vmem:[#allocation22 + $0x20] sm:$0xff] }
 0xd3d   : > { %v19481_v59 = vpop.f32.mrf.mxu1  ;;  %v19519_v34 = vpop.f32.mrf.mxu0 }
 0xd3e   : > { %v24445_v8 = vadd.f32 %v19518_v49, %v19480_v27  ;;  %v16684_v27 = vld [vmem:[#allocation22 + $0x10] sm:$0xff] }
 0xd3f   : > { %v19482_v30 = vpop.f32.mrf.mxu1  ;;  %v19520_v48 = vpop.f32.mrf.mxu0 }
 0xd40   : > { %v19483_v51 = vadd.f32 %v19482_v30, %v19481_v59  ;;  %v19521_v62 = vadd.f32 %v19520_v48, %v19519_v34  ;;  %v16688_v59 = vld [vmem:[#allocation22 + $0x30] sm:$0xff]  ;;  %v16683_v34 = vld [vmem:[#allocation22 + $0x8] sm:$0xff]  ;;  %v16685_v30 = vld [vmem:[#allocation22 + $0x18] sm:$0xff] }
 0xd41   : > { %v16682_v48 = vld [vmem:[#allocation22] sm:$0xff] }
 0xd42   : > { %v24443_v41 = vadd.f32 %v19521_v62, %v19483_v51 }
 0xd44   : > { %19594 = vmatprep.subr.mxu1 %v24443_v41  ;;  %19601 = vmatprep.subr.mxu0 %v24443_v41 }
 0xd45   : > { %19595 = vmatpush3.msra.mxu1 %v24443_v41  ;;  %19602 = vmatpush3.msra.mxu0 %v24443_v41 }
 0xd46   : > { %19596 = vmatprep.subr.mxu1 %v24445_v8  ;;  %19603 = vmatprep.subr.mxu0 %v24445_v8 }
 0xd47   : > { %19597 = vmatpush3.msra.mxu1 %v24445_v8  ;;  %19604 = vmatpush3.msra.mxu0 %v24445_v8 }
 0xd48   : > { %19599 = vmatmul.mubr.msk.f32.vlgmr.msra.gmra.mxu1 %vm15478_vm11, %v15477_v24  ;;  %19606 = vmatmul.mubr.msk.f32.vlgmr.msra.gmra.mxu0 %vm15478_vm11, %v15564_v18 }
 0xd49   : > { %19608 = vmatprep.subr.mxu1 %v15648_v0  ;;  %19615 = vmatprep.subr.mxu0 %v15561_v21 }
 0xd4a   : > { %19609 = vmatpush3.msra.mxu1 %v15648_v0  ;;  %19616 = vmatpush3.msra.mxu0 %v15561_v21 }
 0xd4b   : > { %19610 = vmatprep.subr.mxu1 %v15647_v44  ;;  %19617 = vmatprep.subr.mxu0 %v15560_v26 }
 0xd4c   : > { %19611 = vmatpush3.msra.mxu1 %v15647_v44  ;;  %19618 = vmatpush3.msra.mxu0 %v15560_v26 }
 0xd4d   : > { %19622 = vmatprep.subr.mxu1 %v24443_v41  ;;  %19629 = vmatprep.subr.mxu0 %v15897_v33 }
 0xe08   : > { %v19600_v5 = vpop.f32.mrf.mxu1  ;;  %v19607_v63 = vpop.f32.mrf.mxu0 }
 0xe0a   : > { %v15551_v55 = vpop.f32.mrf.mxu1  ;;  %v15637_v35 = vpop.f32.mrf.mxu0 }
 0xe0b   : > { %19612 = vmatprep.mubr.msk.f32.mxu1 %vm15478_vm11, %v15637_v35  ;;  %19619 = vmatprep.mubr.msk.f32.mxu0 %vm15478_vm11, %v15551_v55 }
 0xe0c   : > { %19613 = vmatmul.mubr.msk.f32.vlgmr.msra.gmra.mxu1 %vm15478_vm11, %v19607_v63  ;;  %19620 = vmatmul.mubr.msk.f32.vlgmr.msra.gmra.mxu0 %vm15478_vm11, %v19600_v5 }
 0xe0d   : > { %19623 = vmatpush3.msra.mxu1 %v24443_v41  ;;  %19626 = vmatprep.mubr.msk.f32.mxu1 %vm15478_vm11, %v15812_v50 }
 0xe0e   : > { %19624 = vmatprep.subr.mxu1 %v24445_v8  ;;  %19630 = vmatpush3.msra.mxu0 %v15897_v33 }
 0xe0f   : > { %19625 = vmatpush3.msra.mxu1 %v24445_v8  ;;  %19631 = vmatprep.subr.mxu0 %v15896_v11 }
 0xe10   : > { %19636 = vmatprep.subr.mxu1 %v24443_v41  ;;  %19627 = vmatmul.mubr.msk.f32.vlgmr.msra.gmra.mxu1 %vm15478_vm11, %v15813_v28 }
 0xe11   : > { %19637 = vmatpush3.msra.mxu1 %v24443_v41  ;;  %19640 = vmatprep.mubr.msk.f32.mxu1 %vm15478_vm11, %v15982_v12 }
 0xe12   : > { %19638 = vmatprep.subr.mxu1 %v24445_v8  ;;  %19632 = vmatpush3.msra.mxu0 %v15896_v11 }
 0xe13   : > { %19639 = vmatpush3.msra.mxu1 %v24445_v8  ;;  %19643 = vmatprep.subr.mxu0 %v16067_v20 }
 0xe14   : > { %19650 = vmatprep.subr.mxu1 %v24443_v41  ;;  %19641 = vmatmul.mubr.msk.f32.vlgmr.msra.gmra.mxu1 %vm15478_vm11, %v15983_v29 }
 0xe15   : > { %19651 = vmatpush3.msra.mxu1 %v24443_v41  ;;  %19654 = vmatprep.mubr.msk.f32.mxu1 %vm15478_vm11, %v16152_v42 }
 0xe16   : > { %19652 = vmatprep.subr.mxu1 %v24445_v8 }
 0xe17   : > { %19653 = vmatpush3.msra.mxu1 %v24445_v8 }
 0xe18   : > { %19664 = vmatprep.subr.mxu1 %v24443_v41  ;;  %19655 = vmatmul.mubr.msk.f32.vlgmr.msra.gmra.mxu1 %vm15478_vm11, %v16153_v25  ;;  %v18818_v25 = vld [vmem:[#allocation31] ss:$0 sm:$0xff] }
 0xe19   : > { %19665 = vmatpush3.msra.mxu1 %v24443_v41  ;;  %19668 = vmatprep.mubr.msk.f32.mxu1 %vm15478_vm11, %v16322_v22 }
 0xe1a   : > { %19666 = vmatprep.subr.mxu1 %v24445_v8 }
 0xe1b   : > { %19667 = vmatpush3.msra.mxu1 %v24445_v8 }
 0xe1c   : > { %19678 = vmatprep.subr.mxu1 %v24443_v41  ;;  %19669 = vmatmul.mubr.msk.f32.vlgmr.msra.gmra.mxu1 %vm15478_vm11, %v16323_v2 }
 0xe1d   : > { %19679 = vmatpush3.msra.mxu1 %v24443_v41  ;;  %19682 = vmatprep.mubr.msk.f32.mxu1 %vm15478_vm11, %v16492_v9 }
 0xe1e   : > { %19680 = vmatprep.subr.mxu1 %v24445_v8 }
 0xe1f   : > { %19681 = vmatpush3.msra.mxu1 %v24445_v8 }
 0xe20   : > { %19683 = vmatmul.mubr.msk.f32.vlgmr.msra.gmra.mxu1 %vm15478_vm11, %v16493_v46  ;;  %16724 = vmatprep.subr.mxu1 %v16687_v10 }
 0xe21   : > { %16760 = vmatprep.mubr.f32.mxu1 %v22619_v40  ;;  %16725 = vmatpush1.msra.mxu1 %v16686_v53 }
 0xe22   : > { %16726 = vmatprep.subr.mxu1 %v16683_v34 }
 0xe23   : > { %16727 = vmatpush1.msra.mxu1 %v16682_v48 }
 0xecc   : > { %v24492_v3 = vpop.f32.mrf.mxu1  ;;  %v19621_v49 = vpop.f32.mrf.mxu0 }
 0xecd   : > { %v15808_v18 = vadd.f32 %v19621_v49, %v24492_v3 }
 0xece   : > { %v24494_v6 = vpop.f32.mrf.mxu1  ;;  %v15802_v51 = vpop.f32.mrf.mxu0 }
 0xecf   : > { %v15803_v44 = vadd.f32 %v15802_v51, %v24494_v6 }
 0xed0   : > { %v19628_v23 = vpop.f32.mrf.mxu1 }
 0xed2   : > { %v15886_v38 = vpop.f32.mrf.mxu1 }
 0xed3   : > { %19633 = vmatprep.mubr.msk.f32.mxu0 %vm15478_vm11, %v15886_v38 }
 0xed4   : > { %19634 = vmatmul.mubr.msk.f32.vlgmr.msra.gmra.mxu0 %vm15478_vm11, %v19628_v23  ;;  %v19642_v58 = vpop.f32.mrf.mxu1 }
 0xed5   : > { %19644 = vmatpush3.msra.mxu0 %v16067_v20 }
 0xed6   : > { %v16056_v57 = vpop.f32.mrf.mxu1  ;;  %19645 = vmatprep.subr.mxu0 %v16066_v16 }
 0xed7   : > { %19646 = vmatpush3.msra.mxu0 %v16066_v16  ;;  %19647 = vmatprep.mubr.msk.f32.mxu0 %vm15478_vm11, %v16056_v57 }
 0xed8   : > { %19648 = vmatmul.mubr.msk.f32.vlgmr.msra.gmra.mxu0 %vm15478_vm11, %v19642_v58  ;;  %v19656_v31 = vpop.f32.mrf.mxu1  ;;  %19657 = vmatprep.subr.mxu0 %v16237_v37 }
 0xed9   : > { %19658 = vmatpush3.msra.mxu0 %v16237_v37 }
 0xeda   : > { %v16226_v36 = vpop.f32.mrf.mxu1  ;;  %19659 = vmatprep.subr.mxu0 %v16236_v43 }
 0xedb   : > { %19660 = vmatpush3.msra.mxu0 %v16236_v43  ;;  %19661 = vmatprep.mubr.msk.f32.mxu0 %vm15478_vm11, %v16226_v36 }
 0xedc   : > { %19662 = vmatmul.mubr.msk.f32.vlgmr.msra.gmra.mxu0 %vm15478_vm11, %v19656_v31  ;;  %v19670_v4 = vpop.f32.mrf.mxu1  ;;  %19671 = vmatprep.subr.mxu0 %v16407_v56 }
 0xedd   : > { %19672 = vmatpush3.msra.mxu0 %v16407_v56 }
 0xede   : > { %v16396_v60 = vpop.f32.mrf.mxu1  ;;  %19673 = vmatprep.subr.mxu0 %v16406_v14 }
 0xedf   : > { %19674 = vmatpush3.msra.mxu0 %v16406_v14  ;;  %19675 = vmatprep.mubr.msk.f32.mxu0 %vm15478_vm11, %v16396_v60 }
 0xee0   : > { %19676 = vmatmul.mubr.msk.f32.vlgmr.msra.gmra.mxu0 %vm15478_vm11, %v19670_v4  ;;  %v19684_v39 = vpop.f32.mrf.mxu1  ;;  %19685 = vmatprep.subr.mxu0 %v16577_v47 }
 0xee1   : > { %19686 = vmatpush3.msra.mxu0 %v16577_v47 }
 0xee2   : > { %v16566_v19 = vpop.f32.mrf.mxu1  ;;  %19687 = vmatprep.subr.mxu0 %v16576_v61 }
 0xee3   : > { %19688 = vmatpush3.msra.mxu0 %v16576_v61  ;;  %19689 = vmatprep.mubr.msk.f32.mxu0 %vm15478_vm11, %v16566_v19 }
 0xee4   : > { %19690 = vmatmul.mubr.msk.f32.vlgmr.msra.gmra.mxu0 %vm15478_vm11, %v19684_v39  ;;  %16801 = vmatprep.subr.mxu0 %v16689_v7 }
 0xee5   : > { %16837 = vmatprep.mubr.f32.mxu0 %v22619_v40  ;;  %16802 = vmatpush1.msra.mxu0 %v16688_v59 }
 0xee6   : > { %16803 = vmatprep.subr.mxu0 %v16685_v30 }
 0xee7   : > { %16804 = vmatpush1.msra.mxu0 %v16684_v27 }
 0xf94   : > { %v19635_v62 = vpop.f32.mrf.mxu0 }
 0xf95   : > { %v15980_v21 = vadd.f32 %v19635_v62, %v15808_v18 }
 0xf96   : > { %v15970_v41 = vpop.f32.mrf.mxu0 }
 0xf97   : > { %v15979_v5 = vadd.f32 %v15970_v41, %v15803_v44 }
 0xf98   : > { %v19649_v8 = vpop.f32.mrf.mxu0 }
 0xf99   : > { %v16150_v63 = vadd.f32 %v19649_v8, %v15980_v21 }
 0xf9a   : > { %v16140_v24 = vpop.f32.mrf.mxu0 }
 0xf9b   : > { %v16149_v35 = vadd.f32 %v16140_v24, %v15979_v5 }
 0xf9c   : > { %v19663_v0 = vpop.f32.mrf.mxu0 }
 0xf9d   : > { %v16320_v50 = vadd.f32 %v19663_v0, %v16150_v63 }
 0xf9e   : > { %v16310_v26 = vpop.f32.mrf.mxu0 }
 0xf9f   : > { %v16319_v12 = vadd.f32 %v16310_v26, %v16149_v35 }
 0xfa0   : > { %v19677_v55 = vpop.f32.mrf.mxu0 }
 0xfa1   : > { %v16490_v29 = vadd.f32 %v19677_v55, %v16320_v50 }
 0xfa2   : > { %v16480_v28 = vpop.f32.mrf.mxu0 }
 0xfa3   : > { %v16489_v22 = vadd.f32 %v16480_v28, %v16319_v12 }
 0xfa4   : > { %v19691_v42 = vpop.f32.mrf.mxu0 }
 0xfa5   : > { %v16660_v2 = vadd.f32 %v19691_v42, %v16490_v29 }
 0xfa6   : > { %v16650_v9 = vpop.f32.mrf.mxu0 }
 0xfa7   : > { %v16669_v46 = vadd.f32 %v18818_v25, %v16660_v2  ;;  %v16659_v33 = vadd.f32 %v16650_v9, %v16489_v22 }
 0xfa9   : > { %v18820_v11 = vmul.f32 -1.442695, %v16669_v46  ;;  %v16668_v20 = vadd.f32 %v18818_v25, %v16659_v33 }
 0xfab   : > { %v18819_v3 = vmul.f32 -1.442695, %v16668_v20  ;;  %22056 = vpow2.f32 %v18820_v11 }
 0xfad   : > { %22058 = vpow2.f32 %v18819_v3 }
 0xfb8   : > { %v22057_v6 = vpop.eup %22056 }
 0xfb9   : > { %v16677_v16 = vadd.f32 1.0, %v22057_v6 }
 0xfba   : > { %v22059_v23 = vpop.eup %22058 }
 0xfbb   : > { %v16676_v38 = vadd.f32 1.0, %v22059_v23 }
 0xfbd   : > { %22060 = vrcp.f32 %v16676_v38 }
 0xfbe   : > { %22062 = vrcp.f32 %v16677_v16 }
 0xfca   : > { %v22061_v58 = vpop.eup %22060 }
 0xfcb   : > { %18821 = vmatmul.mubr.msk.f32.vlgmr.msra.gmra.mxu1 %vm15478_vm11, %v22061_v58  ;;  %18823 = vmatmul.mubr.msk.f32.vlgmr.msra.gmra.mxu0 %vm15478_vm11, %v22061_v58  ;;  %v22063_v37 = vpop.eup %22062 }
 0xfcc   : > { %16766 = vmatprep.mubr.f32.mxu1 %v22619_v40  ;;  %16843 = vmatprep.mubr.f32.mxu0 %v22619_v40 }
 0xfcf   : > { %18822 = vmatmul.mubr.msk.f32.gmra.mxu1 %vm15478_vm11, %v22063_v37  ;;  %18824 = vmatmul.mubr.msk.f32.gmra.mxu0 %vm15478_vm11, %v22063_v37 }
0x108b   : > { %v16762_v57 = vpop.f32.mrf.mxu1  ;;  %v16839_v43 = vpop.f32.mrf.mxu0 }
0x108c   : > { %v16850_v31 = vmul.f32 %v16762_v57, %v24411_v54  ;;  %v16852_v56 = vmul.f32 %v16839_v43, %v24415_v15 }
0x108d   : > { %v16764_v36 = vpop.f32.mrf.mxu1  ;;  %v16841_v14 = vpop.f32.mrf.mxu0 }
0x108e   : > { %16858 = vst [vmem:[%s925_s3] sm:$0xff] %v16850_v31  ;;  %16860 = vst [vmem:[%s925_s3 + $0x10] sm:$0xff] %v16852_v56  ;;  %v16851_v40 = vmul.f32 %v16764_v36, %v24403_v45  ;;  %v16853_v4 = vmul.f32 %v16841_v14, %v24407_v1 }
0x108f   : > { %v16768_v47 = vpop.f32.mrf.mxu1  ;;  %v16845_v60 = vpop.f32.mrf.mxu0 }
0x1090   : > { %16859 = vst [vmem:[%s925_s3 + $0x8] sm:$0xff] %v16851_v40  ;;  %16861 = vst [vmem:[%s925_s3 + $0x18] sm:$0xff] %v16853_v4  ;;  %v16854_v61 = vmul.f32 %v16768_v47, %v24433_v32  ;;  %v16856_v39 = vmul.f32 %v16845_v60, %v24437_v13 }
0x1091   : > { %v16770_v19 = vpop.f32.mrf.mxu1  ;;  %v16847_v54 = vpop.f32.mrf.mxu0 }
0x1092   : > { %16862 = vst [vmem:[%s925_s3 + $0x20] sm:$0xff] %v16854_v61  ;;  %16864 = vst [vmem:[%s925_s3 + $0x30] sm:$0xff] %v16856_v39  ;;  %v16855_v15 = vmul.f32 %v16770_v19, %v24419_v52  ;;  %v16857_v10 = vmul.f32 %v16847_v54, %v24423_v17 }
0x1094   : > { %16863 = vst [vmem:[%s925_s3 + $0x28] sm:$0xff] %v16855_v15  ;;  %16865 = vst [vmem:[%s925_s3 + $0x38] sm:$0xff] %v16857_v10 }
0x1095 PF: > { %s24633_s30 = sld [smem:[#allocation43_spill]] }
0x109b   : > { %s42_s3 = sadd.s32 1, %s24633_s30  }
0x109c   : > { %p39_p9 = scmp.ge.s32.totalorder %s42_s3, 4  }
0x109e   :  { %41 = sbr.rel (!%p39_p9) target bundleno = 19 (0x13), region = 240 }
0x10a3   :  { %16887 = vsyncpa [#allocation6], 1 }
0x10a4   :  { %16889 = vsyncpa [#allocation6 + $0x1], 1 }
0x10a5   :  { %16890 = vsyncpa [#allocation8], 1 }
0x10a6   :  { %16891 = vsyncpa [#allocation11], 1 }
0x10a7   :  { %16892 = vsyncpa [#allocation14], 1 }
0x10a8   :  { %16893 = vsyncpa [#allocation17], 1 }
0x10a9   :  { %16894 = vsyncpa [#allocation20], 1 }
0x10aa   :  { %16895 = vsyncpa [#allocation23], 1 }
0x10ab   :  { %16896 = vsyncpa [#allocation26], 1 }
0x10ac   :  { %16897 = vsyncpa [#allocation29], 1 }
0x10ad   :  { %16898 = vsyncpa [#allocation32], 1 }

</bundles_post_ra>
